<compile_context>
chip_gen: v5e
topology: v5e:2x2
jax: 0.10.0
libtpu: 0.0.40
codegen_flags: <defaults>
</compile_context>

<pallas_src>
import jax
import jax.numpy as jnp
import numpy as np
from jax.experimental import pallas as pl
from jax.experimental.pallas import tpu as pltpu

INPUT_SIZE = 6
HIDDEN = 64
SEQ_LEN = 10          # fc_q / fc_t expect hidden_size * 10 inputs
BATCH = 2


# ----------------------------------------------------------------------------
# Kernel
# ----------------------------------------------------------------------------
def ionet_kernel(x_ref, wih0w_ref, b0w_ref, wwave_ref,
                 bh1_ref, bq2_ref, bt2_ref, w3_ref, b3_ref,
                 whead_hbm,
                 out_ref,
                 xgb_scr, feat_scr, whead_vmem, head_sem):
    f32 = jnp.float32
    bf16 = jnp.bfloat16
    H = HIDDEN
    T = SEQ_LEN
    B = out_ref.shape[0]
    NF = T * H                                     # 640 = LSTM feature width

    # -- kick off the head-weight DMAs immediately; they hide under the
    #    recurrence. Split so the first-layer slab can be waited on earlier.
    cp_h1 = pltpu.make_async_copy(whead_hbm.at[0:NF, :],
                                  whead_vmem.at[0:NF, :], head_sem.at[0])
    cp_h2 = pltpu.make_async_copy(whead_hbm.at[NF:NF + 512, :],
                                  whead_vmem.at[NF:NF + 512, :], head_sem.at[1])
    cp_h1.start()
    cp_h2.start()

    # -- hoisted layer-0 input projection -> per-wave gate-bias table ---------
    # Row r = t*B + b.  Columns use the interleaved wide-gate layout
    # [i0 i1 f0 f1 o0 o1 g0 g1]; the layer-1 columns carry the constant bias b1
    # (their x weights are zero).  Sigmoid (i/f/o) columns are pre-scaled by
    # 0.5 in the wrapper so the nonlinearity is a single tanh pass.
    xgb_scr[...] = (jnp.dot(x_ref[...], wih0w_ref[...],
                            preferred_element_type=f32) + b0w_ref[...])

    lane8 = jax.lax.broadcasted_iota(jnp.int32, (B, 8 * H), 1)
    postmul = jnp.where(lane8 < 6 * H, 0.5, 1.0).astype(f32)
    postadd = jnp.where(lane8 < 6 * H, 0.5, 0.0).astype(f32)
    lane2 = jax.lax.broadcasted_iota(jnp.int32, (B, 2 * H), 1)
    layer0_mask = lane2 < H

    def activate(z):
        # sigmoid(x) = 0.5*tanh(x/2) + 0.5 ; pre-scale folded into weights.
        t = jnp.tanh(z)
        return t * postmul + postadd

    def combine(a, c):
        # All slices are 128-lane aligned (free vreg selection).
        i = a[:, 0:2 * H]
        f = a[:, 2 * H:4 * H]
        o = a[:, 4 * H:6 * H]
        g = a[:, 6 * H:8 * H]
        c_new = f * c + i * g
        return o * jnp.tanh(c_new), c_new

    # -- wavefront LSTM: layer 1 runs one step behind layer 0 -----------------
    # h_st = [h0_w | h1_{w-1}], c_st = [c0_w | c1_{w-1}]   (lane-stacked (B,2H))
    # wave 0: previous state is all-zero -> skip the matmul entirely.
    act = activate(xgb_scr[0:B, :])
    h_st, c_st = combine(act, jnp.zeros((B, 2 * H), f32))
    h_st = jnp.where(layer0_mask, h_st, 0.0)       # discard bogus layer-1 step -1
    c_st = jnp.where(layer0_mask, c_st, 0.0)

    for w in range(1, T):                          # waves 1 .. T-1 (unrolled)
        gates = (jnp.dot(h_st, wwave_ref[...], preferred_element_type=f32)
                 + xgb_scr[w * B:(w + 1) * B, :])
        h_st, c_st = combine(activate(gates), c_st)
        feat_scr[:, (w - 1) * H:w * H] = h_st[:, H:2 * H]     # stream h1_{w-1}

    # wave T: layer-1 epilogue (layer-0 half of the result is discarded)
    gates = jnp.dot(h_st, wwave_ref[...], preferred_element_type=f32) + b0w_ref[...]
    h_st, _ = combine(activate(gates), c_st)
    feat_scr[:, (T - 1) * H:T * H] = h_st[:, H:2 * H]

    feat = feat_scr[...].astype(bf16)              # (B, 640)

    # -- fc_q / fc_t heads (bf16 weights, f32 accumulation) --------------------
    cp_h1.wait()
    y1 = jnp.dot(feat, whead_vmem[0:NF, :], preferred_element_type=f32) + bh1_ref[...]
    y1 = jnp.maximum(y1, 0.0)
    cp_h2.wait()
    y2q = jnp.maximum(jnp.dot(y1[:, :512].astype(bf16),
                              whead_vmem[NF:NF + 512, 0:512],
                              preferred_element_type=f32) + bq2_ref[...], 0.0)
    y2t = jnp.maximum(jnp.dot(y1[:, 512:].astype(bf16),
                              whead_vmem[NF:NF + 512, 512:1024],
                              preferred_element_type=f32) + bt2_ref[...], 0.0)
    y2 = jnp.concatenate([y2q, y2t], axis=-1).astype(bf16)    # (B, 1024)
    # Final layers fused block-diagonally: cols 0:4 = q, 4:7 = t, 7 = padding.
    out_ref[...] = (jnp.dot(y2, w3_ref[...], preferred_element_type=f32)
                    + b3_ref[...])


# ----------------------------------------------------------------------------
# Wrapper
# ----------------------------------------------------------------------------
def ionet_forward(x, p):
    B, T, D = x.shape
    assert T == SEQ_LEN and D == INPUT_SIZE
    H = HIDDEN
    xflat = jnp.transpose(x, (1, 0, 2)).reshape(T * B, D)     # row = t*B + b

    vmem = pl.BlockSpec(memory_space=pltpu.MemorySpace.VMEM)
    hbm = pl.BlockSpec(memory_space=pl.ANY)                   # manual DMA inside

    out = pl.pallas_call(
        ionet_kernel,
        out_shape=jax.ShapeDtypeStruct((B, 8), jnp.float32),
        in_specs=[vmem] * 9 + [hbm],
        out_specs=vmem,
        scratch_shapes=[
            pltpu.VMEM((T * B, 8 * H), jnp.float32),          # per-wave gate bias
            pltpu.VMEM((B, T * H), jnp.float32),              # streamed h1 features
            pltpu.VMEM((T * H + 512, 1024), jnp.bfloat16),    # head-weight landing buf
            pltpu.SemaphoreType.DMA((2,)),
        ],
    )(xflat, p["wih0w"], p["b0w"], p["wwave"],
      p["bh1"], p["bq2"], p["bt2"], p["w3"], p["b3"], p["whead"])
    return out[:, 0:4], out[:, 4:7]


# ----------------------------------------------------------------------------
# Parameter init (PyTorch layout) + packing for the kernel
# ----------------------------------------------------------------------------
def init_torch_params(key):
    """PyTorch-layout params with PyTorch's uniform(-k, k) init."""
    tp = {}
    keys = jax.random.split(key, 24)
    ki = iter(keys)

    def unif(shape, bound):
        return jax.random.uniform(next(ki), shape, jnp.float32, -bound, bound)

    k = 1.0 / np.sqrt(HIDDEN)
    for layer, din in ((0, INPUT_SIZE), (1, HIDDEN)):
        tp[f"weight_ih_l{layer}"] = unif((4 * HIDDEN, din), k)
        tp[f"weight_hh_l{layer}"] = unif((4 * HIDDEN, HIDDEN), k)
        tp[f"bias_ih_l{layer}"] = unif((4 * HIDDEN,), k)
        tp[f"bias_hh_l{layer}"] = unif((4 * HIDDEN,), k)

    def linear(name, din, dout):
        kb = 1.0 / np.sqrt(din)
        tp[name + ".w"] = unif((dout, din), kb)
        tp[name + ".b"] = unif((dout,), kb)

    linear("fc_q.0", HIDDEN * SEQ_LEN, 512)
    linear("fc_q.2", 512, 512)
    linear("fc_q.4", 512, 4)
    linear("fc_t.0", HIDDEN * SEQ_LEN, 512)
    linear("fc_t.2", 512, 512)
    linear("fc_t.4", 512, 3)
    return tp


def pack_params(tp):
    """Pre-transpose / interleave / fuse / pre-scale / cast weights."""
    H = HIDDEN
    f32 = jnp.float32
    bf16 = jnp.bfloat16
    GI, GF, GG, GO = 0, 1, 2, 3           # PyTorch LSTM gate order: i, f, g, o
    ORDER = (GI, GF, GO, GG)              # kernel wide-gate block order: i f o g

    def gcols(wT, g):                     # gate-g column block of a transposed weight
        return wT[:, g * H:(g + 1) * H]

    def gvec(v, g):
        return v[g * H:(g + 1) * H]

    wih0T = tp["weight_ih_l0"].T          # (6, 4H)
    whh0T = tp["weight_hh_l0"].T          # (H, 4H)
    wih1T = tp["weight_ih_l1"].T          # (H, 4H)
    whh1T = tp["weight_hh_l1"].T          # (H, 4H)
    b0 = tp["bias_ih_l0"] + tp["bias_hh_l0"]
    b1 = tp["bias_ih_l1"] + tp["bias_hh_l1"]
    z_in = jnp.zeros((INPUT_SIZE, H), f32)
    z_h = jnp.zeros((H, H), f32)

    # Interleaved wide-gate column layout: [i0 i1 f0 f1 o0 o1 g0 g1]
    wih0w = jnp.concatenate(
        [blk for g in ORDER for blk in (gcols(wih0T, g), z_in)], axis=1)      # (6, 8H)
    b0w = jnp.concatenate(
        [blk for g in ORDER for blk in (gvec(b0, g), gvec(b1, g))])           # (8H,)
    top = jnp.concatenate(
        [blk for g in ORDER for blk in (gcols(whh0T, g), gcols(wih1T, g))], axis=1)
    bot = jnp.concatenate(
        [blk for g in ORDER for blk in (z_h, gcols(whh1T, g))], axis=1)
    wwave = jnp.concatenate([top, bot], axis=0)                               # (2H, 8H)

    # Fold the sigmoid-as-tanh pre-scale (x -> x/2) into the i/f/o columns.
    pre = jnp.where(jnp.arange(8 * H) < 6 * H, 0.5, 1.0).astype(f32)

    p = {}
    p["wih0w"] = (wih0w * pre).astype(f32)
    p["b0w"] = (b0w * pre)[None, :].astype(f32)
    p["wwave"] = (wwave * pre).astype(f32)

    # Heads: fc_q.0|fc_t.0 and fc_q.2|fc_t.2 fused into one bf16 HBM slab that
    # the kernel DMAs asynchronously; third layers fused block-diagonally.
    p["whead"] = jnp.concatenate(
        [jnp.concatenate([tp["fc_q.0.w"].T, tp["fc_t.0.w"].T], axis=1),       # (640, 1024)
         jnp.concatenate([tp["fc_q.2.w"].T, tp["fc_t.2.w"].T], axis=1)],      # (512, 1024)
        axis=0).astype(bf16)                                                  # (1152, 1024)
    p["bh1"] = jnp.concatenate([tp["fc_q.0.b"], tp["fc_t.0.b"]])[None, :]
    p["bq2"] = tp["fc_q.2.b"][None, :]
    p["bt2"] = tp["fc_t.2.b"][None, :]

    w3 = jnp.zeros((1024, 8), f32)
    w3 = w3.at[:512, 0:4].set(tp["fc_q.4.w"].T)
    w3 = w3.at[512:, 4:7].set(tp["fc_t.4.w"].T)
    p["w3"] = w3.astype(bf16)                                                 # (1024, 8)
    b3 = jnp.zeros((1, 8), f32)
    b3 = b3.at[0, 0:4].set(tp["fc_q.4.b"])
    b3 = b3.at[0, 4:7].set(tp["fc_t.4.b"])
    p["b3"] = b3
    return p


# ----------------------------------------------------------------------------
# References
# ----------------------------------------------------------------------------
def ionet_reference_f32(x, tp):
    """Pure-f32 JAX mirror of the PyTorch forward (torch-layout params)."""
    B, T, _ = x.shape
    H = HIDDEN

    def cell(xt, h, c, wih, whh, bih, bhh):
        g = xt @ wih.T + h @ whh.T + bih + bhh
        i = jax.nn.sigmoid(g[:, 0 * H:1 * H])
        f = jax.nn.sigmoid(g[:, 1 * H:2 * H])
        gg = jnp.tanh(g[:, 2 * H:3 * H])
        o = jax.nn.sigmoid(g[:, 3 * H:4 * H])
        c = f * c + i * gg
        h = o * jnp.tanh(c)
        return h, c

    h0 = c0 = h1 = c1 = jnp.zeros((B, H), jnp.float32)
    outs = []
    for t in range(T):
        h0, c0 = cell(x[:, t, :], h0, c0, tp["weight_ih_l0"], tp["weight_hh_l0"],
                      tp["bias_ih_l0"], tp["bias_hh_l0"])
        h1, c1 = cell(h0, h1, c1, tp["weight_ih_l1"], tp["weight_hh_l1"],
                      tp["bias_ih_l1"], tp["bias_hh_l1"])
        outs.append(h1)
    feat = jnp.concatenate(outs, axis=-1)

    def mlp(z, w1, b1, w2, b2, w3, b3):
        z = jnp.maximum(z @ w1.T + b1, 0.0)
        z = jnp.maximum(z @ w2.T + b2, 0.0)
        return z @ w3.T + b3

    q = mlp(feat, tp["fc_q.0.w"], tp["fc_q.0.b"], tp["fc_q.2.w"], tp["fc_q.2.b"],
            tp["fc_q.4.w"], tp["fc_q.4.b"])
    t = mlp(feat, tp["fc_t.0.w"], tp["fc_t.0.b"], tp["fc_t.2.w"], tp["fc_t.2.b"],
            tp["fc_t.4.w"], tp["fc_t.4.b"])
    return q, t


def ionet_reference_matched(x, p):
    """Pure-JAX mirror of the kernel math (same packing / bf16 / f32 accum)."""
    B, T, _ = x.shape
    H = HIDDEN
    f32 = jnp.float32
    bf16 = jnp.bfloat16
    NF = T * H

    xflat = jnp.transpose(x, (1, 0, 2)).reshape(T * B, INPUT_SIZE)
    xgb = jnp.dot(xflat, p["wih0w"], preferred_element_type=f32) + p["b0w"]

    col = jnp.arange(8 * H)
    postmul = jnp.where(col < 6 * H, 0.5, 1.0).astype(f32)
    postadd = jnp.where(col < 6 * H, 0.5, 0.0).astype(f32)
    keep = (jnp.arange(2 * H) < H)

    def activate(z):
        t = jnp.tanh(z)
        return t * postmul + postadd

    def combine(a, c):
        i, f, o, g = a[:, :2 * H], a[:, 2 * H:4 * H], a[:, 4 * H:6 * H], a[:, 6 * H:]
        c = f * c + i * g
        return o * jnp.tanh(c), c

    h_st, c_st = combine(activate(xgb[0:B]), jnp.zeros((B, 2 * H), f32))
    h_st = jnp.where(keep, h_st, 0.0)
    c_st = jnp.where(keep, c_st, 0.0)
    feats = []
    for w in range(1, T):
        z = jnp.dot(h_st, p["wwave"], preferred_element_type=f32) + xgb[w * B:(w + 1) * B]
        h_st, c_st = combine(activate(z), c_st)
        feats.append(h_st[:, H:2 * H])
    z = jnp.dot(h_st, p["wwave"], preferred_element_type=f32) + p["b0w"]
    h_st, _ = combine(activate(z), c_st)
    feats.append(h_st[:, H:2 * H])
    feat = jnp.concatenate(feats, axis=1).astype(bf16)

    wh1 = p["whead"][0:NF, :]
    wq2 = p["whead"][NF:, 0:512]
    wt2 = p["whead"][NF:, 512:]
    y1 = jnp.maximum(jnp.dot(feat, wh1, preferred_element_type=f32) + p["bh1"], 0.0)
    y2q = jnp.maximum(jnp.dot(y1[:, :512].astype(bf16), wq2,
                              preferred_element_type=f32) + p["bq2"], 0.0)
    y2t = jnp.maximum(jnp.dot(y1[:, 512:].astype(bf16), wt2,
                              preferred_element_type=f32) + p["bt2"], 0.0)
    y2 = jnp.concatenate([y2q, y2t], axis=1).astype(bf16)
    out = jnp.dot(y2, p["w3"], preferred_element_type=f32) + p["b3"]
    return out[:, :4], out[:, 4:7]


# ----------------------------------------------------------------------------
if __name__ == "__main__":
    key = jax.random.PRNGKey(0)
    kx, kp = jax.random.split(key)
    x = jax.random.normal(kx, (BATCH, SEQ_LEN, INPUT_SIZE), jnp.float32)

    tp = init_torch_params(kp)
    p = pack_params(tp)

    q, t = ionet_forward(x, p)
    jax.block_until_ready((q, t))
    assert q.shape == (BATCH, 4) and t.shape == (BATCH, 3)

    # Exact-math check vs a pure-JAX mirror of the kernel (same bf16 weights).
    q_m, t_m = ionet_reference_matched(x, p)
    np.testing.assert_allclose(np.asarray(q), np.asarray(q_m), rtol=1e-2, atol=1e-2)
    np.testing.assert_allclose(np.asarray(t), np.asarray(t_m), rtol=1e-2, atol=1e-2)

    # Semantic check vs the full-f32 PyTorch-style forward (looser, since the
    # big head weights were cast to bf16).
    q_f, t_f = ionet_reference_f32(x, tp)
    np.testing.assert_allclose(np.asarray(q), np.asarray(q_f), rtol=5e-2, atol=2e-2)
    np.testing.assert_allclose(np.asarray(t), np.asarray(t_f), rtol=5e-2, atol=2e-2)

    print("KERNEL_OK")
</pallas_src>

<mosaic_0001>
module attributes {stable_mosaic.version = 11 : i64} {
  func.func @ionet_kernel(%arg0: memref<20x6xf32, #tpu.memory_space<vmem>>, %arg1: memref<6x512xf32, #tpu.memory_space<vmem>>, %arg2: memref<1x512xf32, #tpu.memory_space<vmem>>, %arg3: memref<128x512xf32, #tpu.memory_space<vmem>>, %arg4: memref<1x1024xf32, #tpu.memory_space<vmem>>, %arg5: memref<1x512xf32, #tpu.memory_space<vmem>>, %arg6: memref<1x512xf32, #tpu.memory_space<vmem>>, %arg7: memref<1024x8xbf16, #tpu.memory_space<vmem>>, %arg8: memref<1x8xf32, #tpu.memory_space<vmem>>, %arg9: memref<1152x1024xbf16, #tpu.memory_space<any>>, %arg10: memref<2x8xf32, #tpu.memory_space<vmem>>, %arg11: memref<20x512xf32, #tpu.memory_space<vmem>>, %arg12: memref<2x640xf32, #tpu.memory_space<vmem>>, %arg13: memref<1152x1024xbf16, #tpu.memory_space<vmem>>, %arg14: memref<2x!tpu.dma_semaphore, #tpu.memory_space<semaphore_mem>>) attributes {dimension_semantics = [], scalar_prefetch = 0 : i64, scratch_operands = 4 : i64, tpu.core_type = #tpu.core_type<tc>} {
    %c0_i32 = arith.constant 0 : i32
    %c0_i32_0 = arith.constant 0 : i32
    %c0_i32_1 = arith.constant 0 : i32
    %0 = tpu.memref_slice %arg9[%c0_i32_0, %c0_i32_1] : memref<1152x1024xbf16, #tpu.memory_space<any>> -> memref<640x1024xbf16, #tpu.memory_space<any>>
    %c0_i32_2 = arith.constant 0 : i32
    %c0_i32_3 = arith.constant 0 : i32
    %1 = tpu.memref_slice %arg13[%c0_i32_2, %c0_i32_3] : memref<1152x1024xbf16, #tpu.memory_space<vmem>> -> memref<640x1024xbf16, #tpu.memory_space<vmem>>
    %2 = tpu.memref_slice %arg14[%c0_i32] : memref<2x!tpu.dma_semaphore, #tpu.memory_space<semaphore_mem>> -> memref<1x!tpu.dma_semaphore, #tpu.memory_space<semaphore_mem>>
    %3 = tpu.memref_squeeze %2 : memref<1x!tpu.dma_semaphore, #tpu.memory_space<semaphore_mem>> -> memref<!tpu.dma_semaphore, #tpu.memory_space<semaphore_mem>>
    tpu.enqueue_dma source(%0 : memref<640x1024xbf16, #tpu.memory_space<any>>) target(%1 : memref<640x1024xbf16, #tpu.memory_space<vmem>>) target_semaphore(%3 : memref<!tpu.dma_semaphore, #tpu.memory_space<semaphore_mem>>)
    %c1_i32 = arith.constant 1 : i32
    %c640_i32 = arith.constant 640 : i32
    %c0_i32_4 = arith.constant 0 : i32
    %4 = tpu.memref_slice %arg9[%c640_i32, %c0_i32_4] : memref<1152x1024xbf16, #tpu.memory_space<any>> -> memref<512x1024xbf16, #tpu.memory_space<any>>
    %c640_i32_5 = arith.constant 640 : i32
    %c0_i32_6 = arith.constant 0 : i32
    %5 = tpu.memref_slice %arg13[%c640_i32_5, %c0_i32_6] : memref<1152x1024xbf16, #tpu.memory_space<vmem>> -> memref<512x1024xbf16, #tpu.memory_space<vmem>>
    %6 = tpu.memref_slice %arg14[%c1_i32] : memref<2x!tpu.dma_semaphore, #tpu.memory_space<semaphore_mem>> -> memref<1x!tpu.dma_semaphore, #tpu.memory_space<semaphore_mem>>
    %7 = tpu.memref_squeeze %6 : memref<1x!tpu.dma_semaphore, #tpu.memory_space<semaphore_mem>> -> memref<!tpu.dma_semaphore, #tpu.memory_space<semaphore_mem>>
    tpu.enqueue_dma source(%4 : memref<512x1024xbf16, #tpu.memory_space<any>>) target(%5 : memref<512x1024xbf16, #tpu.memory_space<vmem>>) target_semaphore(%7 : memref<!tpu.dma_semaphore, #tpu.memory_space<semaphore_mem>>)
    %c0 = arith.constant 0 : index
    %c0_7 = arith.constant 0 : index
    %8 = vector.load %arg0[%c0, %c0_7] : memref<20x6xf32, #tpu.memory_space<vmem>>, vector<20x6xf32>
    %c0_8 = arith.constant 0 : index
    %c0_9 = arith.constant 0 : index
    %9 = vector.load %arg1[%c0_8, %c0_9] : memref<6x512xf32, #tpu.memory_space<vmem>>, vector<6x512xf32>
    %cst = arith.constant dense<0.000000e+00> : vector<20x512xf32>
    %10 = tpu.matmul %8, %9, %cst {dimension_numbers = #tpu.dot_dimension_numbers<[1], [0], [0], [1], [0, 0, 1, 1], [], []>} : vector<20x6xf32>, vector<6x512xf32>, vector<20x512xf32> -> vector<20x512xf32>
    %c0_10 = arith.constant 0 : index
    %c0_11 = arith.constant 0 : index
    %11 = vector.load %arg2[%c0_10, %c0_11] : memref<1x512xf32, #tpu.memory_space<vmem>>, vector<1x512xf32>
    %12 = vector.broadcast %11 : vector<1x512xf32> to vector<20x512xf32>
    %13 = arith.addf %10, %12 : vector<20x512xf32>
    %c0_12 = arith.constant 0 : index
    %c0_13 = arith.constant 0 : index
    %14 = vector.load %arg11[%c0_12, %c0_13] : memref<20x512xf32, #tpu.memory_space<vmem>>, vector<20x512xf32>
    tpu.vector_store %arg11[%c0_12, %c0_13], %13 {strides = array<i32>} : memref<20x512xf32, #tpu.memory_space<vmem>>, vector<20x512xf32>,
    %15 = tpu.iota {dimensions = array<i32: 1>} : vector<2x512xi32>
    %c384_i32 = arith.constant 384 : i32
    %16 = vector.broadcast %c384_i32 : i32 to vector<2x512xi32>
    %17 = arith.cmpi slt, %15, %16 : vector<2x512xi32>
    %cst_14 = arith.constant 5.000000e-01 : f32
    %cst_15 = arith.constant 1.000000e+00 : f32
    %18 = vector.broadcast %cst_14 : f32 to vector<2x512xf32>
    %19 = vector.broadcast %cst_15 : f32 to vector<2x512xf32>
    %20 = arith.select %17, %18, %19 : vector<2x512xi1>, vector<2x512xf32>
    %c384_i32_16 = arith.constant 384 : i32
    %21 = vector.broadcast %c384_i32_16 : i32 to vector<2x512xi32>
    %22 = arith.cmpi slt, %15, %21 : vector<2x512xi32>
    %cst_17 = arith.constant 5.000000e-01 : f32
    %cst_18 = arith.constant 0.000000e+00 : f32
    %23 = vector.broadcast %cst_17 : f32 to vector<2x512xf32>
    %24 = vector.broadcast %cst_18 : f32 to vector<2x512xf32>
    %25 = arith.select %22, %23, %24 : vector<2x512xi1>, vector<2x512xf32>
    %26 = tpu.iota {dimensions = array<i32: 1>} : vector<2x128xi32>
    %c64_i32 = arith.constant 64 : i32
    %27 = vector.broadcast %c64_i32 : i32 to vector<2x128xi32>
    %28 = arith.cmpi slt, %26, %27 : vector<2x128xi32>
    %c0_19 = arith.constant 0 : index
    %c0_20 = arith.constant 0 : index
    %29 = vector.load %arg11[%c0_19, %c0_20] : memref<20x512xf32, #tpu.memory_space<vmem>>, vector<2x512xf32>
    %30 = math.tanh %29 : vector<2x512xf32>
    %31 = arith.mulf %30, %20 : vector<2x512xf32>
    %32 = arith.addf %31, %25 : vector<2x512xf32>
    %cst_21 = arith.constant 0.000000e+00 : f32
    %33 = vector.broadcast %cst_21 : f32 to vector<2x128xf32>
    %34 = vector.extract_strided_slice %32 {offsets = [0, 0], sizes = [2, 128], strides = [1, 1]} : vector<2x512xf32> to vector<2x128xf32>
    %35 = vector.extract_strided_slice %32 {offsets = [0, 128], sizes = [2, 128], strides = [1, 1]} : vector<2x512xf32> to vector<2x128xf32>
    %36 = vector.extract_strided_slice %32 {offsets = [0, 256], sizes = [2, 128], strides = [1, 1]} : vector<2x512xf32> to vector<2x128xf32>
    %37 = vector.extract_strided_slice %32 {offsets = [0, 384], sizes = [2, 128], strides = [1, 1]} : vector<2x512xf32> to vector<2x128xf32>
    %38 = arith.mulf %35, %33 : vector<2x128xf32>
    %39 = arith.mulf %34, %37 : vector<2x128xf32>
    %40 = arith.addf %38, %39 : vector<2x128xf32>
    %41 = math.tanh %40 : vector<2x128xf32>
    %42 = arith.mulf %36, %41 : vector<2x128xf32>
    %cst_22 = arith.constant 0.000000e+00 : f32
    %43 = vector.broadcast %cst_22 : f32 to vector<2x128xf32>
    %44 = arith.select %28, %42, %43 : vector<2x128xi1>, vector<2x128xf32>
    %cst_23 = arith.constant 0.000000e+00 : f32
    %45 = vector.broadcast %cst_23 : f32 to vector<2x128xf32>
    %46 = arith.select %28, %40, %45 : vector<2x128xi1>, vector<2x128xf32>
    %c0_24 = arith.constant 0 : index
    %c0_25 = arith.constant 0 : index
    %47 = vector.load %arg3[%c0_24, %c0_25] : memref<128x512xf32, #tpu.memory_space<vmem>>, vector<128x512xf32>
    %cst_26 = arith.constant dense<0.000000e+00> : vector<2x512xf32>
    %48 = tpu.matmul %44, %47, %cst_26 {dimension_numbers = #tpu.dot_dimension_numbers<[1], [0], [0], [1], [0, 0, 1, 1], [], []>} : vector<2x128xf32>, vector<128x512xf32>, vector<2x512xf32> -> vector<2x512xf32>
    %c2 = arith.constant 2 : index
    %c0_27 = arith.constant 0 : index
    %49 = vector.load %arg11[%c2, %c0_27] : memref<20x512xf32, #tpu.memory_space<vmem>>, vector<2x512xf32>
    %50 = arith.addf %48, %49 : vector<2x512xf32>
    %51 = math.tanh %50 : vector<2x512xf32>
    %52 = arith.mulf %51, %20 : vector<2x512xf32>
    %53 = arith.addf %52, %25 : vector<2x512xf32>
    %54 = vector.extract_strided_slice %53 {offsets = [0, 0], sizes = [2, 128], strides = [1, 1]} : vector<2x512xf32> to vector<2x128xf32>
    %55 = vector.extract_strided_slice %53 {offsets = [0, 128], sizes = [2, 128], strides = [1, 1]} : vector<2x512xf32> to vector<2x128xf32>
    %56 = vector.extract_strided_slice %53 {offsets = [0, 256], sizes = [2, 128], strides = [1, 1]} : vector<2x512xf32> to vector<2x128xf32>
    %57 = vector.extract_strided_slice %53 {offsets = [0, 384], sizes = [2, 128], strides = [1, 1]} : vector<2x512xf32> to vector<2x128xf32>
    %58 = arith.mulf %55, %46 : vector<2x128xf32>
    %59 = arith.mulf %54, %57 : vector<2x128xf32>
    %60 = arith.addf %58, %59 : vector<2x128xf32>
    %61 = math.tanh %60 : vector<2x128xf32>
    %62 = arith.mulf %56, %61 : vector<2x128xf32>
    %63 = vector.extract_strided_slice %62 {offsets = [0, 64], sizes = [2, 64], strides = [1, 1]} : vector<2x128xf32> to vector<2x64xf32>
    %c0_28 = arith.constant 0 : index
    %c0_29 = arith.constant 0 : index
    %64 = vector.load %arg12[%c0_28, %c0_29] : memref<2x640xf32, #tpu.memory_space<vmem>>, vector<2x64xf32>
    tpu.vector_store %arg12[%c0_28, %c0_29], %63 {strides = array<i32>} : memref<2x640xf32, #tpu.memory_space<vmem>>, vector<2x64xf32>,
    %c0_30 = arith.constant 0 : index
    %c0_31 = arith.constant 0 : index
    %65 = vector.load %arg3[%c0_30, %c0_31] : memref<128x512xf32, #tpu.memory_space<vmem>>, vector<128x512xf32>
    %cst_32 = arith.constant dense<0.000000e+00> : vector<2x512xf32>
    %66 = tpu.matmul %62, %65, %cst_32 {dimension_numbers = #tpu.dot_dimension_numbers<[1], [0], [0], [1], [0, 0, 1, 1], [], []>} : vector<2x128xf32>, vector<128x512xf32>, vector<2x512xf32> -> vector<2x512xf32>
    %c4 = arith.constant 4 : index
    %c0_33 = arith.constant 0 : index
    %67 = vector.load %arg11[%c4, %c0_33] : memref<20x512xf32, #tpu.memory_space<vmem>>, vector<2x512xf32>
    %68 = arith.addf %66, %67 : vector<2x512xf32>
    %69 = math.tanh %68 : vector<2x512xf32>
    %70 = arith.mulf %69, %20 : vector<2x512xf32>
    %71 = arith.addf %70, %25 : vector<2x512xf32>
    %72 = vector.extract_strided_slice %71 {offsets = [0, 0], sizes = [2, 128], strides = [1, 1]} : vector<2x512xf32> to vector<2x128xf32>
    %73 = vector.extract_strided_slice %71 {offsets = [0, 128], sizes = [2, 128], strides = [1, 1]} : vector<2x512xf32> to vector<2x128xf32>
    %74 = vector.extract_strided_slice %71 {offsets = [0, 256], sizes = [2, 128], strides = [1, 1]} : vector<2x512xf32> to vector<2x128xf32>
    %75 = vector.extract_strided_slice %71 {offsets = [0, 384], sizes = [2, 128], strides = [1, 1]} : vector<2x512xf32> to vector<2x128xf32>
    %76 = arith.mulf %73, %60 : vector<2x128xf32>
    %77 = arith.mulf %72, %75 : vector<2x128xf32>
    %78 = arith.addf %76, %77 : vector<2x128xf32>
    %79 = math.tanh %78 : vector<2x128xf32>
    %80 = arith.mulf %74, %79 : vector<2x128xf32>
    %81 = vector.extract_strided_slice %80 {offsets = [0, 64], sizes = [2, 64], strides = [1, 1]} : vector<2x128xf32> to vector<2x64xf32>
    %c0_34 = arith.constant 0 : index
    %c64 = arith.constant 64 : index
    %82 = vector.load %arg12[%c0_34, %c64] : memref<2x640xf32, #tpu.memory_space<vmem>>, vector<2x64xf32>
    tpu.vector_store %arg12[%c0_34, %c64], %81 {strides = array<i32>} : memref<2x640xf32, #tpu.memory_space<vmem>>, vector<2x64xf32>,
    %c0_35 = arith.constant 0 : index
    %c0_36 = arith.constant 0 : index
    %83 = vector.load %arg3[%c0_35, %c0_36] : memref<128x512xf32, #tpu.memory_space<vmem>>, vector<128x512xf32>
    %cst_37 = arith.constant dense<0.000000e+00> : vector<2x512xf32>
    %84 = tpu.matmul %80, %83, %cst_37 {dimension_numbers = #tpu.dot_dimension_numbers<[1], [0], [0], [1], [0, 0, 1, 1], [], []>} : vector<2x128xf32>, vector<128x512xf32>, vector<2x512xf32> -> vector<2x512xf32>
    %c6 = arith.constant 6 : index
    %c0_38 = arith.constant 0 : index
    %85 = vector.load %arg11[%c6, %c0_38] : memref<20x512xf32, #tpu.memory_space<vmem>>, vector<2x512xf32>
    %86 = arith.addf %84, %85 : vector<2x512xf32>
    %87 = math.tanh %86 : vector<2x512xf32>
    %88 = arith.mulf %87, %20 : vector<2x512xf32>
    %89 = arith.addf %88, %25 : vector<2x512xf32>
    %90 = vector.extract_strided_slice %89 {offsets = [0, 0], sizes = [2, 128], strides = [1, 1]} : vector<2x512xf32> to vector<2x128xf32>
    %91 = vector.extract_strided_slice %89 {offsets = [0, 128], sizes = [2, 128], strides = [1, 1]} : vector<2x512xf32> to vector<2x128xf32>
    %92 = vector.extract_strided_slice %89 {offsets = [0, 256], sizes = [2, 128], strides = [1, 1]} : vector<2x512xf32> to vector<2x128xf32>
    %93 = vector.extract_strided_slice %89 {offsets = [0, 384], sizes = [2, 128], strides = [1, 1]} : vector<2x512xf32> to vector<2x128xf32>
    %94 = arith.mulf %91, %78 : vector<2x128xf32>
    %95 = arith.mulf %90, %93 : vector<2x128xf32>
    %96 = arith.addf %94, %95 : vector<2x128xf32>
    %97 = math.tanh %96 : vector<2x128xf32>
    %98 = arith.mulf %92, %97 : vector<2x128xf32>
    %99 = vector.extract_strided_slice %98 {offsets = [0, 64], sizes = [2, 64], strides = [1, 1]} : vector<2x128xf32> to vector<2x64xf32>
    %c0_39 = arith.constant 0 : index
    %c128 = arith.constant 128 : index
    %100 = vector.load %arg12[%c0_39, %c128] : memref<2x640xf32, #tpu.memory_space<vmem>>, vector<2x64xf32>
    tpu.vector_store %arg12[%c0_39, %c128], %99 {strides = array<i32>} : memref<2x640xf32, #tpu.memory_space<vmem>>, vector<2x64xf32>,
    %c0_40 = arith.constant 0 : index
    %c0_41 = arith.constant 0 : index
    %101 = vector.load %arg3[%c0_40, %c0_41] : memref<128x512xf32, #tpu.memory_space<vmem>>, vector<128x512xf32>
    %cst_42 = arith.constant dense<0.000000e+00> : vector<2x512xf32>
    %102 = tpu.matmul %98, %101, %cst_42 {dimension_numbers = #tpu.dot_dimension_numbers<[1], [0], [0], [1], [0, 0, 1, 1], [], []>} : vector<2x128xf32>, vector<128x512xf32>, vector<2x512xf32> -> vector<2x512xf32>
    %c8 = arith.constant 8 : index
    %c0_43 = arith.constant 0 : index
    %103 = vector.load %arg11[%c8, %c0_43] : memref<20x512xf32, #tpu.memory_space<vmem>>, vector<2x512xf32>
    %104 = arith.addf %102, %103 : vector<2x512xf32>
    %105 = math.tanh %104 : vector<2x512xf32>
    %106 = arith.mulf %105, %20 : vector<2x512xf32>
    %107 = arith.addf %106, %25 : vector<2x512xf32>
    %108 = vector.extract_strided_slice %107 {offsets = [0, 0], sizes = [2, 128], strides = [1, 1]} : vector<2x512xf32> to vector<2x128xf32>
    %109 = vector.extract_strided_slice %107 {offsets = [0, 128], sizes = [2, 128], strides = [1, 1]} : vector<2x512xf32> to vector<2x128xf32>
    %110 = vector.extract_strided_slice %107 {offsets = [0, 256], sizes = [2, 128], strides = [1, 1]} : vector<2x512xf32> to vector<2x128xf32>
    %111 = vector.extract_strided_slice %107 {offsets = [0, 384], sizes = [2, 128], strides = [1, 1]} : vector<2x512xf32> to vector<2x128xf32>
    %112 = arith.mulf %109, %96 : vector<2x128xf32>
    %113 = arith.mulf %108, %111 : vector<2x128xf32>
    %114 = arith.addf %112, %113 : vector<2x128xf32>
    %115 = math.tanh %114 : vector<2x128xf32>
    %116 = arith.mulf %110, %115 : vector<2x128xf32>
    %117 = vector.extract_strided_slice %116 {offsets = [0, 64], sizes = [2, 64], strides = [1, 1]} : vector<2x128xf32> to vector<2x64xf32>
    %c0_44 = arith.constant 0 : index
    %c192 = arith.constant 192 : index
    %118 = vector.load %arg12[%c0_44, %c192] : memref<2x640xf32, #tpu.memory_space<vmem>>, vector<2x64xf32>
    tpu.vector_store %arg12[%c0_44, %c192], %117 {strides = array<i32>} : memref<2x640xf32, #tpu.memory_space<vmem>>, vector<2x64xf32>,
    %c0_45 = arith.constant 0 : index
    %c0_46 = arith.constant 0 : index
    %119 = vector.load %arg3[%c0_45, %c0_46] : memref<128x512xf32, #tpu.memory_space<vmem>>, vector<128x512xf32>
    %cst_47 = arith.constant dense<0.000000e+00> : vector<2x512xf32>
    %120 = tpu.matmul %116, %119, %cst_47 {dimension_numbers = #tpu.dot_dimension_numbers<[1], [0], [0], [1], [0, 0, 1, 1], [], []>} : vector<2x128xf32>, vector<128x512xf32>, vector<2x512xf32> -> vector<2x512xf32>
    %c10 = arith.constant 10 : index
    %c0_48 = arith.constant 0 : index
    %121 = vector.load %arg11[%c10, %c0_48] : memref<20x512xf32, #tpu.memory_space<vmem>>, vector<2x512xf32>
    %122 = arith.addf %120, %121 : vector<2x512xf32>
    %123 = math.tanh %122 : vector<2x512xf32>
    %124 = arith.mulf %123, %20 : vector<2x512xf32>
    %125 = arith.addf %124, %25 : vector<2x512xf32>
    %126 = vector.extract_strided_slice %125 {offsets = [0, 0], sizes = [2, 128], strides = [1, 1]} : vector<2x512xf32> to vector<2x128xf32>
    %127 = vector.extract_strided_slice %125 {offsets = [0, 128], sizes = [2, 128], strides = [1, 1]} : vector<2x512xf32> to vector<2x128xf32>
    %128 = vector.extract_strided_slice %125 {offsets = [0, 256], sizes = [2, 128], strides = [1, 1]} : vector<2x512xf32> to vector<2x128xf32>
    %129 = vector.extract_strided_slice %125 {offsets = [0, 384], sizes = [2, 128], strides = [1, 1]} : vector<2x512xf32> to vector<2x128xf32>
    %130 = arith.mulf %127, %114 : vector<2x128xf32>
    %131 = arith.mulf %126, %129 : vector<2x128xf32>
    %132 = arith.addf %130, %131 : vector<2x128xf32>
    %133 = math.tanh %132 : vector<2x128xf32>
    %134 = arith.mulf %128, %133 : vector<2x128xf32>
    %135 = vector.extract_strided_slice %134 {offsets = [0, 64], sizes = [2, 64], strides = [1, 1]} : vector<2x128xf32> to vector<2x64xf32>
    %c0_49 = arith.constant 0 : index
    %c256 = arith.constant 256 : index
    %136 = vector.load %arg12[%c0_49, %c256] : memref<2x640xf32, #tpu.memory_space<vmem>>, vector<2x64xf32>
    tpu.vector_store %arg12[%c0_49, %c256], %135 {strides = array<i32>} : memref<2x640xf32, #tpu.memory_space<vmem>>, vector<2x64xf32>,
    %c0_50 = arith.constant 0 : index
    %c0_51 = arith.constant 0 : index
    %137 = vector.load %arg3[%c0_50, %c0_51] : memref<128x512xf32, #tpu.memory_space<vmem>>, vector<128x512xf32>
    %cst_52 = arith.constant dense<0.000000e+00> : vector<2x512xf32>
    %138 = tpu.matmul %134, %137, %cst_52 {dimension_numbers = #tpu.dot_dimension_numbers<[1], [0], [0], [1], [0, 0, 1, 1], [], []>} : vector<2x128xf32>, vector<128x512xf32>, vector<2x512xf32> -> vector<2x512xf32>
    %c12 = arith.constant 12 : index
    %c0_53 = arith.constant 0 : index
    %139 = vector.load %arg11[%c12, %c0_53] : memref<20x512xf32, #tpu.memory_space<vmem>>, vector<2x512xf32>
    %140 = arith.addf %138, %139 : vector<2x512xf32>
    %141 = math.tanh %140 : vector<2x512xf32>
    %142 = arith.mulf %141, %20 : vector<2x512xf32>
    %143 = arith.addf %142, %25 : vector<2x512xf32>
    %144 = vector.extract_strided_slice %143 {offsets = [0, 0], sizes = [2, 128], strides = [1, 1]} : vector<2x512xf32> to vector<2x128xf32>
    %145 = vector.extract_strided_slice %143 {offsets = [0, 128], sizes = [2, 128], strides = [1, 1]} : vector<2x512xf32> to vector<2x128xf32>
    %146 = vector.extract_strided_slice %143 {offsets = [0, 256], sizes = [2, 128], strides = [1, 1]} : vector<2x512xf32> to vector<2x128xf32>
    %147 = vector.extract_strided_slice %143 {offsets = [0, 384], sizes = [2, 128], strides = [1, 1]} : vector<2x512xf32> to vector<2x128xf32>
    %148 = arith.mulf %145, %132 : vector<2x128xf32>
    %149 = arith.mulf %144, %147 : vector<2x128xf32>
    %150 = arith.addf %148, %149 : vector<2x128xf32>
    %151 = math.tanh %150 : vector<2x128xf32>
    %152 = arith.mulf %146, %151 : vector<2x128xf32>
    %153 = vector.extract_strided_slice %152 {offsets = [0, 64], sizes = [2, 64], strides = [1, 1]} : vector<2x128xf32> to vector<2x64xf32>
    %c0_54 = arith.constant 0 : index
    %c320 = arith.constant 320 : index
    %154 = vector.load %arg12[%c0_54, %c320] : memref<2x640xf32, #tpu.memory_space<vmem>>, vector<2x64xf32>
    tpu.vector_store %arg12[%c0_54, %c320], %153 {strides = array<i32>} : memref<2x640xf32, #tpu.memory_space<vmem>>, vector<2x64xf32>,
    %c0_55 = arith.constant 0 : index
    %c0_56 = arith.constant 0 : index
    %155 = vector.load %arg3[%c0_55, %c0_56] : memref<128x512xf32, #tpu.memory_space<vmem>>, vector<128x512xf32>
    %cst_57 = arith.constant dense<0.000000e+00> : vector<2x512xf32>
    %156 = tpu.matmul %152, %155, %cst_57 {dimension_numbers = #tpu.dot_dimension_numbers<[1], [0], [0], [1], [0, 0, 1, 1], [], []>} : vector<2x128xf32>, vector<128x512xf32>, vector<2x512xf32> -> vector<2x512xf32>
    %c14 = arith.constant 14 : index
    %c0_58 = arith.constant 0 : index
    %157 = vector.load %arg11[%c14, %c0_58] : memref<20x512xf32, #tpu.memory_space<vmem>>, vector<2x512xf32>
    %158 = arith.addf %156, %157 : vector<2x512xf32>
    %159 = math.tanh %158 : vector<2x512xf32>
    %160 = arith.mulf %159, %20 : vector<2x512xf32>
    %161 = arith.addf %160, %25 : vector<2x512xf32>
    %162 = vector.extract_strided_slice %161 {offsets = [0, 0], sizes = [2, 128], strides = [1, 1]} : vector<2x512xf32> to vector<2x128xf32>
    %163 = vector.extract_strided_slice %161 {offsets = [0, 128], sizes = [2, 128], strides = [1, 1]} : vector<2x512xf32> to vector<2x128xf32>
    %164 = vector.extract_strided_slice %161 {offsets = [0, 256], sizes = [2, 128], strides = [1, 1]} : vector<2x512xf32> to vector<2x128xf32>
    %165 = vector.extract_strided_slice %161 {offsets = [0, 384], sizes = [2, 128], strides = [1, 1]} : vector<2x512xf32> to vector<2x128xf32>
    %166 = arith.mulf %163, %150 : vector<2x128xf32>
    %167 = arith.mulf %162, %165 : vector<2x128xf32>
    %168 = arith.addf %166, %167 : vector<2x128xf32>
    %169 = math.tanh %168 : vector<2x128xf32>
    %170 = arith.mulf %164, %169 : vector<2x128xf32>
    %171 = vector.extract_strided_slice %170 {offsets = [0, 64], sizes = [2, 64], strides = [1, 1]} : vector<2x128xf32> to vector<2x64xf32>
    %c0_59 = arith.constant 0 : index
    %c384 = arith.constant 384 : index
    %172 = vector.load %arg12[%c0_59, %c384] : memref<2x640xf32, #tpu.memory_space<vmem>>, vector<2x64xf32>
    tpu.vector_store %arg12[%c0_59, %c384], %171 {strides = array<i32>} : memref<2x640xf32, #tpu.memory_space<vmem>>, vector<2x64xf32>,
    %c0_60 = arith.constant 0 : index
    %c0_61 = arith.constant 0 : index
    %173 = vector.load %arg3[%c0_60, %c0_61] : memref<128x512xf32, #tpu.memory_space<vmem>>, vector<128x512xf32>
    %cst_62 = arith.constant dense<0.000000e+00> : vector<2x512xf32>
    %174 = tpu.matmul %170, %173, %cst_62 {dimension_numbers = #tpu.dot_dimension_numbers<[1], [0], [0], [1], [0, 0, 1, 1], [], []>} : vector<2x128xf32>, vector<128x512xf32>, vector<2x512xf32> -> vector<2x512xf32>
    %c16 = arith.constant 16 : index
    %c0_63 = arith.constant 0 : index
    %175 = vector.load %arg11[%c16, %c0_63] : memref<20x512xf32, #tpu.memory_space<vmem>>, vector<2x512xf32>
    %176 = arith.addf %174, %175 : vector<2x512xf32>
    %177 = math.tanh %176 : vector<2x512xf32>
    %178 = arith.mulf %177, %20 : vector<2x512xf32>
    %179 = arith.addf %178, %25 : vector<2x512xf32>
    %180 = vector.extract_strided_slice %179 {offsets = [0, 0], sizes = [2, 128], strides = [1, 1]} : vector<2x512xf32> to vector<2x128xf32>
    %181 = vector.extract_strided_slice %179 {offsets = [0, 128], sizes = [2, 128], strides = [1, 1]} : vector<2x512xf32> to vector<2x128xf32>
    %182 = vector.extract_strided_slice %179 {offsets = [0, 256], sizes = [2, 128], strides = [1, 1]} : vector<2x512xf32> to vector<2x128xf32>
    %183 = vector.extract_strided_slice %179 {offsets = [0, 384], sizes = [2, 128], strides = [1, 1]} : vector<2x512xf32> to vector<2x128xf32>
    %184 = arith.mulf %181, %168 : vector<2x128xf32>
    %185 = arith.mulf %180, %183 : vector<2x128xf32>
    %186 = arith.addf %184, %185 : vector<2x128xf32>
    %187 = math.tanh %186 : vector<2x128xf32>
    %188 = arith.mulf %182, %187 : vector<2x128xf32>
    %189 = vector.extract_strided_slice %188 {offsets = [0, 64], sizes = [2, 64], strides = [1, 1]} : vector<2x128xf32> to vector<2x64xf32>
    %c0_64 = arith.constant 0 : index
    %c448 = arith.constant 448 : index
    %190 = vector.load %arg12[%c0_64, %c448] : memref<2x640xf32, #tpu.memory_space<vmem>>, vector<2x64xf32>
    tpu.vector_store %arg12[%c0_64, %c448], %189 {strides = array<i32>} : memref<2x640xf32, #tpu.memory_space<vmem>>, vector<2x64xf32>,
    %c0_65 = arith.constant 0 : index
    %c0_66 = arith.constant 0 : index
    %191 = vector.load %arg3[%c0_65, %c0_66] : memref<128x512xf32, #tpu.memory_space<vmem>>, vector<128x512xf32>
    %cst_67 = arith.constant dense<0.000000e+00> : vector<2x512xf32>
    %192 = tpu.matmul %188, %191, %cst_67 {dimension_numbers = #tpu.dot_dimension_numbers<[1], [0], [0], [1], [0, 0, 1, 1], [], []>} : vector<2x128xf32>, vector<128x512xf32>, vector<2x512xf32> -> vector<2x512xf32>
    %c18 = arith.constant 18 : index
    %c0_68 = arith.constant 0 : index
    %193 = vector.load %arg11[%c18, %c0_68] : memref<20x512xf32, #tpu.memory_space<vmem>>, vector<2x512xf32>
    %194 = arith.addf %192, %193 : vector<2x512xf32>
    %195 = math.tanh %194 : vector<2x512xf32>
    %196 = arith.mulf %195, %20 : vector<2x512xf32>
    %197 = arith.addf %196, %25 : vector<2x512xf32>
    %198 = vector.extract_strided_slice %197 {offsets = [0, 0], sizes = [2, 128], strides = [1, 1]} : vector<2x512xf32> to vector<2x128xf32>
    %199 = vector.extract_strided_slice %197 {offsets = [0, 128], sizes = [2, 128], strides = [1, 1]} : vector<2x512xf32> to vector<2x128xf32>
    %200 = vector.extract_strided_slice %197 {offsets = [0, 256], sizes = [2, 128], strides = [1, 1]} : vector<2x512xf32> to vector<2x128xf32>
    %201 = vector.extract_strided_slice %197 {offsets = [0, 384], sizes = [2, 128], strides = [1, 1]} : vector<2x512xf32> to vector<2x128xf32>
    %202 = arith.mulf %199, %186 : vector<2x128xf32>
    %203 = arith.mulf %198, %201 : vector<2x128xf32>
    %204 = arith.addf %202, %203 : vector<2x128xf32>
    %205 = math.tanh %204 : vector<2x128xf32>
    %206 = arith.mulf %200, %205 : vector<2x128xf32>
    %207 = vector.extract_strided_slice %206 {offsets = [0, 64], sizes = [2, 64], strides = [1, 1]} : vector<2x128xf32> to vector<2x64xf32>
    %c0_69 = arith.constant 0 : index
    %c512 = arith.constant 512 : index
    %208 = vector.load %arg12[%c0_69, %c512] : memref<2x640xf32, #tpu.memory_space<vmem>>, vector<2x64xf32>
    tpu.vector_store %arg12[%c0_69, %c512], %207 {strides = array<i32>} : memref<2x640xf32, #tpu.memory_space<vmem>>, vector<2x64xf32>,
    %c0_70 = arith.constant 0 : index
    %c0_71 = arith.constant 0 : index
    %209 = vector.load %arg3[%c0_70, %c0_71] : memref<128x512xf32, #tpu.memory_space<vmem>>, vector<128x512xf32>
    %cst_72 = arith.constant dense<0.000000e+00> : vector<2x512xf32>
    %210 = tpu.matmul %206, %209, %cst_72 {dimension_numbers = #tpu.dot_dimension_numbers<[1], [0], [0], [1], [0, 0, 1, 1], [], []>} : vector<2x128xf32>, vector<128x512xf32>, vector<2x512xf32> -> vector<2x512xf32>
    %c0_73 = arith.constant 0 : index
    %c0_74 = arith.constant 0 : index
    %211 = vector.load %arg2[%c0_73, %c0_74] : memref<1x512xf32, #tpu.memory_space<vmem>>, vector<1x512xf32>
    %212 = vector.broadcast %211 : vector<1x512xf32> to vector<2x512xf32>
    %213 = arith.addf %210, %212 : vector<2x512xf32>
    %214 = math.tanh %213 : vector<2x512xf32>
    %215 = arith.mulf %214, %20 : vector<2x512xf32>
    %216 = arith.addf %215, %25 : vector<2x512xf32>
    %217 = vector.extract_strided_slice %216 {offsets = [0, 0], sizes = [2, 128], strides = [1, 1]} : vector<2x512xf32> to vector<2x128xf32>
    %218 = vector.extract_strided_slice %216 {offsets = [0, 128], sizes = [2, 128], strides = [1, 1]} : vector<2x512xf32> to vector<2x128xf32>
    %219 = vector.extract_strided_slice %216 {offsets = [0, 256], sizes = [2, 128], strides = [1, 1]} : vector<2x512xf32> to vector<2x128xf32>
    %220 = vector.extract_strided_slice %216 {offsets = [0, 384], sizes = [2, 128], strides = [1, 1]} : vector<2x512xf32> to vector<2x128xf32>
    %221 = arith.mulf %218, %204 : vector<2x128xf32>
    %222 = arith.mulf %217, %220 : vector<2x128xf32>
    %223 = arith.addf %221, %222 : vector<2x128xf32>
    %224 = math.tanh %223 : vector<2x128xf32>
    %225 = arith.mulf %219, %224 : vector<2x128xf32>
    %226 = vector.extract_strided_slice %225 {offsets = [0, 64], sizes = [2, 64], strides = [1, 1]} : vector<2x128xf32> to vector<2x64xf32>
    %c0_75 = arith.constant 0 : index
    %c576 = arith.constant 576 : index
    %227 = vector.load %arg12[%c0_75, %c576] : memref<2x640xf32, #tpu.memory_space<vmem>>, vector<2x64xf32>
    tpu.vector_store %arg12[%c0_75, %c576], %226 {strides = array<i32>} : memref<2x640xf32, #tpu.memory_space<vmem>>, vector<2x64xf32>,
    %c0_76 = arith.constant 0 : index
    %c0_77 = arith.constant 0 : index
    %228 = vector.load %arg12[%c0_76, %c0_77] : memref<2x640xf32, #tpu.memory_space<vmem>>, vector<2x640xf32>
    %229 = arith.truncf %228 : vector<2x640xf32> to vector<2x640xbf16>
    %c0_i32_78 = arith.constant 0 : i32
    %c0_i32_79 = arith.constant 0 : i32
    %c0_i32_80 = arith.constant 0 : i32
    %230 = tpu.memref_slice %arg9[%c0_i32_79, %c0_i32_80] : memref<1152x1024xbf16, #tpu.memory_space<any>> -> memref<640x1024xbf16, #tpu.memory_space<any>>
    %c0_i32_81 = arith.constant 0 : i32
    %c0_i32_82 = arith.constant 0 : i32
    %231 = tpu.memref_slice %arg13[%c0_i32_81, %c0_i32_82] : memref<1152x1024xbf16, #tpu.memory_space<vmem>> -> memref<640x1024xbf16, #tpu.memory_space<vmem>>
    %232 = tpu.memref_slice %arg14[%c0_i32_78] : memref<2x!tpu.dma_semaphore, #tpu.memory_space<semaphore_mem>> -> memref<1x!tpu.dma_semaphore, #tpu.memory_space<semaphore_mem>>
    %233 = tpu.memref_squeeze %232 : memref<1x!tpu.dma_semaphore, #tpu.memory_space<semaphore_mem>> -> memref<!tpu.dma_semaphore, #tpu.memory_space<semaphore_mem>>
    tpu.wait_dma2 semaphore(%233 : memref<!tpu.dma_semaphore, #tpu.memory_space<semaphore_mem>>) src(%230 : memref<640x1024xbf16, #tpu.memory_space<any>>) dst(%231 : memref<640x1024xbf16, #tpu.memory_space<vmem>>)
    %c0_83 = arith.constant 0 : index
    %c0_84 = arith.constant 0 : index
    %234 = vector.load %arg13[%c0_83, %c0_84] : memref<1152x1024xbf16, #tpu.memory_space<vmem>>, vector<640x1024xbf16>
    %cst_85 = arith.constant dense<0.000000e+00> : vector<2x1024xf32>
    %235 = tpu.matmul %229, %234, %cst_85 {dimension_numbers = #tpu.dot_dimension_numbers<[1], [0], [0], [1], [0, 0, 1, 1], [], []>} : vector<2x640xbf16>, vector<640x1024xbf16>, vector<2x1024xf32> -> vector<2x1024xf32>
    %c0_86 = arith.constant 0 : index
    %c0_87 = arith.constant 0 : index
    %236 = vector.load %arg4[%c0_86, %c0_87] : memref<1x1024xf32, #tpu.memory_space<vmem>>, vector<1x1024xf32>
    %237 = vector.broadcast %236 : vector<1x1024xf32> to vector<2x1024xf32>
    %238 = arith.addf %235, %237 : vector<2x1024xf32>
    %cst_88 = arith.constant 0.000000e+00 : f32
    %239 = vector.broadcast %cst_88 : f32 to vector<2x1024xf32>
    %240 = arith.maximumf %238, %239 : vector<2x1024xf32>
    %c1_i32_89 = arith.constant 1 : i32
    %c640_i32_90 = arith.constant 640 : i32
    %c0_i32_91 = arith.constant 0 : i32
    %241 = tpu.memref_slice %arg9[%c640_i32_90, %c0_i32_91] : memref<1152x1024xbf16, #tpu.memory_space<any>> -> memref<512x1024xbf16, #tpu.memory_space<any>>
    %c640_i32_92 = arith.constant 640 : i32
    %c0_i32_93 = arith.constant 0 : i32
    %242 = tpu.memref_slice %arg13[%c640_i32_92, %c0_i32_93] : memref<1152x1024xbf16, #tpu.memory_space<vmem>> -> memref<512x1024xbf16, #tpu.memory_space<vmem>>
    %243 = tpu.memref_slice %arg14[%c1_i32_89] : memref<2x!tpu.dma_semaphore, #tpu.memory_space<semaphore_mem>> -> memref<1x!tpu.dma_semaphore, #tpu.memory_space<semaphore_mem>>
    %244 = tpu.memref_squeeze %243 : memref<1x!tpu.dma_semaphore, #tpu.memory_space<semaphore_mem>> -> memref<!tpu.dma_semaphore, #tpu.memory_space<semaphore_mem>>
    tpu.wait_dma2 semaphore(%244 : memref<!tpu.dma_semaphore, #tpu.memory_space<semaphore_mem>>) src(%241 : memref<512x1024xbf16, #tpu.memory_space<any>>) dst(%242 : memref<512x1024xbf16, #tpu.memory_space<vmem>>)
    %245 = vector.extract_strided_slice %240 {offsets = [0, 0], sizes = [2, 512], strides = [1, 1]} : vector<2x1024xf32> to vector<2x512xf32>
    %246 = arith.truncf %245 : vector<2x512xf32> to vector<2x512xbf16>
    %c640 = arith.constant 640 : index
    %c0_94 = arith.constant 0 : index
    %247 = vector.load %arg13[%c640, %c0_94] : memref<1152x1024xbf16, #tpu.memory_space<vmem>>, vector<512x512xbf16>
    %cst_95 = arith.constant dense<0.000000e+00> : vector<2x512xf32>
    %248 = tpu.matmul %246, %247, %cst_95 {dimension_numbers = #tpu.dot_dimension_numbers<[1], [0], [0], [1], [0, 0, 1, 1], [], []>} : vector<2x512xbf16>, vector<512x512xbf16>, vector<2x512xf32> -> vector<2x512xf32>
    %c0_96 = arith.constant 0 : index
    %c0_97 = arith.constant 0 : index
    %249 = vector.load %arg5[%c0_96, %c0_97] : memref<1x512xf32, #tpu.memory_space<vmem>>, vector<1x512xf32>
    %250 = vector.broadcast %249 : vector<1x512xf32> to vector<2x512xf32>
    %251 = arith.addf %248, %250 : vector<2x512xf32>
    %cst_98 = arith.constant 0.000000e+00 : f32
    %252 = vector.broadcast %cst_98 : f32 to vector<2x512xf32>
    %253 = arith.maximumf %251, %252 : vector<2x512xf32>
    %254 = vector.extract_strided_slice %240 {offsets = [0, 512], sizes = [2, 512], strides = [1, 1]} : vector<2x1024xf32> to vector<2x512xf32>
    %255 = arith.truncf %254 : vector<2x512xf32> to vector<2x512xbf16>
    %c640_99 = arith.constant 640 : index
    %c512_100 = arith.constant 512 : index
    %256 = vector.load %arg13[%c640_99, %c512_100] : memref<1152x1024xbf16, #tpu.memory_space<vmem>>, vector<512x512xbf16>
    %cst_101 = arith.constant dense<0.000000e+00> : vector<2x512xf32>
    %257 = tpu.matmul %255, %256, %cst_101 {dimension_numbers = #tpu.dot_dimension_numbers<[1], [0], [0], [1], [0, 0, 1, 1], [], []>} : vector<2x512xbf16>, vector<512x512xbf16>, vector<2x512xf32> -> vector<2x512xf32>
    %c0_102 = arith.constant 0 : index
    %c0_103 = arith.constant 0 : index
    %258 = vector.load %arg6[%c0_102, %c0_103] : memref<1x512xf32, #tpu.memory_space<vmem>>, vector<1x512xf32>
    %259 = vector.broadcast %258 : vector<1x512xf32> to vector<2x512xf32>
    %260 = arith.addf %257, %259 : vector<2x512xf32>
    %cst_104 = arith.constant 0.000000e+00 : f32
    %261 = vector.broadcast %cst_104 : f32 to vector<2x512xf32>
    %262 = arith.maximumf %260, %261 : vector<2x512xf32>
    %263 = tpu.concatenate %253, %262 in 1 : vector<2x512xf32>, vector<2x512xf32> -> vector<2x1024xf32>
    %264 = arith.truncf %263 : vector<2x1024xf32> to vector<2x1024xbf16>
    %c0_105 = arith.constant 0 : index
    %c0_106 = arith.constant 0 : index
    %265 = vector.load %arg7[%c0_105, %c0_106] : memref<1024x8xbf16, #tpu.memory_space<vmem>>, vector<1024x8xbf16>
    %cst_107 = arith.constant dense<0.000000e+00> : vector<2x8xf32>
    %266 = tpu.matmul %264, %265, %cst_107 {dimension_numbers = #tpu.dot_dimension_numbers<[1], [0], [0], [1], [0, 0, 1, 1], [], []>} : vector<2x1024xbf16>, vector<1024x8xbf16>, vector<2x8xf32> -> vector<2x8xf32>
    %c0_108 = arith.constant 0 : index
    %c0_109 = arith.constant 0 : index
    %267 = vector.load %arg8[%c0_108, %c0_109] : memref<1x8xf32, #tpu.memory_space<vmem>>, vector<1x8xf32>
    %268 = vector.broadcast %267 : vector<1x8xf32> to vector<2x8xf32>
    %269 = arith.addf %266, %268 : vector<2x8xf32>
    %c0_110 = arith.constant 0 : index
    %c0_111 = arith.constant 0 : index
    %270 = vector.load %arg10[%c0_110, %c0_111] : memref<2x8xf32, #tpu.memory_space<vmem>>, vector<2x8xf32>
    tpu.vector_store %arg10[%c0_110, %c0_111], %269 {strides = array<i32>} : memref<2x8xf32, #tpu.memory_space<vmem>>, vector<2x8xf32>,
    return
  }
}

</mosaic_0001>

<bundles_post_ra>
// kernel: tpu_custom_call.1
= control target key start
LH: loop header
LB: loop body
LE: loop exit
PB: predicated region body
PF: predicated region fallthrough
CT: control target
= control target key end

     0   :  { %15 = vsyncpa [#allocation7], 0  ;;  %s12475_s0 = inlined_call_operand.vmem [shape: f32[20,6], index: 0, kind: input, shape index: {}]   ;;  %s12476_s1 = inlined_call_operand.hbm [shape: f32[6,512], index: 1, kind: input, shape index: {}]   ;;  %s12477_s2 = inlined_call_operand.hbm [shape: f32[1,512], index: 2, kind: input, shape index: {}]   ;;  %s12478_s3 = inlined_call_operand.hbm [shape: f32[128,512], index: 3, kind: input, shape index: {}]   ;;  %s12479_s4 = inlined_call_operand.hbm [shape: f32[1,1024], index: 4, kind: input, shape index: {}]   ;;  %s12480_s5 = inlined_call_operand.hbm [shape: f32[1,512], index: 5, kind: input, shape index: {}]   ;;  %s12481_s6 = inlined_call_operand.hbm [shape: f32[1,512], index: 6, kind: input, shape index: {}]   ;;  %s12482_s7 = inlined_call_operand.vmem [shape: bf16[1024,8], index: 7, kind: input, shape index: {}]   ;;  %s12483_s8 = inlined_call_operand.hbm [shape: f32[1,8], index: 8, kind: input, shape index: {}]   ;;  %s12484_s9 = inlined_call_operand.hbm [shape: bf16[1152,1024], index: 9, kind: input, shape index: {}]   ;;  %s12485_s10 = inlined_call_operand.hbm [shape: f32[2,8], index: 10, kind: output, shape index: {}]  }
   0x1   :  { %16 = vsyncpa [#allocation10], 0 }
   0x2   :  { %17 = vsyncpa [#allocation13], 0 }
   0x3   :  { %18 = vsyncpa [#allocation16], 0  ;;  %s38_s15 = sshll.u32 %s12477_s2, 4  ;;  %s39_s15 = int_to_ptr.hbm [resolvable:$true] %s38_s15 }
   0x4   :  { %19 = vsyncpa [#allocation8], 0  ;;  %s10877_s16 = smov [#allocation9]   ;;  %s62_s20 = sshll.u32 %s12479_s4, 4  ;;  %s63_s20 = int_to_ptr.hbm [resolvable:$true] %s62_s20 }
   0x5   :  { %s40_s17 = sshll.u32 %s10877_s16, 4  ;;  %s10878_s21 = smov [#allocation12]   ;;  %s41_s17 = int_to_ptr.vmem [resolvable:$true] %s40_s17 }
   0x6   :  { %43 = dma.hbm_to_vmem [thread:$0]  %s39_s15, 64, %s41_s17, [#allocation10]  }
   0x7   :  { %s64_s22 = sshll.u32 %s10878_s21, 4  ;;  %s84_s25 = sshll.u32 %s12481_s6, 4  ;;  %s65_s22 = int_to_ptr.vmem [resolvable:$true] %s64_s22  ;;  %s85_s25 = int_to_ptr.hbm [resolvable:$true] %s84_s25 }
   0x8   :  { %67 = dma.hbm_to_vmem [thread:$0]  %s63_s20, 128, %s65_s22, [#allocation13]  }
   0x9   :  { %s27_s27 = sshll.u32 %s12476_s1, 4  ;;  %s10879_s28 = smov [#allocation15]   ;;  %s28_s27 = int_to_ptr.hbm [resolvable:$true] %s27_s27 }
   0xa   :  { %s86_s29 = sshll.u32 %s10879_s28, 4  ;;  %s10880_s4 = smov [#allocation6]   ;;  %s87_s29 = int_to_ptr.vmem [resolvable:$true] %s86_s29 }
   0xb   :  { %89 = dma.hbm_to_vmem [thread:$0]  %s85_s25, 64, %s87_s29, [#allocation16]  }
   0xc   :  { %s29_s30 = sshll.u32 %s10880_s4, 4  ;;  %s48_s13 = sshll.u32 %s12478_s3, 4  ;;  %s30_s30 = int_to_ptr.vmem [resolvable:$true] %s29_s30  ;;  %s49_s13 = int_to_ptr.hbm [resolvable:$true] %s48_s13 }
   0xd   :  { %32 = dma.hbm_to_vmem [thread:$0]  %s28_s27, 512, %s30_s30, [#allocation7]  }
   0xe   :  { %s10881_s6 = smov [#allocation11]   ;;  %s73_s1 = sshll.u32 %s12480_s5, 4  ;;  %s74_s1 = int_to_ptr.hbm [resolvable:$true] %s73_s1 }
   0xf   :  { %s50_s14 = sshll.u32 %s10881_s6, 4  ;;  %s10882_s17 = smov 512   ;;  %s51_s14 = int_to_ptr.vmem [resolvable:$true] %s50_s14 }
  0x10   :  { %s10883_s18 = smov 32   ;;  %s10884_s19 = smov [#allocation14]  }
  0x11   :  { %56 = dma.hbm_to_vmem [thread:$0]  %s49_s13, 8192, %s51_s14, [#allocation10], %s10882_s17, %s10882_s17, %s10883_s18  }
  0x12   :  { %s75_s20 = sshll.u32 %s10884_s19, 4  ;;  %s97_s3 = sshll.u32 %s12483_s8, 4  ;;  %s76_s20 = int_to_ptr.vmem [resolvable:$true] %s75_s20  ;;  %s98_s3 = int_to_ptr.hbm [resolvable:$true] %s97_s3 }
  0x13   :  { %78 = dma.hbm_to_vmem [thread:$0]  %s74_s1, 64, %s76_s20, [#allocation13]  }
  0x14   :  { %s10885_s23 = smov [#allocation17]  }
  0x15   :  { %s99_s24 = sshll.u32 %s10885_s23, 4  ;;  %s100_s24 = int_to_ptr.vmem [resolvable:$true] %s99_s24 }
  0x16   :  { %102 = dma.hbm_to_vmem [thread:$0]  %s98_s3, 16, %s100_s24, [#allocation16]  }
  0x17   :  { %10863 = dma.done.wait [#allocation7], 512  }
  0x18   :  { %10864 = vsyncadd [#allocation7], 4294966784 }
  0x19   :  { %10865 = dma.done.wait [#allocation10], 8256  }
  0x1a   :  { %10866 = vsyncadd [#allocation10], 4294959040 }
  0x1b   :  { %10867 = dma.done.wait [#allocation13], 192  }
  0x1c   :  { %10868 = vsyncadd [#allocation13], 4294967104 }
  0x1d   :  { %10869 = dma.done.wait [#allocation16], 80  }
  0x1e   :  { %10870 = vsyncadd [#allocation16], 4294967216  ;;  %vm187_vm0 = vcmask 1045504   ;;  %vm177_vm1 = vcmask 48128   ;;  %v166_v0 = vld [vmem:[#allocation6 + $0x18] sm:$0x3f] }
  0x1f   :  { %v160_v1 = vld [vmem:[%s12475_s0] sm:$0xff]  ;;  %v163_v2 = vld [vmem:[#allocation6] sm:$0x3f]  ;;  %7288 = vmatpush.msk.msra.mxu3 %vm187_vm0, %v166_v0  ;;  %v164_v3 = vld [vmem:[#allocation6 + $0x8] sm:$0x3f]  ;;  %vm538_vm3 = vcmask 517120  }
  0x20   :  { %7276 = vmatpush.msk.msra.mxu0 %vm187_vm0, %v163_v2  ;;  %v165_v4 = vld [vmem:[#allocation6 + $0x10] sm:$0x3f]  ;;  %7289 = vmatmul.msk.f32.vlgmr.msra.gmra.mxu3 %vm177_vm1, %v160_v1  ;;  %v10973_v5 = vld [vmem:[#allocation11 + $0x1e0] sm:$0xff]  ;;  %v10981_v8 = vld [vmem:[#allocation11 + $0x1f8] sm:$0xff]  ;;  %vm717_vm4 = vcmask 1041920   ;;  %s138_s4 = sshll.u32 %s12484_s9, 4  ;;  %s139_s4 = int_to_ptr.hbm [resolvable:$true] %s138_s4 }
  0x21   :  { %7280 = vmatpush.msk.msra.mxu1 %vm187_vm0, %v164_v3  ;;  %7277 = vmatmul.msk.f32.vlgmr.msra.gmra.mxu0 %vm177_vm1, %v160_v1  ;;  %v10975_v6 = vld [vmem:[#allocation11 + $0x1e8] sm:$0xff]  ;;  %v10977_v7 = vld [vmem:[#allocation11 + $0x1f0] sm:$0xff]  ;;  %v10985_v9 = vld [vmem:[#allocation11 + $0x1c0] sm:$0xff]  ;;  %s10887_s30 = smov [#allocation4]   ;;  %s144_s6 = scalar_lea.hbm %s12484_s9, 2560 }
  0x22   :  { %7281 = vmatmul.msk.f32.vlgmr.msra.gmra.mxu1 %vm177_vm1, %v160_v1  ;;  %7284 = vmatpush.msk.msra.mxu2 %vm187_vm0, %v165_v4  ;;  %v10987_v10 = vld [vmem:[#allocation11 + $0x1c8] sm:$0xff]  ;;  %v10989_v11 = vld [vmem:[#allocation11 + $0x1d0] sm:$0xff]  ;;  %v10993_v12 = vld [vmem:[#allocation11 + $0x1d8] sm:$0xff]  ;;  %s140_s11 = sshll.u32 %s10887_s30, 4  ;;  %s154_s14 = sshll.u32 %s144_s6, 4  ;;  %s141_s11 = int_to_ptr.vmem [resolvable:$true] %s140_s11  ;;  %s155_s14 = int_to_ptr.hbm [resolvable:$true] %s154_s14 }
  0x23   :  { %7285 = vmatmul.msk.f32.vlgmr.msra.gmra.mxu2 %vm177_vm1, %v160_v1  ;;  %437 = vmatpush.msrb.mxu0 %v10973_v5  ;;  %v10997_v13 = vld [vmem:[#allocation11 + $0x1a0] sm:$0xff]  ;;  %v10999_v14 = vld [vmem:[#allocation11 + $0x1a8] sm:$0xff]  ;;  %v11001_v15 = vld [vmem:[#allocation11 + $0x1b0] sm:$0xff]  ;;  %143 = dma.hbm_to_vmem [thread:$0]  %s139_s4, 40960, %s141_s11, [#allocation5] }
  0x24   :  { %457 = vmatpush.msrb.mxu1 %v10975_v6  ;;  %477 = vmatpush.msrb.mxu2 %v10977_v7  ;;  %v11005_v16 = vld [vmem:[#allocation11 + $0x1b8] sm:$0xff]  ;;  %v11007_v17 = vld [vmem:[#allocation11 + $0x180] sm:$0xff]  ;;  %v11009_v18 = vld [vmem:[#allocation11 + $0x188] sm:$0xff]  ;;  %s10888_s15 = smov [#allocation4 + $0xa00]  }
  0x25   :  { %497 = vmatpush.msrb.mxu3 %v10981_v8  ;;  %438 = vmatpush.msrb.mxu0 %v10985_v9  ;;  %12577 = vst [vmem:[#allocation32_spill] sm:$0xff] %v11009_v18  ;;  %v11013_v19 = vld [vmem:[#allocation11 + $0x190] sm:$0xff]  ;;  %v11015_v20 = vld [vmem:[#allocation11 + $0x198] sm:$0xff]  ;;  %v11019_v21 = vld [vmem:[#allocation11 + $0x160] sm:$0xff]  ;;  %s156_s16 = sshll.u32 %s10888_s15, 4  ;;  %s157_s16 = int_to_ptr.vmem [resolvable:$true] %s156_s16 }
  0x26   :  { %458 = vmatpush.msrb.mxu1 %v10987_v10  ;;  %478 = vmatpush.msrb.mxu2 %v10989_v11  ;;  %12578 = vst [vmem:[#allocation33_spill] sm:$0xff] %v11015_v20  ;;  %v11021_v22 = vld [vmem:[#allocation11 + $0x168] sm:$0xff]  ;;  %v11023_v23 = vld [vmem:[#allocation11 + $0x170] sm:$0xff]  ;;  %v11027_v24 = vld [vmem:[#allocation11 + $0x178] sm:$0xff]  ;;  %159 = dma.hbm_to_vmem [thread:$0]  %s155_s14, 32768, %s157_s16, [#allocation5 + $0x1] }
  0x27   :  { %498 = vmatpush.msrb.mxu3 %v10993_v12  ;;  %439 = vmatpush.msrb.mxu0 %v10997_v13  ;;  %12579 = vst [vmem:[#allocation34_spill] sm:$0xff] %v11021_v22  ;;  %v11029_v25 = vld [vmem:[#allocation11 + $0x140] sm:$0xff]  ;;  %v11031_v26 = vld [vmem:[#allocation11 + $0x148] sm:$0xff]  ;;  %v11035_v27 = vld [vmem:[#allocation11 + $0x150] sm:$0xff] }
  0x28   :  { %459 = vmatpush.msrb.mxu1 %v10999_v14  ;;  %479 = vmatpush.msrb.mxu2 %v11001_v15  ;;  %v11037_v28 = vld [vmem:[#allocation11 + $0x158] sm:$0xff]  ;;  %v11041_v29 = vld [vmem:[#allocation11 + $0x120] sm:$0xff]  ;;  %v11043_v30 = vld [vmem:[#allocation11 + $0x128] sm:$0xff] }
  0x29   :  { %499 = vmatpush.msrb.mxu3 %v11005_v16  ;;  %440 = vmatpush.msrb.mxu0 %v11007_v17  ;;  %v11047_v31 = vld [vmem:[#allocation11 + $0x130] sm:$0xff]  ;;  %v11049_v32 = vld [vmem:[#allocation11 + $0x138] sm:$0xff]  ;;  %v11053_v33 = vld [vmem:[#allocation11 + $0x100] sm:$0xff] }
  0x2a   :  { %460 = vmatpush.msrb.mxu1 %v11009_v18  ;;  %480 = vmatpush.msrb.mxu2 %v11013_v19  ;;  %v11055_v34 = vld [vmem:[#allocation11 + $0x108] sm:$0xff]  ;;  %v11059_v35 = vld [vmem:[#allocation11 + $0x110] sm:$0xff]  ;;  %v11061_v36 = vld [vmem:[#allocation11 + $0x118] sm:$0xff] }
  0x2b   :  { %500 = vmatpush.msrb.mxu3 %v11015_v20  ;;  %441 = vmatpush.msrb.mxu0 %v11019_v21  ;;  %v161_v37 = vld [vmem:[%s12475_s0 + $0x8] sm:$0xff]  ;;  %v11072_v38 = vld [vmem:[#allocation11 + $0xe0] sm:$0xff]  ;;  %v11074_v39 = vld [vmem:[#allocation11 + $0xe8] sm:$0xff] }
  0x2c   :  { %461 = vmatpush.msrb.mxu1 %v11021_v22  ;;  %481 = vmatpush.msrb.mxu2 %v11023_v23  ;;  %v11078_v40 = vld [vmem:[#allocation11 + $0xf0] sm:$0xff]  ;;  %v11080_v41 = vld [vmem:[#allocation11 + $0xf8] sm:$0xff]  ;;  %v11084_v42 = vld [vmem:[#allocation11 + $0xc0] sm:$0xff] }
  0x2d   :  { %501 = vmatpush.msrb.mxu3 %v11027_v24  ;;  %442 = vmatpush.msrb.mxu0 %v11029_v25  ;;  %v11086_v43 = vld [vmem:[#allocation11 + $0xc8] sm:$0xff]  ;;  %v11090_v44 = vld [vmem:[#allocation11 + $0xd0] sm:$0xff]  ;;  %v11092_v45 = vld [vmem:[#allocation11 + $0xd8] sm:$0xff] }
  0x2e   :  { %462 = vmatpush.msrb.mxu1 %v11031_v26  ;;  %482 = vmatpush.msrb.mxu2 %v11035_v27  ;;  %v11096_v46 = vld [vmem:[#allocation11 + $0xa0] sm:$0xff]  ;;  %v11098_v47 = vld [vmem:[#allocation11 + $0xa8] sm:$0xff]  ;;  %v11102_v48 = vld [vmem:[#allocation11 + $0xb0] sm:$0xff] }
  0x2f   :  { %502 = vmatpush.msrb.mxu3 %v11037_v28  ;;  %443 = vmatpush.msrb.mxu0 %v11041_v29  ;;  %v11104_v49 = vld [vmem:[#allocation11 + $0xb8] sm:$0xff]  ;;  %v11108_v51 = vld [vmem:[#allocation11 + $0x80] sm:$0xff]  ;;  %v11110_v52 = vld [vmem:[#allocation11 + $0x88] sm:$0xff] }
  0x30   :  { %463 = vmatpush.msrb.mxu1 %v11043_v30  ;;  %483 = vmatpush.msrb.mxu2 %v11047_v31  ;;  %v167_v50 = vld [vmem:[#allocation9] sm:$0xf]  ;;  %v11114_v53 = vld [vmem:[#allocation11 + $0x90] sm:$0xff]  ;;  %v11131_v58 = vld [vmem:[#allocation11 + $0x60] sm:$0xff] }
  0x31   :  { %503 = vmatpush.msrb.mxu3 %v11049_v32  ;;  %444 = vmatpush.msrb.mxu0 %v11053_v33  ;;  %12580 = vst [vmem:[#allocation35_spill] sm:$0xff] %v11114_v53  ;;  %v11116_v54 = vld [vmem:[#allocation11 + $0x98] sm:$0xff]  ;;  %v11123_v56 = vperm.slane %v167_v50, 0  ;;  %v11125_v57 = vperm.slane %v167_v50, 1  ;;  %v11133_v59 = vld [vmem:[#allocation11 + $0x68] sm:$0xff]  ;;  %v11137_v60 = vld [vmem:[#allocation11 + $0x70] sm:$0xff] }
  0x32   :  { %464 = vmatpush.msrb.mxu1 %v11055_v34  ;;  %484 = vmatpush.msrb.mxu2 %v11059_v35  ;;  %12581 = vst [vmem:[#allocation36_spill] sm:$0xff] %v11116_v54  ;;  %v162_v55 = vld [vmem:[%s12475_s0 + $0x10] sm:$0xf]  ;;  %v11143_v0 = vld [vmem:[#allocation11 + $0x40] sm:$0xff]  ;;  %v11145_v1 = vld [vmem:[#allocation11 + $0x48] sm:$0xff]  ;;  %s10886_s0 = smov 64  }
  0x33   :  { %504 = vmatpush.msrb.mxu3 %v11061_v36  ;;  %7278 = vmatmul.msk.f32.gmra.mxu0 %vm177_vm1, %v161_v37  ;;  %12582 = vst [vmem:[#allocation37_spill] sm:$0xff] %v11123_v56  ;;  %v11139_v61 = vld [vmem:[#allocation11 + $0x78] sm:$0xff]  ;;  %v11151_v4 = vld [vmem:[#allocation11 + $0x50] sm:$0xff] }
  0x34   :  { %7282 = vmatmul.msk.f32.gmra.mxu1 %vm177_vm1, %v161_v37  ;;  %7286 = vmatmul.msk.f32.gmra.mxu2 %vm177_vm1, %v161_v37  ;;  %12583 = vst [vmem:[#allocation38_spill] sm:$0xff] %v11125_v57 }
  0x35   :  { %7290 = vmatmul.msk.f32.gmra.mxu3 %vm177_vm1, %v161_v37  ;;  %445 = vmatpush.msrb.mxu0 %v11072_v38  ;;  %12584 = vst [vmem:[#allocation39_spill] sm:$0xff] %v11137_v60  ;;  %v11153_v37 = vld [vmem:[#allocation11 + $0x58] sm:$0xff] }
  0x36   :  { %465 = vmatpush.msrb.mxu1 %v11074_v39  ;;  %485 = vmatpush.msrb.mxu2 %v11078_v40  ;;  %12585 = vst [vmem:[#allocation40_spill] sm:$0xff] %v11139_v61 }
  0x37   :  { %505 = vmatpush.msrb.mxu3 %v11080_v41  ;;  %446 = vmatpush.msrb.mxu0 %v11084_v42  ;;  %12586 = vst [vmem:[#allocation41_spill] sm:$0xff] %v11145_v1 }
  0x38   :  { %466 = vmatpush.msrb.mxu1 %v11086_v43  ;;  %486 = vmatpush.msrb.mxu2 %v11090_v44 }
  0x39   :  { %506 = vmatpush.msrb.mxu3 %v11092_v45  ;;  %447 = vmatpush.msrb.mxu0 %v11096_v46 }
  0x3a   :  { %467 = vmatpush.msrb.mxu1 %v11098_v47  ;;  %487 = vmatpush.msrb.mxu2 %v11102_v48 }
  0x3b   :  { %507 = vmatpush.msrb.mxu3 %v11104_v49  ;;  %448 = vmatpush.msrb.mxu0 %v11108_v51 }
  0x3c   :  { %468 = vmatpush.msrb.mxu1 %v11110_v52  ;;  %488 = vmatpush.msrb.mxu2 %v11114_v53  ;;  %v11161_v53 = vld [vmem:[#allocation11 + $0x28] sm:$0xff] }
  0x3d   :  { %508 = vmatpush.msrb.mxu3 %v11116_v54  ;;  %7279 = vmatmul.msk.f32.gmra.mxu0 %vm177_vm1, %v162_v55  ;;  %v11155_v54 = vperm.slane %v167_v50, 3  ;;  %12588 = vst [vmem:[#allocation43_spill] sm:$0xff] %v11161_v53 }
  0x3e   :  { %7283 = vmatmul.msk.f32.gmra.mxu1 %vm177_vm1, %v162_v55  ;;  %7287 = vmatmul.msk.f32.gmra.mxu2 %vm177_vm1, %v162_v55 }
  0x3f   :  { %7291 = vmatmul.msk.f32.gmra.mxu3 %vm177_vm1, %v162_v55  ;;  %449 = vmatpush.msrb.mxu0 %v11131_v58  ;;  %12587 = vst [vmem:[#allocation42_spill] sm:$0xff] %v11155_v54  ;;  %v11159_v55 = vld [vmem:[#allocation11 + $0x20] sm:$0xff] }
  0x40   :  { %469 = vmatpush.msrb.mxu1 %v11133_v59  ;;  %489 = vmatpush.msrb.mxu2 %v11137_v60  ;;  %v11175_v60 = vperm.slane %v167_v50, 2 }
  0x41   :  { %509 = vmatpush.msrb.mxu3 %v11139_v61  ;;  %450 = vmatpush.msrb.mxu0 %v11143_v0 }
  0x42   :  { %470 = vmatpush.msrb.mxu1 %v11145_v1  ;;  %490 = vmatpush.msrb.mxu2 %v11151_v4  ;;  %12589 = vst [vmem:[#allocation44_spill] sm:$0xff] %v11175_v60  ;;  %v11181_v1 = vld [vmem:[#allocation11 + $0x18] sm:$0xff] }
  0x43   :  { %510 = vmatpush.msrb.mxu3 %v11153_v37  ;;  %451 = vmatpush.msrb.mxu0 %v11159_v55 }
  0x44   :  { %471 = vmatpush.msrb.mxu1 %v11161_v53 }
  0x9e   :  { %v217_v62 = vpop.f32.mrf.mxu0 }
  0x9f   :  { %v243_v63 = vpop.f32.mrf.mxu1  ;;  %v218_v2 = vadd.f32 %v217_v62, %v11123_v56  ;;  %v11165_v62 = vld [vmem:[#allocation11 + $0x30] sm:$0xff]  ;;  %v11173_v56 = vld [vmem:[#allocation11 + $0x8] sm:$0xff] }
  0xa0   :  { %v244_v3 = vadd.f32 %v243_v63, %v11125_v57  ;;  %v11167_v63 = vld [vmem:[#allocation11 + $0x38] sm:$0xff]  ;;  %v11171_v57 = vld [vmem:[#allocation11] sm:$0xff]  ;;  %491 = vmatpush.msrb.mxu2 %v11165_v62  ;;  %472 = vmatpush.msrb.mxu1 %v11173_v56 }
  0xa1   :  { %304 = vst [vmem:[#allocation2 + $0x30] sm:$0xff] %v218_v2  ;;  %v11179_v2 = vld [vmem:[#allocation11 + $0x10] sm:$0xff]  ;;  %511 = vmatpush.msrb.mxu3 %v11167_v63  ;;  %452 = vmatpush.msrb.mxu0 %v11171_v57 }
  0xa2   :  { %305 = vst [vmem:[#allocation2] sm:$0xff] %v244_v3  ;;  %492 = vmatpush.msrb.mxu2 %v11179_v2  ;;  %640 = vmatpush.msra.mxu1 %v10975_v6 }
  0xa3   :  { %v295_v61 = vpop.f32.mrf.mxu3  ;;  %512 = vmatpush.msrb.mxu3 %v11181_v1  ;;  %620 = vmatpush.msra.mxu0 %v10973_v5 }
  0xa4   :  { %v296_v3 = vadd.f32 %v295_v61, %v11155_v54  ;;  %660 = vmatpush.msra.mxu2 %v10977_v7  ;;  %641 = vmatpush.msra.mxu1 %v10987_v10 }
  0xa5   :  { %680 = vmatpush.msra.mxu3 %v10981_v8  ;;  %621 = vmatpush.msra.mxu0 %v10985_v9 }
  0xa6   :  { %307 = vst [vmem:[#allocation2 + $0x18] sm:$0xff] %v296_v3  ;;  %v269_v50 = vpop.f32.mrf.mxu2  ;;  %661 = vmatpush.msra.mxu2 %v10989_v11  ;;  %642 = vmatpush.msra.mxu1 %v10999_v14  ;;  %v316_v3 = vlaneseq }
  0xa7   :  { %v270_v53 = vadd.f32 %v269_v50, %v11175_v60  ;;  %681 = vmatpush.msra.mxu3 %v10993_v12  ;;  %622 = vmatpush.msra.mxu0 %v10997_v13 }
  0xa8   :  { %v334_v61 = vld [vmem:[#allocation2 + $0x30] sm:$0x3]  ;;  %662 = vmatpush.msra.mxu2 %v11001_v15  ;;  %643 = vmatpush.msra.mxu1 %v11009_v18 }
  0xa9   :  { %306 = vst [vmem:[#allocation2 + $0x58] sm:$0xff] %v270_v53  ;;  %v335_v54 = vld [vmem:[#allocation2] sm:$0x3]  ;;  %10511 = vtanh.f32 %v334_v61  ;;  %682 = vmatpush.msra.mxu3 %v11005_v16  ;;  %623 = vmatpush.msra.mxu0 %v11007_v17 }
  0xaa   :  { %10513 = vtanh.f32 %v335_v54  ;;  %663 = vmatpush.msra.mxu2 %v11013_v19  ;;  %644 = vmatpush.msra.mxu1 %v11021_v22 }
  0xab   :  { %683 = vmatpush.msra.mxu3 %v11015_v20  ;;  %624 = vmatpush.msra.mxu0 %v11019_v21 }
  0xac   :  { %664 = vmatpush.msra.mxu2 %v11023_v23  ;;  %645 = vmatpush.msra.mxu1 %v11031_v26 }
  0xad   :  { %v337_v53 = vld [vmem:[#allocation2 + $0x18] sm:$0x3]  ;;  %684 = vmatpush.msra.mxu3 %v11027_v24  ;;  %625 = vmatpush.msra.mxu0 %v11029_v25 }
  0xae   :  { %10515 = vtanh.f32 %v337_v53  ;;  %v317_v53 = vand.u32 127, %v316_v3  ;;  %665 = vmatpush.msra.mxu2 %v11035_v27  ;;  %646 = vmatpush.msra.mxu1 %v11043_v30 }
  0xaf   :  { %v10512_v54 = vpop.eup %10511  ;;  %685 = vmatpush.msra.mxu3 %v11037_v28  ;;  %626 = vmatpush.msra.mxu0 %v11041_v29 }
  0xb0   :  { %v10514_v50 = vpop.eup %10513  ;;  %v336_v61 = vld [vmem:[#allocation2 + $0x58] sm:$0x3]  ;;  %v342_v60 = vmul.f32 0.5, %v10512_v54  ;;  %666 = vmatpush.msra.mxu2 %v11047_v31  ;;  %647 = vmatpush.msra.mxu1 %v11055_v34  ;;  %vm333_vm2 = vcmp.lt.s32.totalorder %v317_v53, 64 }
  0xb1   :  { %10517 = vtanh.f32 %v336_v61  ;;  %v343_v18 = vmul.f32 0.5, %v10514_v50  ;;  %686 = vmatpush.msra.mxu3 %v11049_v32  ;;  %627 = vmatpush.msra.mxu0 %v11053_v33 }
  0xb2   :  { %v346_v20 = vadd.f32 0.5, %v342_v60  ;;  %667 = vmatpush.msra.mxu2 %v11059_v35  ;;  %648 = vmatpush.msra.mxu1 %v11074_v39 }
  0xb3   :  { %v347_v22 = vadd.f32 0.5, %v343_v18  ;;  %687 = vmatpush.msra.mxu3 %v11061_v36  ;;  %628 = vmatpush.msra.mxu0 %v11072_v38 }
  0xb4   :  { %v10516_v54 = vpop.eup %10515  ;;  %668 = vmatpush.msra.mxu2 %v11078_v40  ;;  %649 = vmatpush.msra.mxu1 %v11086_v43 }
  0xb5   :  { %v350_v50 = vmul.f32 0.0, %v347_v22  ;;  %v351_v61 = vmul.f32 %v10516_v54, %v346_v20  ;;  %688 = vmatpush.msra.mxu3 %v11080_v41  ;;  %629 = vmatpush.msra.mxu0 %v11084_v42  ;;  %v12591_v54 = vld [vmem:[#allocation35_spill] sm:$0xff] }
  0xb6   :  { %669 = vmatpush.msra.mxu2 %v11090_v44  ;;  %650 = vmatpush.msra.mxu1 %v11098_v47 }
  0xb7   :  { %v10518_v18 = vpop.eup %10517  ;;  %v352_v60 = vadd.f32 %v351_v61, %v350_v50  ;;  %689 = vmatpush.msra.mxu3 %v11092_v45  ;;  %630 = vmatpush.msra.mxu0 %v11096_v46  ;;  %v12592_v50 = vld [vmem:[#allocation36_spill] sm:$0xff] }
  0xb8   :  { %v344_v3 = vmul.f32 0.5, %v10518_v18  ;;  %670 = vmatpush.msra.mxu2 %v11102_v48  ;;  %651 = vmatpush.msra.mxu1 %v11110_v52 }
  0xb9   :  { %10519 = vtanh.f32 %v352_v60  ;;  %v11228_v20 = vsel %vm333_vm2, %v352_v60, 0.0  ;;  %690 = vmatpush.msra.mxu3 %v11104_v49  ;;  %631 = vmatpush.msra.mxu0 %v11108_v51  ;;  %v12593_v60 = vld [vmem:[#allocation39_spill] sm:$0xff] }
  0xba   :  { %12590 = vst [vmem:[#allocation45_spill] sm:$0xff] %v11228_v20  ;;  %v348_v22 = vadd.f32 0.5, %v344_v3  ;;  %671 = vmatpush.msra.mxu2 %v12591_v54  ;;  %652 = vmatpush.msra.mxu1 %v11133_v59  ;;  %v12594_v3 = vld [vmem:[#allocation40_spill] sm:$0xff]  ;;  %v12595_v20 = vld [vmem:[#allocation41_spill] sm:$0xff] }
  0xbb   :  { %691 = vmatpush.msra.mxu3 %v12592_v50  ;;  %632 = vmatpush.msra.mxu0 %v11131_v58 }
  0xbc   :  { %672 = vmatpush.msra.mxu2 %v12593_v60  ;;  %653 = vmatpush.msra.mxu1 %v12595_v20 }
  0xbd   :  { %692 = vmatpush.msra.mxu3 %v12594_v3  ;;  %633 = vmatpush.msra.mxu0 %v11143_v0 }
  0xbe   :  { %673 = vmatpush.msra.mxu2 %v11151_v4 }
  0xbf   :  { %v10520_v61 = vpop.eup %10519  ;;  %693 = vmatpush.msra.mxu3 %v11153_v37  ;;  %634 = vmatpush.msra.mxu0 %v11159_v55 }
  0xc0   :  { %v354_v18 = vmul.f32 %v10520_v61, %v348_v22  ;;  %v12596_v22 = vld [vmem:[#allocation43_spill] sm:$0xff]  ;;  %674 = vmatpush.msra.mxu2 %v11165_v62 }
  0xc1   :  { %654 = vmatpush.msra.mxu1 %v12596_v22  ;;  %694 = vmatpush.msra.mxu3 %v11167_v63 }
  0xc2   :  { %7292 = vmatmul.msk.f32.vlgmr.msrb.gmra.mxu0 %vm333_vm2, %v354_v18  ;;  %7293 = vmatmul.msk.f32.vlgmr.msrb.gmra.mxu1 %vm333_vm2, %v354_v18 }
  0xc3   :  { %7294 = vmatmul.msk.f32.vlgmr.msrb.gmra.mxu2 %vm333_vm2, %v354_v18  ;;  %7295 = vmatmul.msk.f32.vlgmr.msrb.gmra.mxu3 %vm333_vm2, %v354_v18 }
  0xc4   :  { %635 = vmatpush.msra.mxu0 %v11171_v57  ;;  %655 = vmatpush.msra.mxu1 %v11173_v56 }
  0xc5   :  { %675 = vmatpush.msra.mxu2 %v11179_v2  ;;  %695 = vmatpush.msra.mxu3 %v11181_v1 }
  0xc6   :  { %799 = vmatpush.msrb.mxu0 %v10973_v5  ;;  %819 = vmatpush.msrb.mxu1 %v10975_v6  ;;  %v12597_v5 = vld [vmem:[#allocation32_spill] sm:$0xff]  ;;  %v12598_v6 = vld [vmem:[#allocation33_spill] sm:$0xff] }
  0xc7   :  { %839 = vmatpush.msrb.mxu2 %v10977_v7  ;;  %859 = vmatpush.msrb.mxu3 %v10981_v8  ;;  %v12599_v7 = vld [vmem:[#allocation34_spill] sm:$0xff]  ;;  %v220_v8 = vpop.f32.mrf.mxu0 }
  0xc8   :  { %800 = vmatpush.msrb.mxu0 %v10985_v9  ;;  %820 = vmatpush.msrb.mxu1 %v10987_v10  ;;  %v246_v9 = vpop.f32.mrf.mxu1  ;;  %v12600_v10 = vld [vmem:[#allocation37_spill] sm:$0xff] }
  0xc9   :  { %840 = vmatpush.msrb.mxu2 %v10989_v11  ;;  %860 = vmatpush.msrb.mxu3 %v10993_v12  ;;  %v221_v11 = vadd.f32 %v220_v8, %v12600_v10  ;;  %v12601_v12 = vld [vmem:[#allocation38_spill] sm:$0xff] }
  0xca   :  { %801 = vmatpush.msrb.mxu0 %v10997_v13  ;;  %821 = vmatpush.msrb.mxu1 %v10999_v14  ;;  %v247_v13 = vadd.f32 %v246_v9, %v12601_v12  ;;  %v272_v14 = vpop.f32.mrf.mxu2  ;;  %v607_v9 = vld [vmem:[#allocation2 + $0x18] sm:$0x30] }
  0xcb   :  { %841 = vmatpush.msrb.mxu2 %v11001_v15  ;;  %861 = vmatpush.msrb.mxu3 %v11005_v16  ;;  %308 = vst [vmem:[#allocation2 + $0x50] sm:$0xff] %v221_v11  ;;  %v298_v15 = vpop.f32.mrf.mxu3  ;;  %v12602_v16 = vld [vmem:[#allocation44_spill] sm:$0xff] }
  0xcc   :  { %802 = vmatpush.msrb.mxu0 %v11007_v17  ;;  %822 = vmatpush.msrb.mxu1 %v12597_v5  ;;  %309 = vst [vmem:[#allocation2 + $0x20] sm:$0xff] %v247_v13  ;;  %v273_v17 = vadd.f32 %v272_v14, %v12602_v16 }
  0xcd   :  { %842 = vmatpush.msrb.mxu2 %v11013_v19  ;;  %862 = vmatpush.msrb.mxu3 %v12598_v6  ;;  %v12603_v19 = vld [vmem:[#allocation42_spill] sm:$0xff] }
  0xce   :  { %803 = vmatpush.msrb.mxu0 %v11019_v21  ;;  %823 = vmatpush.msrb.mxu1 %v12599_v7  ;;  %v299_v21 = vadd.f32 %v298_v15, %v12603_v19  ;;  %310 = vst [vmem:[#allocation2 + $0x8] sm:$0xff] %v273_v17  ;;  %v11345_v7 = vld [vmem:[#allocation11 + $0x1f8] sm:$0xff] }
  0xcf   :  { %843 = vmatpush.msrb.mxu2 %v11023_v23  ;;  %863 = vmatpush.msrb.mxu3 %v11027_v24  ;;  %v223_v23 = vpop.f32.mrf.mxu0 }
  0xd0   :  { %804 = vmatpush.msrb.mxu0 %v11029_v25  ;;  %824 = vmatpush.msrb.mxu1 %v11031_v26  ;;  %v249_v24 = vpop.f32.mrf.mxu1  ;;  %311 = vst [vmem:[#allocation2 + $0x38] sm:$0xff] %v299_v21  ;;  %v224_v25 = vadd.f32 %v223_v23, %v12600_v10  ;;  %v606_v10 = vld [vmem:[#allocation2 + $0x58] sm:$0x30] }
  0xd1   :  { %844 = vmatpush.msrb.mxu2 %v11035_v27  ;;  %864 = vmatpush.msrb.mxu3 %v11037_v28  ;;  %v250_v26 = vadd.f32 %v249_v24, %v12601_v12  ;;  %v615_v12 = vrot.slane %v607_v9, 4  ;;  %v614_v13 = vrot.slane %v606_v10, 4  ;;  %v11463_v9 = vld [vmem:[#allocation11 + $0xa8] sm:$0xff]  ;;  %v11465_v10 = vld [vmem:[#allocation11 + $0xb0] sm:$0xff] }
  0xd2   :  { %805 = vmatpush.msrb.mxu0 %v11041_v29  ;;  %825 = vmatpush.msrb.mxu1 %v11043_v30  ;;  %312 = vst [vmem:[#allocation2 + $0x28] sm:$0xf] %v224_v25  ;;  %v275_v27 = vpop.f32.mrf.mxu2 }
  0xd3   :  { %845 = vmatpush.msrb.mxu2 %v11047_v31  ;;  %865 = vmatpush.msrb.mxu3 %v11049_v32  ;;  %313 = vst [vmem:[#allocation2 + $0x48] sm:$0xf] %v250_v26  ;;  %v301_v28 = vpop.f32.mrf.mxu3  ;;  %v276_v29 = vadd.f32 %v275_v27, %v12602_v16  ;;  %v421_v31 = vld [vmem:[#allocation2 + $0x30] sm:$0xc]  ;;  %v422_v32 = vld [vmem:[#allocation2] sm:$0xc] }
  0xd4   :  { %806 = vmatpush.msrb.mxu0 %v11053_v33  ;;  %826 = vmatpush.msrb.mxu1 %v11055_v34  ;;  %v302_v30 = vadd.f32 %v301_v28, %v12603_v19  ;;  %v429_v33 = vrot.slane %v421_v31, 2  ;;  %v430_v34 = vrot.slane %v422_v32, 2 }
  0xd5   :  { %846 = vmatpush.msrb.mxu2 %v11059_v35  ;;  %866 = vmatpush.msrb.mxu3 %v11061_v36  ;;  %314 = vst [vmem:[#allocation2 + $0x10] sm:$0xf] %v276_v29 }
  0xd6   :  { %807 = vmatpush.msrb.mxu0 %v11072_v38  ;;  %827 = vmatpush.msrb.mxu1 %v11074_v39  ;;  %315 = vst [vmem:[#allocation2 + $0x40] sm:$0xf] %v302_v30 }
  0xd7   :  { %847 = vmatpush.msrb.mxu2 %v11078_v40  ;;  %867 = vmatpush.msrb.mxu3 %v11080_v41  ;;  %v424_v40 = vld [vmem:[#allocation2 + $0x18] sm:$0xc] }
  0xd8   :  { %808 = vmatpush.msrb.mxu0 %v11084_v42  ;;  %828 = vmatpush.msrb.mxu1 %v11086_v43  ;;  %v423_v41 = vld [vmem:[#allocation2 + $0x58] sm:$0xc]  ;;  %v432_v42 = vrot.slane %v424_v40, 2  ;;  %v11365_v40 = vld [vmem:[#allocation11 + $0x1a0] sm:$0xff] }
  0xd9   :  { %848 = vmatpush.msrb.mxu2 %v11090_v44  ;;  %868 = vmatpush.msrb.mxu3 %v11092_v45  ;;  %v431_v45 = vrot.slane %v423_v41, 2  ;;  %v11367_v41 = vld [vmem:[#allocation11 + $0x1a8] sm:$0xff] }
  0xda   :  { %809 = vmatpush.msrb.mxu0 %v11096_v46  ;;  %829 = vmatpush.msrb.mxu1 %v11098_v47 }
  0xdb   :  { %849 = vmatpush.msrb.mxu2 %v11102_v48  ;;  %869 = vmatpush.msrb.mxu3 %v11104_v49 }
  0xdc   :  { %810 = vmatpush.msrb.mxu0 %v11108_v51  ;;  %830 = vmatpush.msrb.mxu1 %v11110_v52 }
  0xdd   :  { %850 = vmatpush.msrb.mxu2 %v12591_v54  ;;  %870 = vmatpush.msrb.mxu3 %v12592_v50  ;;  %v605_v54 = vld [vmem:[#allocation2] sm:$0x30] }
  0xde   :  { %811 = vmatpush.msrb.mxu0 %v11131_v58  ;;  %831 = vmatpush.msrb.mxu1 %v11133_v59  ;;  %v12604_v59 = vld [vmem:[#allocation45_spill] sm:$0xff]  ;;  %v613_v18 = vrot.slane %v605_v54, 4  ;;  %v11441_v54 = vld [vmem:[#allocation11 + $0xf0] sm:$0xff] }
  0xdf   :  { %851 = vmatpush.msrb.mxu2 %v12593_v60  ;;  %871 = vmatpush.msrb.mxu3 %v12594_v3  ;;  %v11337_v60 = vld [vmem:[#allocation11 + $0x1e0] sm:$0xff]  ;;  %v11339_v3 = vld [vmem:[#allocation11 + $0x1e8] sm:$0xff] }
  0xe0   :  { %812 = vmatpush.msrb.mxu0 %v11143_v0  ;;  %832 = vmatpush.msrb.mxu1 %v12595_v20  ;;  %v604_v20 = vld [vmem:[#allocation2 + $0x30] sm:$0x30] }
  0xe1   :  { %852 = vmatpush.msrb.mxu2 %v11151_v4  ;;  %872 = vmatpush.msrb.mxu3 %v11153_v37  ;;  %v612_v50 = vrot.slane %v604_v20, 4  ;;  %v11439_v20 = vld [vmem:[#allocation11 + $0xe8] sm:$0xff] }
  0xe2   :  { %813 = vmatpush.msrb.mxu0 %v11159_v55  ;;  %833 = vmatpush.msrb.mxu1 %v12596_v22  ;;  %v11341_v22 = vld [vmem:[#allocation11 + $0x1f0] sm:$0xff] }
  0xe3   :  { %853 = vmatpush.msrb.mxu2 %v11165_v62  ;;  %873 = vmatpush.msrb.mxu3 %v11167_v63 }
  0xe4   :  { %814 = vmatpush.msrb.mxu0 %v11171_v57  ;;  %834 = vmatpush.msrb.mxu1 %v11173_v56 }
  0xe5   :  { %854 = vmatpush.msrb.mxu2 %v11179_v2  ;;  %874 = vmatpush.msrb.mxu3 %v11181_v1 }
 0x13f   :  { %v454_v35 = vpop.f32.mrf.mxu0  ;;  %v474_v36 = vpop.f32.mrf.mxu1 }
 0x140   :  { %v455_v38 = vadd.f32 %v454_v35, %v429_v33  ;;  %v475_v39 = vadd.f32 %v474_v36, %v430_v34  ;;  %v11353_v35 = vld [vmem:[#allocation11 + $0x1c0] sm:$0xff]  ;;  %v11355_v36 = vld [vmem:[#allocation11 + $0x1c8] sm:$0xff] }
 0x142   :  { %10521 = vtanh.f32 %v455_v38  ;;  %v11357_v38 = vld [vmem:[#allocation11 + $0x1d0] sm:$0xff] }
 0x143   :  { %10523 = vtanh.f32 %v475_v39  ;;  %v11361_v39 = vld [vmem:[#allocation11 + $0x1d8] sm:$0xff] }
 0x146   :  { %v494_v43 = vpop.f32.mrf.mxu2  ;;  %v514_v44 = vpop.f32.mrf.mxu3 }
 0x147   :  { %v515_v46 = vadd.f32 %v514_v44, %v432_v42  ;;  %v495_v49 = vadd.f32 %v494_v43, %v431_v45  ;;  %v11369_v42 = vld [vmem:[#allocation11 + $0x1b0] sm:$0xff]  ;;  %v11373_v43 = vld [vmem:[#allocation11 + $0x1b8] sm:$0xff]  ;;  %v11377_v44 = vld [vmem:[#allocation11 + $0x180] sm:$0xff] }
 0x148   :  { %v10522_v47 = vpop.eup %10521  ;;  %12605 = vst [vmem:[#allocation35_spill] sm:$0xff] %v11377_v44  ;;  %v11379_v45 = vld [vmem:[#allocation11 + $0x188] sm:$0xff] }
 0x149   :  { %v10524_v48 = vpop.eup %10523  ;;  %10525 = vtanh.f32 %v515_v46  ;;  %v521_v52 = vmul.f32 0.5, %v10522_v47  ;;  %v11381_v46 = vld [vmem:[#allocation11 + $0x190] sm:$0xff]  ;;  %v11385_v47 = vld [vmem:[#allocation11 + $0x198] sm:$0xff] }
 0x14a   :  { %v522_v51 = vmul.f32 0.5, %v10524_v48  ;;  %10527 = vtanh.f32 %v495_v49  ;;  %12606 = vst [vmem:[#allocation36_spill] sm:$0xff] %v11381_v46  ;;  %v11389_v48 = vld [vmem:[#allocation11 + $0x160] sm:$0xff]  ;;  %v11391_v49 = vld [vmem:[#allocation11 + $0x168] sm:$0xff] }
 0x14b   :  { %v525_v57 = vadd.f32 0.5, %v521_v52  ;;  %v11397_v52 = vld [vmem:[#allocation11 + $0x178] sm:$0xff] }
 0x14c   :  { %v526_v56 = vadd.f32 0.5, %v522_v51  ;;  %v11393_v51 = vld [vmem:[#allocation11 + $0x170] sm:$0xff] }
 0x14e   :  { %v529_v0 = vmul.f32 %v526_v56, %v12604_v59  ;;  %v11401_v56 = vld [vmem:[#allocation11 + $0x140] sm:$0xff]  ;;  %v11409_v59 = vld [vmem:[#allocation11 + $0x158] sm:$0xff] }
 0x14f   :  { %v10526_v58 = vpop.eup %10525 }
 0x150   :  { %v530_v1 = vmul.f32 %v10526_v58, %v525_v57  ;;  %v10528_v4 = vpop.eup %10527  ;;  %v11403_v57 = vld [vmem:[#allocation11 + $0x148] sm:$0xff]  ;;  %v11405_v58 = vld [vmem:[#allocation11 + $0x150] sm:$0xff] }
 0x151   :  { %v523_v55 = vmul.f32 0.5, %v10528_v4  ;;  %v11417_v4 = vld [vmem:[#allocation11 + $0x130] sm:$0xff] }
 0x152   :  { %v531_v37 = vadd.f32 %v530_v1, %v529_v0  ;;  %v11413_v0 = vld [vmem:[#allocation11 + $0x120] sm:$0xff]  ;;  %v11415_v1 = vld [vmem:[#allocation11 + $0x128] sm:$0xff] }
 0x153   :  { %v527_v62 = vadd.f32 0.5, %v523_v55  ;;  %v11425_v55 = vld [vmem:[#allocation11 + $0x100] sm:$0xff] }
 0x154   :  { %10529 = vtanh.f32 %v531_v37 }
 0x15a   :  { %v10530_v63 = vpop.eup %10529 }
 0x15b   :  { %v533_v2 = vmul.f32 %v10530_v63, %v527_v62  ;;  %v11427_v62 = vld [vmem:[#allocation11 + $0x108] sm:$0xff]  ;;  %v11429_v63 = vld [vmem:[#allocation11 + $0x110] sm:$0xff] }
 0x15d   :  { %535 = vrot.lane.b32.xlu0 %v533_v2, %s10886_s0  ;;  %636 = vmatmul.f32.vlgmr.msra.gmra.mxu0 %v533_v2 }
 0x15e   :  { %656 = vmatmul.f32.vlgmr.msra.gmra.mxu1 %v533_v2  ;;  %676 = vmatmul.f32.vlgmr.msra.gmra.mxu2 %v533_v2 }
 0x15f   :  { %696 = vmatmul.f32.vlgmr.msra.gmra.mxu3 %v533_v2  ;;  %969 = vmatpush.msra.mxu0 %v11337_v60  ;;  %v11433_v2 = vld [vmem:[#allocation11 + $0x118] sm:$0xff] }
 0x160   :  { %989 = vmatpush.msra.mxu1 %v11339_v3  ;;  %1009 = vmatpush.msra.mxu2 %v11341_v22 }
 0x161   :  { %1029 = vmatpush.msra.mxu3 %v11345_v7  ;;  %970 = vmatpush.msra.mxu0 %v11353_v35 }
 0x162   :  { %990 = vmatpush.msra.mxu1 %v11355_v36  ;;  %1010 = vmatpush.msra.mxu2 %v11357_v38 }
 0x163   :  { %1030 = vmatpush.msra.mxu3 %v11361_v39  ;;  %971 = vmatpush.msra.mxu0 %v11365_v40 }
 0x164   :  { %991 = vmatpush.msra.mxu1 %v11367_v41  ;;  %1011 = vmatpush.msra.mxu2 %v11369_v42 }
 0x165   :  { %1031 = vmatpush.msra.mxu3 %v11373_v43  ;;  %972 = vmatpush.msra.mxu0 %v11377_v44 }
 0x166   :  { %992 = vmatpush.msra.mxu1 %v11379_v45  ;;  %1012 = vmatpush.msra.mxu2 %v11381_v46 }
 0x167   :  { %1032 = vmatpush.msra.mxu3 %v11385_v47  ;;  %973 = vmatpush.msra.mxu0 %v11389_v48 }
 0x168   :  { %993 = vmatpush.msra.mxu1 %v11391_v49  ;;  %1013 = vmatpush.msra.mxu2 %v11393_v51 }
 0x169   :  { %1033 = vmatpush.msra.mxu3 %v11397_v52  ;;  %974 = vmatpush.msra.mxu0 %v11401_v56 }
 0x16a   :  { %994 = vmatpush.msra.mxu1 %v11403_v57  ;;  %1014 = vmatpush.msra.mxu2 %v11405_v58 }
 0x16b   :  { %1034 = vmatpush.msra.mxu3 %v11409_v59  ;;  %975 = vmatpush.msra.mxu0 %v11413_v0 }
 0x16c   :  { %995 = vmatpush.msra.mxu1 %v11415_v1  ;;  %1015 = vmatpush.msra.mxu2 %v11417_v4 }
 0x16d   :  { %976 = vmatpush.msra.mxu0 %v11425_v55 }
 0x16e   :  { %996 = vmatpush.msra.mxu1 %v11427_v62  ;;  %1016 = vmatpush.msra.mxu2 %v11429_v63 }
 0x170   :  { %997 = vmatpush.msra.mxu1 %v11439_v20  ;;  %1017 = vmatpush.msra.mxu2 %v11441_v54 }
 0x1cf   :  { %v536_v53 = vpop.permute.xlu0 %535 }
 0x1d0   :  { %539 = vst.msk [vmem:[#allocation3] sm:$0x3] %vm538_vm3, %v536_v53  ;;  %v11437_v53 = vld [vmem:[#allocation11 + $0xe0] sm:$0xff] }
 0x1d1   :  { %977 = vmatpush.msra.mxu0 %v11437_v53 }
 0x1da   :  { %v637_v61 = vpop.f32.mrf.mxu0 }
 0x1db   :  { %v638_v5 = vadd.f32 %v637_v61, %v612_v50  ;;  %v657_v6 = vpop.f32.mrf.mxu1  ;;  %v11445_v50 = vld [vmem:[#allocation11 + $0xf8] sm:$0xff]  ;;  %v11449_v61 = vld [vmem:[#allocation11 + $0xc0] sm:$0xff] }
 0x1dc   :  { %v658_v8 = vadd.f32 %v657_v6, %v613_v18  ;;  %v11451_v18 = vld [vmem:[#allocation11 + $0xc8] sm:$0xff]  ;;  %978 = vmatpush.msra.mxu0 %v11449_v61  ;;  %v11457_v6 = vld [vmem:[#allocation11 + $0xd8] sm:$0xff] }
 0x1dd   :  { %10531 = vtanh.f32 %v638_v5  ;;  %v11453_v5 = vld [vmem:[#allocation11 + $0xd0] sm:$0xff]  ;;  %998 = vmatpush.msra.mxu1 %v11451_v18 }
 0x1de   :  { %10533 = vtanh.f32 %v658_v8  ;;  %1018 = vmatpush.msra.mxu2 %v11453_v5  ;;  %v11461_v8 = vld [vmem:[#allocation11 + $0xa0] sm:$0xff] }
 0x1df   :  { %979 = vmatpush.msra.mxu0 %v11461_v8  ;;  %999 = vmatpush.msra.mxu1 %v11463_v9 }
 0x1e0   :  { %1019 = vmatpush.msra.mxu2 %v11465_v10 }
 0x1e1   :  { %v677_v11 = vpop.f32.mrf.mxu2 }
 0x1e2   :  { %v697_v14 = vpop.f32.mrf.mxu3  ;;  %v678_v19 = vadd.f32 %v677_v11, %v614_v13  ;;  %v11469_v11 = vld [vmem:[#allocation11 + $0xb8] sm:$0xff]  ;;  %v11475_v13 = vld [vmem:[#allocation11 + $0x88] sm:$0xff] }
 0x1e3   :  { %v10532_v15 = vpop.eup %10531  ;;  %v698_v16 = vadd.f32 %v697_v14, %v615_v12  ;;  %v11473_v12 = vld [vmem:[#allocation11 + $0x80] sm:$0xff]  ;;  %12608 = vst [vmem:[#allocation40_spill] sm:$0xff] %v11475_v13  ;;  %v11477_v14 = vld [vmem:[#allocation11 + $0x90] sm:$0xff]  ;;  %1000 = vmatpush.msra.mxu1 %v11475_v13 }
 0x1e4   :  { %v10534_v17 = vpop.eup %10533  ;;  %v704_v23 = vmul.f32 0.5, %v10532_v15  ;;  %12607 = vst [vmem:[#allocation39_spill] sm:$0xff] %v11473_v12  ;;  %980 = vmatpush.msra.mxu0 %v11473_v12  ;;  %v11481_v15 = vld [vmem:[#allocation11 + $0x98] sm:$0xff]  ;;  %1020 = vmatpush.msra.mxu2 %v11477_v14 }
 0x1e5   :  { %v705_v21 = vmul.f32 0.5, %v10534_v17  ;;  %10535 = vtanh.f32 %v698_v16  ;;  %12609 = vst [vmem:[#allocation41_spill] sm:$0xff] %v11477_v14  ;;  %v11483_v16 = vld [vmem:[#allocation11 + $0x60] sm:$0xff]  ;;  %v11485_v17 = vld [vmem:[#allocation11 + $0x68] sm:$0xff] }
 0x1e6   :  { %10537 = vtanh.f32 %v678_v19  ;;  %v708_v25 = vadd.f32 0.5, %v704_v23  ;;  %12610 = vst [vmem:[#allocation43_spill] sm:$0xff] %v11481_v15  ;;  %v11489_v19 = vld [vmem:[#allocation11 + $0x70] sm:$0xff]  ;;  %v11493_v23 = vld [vmem:[#allocation11 + $0x40] sm:$0xff]  ;;  %981 = vmatpush.msra.mxu0 %v11483_v16  ;;  %1001 = vmatpush.msra.mxu1 %v11485_v17 }
 0x1e7   :  { %v709_v24 = vadd.f32 0.5, %v705_v21  ;;  %12611 = vst [vmem:[#allocation32_spill] sm:$0xff] %v11483_v16  ;;  %v11491_v21 = vld [vmem:[#allocation11 + $0x78] sm:$0xff]  ;;  %1021 = vmatpush.msra.mxu2 %v11489_v19 }
 0x1e8   :  { %12612 = vst [vmem:[#allocation33_spill] sm:$0xff] %v11485_v17  ;;  %982 = vmatpush.msra.mxu0 %v11493_v23 }
 0x1e9   :  { %v712_v27 = vmul.f32 %v709_v24, %v531_v37  ;;  %v11421_v37 = vld [vmem:[#allocation11 + $0x138] sm:$0xff]  ;;  %12613 = vst [vmem:[#allocation34_spill] sm:$0xff] %v11489_v19  ;;  %v11497_v24 = vld [vmem:[#allocation11 + $0x48] sm:$0xff] }
 0x1ea   :  { %1035 = vmatpush.msra.mxu3 %v11421_v37  ;;  %12614 = vst [vmem:[#allocation37_spill] sm:$0xff] %v11491_v21  ;;  %1002 = vmatpush.msra.mxu1 %v11497_v24 }
 0x1eb   :  { %v10536_v26 = vpop.eup %10535  ;;  %12615 = vst [vmem:[#allocation38_spill] sm:$0xff] %v11493_v23  ;;  %v11523_v23 = vld [vmem:[#allocation11 + $0x10] sm:$0xff] }
 0x1ec   :  { %v713_v28 = vmul.f32 %v10536_v26, %v708_v25  ;;  %v10538_v29 = vpop.eup %10537  ;;  %1036 = vmatpush.msra.mxu3 %v11433_v2  ;;  %12616 = vst [vmem:[#allocation44_spill] sm:$0xff] %v11497_v24  ;;  %v11499_v25 = vld [vmem:[#allocation11 + $0x50] sm:$0xff]  ;;  %v11501_v26 = vld [vmem:[#allocation11 + $0x58] sm:$0xff] }
 0x1ed   :  { %v706_v31 = vmul.f32 0.5, %v10538_v29  ;;  %12617 = vst [vmem:[#allocation42_spill] sm:$0xff] %v11499_v25  ;;  %v11511_v29 = vld [vmem:[#allocation11 + $0x30] sm:$0xff]  ;;  %1022 = vmatpush.msra.mxu2 %v11499_v25  ;;  %v11525_v24 = vld [vmem:[#allocation11 + $0x18] sm:$0xff] }
 0x1ee   :  { %v11349_v30 = vadd.f32 %v713_v28, %v712_v27  ;;  %1037 = vmatpush.msra.mxu3 %v11445_v50  ;;  %12618 = vst [vmem:[#allocation45_spill] sm:$0xff] %v11501_v26  ;;  %v11505_v27 = vld [vmem:[#allocation11 + $0x20] sm:$0xff]  ;;  %v11507_v28 = vld [vmem:[#allocation11 + $0x28] sm:$0xff] }
 0x1ef   :  { %v710_v32 = vadd.f32 0.5, %v706_v31  ;;  %12619 = vst [vmem:[#allocation46_spill] sm:$0xff] %v11505_v27  ;;  %v11513_v31 = vld [vmem:[#allocation11 + $0x38] sm:$0xff]  ;;  %983 = vmatpush.msra.mxu0 %v11505_v27  ;;  %1003 = vmatpush.msra.mxu1 %v11507_v28 }
 0x1f0   :  { %10539 = vtanh.f32 %v11349_v30  ;;  %1038 = vmatpush.msra.mxu3 %v11457_v6  ;;  %12620 = vst [vmem:[#allocation47_spill] sm:$0xff] %v11507_v28  ;;  %1023 = vmatpush.msra.mxu2 %v11511_v29 }
 0x1f1   :  { %12621 = vst [vmem:[#allocation48_spill] sm:$0xff] %v11511_v29 }
 0x1f2   :  { %1039 = vmatpush.msra.mxu3 %v11469_v11  ;;  %12622 = vst [vmem:[#allocation49_spill] sm:$0xff] %v11513_v31  ;;  %1024 = vmatpush.msra.mxu2 %v11523_v23 }
 0x1f3   :  { %12625 = vst [vmem:[#allocation52_spill] sm:$0xff] %v11523_v23 }
 0x1f4   :  { %1040 = vmatpush.msra.mxu3 %v11481_v15  ;;  %12626 = vst [vmem:[#allocation53_spill] sm:$0xff] %v11525_v24 }
 0x1f6   :  { %v10540_v33 = vpop.eup %10539  ;;  %1041 = vmatpush.msra.mxu3 %v11491_v21  ;;  %v784_v21 = vld [vmem:[#allocation2] sm:$0xc0] }
 0x1f7   :  { %v716_v34 = vmul.f32 %v10540_v33, %v710_v32  ;;  %v783_v32 = vld [vmem:[#allocation2 + $0x30] sm:$0xc0]  ;;  %v11517_v33 = vld [vmem:[#allocation11] sm:$0xff]  ;;  %v792_v25 = vrot.slane %v784_v21, 6  ;;  %v786_v21 = vld [vmem:[#allocation2 + $0x18] sm:$0xc0] }
 0x1f8   :  { %1042 = vmatpush.msra.mxu3 %v11501_v26  ;;  %12623 = vst [vmem:[#allocation50_spill] sm:$0xff] %v11517_v33  ;;  %984 = vmatpush.msra.mxu0 %v11517_v33  ;;  %v791_v26 = vrot.slane %v783_v32, 6 }
 0x1f9   :  { %718 = vst.msk [vmem:[#allocation3] sm:$0x3] %vm717_vm4, %v716_v34  ;;  %815 = vmatmul.f32.vlgmr.msrb.gmra.mxu0 %v716_v34  ;;  %835 = vmatmul.f32.vlgmr.msrb.gmra.mxu1 %v716_v34 }
 0x1fa   :  { %855 = vmatmul.f32.vlgmr.msrb.gmra.mxu2 %v716_v34  ;;  %875 = vmatmul.f32.vlgmr.msrb.gmra.mxu3 %v716_v34  ;;  %v11519_v34 = vld [vmem:[#allocation11 + $0x8] sm:$0xff] }
 0x1fb   :  { %12624 = vst [vmem:[#allocation51_spill] sm:$0xff] %v11519_v34  ;;  %1043 = vmatpush.msra.mxu3 %v11513_v31  ;;  %1004 = vmatpush.msra.mxu1 %v11519_v34 }
 0x1fc   :  { %1147 = vmatpush.msrb.mxu0 %v11337_v60  ;;  %1187 = vmatpush.msrb.mxu2 %v11341_v22 }
 0x1fd   :  { %1044 = vmatpush.msra.mxu3 %v11525_v24  ;;  %1167 = vmatpush.msrb.mxu1 %v11339_v3 }
 0x1fe   :  { %1148 = vmatpush.msrb.mxu0 %v11353_v35  ;;  %1188 = vmatpush.msrb.mxu2 %v11357_v38 }
 0x1ff   :  { %1207 = vmatpush.msrb.mxu3 %v11345_v7  ;;  %1168 = vmatpush.msrb.mxu1 %v11355_v36 }
 0x200   :  { %1149 = vmatpush.msrb.mxu0 %v11365_v40  ;;  %1189 = vmatpush.msrb.mxu2 %v11369_v42 }
 0x201   :  { %1208 = vmatpush.msrb.mxu3 %v11361_v39  ;;  %1169 = vmatpush.msrb.mxu1 %v11367_v41 }
 0x202   :  { %1150 = vmatpush.msrb.mxu0 %v11377_v44  ;;  %1190 = vmatpush.msrb.mxu2 %v11381_v46 }
 0x203   :  { %1209 = vmatpush.msrb.mxu3 %v11373_v43  ;;  %1170 = vmatpush.msrb.mxu1 %v11379_v45 }
 0x204   :  { %1151 = vmatpush.msrb.mxu0 %v11389_v48  ;;  %1191 = vmatpush.msrb.mxu2 %v11393_v51 }
 0x205   :  { %1210 = vmatpush.msrb.mxu3 %v11385_v47  ;;  %1171 = vmatpush.msrb.mxu1 %v11391_v49 }
 0x206   :  { %1152 = vmatpush.msrb.mxu0 %v11401_v56  ;;  %1192 = vmatpush.msrb.mxu2 %v11405_v58 }
 0x207   :  { %1211 = vmatpush.msrb.mxu3 %v11397_v52  ;;  %1172 = vmatpush.msrb.mxu1 %v11403_v57 }
 0x208   :  { %1153 = vmatpush.msrb.mxu0 %v11413_v0  ;;  %1193 = vmatpush.msrb.mxu2 %v11417_v4 }
 0x209   :  { %1212 = vmatpush.msrb.mxu3 %v11409_v59  ;;  %1173 = vmatpush.msrb.mxu1 %v11415_v1 }
 0x20a   :  { %1154 = vmatpush.msrb.mxu0 %v11425_v55  ;;  %1194 = vmatpush.msrb.mxu2 %v11429_v63 }
 0x20b   :  { %1213 = vmatpush.msrb.mxu3 %v11421_v37  ;;  %1174 = vmatpush.msrb.mxu1 %v11427_v62 }
 0x20c   :  { %1155 = vmatpush.msrb.mxu0 %v11437_v53  ;;  %1195 = vmatpush.msrb.mxu2 %v11441_v54 }
 0x20d   :  { %1214 = vmatpush.msrb.mxu3 %v11433_v2  ;;  %1175 = vmatpush.msrb.mxu1 %v11439_v20 }
 0x20e   :  { %1156 = vmatpush.msrb.mxu0 %v11449_v61  ;;  %1196 = vmatpush.msrb.mxu2 %v11453_v5 }
 0x20f   :  { %1215 = vmatpush.msrb.mxu3 %v11445_v50  ;;  %1176 = vmatpush.msrb.mxu1 %v11451_v18 }
 0x210   :  { %1157 = vmatpush.msrb.mxu0 %v11461_v8  ;;  %1197 = vmatpush.msrb.mxu2 %v11465_v10 }
 0x211   :  { %1216 = vmatpush.msrb.mxu3 %v11457_v6  ;;  %1177 = vmatpush.msrb.mxu1 %v11463_v9 }
 0x212   :  { %1158 = vmatpush.msrb.mxu0 %v11473_v12  ;;  %1198 = vmatpush.msrb.mxu2 %v11477_v14 }
 0x213   :  { %1217 = vmatpush.msrb.mxu3 %v11469_v11  ;;  %1178 = vmatpush.msrb.mxu1 %v11475_v13 }
 0x214   :  { %1159 = vmatpush.msrb.mxu0 %v11483_v16 }
 0x215   :  { %1218 = vmatpush.msrb.mxu3 %v11481_v15  ;;  %1179 = vmatpush.msrb.mxu1 %v11485_v17  ;;  %v12636_v17 = vld [vmem:[#allocation48_spill] sm:$0xff] }
 0x276   :  { %v816_v27 = vpop.f32.mrf.mxu0  ;;  %v836_v28 = vpop.f32.mrf.mxu1 }
 0x277   :  { %v817_v19 = vadd.f32 %v816_v27, %v791_v26  ;;  %v837_v29 = vadd.f32 %v836_v28, %v792_v25  ;;  %v785_v25 = vld [vmem:[#allocation2 + $0x58] sm:$0xc0]  ;;  %v794_v26 = vrot.slane %v786_v21, 6 }
 0x278   :  { %v793_v28 = vrot.slane %v785_v25, 6 }
 0x279   :  { %10541 = vtanh.f32 %v817_v19 }
 0x27a   :  { %10543 = vtanh.f32 %v837_v29 }
 0x27d   :  { %v856_v19 = vpop.f32.mrf.mxu2  ;;  %v876_v27 = vpop.f32.mrf.mxu3 }
 0x27e   :  { %v877_v29 = vadd.f32 %v876_v27, %v794_v26  ;;  %v857_v44 = vadd.f32 %v856_v19, %v793_v28 }
 0x27f   :  { %v10542_v32 = vpop.eup %10541 }
 0x280   :  { %v10544_v21 = vpop.eup %10543  ;;  %10545 = vtanh.f32 %v877_v29  ;;  %v883_v25 = vmul.f32 0.5, %v10542_v32  ;;  %v12628_v32 = vld [vmem:[#allocation34_spill] sm:$0xff] }
 0x281   :  { %v884_v46 = vmul.f32 0.5, %v10544_v21  ;;  %10547 = vtanh.f32 %v857_v44  ;;  %1199 = vmatpush.msrb.mxu2 %v12628_v32  ;;  %v12629_v21 = vld [vmem:[#allocation37_spill] sm:$0xff] }
 0x282   :  { %v887_v19 = vadd.f32 0.5, %v883_v25  ;;  %1219 = vmatpush.msrb.mxu3 %v12629_v21  ;;  %v12630_v25 = vld [vmem:[#allocation38_spill] sm:$0xff] }
 0x283   :  { %v888_v26 = vadd.f32 0.5, %v884_v46  ;;  %1160 = vmatpush.msrb.mxu0 %v12630_v25 }
 0x285   :  { %v891_v44 = vmul.f32 %v888_v26, %v11349_v30  ;;  %v12631_v26 = vld [vmem:[#allocation44_spill] sm:$0xff] }
 0x286   :  { %v10546_v27 = vpop.eup %10545  ;;  %1180 = vmatpush.msrb.mxu1 %v12631_v26 }
 0x287   :  { %v892_v46 = vmul.f32 %v10546_v27, %v887_v19  ;;  %v10548_v28 = vpop.eup %10547  ;;  %v12632_v27 = vld [vmem:[#allocation42_spill] sm:$0xff] }
 0x288   :  { %v885_v30 = vmul.f32 0.5, %v10548_v28  ;;  %1200 = vmatpush.msrb.mxu2 %v12632_v27  ;;  %v12634_v28 = vld [vmem:[#allocation46_spill] sm:$0xff] }
 0x289   :  { %v11574_v29 = vadd.f32 %v892_v46, %v891_v44  ;;  %v12633_v44 = vld [vmem:[#allocation45_spill] sm:$0xff]  ;;  %1161 = vmatpush.msrb.mxu0 %v12634_v28 }
 0x28a   :  { %v889_v19 = vadd.f32 0.5, %v885_v30  ;;  %1220 = vmatpush.msrb.mxu3 %v12633_v44  ;;  %1201 = vmatpush.msrb.mxu2 %v12636_v17  ;;  %v12638_v30 = vld [vmem:[#allocation36_spill] sm:$0xff] }
 0x28b   :  { %12627 = vst [vmem:[#allocation54_spill] sm:$0xff] %v11574_v29  ;;  %10549 = vtanh.f32 %v11574_v29  ;;  %v12635_v29 = vld [vmem:[#allocation47_spill] sm:$0xff]  ;;  %1162 = vmatpush.msrb.mxu0 %v11517_v33 }
 0x28c   :  { %1181 = vmatpush.msrb.mxu1 %v12635_v29  ;;  %1221 = vmatpush.msrb.mxu3 %v11513_v31 }
 0x28d   :  { %1202 = vmatpush.msrb.mxu2 %v11523_v23 }
 0x28e   :  { %1182 = vmatpush.msrb.mxu1 %v11519_v34  ;;  %1222 = vmatpush.msrb.mxu3 %v11525_v24 }
 0x291   :  { %v10550_v46 = vpop.eup %10549 }
 0x292   :  { %v895_v16 = vmul.f32 %v10550_v46, %v889_v19  ;;  %v12639_v19 = vld [vmem:[#allocation32_spill] sm:$0xff]  ;;  %v12640_v46 = vld [vmem:[#allocation33_spill] sm:$0xff] }
 0x294   :  { %897 = vrot.lane.b32.xlu0 %v895_v16, %s10886_s0  ;;  %985 = vmatmul.f32.vlgmr.msra.gmra.mxu0 %v895_v16 }
 0x295   :  { %1005 = vmatmul.f32.vlgmr.msra.gmra.mxu1 %v895_v16  ;;  %1025 = vmatmul.f32.vlgmr.msra.gmra.mxu2 %v895_v16 }
 0x296   :  { %1045 = vmatmul.f32.vlgmr.msra.gmra.mxu3 %v895_v16  ;;  %1329 = vmatpush.msra.mxu0 %v11337_v60  ;;  %v12637_v16 = vld [vmem:[#allocation35_spill] sm:$0xff] }
 0x297   :  { %1349 = vmatpush.msra.mxu1 %v11339_v3  ;;  %1369 = vmatpush.msra.mxu2 %v11341_v22 }
 0x298   :  { %1389 = vmatpush.msra.mxu3 %v11345_v7  ;;  %1330 = vmatpush.msra.mxu0 %v11353_v35 }
 0x299   :  { %1350 = vmatpush.msra.mxu1 %v11355_v36  ;;  %1370 = vmatpush.msra.mxu2 %v11357_v38 }
 0x29a   :  { %1390 = vmatpush.msra.mxu3 %v11361_v39  ;;  %1331 = vmatpush.msra.mxu0 %v11365_v40 }
 0x29b   :  { %1351 = vmatpush.msra.mxu1 %v11367_v41  ;;  %1371 = vmatpush.msra.mxu2 %v11369_v42 }
 0x29c   :  { %1391 = vmatpush.msra.mxu3 %v11373_v43  ;;  %1332 = vmatpush.msra.mxu0 %v12637_v16 }
 0x29d   :  { %1352 = vmatpush.msra.mxu1 %v11379_v45  ;;  %1372 = vmatpush.msra.mxu2 %v12638_v30 }
 0x29e   :  { %1392 = vmatpush.msra.mxu3 %v11385_v47  ;;  %1333 = vmatpush.msra.mxu0 %v11389_v48 }
 0x29f   :  { %1353 = vmatpush.msra.mxu1 %v11391_v49  ;;  %1373 = vmatpush.msra.mxu2 %v11393_v51 }
 0x2a0   :  { %1393 = vmatpush.msra.mxu3 %v11397_v52  ;;  %1334 = vmatpush.msra.mxu0 %v11401_v56 }
 0x2a1   :  { %1354 = vmatpush.msra.mxu1 %v11403_v57  ;;  %1374 = vmatpush.msra.mxu2 %v11405_v58 }
 0x2a2   :  { %1394 = vmatpush.msra.mxu3 %v11409_v59  ;;  %1335 = vmatpush.msra.mxu0 %v11413_v0 }
 0x2a3   :  { %1355 = vmatpush.msra.mxu1 %v11415_v1  ;;  %1375 = vmatpush.msra.mxu2 %v11417_v4 }
 0x2a4   :  { %1395 = vmatpush.msra.mxu3 %v11421_v37  ;;  %1336 = vmatpush.msra.mxu0 %v11425_v55 }
 0x2a5   :  { %1356 = vmatpush.msra.mxu1 %v11427_v62  ;;  %1376 = vmatpush.msra.mxu2 %v11429_v63 }
 0x2a6   :  { %1396 = vmatpush.msra.mxu3 %v11433_v2  ;;  %1337 = vmatpush.msra.mxu0 %v11437_v53 }
 0x2a7   :  { %1357 = vmatpush.msra.mxu1 %v11439_v20  ;;  %1377 = vmatpush.msra.mxu2 %v11441_v54 }
 0x2a8   :  { %1397 = vmatpush.msra.mxu3 %v11445_v50  ;;  %1338 = vmatpush.msra.mxu0 %v11449_v61 }
 0x2a9   :  { %1358 = vmatpush.msra.mxu1 %v11451_v18  ;;  %1378 = vmatpush.msra.mxu2 %v11453_v5 }
 0x2aa   :  { %1398 = vmatpush.msra.mxu3 %v11457_v6  ;;  %1339 = vmatpush.msra.mxu0 %v11461_v8 }
 0x2ab   :  { %1359 = vmatpush.msra.mxu1 %v11463_v9  ;;  %1379 = vmatpush.msra.mxu2 %v11465_v10 }
 0x2ac   :  { %1399 = vmatpush.msra.mxu3 %v11469_v11  ;;  %1340 = vmatpush.msra.mxu0 %v11473_v12 }
 0x2ad   :  { %1360 = vmatpush.msra.mxu1 %v11475_v13  ;;  %1380 = vmatpush.msra.mxu2 %v11477_v14 }
 0x2ae   :  { %1400 = vmatpush.msra.mxu3 %v11481_v15  ;;  %1341 = vmatpush.msra.mxu0 %v12639_v19 }
 0x2af   :  { %1361 = vmatpush.msra.mxu1 %v12640_v46  ;;  %1381 = vmatpush.msra.mxu2 %v12628_v32 }
 0x2b0   :  { %1401 = vmatpush.msra.mxu3 %v12629_v21  ;;  %1342 = vmatpush.msra.mxu0 %v12630_v25  ;;  %v966_v25 = vld [vmem:[#allocation2 + $0x20] sm:$0x3] }
 0x2b1   :  { %1362 = vmatpush.msra.mxu1 %v12631_v26  ;;  %1382 = vmatpush.msra.mxu2 %v12632_v27 }
 0x2b2   :  { %1402 = vmatpush.msra.mxu3 %v12633_v44  ;;  %1343 = vmatpush.msra.mxu0 %v12634_v28  ;;  %v965_v44 = vld [vmem:[#allocation2 + $0x50] sm:$0x3] }
 0x2b3   :  { %1363 = vmatpush.msra.mxu1 %v12635_v29  ;;  %1383 = vmatpush.msra.mxu2 %v12636_v17  ;;  %v968_v17 = vld [vmem:[#allocation2 + $0x38] sm:$0x3] }
 0x2b4   :  { %1403 = vmatpush.msra.mxu3 %v11513_v31  ;;  %1344 = vmatpush.msra.mxu0 %v11517_v33 }
 0x2b5   :  { %1364 = vmatpush.msra.mxu1 %v11519_v34  ;;  %1384 = vmatpush.msra.mxu2 %v11523_v23  ;;  %v967_v34 = vld [vmem:[#allocation2 + $0x8] sm:$0x3] }
 0x2b6   :  { %1404 = vmatpush.msra.mxu3 %v11525_v24 }
 0x306   :  { %v898_v26 = vpop.permute.xlu0 %897 }
 0x307   :  { %900 = vst.msk [vmem:[#allocation3 + $0x2] sm:$0x3] %vm538_vm3, %v898_v26 }
 0x311   :  { %v986_v27 = vpop.f32.mrf.mxu0 }
 0x312   :  { %v987_v28 = vadd.f32 %v986_v27, %v965_v44  ;;  %v1006_v29 = vpop.f32.mrf.mxu1  ;;  %v12641_v44 = vld [vmem:[#allocation54_spill] sm:$0xff] }
 0x313   :  { %v1007_v21 = vadd.f32 %v1006_v29, %v966_v25 }
 0x314   :  { %10551 = vtanh.f32 %v987_v28 }
 0x315   :  { %10553 = vtanh.f32 %v1007_v21 }
 0x318   :  { %v1026_v31 = vpop.f32.mrf.mxu2 }
 0x319   :  { %v1046_v33 = vpop.f32.mrf.mxu3  ;;  %v1027_v19 = vadd.f32 %v1026_v31, %v967_v34 }
 0x31a   :  { %v10552_v32 = vpop.eup %10551  ;;  %v1047_v46 = vadd.f32 %v1046_v33, %v968_v17 }
 0x31b   :  { %v10554_v23 = vpop.eup %10553  ;;  %v1053_v15 = vmul.f32 0.5, %v10552_v32 }
 0x31c   :  { %v1054_v24 = vmul.f32 0.5, %v10554_v23  ;;  %10555 = vtanh.f32 %v1047_v46 }
 0x31d   :  { %10557 = vtanh.f32 %v1027_v19  ;;  %v1057_v14 = vadd.f32 0.5, %v1053_v15  ;;  %v1314_v19 = vld [vmem:[#allocation2 + $0x20] sm:$0x30] }
 0x31e   :  { %v1058_v26 = vadd.f32 0.5, %v1054_v24 }
 0x320   :  { %v1061_v13 = vmul.f32 %v1058_v26, %v12641_v44  ;;  %v11739_v44 = vld [vmem:[#allocation11 + $0x1e0] sm:$0xff] }
 0x322   :  { %v10556_v27 = vpop.eup %10555 }
 0x323   :  { %v1062_v29 = vmul.f32 %v10556_v27, %v1057_v14  ;;  %v10558_v25 = vpop.eup %10557  ;;  %v1322_v27 = vrot.slane %v1314_v19, 4  ;;  %v11843_v19 = vld [vmem:[#allocation11 + $0xf0] sm:$0xff] }
 0x324   :  { %v1055_v28 = vmul.f32 0.5, %v10558_v25  ;;  %v11743_v25 = vld [vmem:[#allocation11 + $0x1f0] sm:$0xff] }
 0x325   :  { %v11668_v21 = vadd.f32 %v1062_v29, %v1061_v13  ;;  %v11741_v29 = vld [vmem:[#allocation11 + $0x1e8] sm:$0xff] }
 0x326   :  { %v1059_v12 = vadd.f32 0.5, %v1055_v28 }
 0x327   :  { %10559 = vtanh.f32 %v11668_v21 }
 0x32d   :  { %v10560_v17 = vpop.eup %10559 }
 0x32e   :  { %v1065_v33 = vmul.f32 %v10560_v17, %v1059_v12  ;;  %v11747_v17 = vld [vmem:[#allocation11 + $0x1f8] sm:$0xff] }
 0x330   :  { %1066 = vst.msk [vmem:[#allocation3 + $0x2] sm:$0x3] %vm717_vm4, %v1065_v33  ;;  %1163 = vmatmul.f32.vlgmr.msrb.gmra.mxu0 %v1065_v33  ;;  %1183 = vmatmul.f32.vlgmr.msrb.gmra.mxu1 %v1065_v33 }
 0x331   :  { %1203 = vmatmul.f32.vlgmr.msrb.gmra.mxu2 %v1065_v33  ;;  %1223 = vmatmul.f32.vlgmr.msrb.gmra.mxu3 %v1065_v33 }
 0x332   :  { %1507 = vmatpush.msrb.mxu0 %v11337_v60  ;;  %1527 = vmatpush.msrb.mxu1 %v11339_v3  ;;  %v12642_v60 = vld [vmem:[#allocation39_spill] sm:$0xff]  ;;  %v12643_v3 = vld [vmem:[#allocation40_spill] sm:$0xff] }
 0x333   :  { %1547 = vmatpush.msrb.mxu2 %v11341_v22  ;;  %1567 = vmatpush.msrb.mxu3 %v11345_v7  ;;  %v12644_v22 = vld [vmem:[#allocation41_spill] sm:$0xff]  ;;  %v12645_v7 = vld [vmem:[#allocation43_spill] sm:$0xff] }
 0x334   :  { %1508 = vmatpush.msrb.mxu0 %v11353_v35  ;;  %1528 = vmatpush.msrb.mxu1 %v11355_v36  ;;  %v12646_v35 = vld [vmem:[#allocation32_spill] sm:$0xff]  ;;  %v12647_v36 = vld [vmem:[#allocation33_spill] sm:$0xff] }
 0x335   :  { %1548 = vmatpush.msrb.mxu2 %v11357_v38  ;;  %1568 = vmatpush.msrb.mxu3 %v11361_v39  ;;  %v12648_v38 = vld [vmem:[#allocation34_spill] sm:$0xff]  ;;  %v12649_v39 = vld [vmem:[#allocation37_spill] sm:$0xff] }
 0x336   :  { %1509 = vmatpush.msrb.mxu0 %v11365_v40  ;;  %1529 = vmatpush.msrb.mxu1 %v11367_v41  ;;  %v12650_v40 = vld [vmem:[#allocation38_spill] sm:$0xff]  ;;  %v12651_v41 = vld [vmem:[#allocation44_spill] sm:$0xff] }
 0x337   :  { %1549 = vmatpush.msrb.mxu2 %v11369_v42  ;;  %1569 = vmatpush.msrb.mxu3 %v11373_v43  ;;  %v12652_v42 = vld [vmem:[#allocation42_spill] sm:$0xff]  ;;  %v12653_v43 = vld [vmem:[#allocation45_spill] sm:$0xff] }
 0x338   :  { %1510 = vmatpush.msrb.mxu0 %v12637_v16  ;;  %1530 = vmatpush.msrb.mxu1 %v11379_v45  ;;  %v12654_v45 = vld [vmem:[#allocation46_spill] sm:$0xff] }
 0x339   :  { %1550 = vmatpush.msrb.mxu2 %v12638_v30  ;;  %1570 = vmatpush.msrb.mxu3 %v11385_v47  ;;  %v12655_v47 = vld [vmem:[#allocation47_spill] sm:$0xff]  ;;  %v1313_v30 = vld [vmem:[#allocation2 + $0x50] sm:$0x30] }
 0x33a   :  { %1511 = vmatpush.msrb.mxu0 %v11389_v48  ;;  %1531 = vmatpush.msrb.mxu1 %v11391_v49  ;;  %v12656_v48 = vld [vmem:[#allocation48_spill] sm:$0xff]  ;;  %v12657_v49 = vld [vmem:[#allocation49_spill] sm:$0xff]  ;;  %v1321_v46 = vrot.slane %v1313_v30, 4  ;;  %v11841_v30 = vld [vmem:[#allocation11 + $0xe8] sm:$0xff] }
 0x33b   :  { %1551 = vmatpush.msrb.mxu2 %v11393_v51  ;;  %1571 = vmatpush.msrb.mxu3 %v11397_v52  ;;  %v12658_v51 = vld [vmem:[#allocation50_spill] sm:$0xff]  ;;  %v12659_v52 = vld [vmem:[#allocation51_spill] sm:$0xff] }
 0x33c   :  { %1512 = vmatpush.msrb.mxu0 %v11401_v56  ;;  %1532 = vmatpush.msrb.mxu1 %v11403_v57  ;;  %v12660_v56 = vld [vmem:[#allocation52_spill] sm:$0xff]  ;;  %v12661_v57 = vld [vmem:[#allocation53_spill] sm:$0xff] }
 0x33d   :  { %1552 = vmatpush.msrb.mxu2 %v11405_v58  ;;  %1572 = vmatpush.msrb.mxu3 %v11409_v59  ;;  %v1131_v58 = vld [vmem:[#allocation2 + $0x50] sm:$0xc]  ;;  %v1132_v59 = vld [vmem:[#allocation2 + $0x20] sm:$0xc] }
 0x33e   :  { %1513 = vmatpush.msrb.mxu0 %v11413_v0  ;;  %1533 = vmatpush.msrb.mxu1 %v11415_v1  ;;  %v1139_v0 = vrot.slane %v1131_v58, 2  ;;  %v1140_v1 = vrot.slane %v1132_v59, 2 }
 0x33f   :  { %1553 = vmatpush.msrb.mxu2 %v11417_v4  ;;  %1573 = vmatpush.msrb.mxu3 %v11421_v37 }
 0x340   :  { %1514 = vmatpush.msrb.mxu0 %v11425_v55  ;;  %1534 = vmatpush.msrb.mxu1 %v11427_v62 }
 0x341   :  { %1554 = vmatpush.msrb.mxu2 %v11429_v63  ;;  %1574 = vmatpush.msrb.mxu3 %v11433_v2  ;;  %v1134_v63 = vld [vmem:[#allocation2 + $0x38] sm:$0xc]  ;;  %v1133_v2 = vld [vmem:[#allocation2 + $0x8] sm:$0xc] }
 0x342   :  { %1515 = vmatpush.msrb.mxu0 %v11437_v53  ;;  %1535 = vmatpush.msrb.mxu1 %v11439_v20  ;;  %v1142_v53 = vrot.slane %v1134_v63, 2  ;;  %v11769_v63 = vld [vmem:[#allocation11 + $0x1a8] sm:$0xff] }
 0x343   :  { %1555 = vmatpush.msrb.mxu2 %v11441_v54  ;;  %1575 = vmatpush.msrb.mxu3 %v11445_v50  ;;  %v1141_v50 = vrot.slane %v1133_v2, 2  ;;  %v11771_v2 = vld [vmem:[#allocation11 + $0x1b0] sm:$0xff] }
 0x344   :  { %1516 = vmatpush.msrb.mxu0 %v11449_v61  ;;  %1536 = vmatpush.msrb.mxu1 %v11451_v18 }
 0x345   :  { %1556 = vmatpush.msrb.mxu2 %v11453_v5  ;;  %1576 = vmatpush.msrb.mxu3 %v11457_v6 }
 0x346   :  { %1517 = vmatpush.msrb.mxu0 %v11461_v8  ;;  %1537 = vmatpush.msrb.mxu1 %v11463_v9 }
 0x347   :  { %1557 = vmatpush.msrb.mxu2 %v11465_v10  ;;  %1577 = vmatpush.msrb.mxu3 %v11469_v11 }
 0x348   :  { %1518 = vmatpush.msrb.mxu0 %v12642_v60  ;;  %1538 = vmatpush.msrb.mxu1 %v12643_v3  ;;  %v1316_v60 = vld [vmem:[#allocation2 + $0x38] sm:$0x30]  ;;  %v1315_v3 = vld [vmem:[#allocation2 + $0x8] sm:$0x30] }
 0x349   :  { %1558 = vmatpush.msrb.mxu2 %v12644_v22  ;;  %1578 = vmatpush.msrb.mxu3 %v12645_v7  ;;  %v1324_v7 = vrot.slane %v1316_v60, 4  ;;  %v11865_v60 = vld [vmem:[#allocation11 + $0xa8] sm:$0xff] }
 0x34a   :  { %1519 = vmatpush.msrb.mxu0 %v12646_v35  ;;  %1539 = vmatpush.msrb.mxu1 %v12647_v36  ;;  %v1323_v35 = vrot.slane %v1315_v3, 4  ;;  %v11867_v3 = vld [vmem:[#allocation11 + $0xb0] sm:$0xff] }
 0x34b   :  { %1559 = vmatpush.msrb.mxu2 %v12648_v38  ;;  %1579 = vmatpush.msrb.mxu3 %v12649_v39 }
 0x34c   :  { %1520 = vmatpush.msrb.mxu0 %v12650_v40  ;;  %1540 = vmatpush.msrb.mxu1 %v12651_v41 }
 0x34d   :  { %1560 = vmatpush.msrb.mxu2 %v12652_v42  ;;  %1580 = vmatpush.msrb.mxu3 %v12653_v43 }
 0x34e   :  { %1521 = vmatpush.msrb.mxu0 %v12654_v45  ;;  %1541 = vmatpush.msrb.mxu1 %v12655_v47 }
 0x34f   :  { %1561 = vmatpush.msrb.mxu2 %v12656_v48  ;;  %1581 = vmatpush.msrb.mxu3 %v12657_v49 }
 0x350   :  { %1522 = vmatpush.msrb.mxu0 %v12658_v51  ;;  %1542 = vmatpush.msrb.mxu1 %v12659_v52 }
 0x351   :  { %1562 = vmatpush.msrb.mxu2 %v12660_v56  ;;  %1582 = vmatpush.msrb.mxu3 %v12661_v57 }
 0x3ad   :  { %v1164_v4 = vpop.f32.mrf.mxu0  ;;  %v1184_v37 = vpop.f32.mrf.mxu1 }
 0x3ae   :  { %v1165_v55 = vadd.f32 %v1164_v4, %v1139_v0  ;;  %v1185_v62 = vadd.f32 %v1184_v37, %v1140_v1  ;;  %v11755_v1 = vld [vmem:[#allocation11 + $0x1c0] sm:$0xff]  ;;  %v11757_v4 = vld [vmem:[#allocation11 + $0x1c8] sm:$0xff]  ;;  %v11759_v37 = vld [vmem:[#allocation11 + $0x1d0] sm:$0xff] }
 0x3b0   :  { %10561 = vtanh.f32 %v1165_v55  ;;  %v11763_v55 = vld [vmem:[#allocation11 + $0x1d8] sm:$0xff] }
 0x3b1   :  { %10563 = vtanh.f32 %v1185_v62  ;;  %v11767_v62 = vld [vmem:[#allocation11 + $0x1a0] sm:$0xff] }
 0x3b4   :  { %v1204_v20 = vpop.f32.mrf.mxu2  ;;  %v1224_v54 = vpop.f32.mrf.mxu3 }
 0x3b5   :  { %v1225_v61 = vadd.f32 %v1224_v54, %v1142_v53  ;;  %v1205_v6 = vadd.f32 %v1204_v20, %v1141_v50  ;;  %v11775_v53 = vld [vmem:[#allocation11 + $0x1b8] sm:$0xff]  ;;  %v11779_v20 = vld [vmem:[#allocation11 + $0x180] sm:$0xff]  ;;  %v11781_v54 = vld [vmem:[#allocation11 + $0x188] sm:$0xff] }
 0x3b6   :  { %v10562_v18 = vpop.eup %10561  ;;  %12662 = vst [vmem:[#allocation35_spill] sm:$0xff] %v11779_v20  ;;  %v11783_v50 = vld [vmem:[#allocation11 + $0x190] sm:$0xff] }
 0x3b7   :  { %v10564_v5 = vpop.eup %10563  ;;  %10565 = vtanh.f32 %v1225_v61  ;;  %v1231_v9 = vmul.f32 0.5, %v10562_v18  ;;  %12663 = vst [vmem:[#allocation36_spill] sm:$0xff] %v11783_v50  ;;  %v11787_v61 = vld [vmem:[#allocation11 + $0x198] sm:$0xff]  ;;  %v11791_v18 = vld [vmem:[#allocation11 + $0x160] sm:$0xff] }
 0x3b8   :  { %v1232_v8 = vmul.f32 0.5, %v10564_v5  ;;  %10567 = vtanh.f32 %v1205_v6  ;;  %v11793_v5 = vld [vmem:[#allocation11 + $0x168] sm:$0xff]  ;;  %v11795_v6 = vld [vmem:[#allocation11 + $0x170] sm:$0xff] }
 0x3b9   :  { %v1235_v11 = vadd.f32 0.5, %v1231_v9  ;;  %v11803_v9 = vld [vmem:[#allocation11 + $0x140] sm:$0xff] }
 0x3ba   :  { %v1236_v10 = vadd.f32 0.5, %v1232_v8  ;;  %v11799_v8 = vld [vmem:[#allocation11 + $0x178] sm:$0xff] }
 0x3bc   :  { %v1239_v13 = vmul.f32 %v1236_v10, %v11668_v21  ;;  %v11805_v10 = vld [vmem:[#allocation11 + $0x148] sm:$0xff] }
 0x3bd   :  { %v10566_v12 = vpop.eup %10565 }
 0x3be   :  { %v1240_v14 = vmul.f32 %v10566_v12, %v1235_v11  ;;  %v10568_v15 = vpop.eup %10567  ;;  %v11807_v11 = vld [vmem:[#allocation11 + $0x150] sm:$0xff]  ;;  %v11811_v12 = vld [vmem:[#allocation11 + $0x158] sm:$0xff] }
 0x3bf   :  { %v1233_v24 = vmul.f32 0.5, %v10568_v15  ;;  %v11819_v15 = vld [vmem:[#allocation11 + $0x130] sm:$0xff] }
 0x3c0   :  { %v1241_v23 = vadd.f32 %v1240_v14, %v1239_v13  ;;  %v11815_v13 = vld [vmem:[#allocation11 + $0x120] sm:$0xff]  ;;  %v11817_v14 = vld [vmem:[#allocation11 + $0x128] sm:$0xff] }
 0x3c1   :  { %v1237_v31 = vadd.f32 0.5, %v1233_v24  ;;  %v11827_v24 = vld [vmem:[#allocation11 + $0x100] sm:$0xff] }
 0x3c2   :  { %10569 = vtanh.f32 %v1241_v23 }
 0x3c8   :  { %v10570_v34 = vpop.eup %10569 }
 0x3c9   :  { %v1243_v32 = vmul.f32 %v10570_v34, %v1237_v31  ;;  %v11829_v31 = vld [vmem:[#allocation11 + $0x108] sm:$0xff]  ;;  %v11831_v34 = vld [vmem:[#allocation11 + $0x110] sm:$0xff] }
 0x3cb   :  { %1245 = vrot.lane.b32.xlu1 %v1243_v32, %s10886_s0  ;;  %1345 = vmatmul.f32.vlgmr.msra.gmra.mxu0 %v1243_v32 }
 0x3cc   :  { %1365 = vmatmul.f32.vlgmr.msra.gmra.mxu1 %v1243_v32  ;;  %1385 = vmatmul.f32.vlgmr.msra.gmra.mxu2 %v1243_v32 }
 0x3cd   :  { %1405 = vmatmul.f32.vlgmr.msra.gmra.mxu3 %v1243_v32  ;;  %1677 = vmatpush.msra.mxu0 %v11739_v44  ;;  %v11835_v32 = vld [vmem:[#allocation11 + $0x118] sm:$0xff] }
 0x3ce   :  { %1697 = vmatpush.msra.mxu1 %v11741_v29  ;;  %1717 = vmatpush.msra.mxu2 %v11743_v25 }
 0x3cf   :  { %1737 = vmatpush.msra.mxu3 %v11747_v17  ;;  %1678 = vmatpush.msra.mxu0 %v11755_v1 }
 0x3d0   :  { %1698 = vmatpush.msra.mxu1 %v11757_v4  ;;  %1718 = vmatpush.msra.mxu2 %v11759_v37 }
 0x3d1   :  { %1738 = vmatpush.msra.mxu3 %v11763_v55  ;;  %1679 = vmatpush.msra.mxu0 %v11767_v62 }
 0x3d2   :  { %1699 = vmatpush.msra.mxu1 %v11769_v63  ;;  %1719 = vmatpush.msra.mxu2 %v11771_v2 }
 0x3d3   :  { %1739 = vmatpush.msra.mxu3 %v11775_v53  ;;  %1680 = vmatpush.msra.mxu0 %v11779_v20 }
 0x3d4   :  { %1700 = vmatpush.msra.mxu1 %v11781_v54  ;;  %1720 = vmatpush.msra.mxu2 %v11783_v50 }
 0x3d5   :  { %1740 = vmatpush.msra.mxu3 %v11787_v61  ;;  %1681 = vmatpush.msra.mxu0 %v11791_v18 }
 0x3d6   :  { %1701 = vmatpush.msra.mxu1 %v11793_v5  ;;  %1721 = vmatpush.msra.mxu2 %v11795_v6 }
 0x3d7   :  { %1741 = vmatpush.msra.mxu3 %v11799_v8  ;;  %1682 = vmatpush.msra.mxu0 %v11803_v9 }
 0x3d8   :  { %1702 = vmatpush.msra.mxu1 %v11805_v10  ;;  %1722 = vmatpush.msra.mxu2 %v11807_v11 }
 0x3d9   :  { %1742 = vmatpush.msra.mxu3 %v11811_v12  ;;  %1683 = vmatpush.msra.mxu0 %v11815_v13 }
 0x3da   :  { %1703 = vmatpush.msra.mxu1 %v11817_v14  ;;  %1723 = vmatpush.msra.mxu2 %v11819_v15 }
 0x3db   :  { %1684 = vmatpush.msra.mxu0 %v11827_v24 }
 0x3dc   :  { %1704 = vmatpush.msra.mxu1 %v11829_v31  ;;  %1724 = vmatpush.msra.mxu2 %v11831_v34 }
 0x3de   :  { %1705 = vmatpush.msra.mxu1 %v11841_v30  ;;  %1725 = vmatpush.msra.mxu2 %v11843_v19 }
 0x43d   :  { %v1246_v16 = vpop.permute.xlu1 %1245 }
 0x43e   :  { %1248 = vst.msk [vmem:[#allocation3 + $0x4] sm:$0x3] %vm538_vm3, %v1246_v16  ;;  %v11839_v16 = vld [vmem:[#allocation11 + $0xe0] sm:$0xff] }
 0x43f   :  { %1685 = vmatpush.msra.mxu0 %v11839_v16 }
 0x448   :  { %v1346_v26 = vpop.f32.mrf.mxu0 }
 0x449   :  { %v1347_v21 = vadd.f32 %v1346_v26, %v1321_v46  ;;  %v1366_v28 = vpop.f32.mrf.mxu1  ;;  %v11847_v46 = vld [vmem:[#allocation11 + $0xf8] sm:$0xff]  ;;  %v11851_v26 = vld [vmem:[#allocation11 + $0xc0] sm:$0xff] }
 0x44a   :  { %v1367_v33 = vadd.f32 %v1366_v28, %v1322_v27  ;;  %v11853_v27 = vld [vmem:[#allocation11 + $0xc8] sm:$0xff]  ;;  %1686 = vmatpush.msra.mxu0 %v11851_v26  ;;  %v11859_v28 = vld [vmem:[#allocation11 + $0xd8] sm:$0xff] }
 0x44b   :  { %10571 = vtanh.f32 %v1347_v21  ;;  %v11855_v21 = vld [vmem:[#allocation11 + $0xd0] sm:$0xff]  ;;  %1706 = vmatpush.msra.mxu1 %v11853_v27 }
 0x44c   :  { %10573 = vtanh.f32 %v1367_v33  ;;  %1726 = vmatpush.msra.mxu2 %v11855_v21  ;;  %v11863_v33 = vld [vmem:[#allocation11 + $0xa0] sm:$0xff] }
 0x44d   :  { %1687 = vmatpush.msra.mxu0 %v11863_v33  ;;  %1707 = vmatpush.msra.mxu1 %v11865_v60 }
 0x44e   :  { %1727 = vmatpush.msra.mxu2 %v11867_v3 }
 0x44f   :  { %v1386_v22 = vpop.f32.mrf.mxu2 }
 0x450   :  { %v1406_v36 = vpop.f32.mrf.mxu3  ;;  %v1387_v41 = vadd.f32 %v1386_v22, %v1323_v35  ;;  %v11871_v22 = vld [vmem:[#allocation11 + $0xb8] sm:$0xff]  ;;  %v11877_v35 = vld [vmem:[#allocation11 + $0x88] sm:$0xff] }
 0x451   :  { %v10572_v38 = vpop.eup %10571  ;;  %v1407_v39 = vadd.f32 %v1406_v36, %v1324_v7  ;;  %v11875_v7 = vld [vmem:[#allocation11 + $0x80] sm:$0xff]  ;;  %v11879_v36 = vld [vmem:[#allocation11 + $0x90] sm:$0xff]  ;;  %1708 = vmatpush.msra.mxu1 %v11877_v35 }
 0x452   :  { %v10574_v40 = vpop.eup %10573  ;;  %v1413_v43 = vmul.f32 0.5, %v10572_v38  ;;  %1688 = vmatpush.msra.mxu0 %v11875_v7  ;;  %v11883_v38 = vld [vmem:[#allocation11 + $0x98] sm:$0xff]  ;;  %1728 = vmatpush.msra.mxu2 %v11879_v36 }
 0x453   :  { %v1414_v42 = vmul.f32 0.5, %v10574_v40  ;;  %10575 = vtanh.f32 %v1407_v39  ;;  %v11885_v39 = vld [vmem:[#allocation11 + $0x60] sm:$0xff]  ;;  %v11887_v40 = vld [vmem:[#allocation11 + $0x68] sm:$0xff] }
 0x454   :  { %10577 = vtanh.f32 %v1387_v41  ;;  %v1417_v47 = vadd.f32 0.5, %v1413_v43  ;;  %12664 = vst [vmem:[#allocation54_spill] sm:$0xff] %v11885_v39  ;;  %v11891_v41 = vld [vmem:[#allocation11 + $0x70] sm:$0xff]  ;;  %v11895_v43 = vld [vmem:[#allocation11 + $0x40] sm:$0xff]  ;;  %1689 = vmatpush.msra.mxu0 %v11885_v39  ;;  %1709 = vmatpush.msra.mxu1 %v11887_v40 }
 0x455   :  { %v1418_v45 = vadd.f32 0.5, %v1414_v42  ;;  %12665 = vst [vmem:[#allocation39_spill] sm:$0xff] %v11887_v40  ;;  %v11893_v42 = vld [vmem:[#allocation11 + $0x78] sm:$0xff]  ;;  %1729 = vmatpush.msra.mxu2 %v11891_v41 }
 0x456   :  { %12666 = vst [vmem:[#allocation40_spill] sm:$0xff] %v11891_v41  ;;  %1690 = vmatpush.msra.mxu0 %v11895_v43 }
 0x457   :  { %v1421_v49 = vmul.f32 %v1418_v45, %v1241_v23  ;;  %v11823_v23 = vld [vmem:[#allocation11 + $0x138] sm:$0xff]  ;;  %12667 = vst [vmem:[#allocation41_spill] sm:$0xff] %v11893_v42  ;;  %v11899_v45 = vld [vmem:[#allocation11 + $0x48] sm:$0xff] }
 0x458   :  { %1743 = vmatpush.msra.mxu3 %v11823_v23  ;;  %12668 = vst [vmem:[#allocation43_spill] sm:$0xff] %v11895_v43  ;;  %1710 = vmatpush.msra.mxu1 %v11899_v45  ;;  %v11925_v43 = vld [vmem:[#allocation11 + $0x10] sm:$0xff] }
 0x459   :  { %v10576_v48 = vpop.eup %10575  ;;  %12669 = vst [vmem:[#allocation32_spill] sm:$0xff] %v11899_v45  ;;  %v11927_v45 = vld [vmem:[#allocation11 + $0x18] sm:$0xff] }
 0x45a   :  { %v1422_v51 = vmul.f32 %v10576_v48, %v1417_v47  ;;  %v10578_v52 = vpop.eup %10577  ;;  %1744 = vmatpush.msra.mxu3 %v11835_v32  ;;  %v11901_v47 = vld [vmem:[#allocation11 + $0x50] sm:$0xff]  ;;  %v11903_v48 = vld [vmem:[#allocation11 + $0x58] sm:$0xff] }
 0x45b   :  { %v1415_v57 = vmul.f32 0.5, %v10578_v52  ;;  %12670 = vst [vmem:[#allocation33_spill] sm:$0xff] %v11901_v47  ;;  %v11913_v52 = vld [vmem:[#allocation11 + $0x30] sm:$0xff]  ;;  %1730 = vmatpush.msra.mxu2 %v11901_v47 }
 0x45c   :  { %v11751_v56 = vadd.f32 %v1422_v51, %v1421_v49  ;;  %1745 = vmatpush.msra.mxu3 %v11847_v46  ;;  %12671 = vst [vmem:[#allocation34_spill] sm:$0xff] %v11903_v48  ;;  %v11907_v49 = vld [vmem:[#allocation11 + $0x20] sm:$0xff]  ;;  %v11909_v51 = vld [vmem:[#allocation11 + $0x28] sm:$0xff] }
 0x45d   :  { %v1419_v58 = vadd.f32 0.5, %v1415_v57  ;;  %12672 = vst [vmem:[#allocation37_spill] sm:$0xff] %v11907_v49  ;;  %v11915_v57 = vld [vmem:[#allocation11 + $0x38] sm:$0xff]  ;;  %1691 = vmatpush.msra.mxu0 %v11907_v49  ;;  %1711 = vmatpush.msra.mxu1 %v11909_v51 }
 0x45e   :  { %10579 = vtanh.f32 %v11751_v56  ;;  %1746 = vmatpush.msra.mxu3 %v11859_v28  ;;  %12673 = vst [vmem:[#allocation38_spill] sm:$0xff] %v11909_v51  ;;  %1731 = vmatpush.msra.mxu2 %v11913_v52 }
 0x45f   :  { %12674 = vst [vmem:[#allocation44_spill] sm:$0xff] %v11913_v52 }
 0x460   :  { %1747 = vmatpush.msra.mxu3 %v11871_v22  ;;  %1732 = vmatpush.msra.mxu2 %v11925_v43 }
 0x462   :  { %1748 = vmatpush.msra.mxu3 %v11883_v38 }
 0x464   :  { %v10580_v59 = vpop.eup %10579  ;;  %1749 = vmatpush.msra.mxu3 %v11893_v42  ;;  %v1492_v42 = vld [vmem:[#allocation2 + $0x20] sm:$0xc0] }
 0x465   :  { %v1425_v0 = vmul.f32 %v10580_v59, %v1419_v58  ;;  %v1491_v58 = vld [vmem:[#allocation2 + $0x50] sm:$0xc0]  ;;  %v11919_v59 = vld [vmem:[#allocation11] sm:$0xff]  ;;  %v1500_v47 = vrot.slane %v1492_v42, 6  ;;  %v1494_v42 = vld [vmem:[#allocation2 + $0x38] sm:$0xc0] }
 0x466   :  { %1750 = vmatpush.msra.mxu3 %v11903_v48  ;;  %1692 = vmatpush.msra.mxu0 %v11919_v59  ;;  %v1499_v48 = vrot.slane %v1491_v58, 6 }
 0x467   :  { %1426 = vst.msk [vmem:[#allocation3 + $0x4] sm:$0x3] %vm717_vm4, %v1425_v0  ;;  %1523 = vmatmul.f32.vlgmr.msrb.gmra.mxu0 %v1425_v0  ;;  %1543 = vmatmul.f32.vlgmr.msrb.gmra.mxu1 %v1425_v0 }
 0x468   :  { %1563 = vmatmul.f32.vlgmr.msrb.gmra.mxu2 %v1425_v0  ;;  %1583 = vmatmul.f32.vlgmr.msrb.gmra.mxu3 %v1425_v0  ;;  %v11921_v0 = vld [vmem:[#allocation11 + $0x8] sm:$0xff] }
 0x469   :  { %1751 = vmatpush.msra.mxu3 %v11915_v57  ;;  %1712 = vmatpush.msra.mxu1 %v11921_v0 }
 0x46a   :  { %1855 = vmatpush.msrb.mxu0 %v11739_v44  ;;  %1895 = vmatpush.msrb.mxu2 %v11743_v25 }
 0x46b   :  { %1752 = vmatpush.msra.mxu3 %v11927_v45  ;;  %1875 = vmatpush.msrb.mxu1 %v11741_v29 }
 0x46c   :  { %1856 = vmatpush.msrb.mxu0 %v11755_v1  ;;  %1896 = vmatpush.msrb.mxu2 %v11759_v37 }
 0x46d   :  { %1915 = vmatpush.msrb.mxu3 %v11747_v17  ;;  %1876 = vmatpush.msrb.mxu1 %v11757_v4 }
 0x46e   :  { %1857 = vmatpush.msrb.mxu0 %v11767_v62  ;;  %1897 = vmatpush.msrb.mxu2 %v11771_v2 }
 0x46f   :  { %1916 = vmatpush.msrb.mxu3 %v11763_v55  ;;  %1877 = vmatpush.msrb.mxu1 %v11769_v63 }
 0x470   :  { %1858 = vmatpush.msrb.mxu0 %v11779_v20  ;;  %1898 = vmatpush.msrb.mxu2 %v11783_v50 }
 0x471   :  { %1917 = vmatpush.msrb.mxu3 %v11775_v53  ;;  %1878 = vmatpush.msrb.mxu1 %v11781_v54 }
 0x472   :  { %1859 = vmatpush.msrb.mxu0 %v11791_v18  ;;  %1899 = vmatpush.msrb.mxu2 %v11795_v6 }
 0x473   :  { %1918 = vmatpush.msrb.mxu3 %v11787_v61  ;;  %1879 = vmatpush.msrb.mxu1 %v11793_v5 }
 0x474   :  { %1860 = vmatpush.msrb.mxu0 %v11803_v9  ;;  %1900 = vmatpush.msrb.mxu2 %v11807_v11 }
 0x475   :  { %1919 = vmatpush.msrb.mxu3 %v11799_v8  ;;  %1880 = vmatpush.msrb.mxu1 %v11805_v10 }
 0x476   :  { %1861 = vmatpush.msrb.mxu0 %v11815_v13  ;;  %1901 = vmatpush.msrb.mxu2 %v11819_v15 }
 0x477   :  { %1920 = vmatpush.msrb.mxu3 %v11811_v12  ;;  %1881 = vmatpush.msrb.mxu1 %v11817_v14 }
 0x478   :  { %1862 = vmatpush.msrb.mxu0 %v11827_v24  ;;  %1902 = vmatpush.msrb.mxu2 %v11831_v34 }
 0x479   :  { %1921 = vmatpush.msrb.mxu3 %v11823_v23  ;;  %1882 = vmatpush.msrb.mxu1 %v11829_v31 }
 0x47a   :  { %1863 = vmatpush.msrb.mxu0 %v11839_v16  ;;  %1903 = vmatpush.msrb.mxu2 %v11843_v19 }
 0x47b   :  { %1922 = vmatpush.msrb.mxu3 %v11835_v32  ;;  %1883 = vmatpush.msrb.mxu1 %v11841_v30 }
 0x47c   :  { %1864 = vmatpush.msrb.mxu0 %v11851_v26  ;;  %1904 = vmatpush.msrb.mxu2 %v11855_v21 }
 0x47d   :  { %1923 = vmatpush.msrb.mxu3 %v11847_v46  ;;  %1884 = vmatpush.msrb.mxu1 %v11853_v27 }
 0x47e   :  { %1865 = vmatpush.msrb.mxu0 %v11863_v33  ;;  %1905 = vmatpush.msrb.mxu2 %v11867_v3 }
 0x47f   :  { %1924 = vmatpush.msrb.mxu3 %v11859_v28  ;;  %1885 = vmatpush.msrb.mxu1 %v11865_v60 }
 0x480   :  { %1866 = vmatpush.msrb.mxu0 %v11875_v7  ;;  %1906 = vmatpush.msrb.mxu2 %v11879_v36 }
 0x481   :  { %1925 = vmatpush.msrb.mxu3 %v11871_v22  ;;  %1886 = vmatpush.msrb.mxu1 %v11877_v35 }
 0x482   :  { %1867 = vmatpush.msrb.mxu0 %v11885_v39 }
 0x483   :  { %1926 = vmatpush.msrb.mxu3 %v11883_v38  ;;  %1887 = vmatpush.msrb.mxu1 %v11887_v40  ;;  %v12684_v40 = vld [vmem:[#allocation44_spill] sm:$0xff] }
 0x4e4   :  { %v1524_v49 = vpop.f32.mrf.mxu0  ;;  %v1544_v51 = vpop.f32.mrf.mxu1 }
 0x4e5   :  { %v1525_v41 = vadd.f32 %v1524_v49, %v1499_v48  ;;  %v1545_v52 = vadd.f32 %v1544_v51, %v1500_v47  ;;  %v1493_v47 = vld [vmem:[#allocation2 + $0x8] sm:$0xc0]  ;;  %v1502_v48 = vrot.slane %v1494_v42, 6 }
 0x4e6   :  { %v1501_v51 = vrot.slane %v1493_v47, 6 }
 0x4e7   :  { %10581 = vtanh.f32 %v1525_v41 }
 0x4e8   :  { %10583 = vtanh.f32 %v1545_v52 }
 0x4eb   :  { %v1564_v41 = vpop.f32.mrf.mxu2  ;;  %v1584_v49 = vpop.f32.mrf.mxu3 }
 0x4ec   :  { %v1585_v52 = vadd.f32 %v1584_v49, %v1502_v48  ;;  %v1565_v20 = vadd.f32 %v1564_v41, %v1501_v51 }
 0x4ed   :  { %v10582_v58 = vpop.eup %10581 }
 0x4ee   :  { %v10584_v42 = vpop.eup %10583  ;;  %10585 = vtanh.f32 %v1585_v52  ;;  %v1591_v47 = vmul.f32 0.5, %v10582_v58  ;;  %v12676_v58 = vld [vmem:[#allocation40_spill] sm:$0xff] }
 0x4ef   :  { %v1592_v50 = vmul.f32 0.5, %v10584_v42  ;;  %10587 = vtanh.f32 %v1565_v20  ;;  %1907 = vmatpush.msrb.mxu2 %v12676_v58  ;;  %v12677_v42 = vld [vmem:[#allocation41_spill] sm:$0xff] }
 0x4f0   :  { %v1595_v41 = vadd.f32 0.5, %v1591_v47  ;;  %1927 = vmatpush.msrb.mxu3 %v12677_v42  ;;  %v12678_v47 = vld [vmem:[#allocation43_spill] sm:$0xff] }
 0x4f1   :  { %v1596_v48 = vadd.f32 0.5, %v1592_v50  ;;  %1868 = vmatpush.msrb.mxu0 %v12678_v47 }
 0x4f3   :  { %v1599_v20 = vmul.f32 %v1596_v48, %v11751_v56  ;;  %v12679_v48 = vld [vmem:[#allocation32_spill] sm:$0xff] }
 0x4f4   :  { %v10586_v49 = vpop.eup %10585  ;;  %1888 = vmatpush.msrb.mxu1 %v12679_v48 }
 0x4f5   :  { %v1600_v50 = vmul.f32 %v10586_v49, %v1595_v41  ;;  %v10588_v51 = vpop.eup %10587  ;;  %v12680_v49 = vld [vmem:[#allocation33_spill] sm:$0xff] }
 0x4f6   :  { %v1593_v56 = vmul.f32 0.5, %v10588_v51  ;;  %1908 = vmatpush.msrb.mxu2 %v12680_v49  ;;  %v12682_v51 = vld [vmem:[#allocation37_spill] sm:$0xff] }
 0x4f7   :  { %v11976_v52 = vadd.f32 %v1600_v50, %v1599_v20  ;;  %v12681_v20 = vld [vmem:[#allocation34_spill] sm:$0xff]  ;;  %1869 = vmatpush.msrb.mxu0 %v12682_v51 }
 0x4f8   :  { %v1597_v41 = vadd.f32 0.5, %v1593_v56  ;;  %1928 = vmatpush.msrb.mxu3 %v12681_v20  ;;  %1909 = vmatpush.msrb.mxu2 %v12684_v40 }
 0x4f9   :  { %12675 = vst [vmem:[#allocation42_spill] sm:$0xff] %v11976_v52  ;;  %10589 = vtanh.f32 %v11976_v52  ;;  %v12683_v52 = vld [vmem:[#allocation38_spill] sm:$0xff]  ;;  %1870 = vmatpush.msrb.mxu0 %v11919_v59 }
 0x4fa   :  { %1889 = vmatpush.msrb.mxu1 %v12683_v52  ;;  %1929 = vmatpush.msrb.mxu3 %v11915_v57 }
 0x4fb   :  { %1910 = vmatpush.msrb.mxu2 %v11925_v43 }
 0x4fc   :  { %1890 = vmatpush.msrb.mxu1 %v11921_v0  ;;  %1930 = vmatpush.msrb.mxu3 %v11927_v45 }
 0x4ff   :  { %v10590_v50 = vpop.eup %10589 }
 0x500   :  { %v1603_v39 = vmul.f32 %v10590_v50, %v1597_v41 }
 0x502   :  { %1605 = vrot.lane.b32.xlu1 %v1603_v39, %s10886_s0  ;;  %1693 = vmatmul.f32.vlgmr.msra.gmra.mxu0 %v1603_v39 }
 0x503   :  { %1713 = vmatmul.f32.vlgmr.msra.gmra.mxu1 %v1603_v39  ;;  %1733 = vmatmul.f32.vlgmr.msra.gmra.mxu2 %v1603_v39 }
 0x504   :  { %1753 = vmatmul.f32.vlgmr.msra.gmra.mxu3 %v1603_v39  ;;  %2031 = vmatpush.msra.mxu0 %v11739_v44  ;;  %v12685_v44 = vld [vmem:[#allocation35_spill] sm:$0xff] }
 0x505   :  { %2051 = vmatpush.msra.mxu1 %v11741_v29  ;;  %2071 = vmatpush.msra.mxu2 %v11743_v25  ;;  %v12686_v29 = vld [vmem:[#allocation36_spill] sm:$0xff]  ;;  %v12687_v25 = vld [vmem:[#allocation54_spill] sm:$0xff] }
 0x506   :  { %2091 = vmatpush.msra.mxu3 %v11747_v17  ;;  %2032 = vmatpush.msra.mxu0 %v11755_v1  ;;  %v12688_v17 = vld [vmem:[#allocation39_spill] sm:$0xff] }
 0x507   :  { %2052 = vmatpush.msra.mxu1 %v11757_v4  ;;  %2072 = vmatpush.msra.mxu2 %v11759_v37  ;;  %v1673_v4 = vld [vmem:[#allocation2 + $0x28] sm:$0x3] }
 0x508   :  { %2092 = vmatpush.msra.mxu3 %v11763_v55  ;;  %2033 = vmatpush.msra.mxu0 %v11767_v62  ;;  %v1674_v62 = vld [vmem:[#allocation2 + $0x48] sm:$0x3] }
 0x509   :  { %2053 = vmatpush.msra.mxu1 %v11769_v63  ;;  %2073 = vmatpush.msra.mxu2 %v11771_v2 }
 0x50a   :  { %2093 = vmatpush.msra.mxu3 %v11775_v53  ;;  %2034 = vmatpush.msra.mxu0 %v12685_v44 }
 0x50b   :  { %2054 = vmatpush.msra.mxu1 %v11781_v54  ;;  %2074 = vmatpush.msra.mxu2 %v12686_v29  ;;  %v1676_v54 = vld [vmem:[#allocation2 + $0x40] sm:$0x3] }
 0x50c   :  { %2094 = vmatpush.msra.mxu3 %v11787_v61  ;;  %2035 = vmatpush.msra.mxu0 %v11791_v18 }
 0x50d   :  { %2055 = vmatpush.msra.mxu1 %v11793_v5  ;;  %2075 = vmatpush.msra.mxu2 %v11795_v6  ;;  %v1675_v5 = vld [vmem:[#allocation2 + $0x10] sm:$0x3] }
 0x50e   :  { %2095 = vmatpush.msra.mxu3 %v11799_v8  ;;  %2036 = vmatpush.msra.mxu0 %v11803_v9 }
 0x50f   :  { %2056 = vmatpush.msra.mxu1 %v11805_v10  ;;  %2076 = vmatpush.msra.mxu2 %v11807_v11 }
 0x510   :  { %2096 = vmatpush.msra.mxu3 %v11811_v12  ;;  %2037 = vmatpush.msra.mxu0 %v11815_v13 }
 0x511   :  { %2057 = vmatpush.msra.mxu1 %v11817_v14  ;;  %2077 = vmatpush.msra.mxu2 %v11819_v15  ;;  %v12689_v15 = vld [vmem:[#allocation42_spill] sm:$0xff] }
 0x512   :  { %2097 = vmatpush.msra.mxu3 %v11823_v23  ;;  %2038 = vmatpush.msra.mxu0 %v11827_v24 }
 0x513   :  { %2058 = vmatpush.msra.mxu1 %v11829_v31  ;;  %2078 = vmatpush.msra.mxu2 %v11831_v34 }
 0x514   :  { %2098 = vmatpush.msra.mxu3 %v11835_v32  ;;  %2039 = vmatpush.msra.mxu0 %v11839_v16 }
 0x515   :  { %2059 = vmatpush.msra.mxu1 %v11841_v30  ;;  %2079 = vmatpush.msra.mxu2 %v11843_v19 }
 0x516   :  { %2099 = vmatpush.msra.mxu3 %v11847_v46  ;;  %2040 = vmatpush.msra.mxu0 %v11851_v26 }
 0x517   :  { %2060 = vmatpush.msra.mxu1 %v11853_v27  ;;  %2080 = vmatpush.msra.mxu2 %v11855_v21 }
 0x518   :  { %2100 = vmatpush.msra.mxu3 %v11859_v28  ;;  %2041 = vmatpush.msra.mxu0 %v11863_v33 }
 0x519   :  { %2061 = vmatpush.msra.mxu1 %v11865_v60  ;;  %2081 = vmatpush.msra.mxu2 %v11867_v3 }
 0x51a   :  { %2101 = vmatpush.msra.mxu3 %v11871_v22  ;;  %2042 = vmatpush.msra.mxu0 %v11875_v7  ;;  %v1839_v7 = vld [vmem:[#allocation2 + $0x28] sm:$0xc] }
 0x51b   :  { %2062 = vmatpush.msra.mxu1 %v11877_v35  ;;  %2082 = vmatpush.msra.mxu2 %v11879_v36  ;;  %v1840_v35 = vld [vmem:[#allocation2 + $0x48] sm:$0xc]  ;;  %v1847_v36 = vrot.slane %v1839_v7, 2 }
 0x51c   :  { %2102 = vmatpush.msra.mxu3 %v11883_v38  ;;  %2043 = vmatpush.msra.mxu0 %v12687_v25  ;;  %v1848_v38 = vrot.slane %v1840_v35, 2 }
 0x51d   :  { %2063 = vmatpush.msra.mxu1 %v12688_v17  ;;  %2083 = vmatpush.msra.mxu2 %v12676_v58 }
 0x51e   :  { %2103 = vmatpush.msra.mxu3 %v12677_v42  ;;  %2044 = vmatpush.msra.mxu0 %v12678_v47 }
 0x51f   :  { %2064 = vmatpush.msra.mxu1 %v12679_v48  ;;  %2084 = vmatpush.msra.mxu2 %v12680_v49 }
 0x520   :  { %2104 = vmatpush.msra.mxu3 %v12681_v20  ;;  %2045 = vmatpush.msra.mxu0 %v12682_v51 }
 0x521   :  { %2065 = vmatpush.msra.mxu1 %v12683_v52  ;;  %2085 = vmatpush.msra.mxu2 %v12684_v40 }
 0x522   :  { %2105 = vmatpush.msra.mxu3 %v11915_v57  ;;  %2046 = vmatpush.msra.mxu0 %v11919_v59  ;;  %v1842_v57 = vld [vmem:[#allocation2 + $0x40] sm:$0xc]  ;;  %v1841_v59 = vld [vmem:[#allocation2 + $0x10] sm:$0xc] }
 0x523   :  { %2066 = vmatpush.msra.mxu1 %v11921_v0  ;;  %2086 = vmatpush.msra.mxu2 %v11925_v43  ;;  %v1850_v0 = vrot.slane %v1842_v57, 2  ;;  %v1849_v58 = vrot.slane %v1841_v59, 2 }
 0x524   :  { %2106 = vmatpush.msra.mxu3 %v11927_v45 }
 0x574   :  { %v1606_v1 = vpop.permute.xlu1 %1605 }
 0x575   :  { %1608 = vst.msk [vmem:[#allocation3 + $0x6] sm:$0x3] %vm538_vm3, %v1606_v1 }
 0x57f   :  { %v1694_v37 = vpop.f32.mrf.mxu0 }
 0x580   :  { %v1695_v55 = vadd.f32 %v1694_v37, %v1673_v4  ;;  %v1714_v63 = vpop.f32.mrf.mxu1 }
 0x581   :  { %v1715_v2 = vadd.f32 %v1714_v63, %v1674_v62 }
 0x582   :  { %10591 = vtanh.f32 %v1695_v55 }
 0x583   :  { %10593 = vtanh.f32 %v1715_v2  ;;  %v2021_v2 = vld [vmem:[#allocation9] sm:$0xf] }
 0x586   :  { %v1734_v53 = vpop.f32.mrf.mxu2 }
 0x587   :  { %v1754_v61 = vpop.f32.mrf.mxu3  ;;  %v1735_v9 = vadd.f32 %v1734_v53, %v1675_v5  ;;  %v2023_v53 = vperm.slane %v2021_v2, 0 }
 0x588   :  { %v10592_v18 = vpop.eup %10591  ;;  %v1755_v6 = vadd.f32 %v1754_v61, %v1676_v54  ;;  %v2024_v54 = vperm.slane %v2021_v2, 1 }
 0x589   :  { %v10594_v8 = vpop.eup %10593  ;;  %v1761_v11 = vmul.f32 0.5, %v10592_v18 }
 0x58a   :  { %v1762_v10 = vmul.f32 0.5, %v10594_v8  ;;  %10595 = vtanh.f32 %v1755_v6  ;;  %v2026_v8 = vperm.slane %v2021_v2, 3 }
 0x58b   :  { %10597 = vtanh.f32 %v1735_v9  ;;  %v1765_v13 = vadd.f32 0.5, %v1761_v11  ;;  %v2025_v9 = vperm.slane %v2021_v2, 2 }
 0x58c   :  { %v1766_v12 = vadd.f32 0.5, %v1762_v10 }
 0x58e   :  { %v1769_v23 = vmul.f32 %v1766_v12, %v12689_v15 }
 0x590   :  { %v10596_v14 = vpop.eup %10595 }
 0x591   :  { %v1770_v24 = vmul.f32 %v10596_v14, %v1765_v13  ;;  %v10598_v31 = vpop.eup %10597 }
 0x592   :  { %v1763_v32 = vmul.f32 0.5, %v10598_v31 }
 0x593   :  { %v1771_v34 = vadd.f32 %v1770_v24, %v1769_v23 }
 0x594   :  { %v1767_v16 = vadd.f32 0.5, %v1763_v32 }
 0x595   :  { %10599 = vtanh.f32 %v1771_v34 }
 0x59b   :  { %v10600_v30 = vpop.eup %10599 }
 0x59c   :  { %v1773_v19 = vmul.f32 %v10600_v30, %v1767_v16 }
 0x59e   :  { %1774 = vst.msk [vmem:[#allocation3 + $0x6] sm:$0x3] %vm717_vm4, %v1773_v19  ;;  %1871 = vmatmul.f32.vlgmr.msrb.gmra.mxu0 %v1773_v19  ;;  %1891 = vmatmul.f32.vlgmr.msrb.gmra.mxu1 %v1773_v19 }
 0x59f   :  { %1911 = vmatmul.f32.vlgmr.msrb.gmra.mxu2 %v1773_v19  ;;  %1931 = vmatmul.f32.vlgmr.msrb.gmra.mxu3 %v1773_v19 }
 0x5a5   :  { %v2129_v46 = vld [vmem:[#allocation3] sm:$0xff] }
 0x5a6   :  { %2133 = vst [vmem:[#allocation1] ss:$4 sm:$0xff] %v2129_v46 }
 0x5ad   :  { %v2136_v26 = vld.sshfl [vmem:[#allocation1] sm:$0xff pattern:$0x73625140]  ;;  %v2137_v27 = vld.sshfl [vmem:[#allocation1 + $0x8] sm:$0xff pattern:$0x73625140] }
 0x5ae   :  { %v2138_v21 = vld.sshfl [vmem:[#allocation1 + $0x10] sm:$0xff pattern:$0x73625140]  ;;  %v2139_v28 = vld.sshfl [vmem:[#allocation1 + $0x18] sm:$0xff pattern:$0x73625140]  ;;  %v12071_v33 = vpack.c.bf16 %v2136_v26, %v2136_v26  ;;  %v12073_v60 = vpack.c.bf16 %v2137_v27, %v2137_v27 }
 0x5af   :  { %v12075_v3 = vpack.c.bf16 %v2138_v21, %v2138_v21  ;;  %v12077_v22 = vpack.c.bf16 %v2139_v28, %v2139_v28 }
 0x61b   :  { %v1872_v39 = vpop.f32.mrf.mxu0  ;;  %v1892_v40 = vpop.f32.mrf.mxu1 }
 0x61c   :  { %v1873_v43 = vadd.f32 %v1872_v39, %v1847_v36  ;;  %v1893_v45 = vadd.f32 %v1892_v40, %v1848_v38 }
 0x61e   :  { %10601 = vtanh.f32 %v1873_v43 }
 0x61f   :  { %10603 = vtanh.f32 %v1893_v45 }
 0x622   :  { %v1912_v52 = vpop.f32.mrf.mxu2  ;;  %v1932_v56 = vpop.f32.mrf.mxu3 }
 0x623   :  { %v1933_v42 = vadd.f32 %v1932_v56, %v1850_v0  ;;  %v1913_v41 = vadd.f32 %v1912_v52, %v1849_v58 }
 0x624   :  { %v10602_v47 = vpop.eup %10601 }
 0x625   :  { %v10604_v48 = vpop.eup %10603  ;;  %10605 = vtanh.f32 %v1933_v42  ;;  %v1939_v20 = vmul.f32 0.5, %v10602_v47 }
 0x626   :  { %v1940_v49 = vmul.f32 0.5, %v10604_v48  ;;  %10607 = vtanh.f32 %v1913_v41 }
 0x627   :  { %v1943_v51 = vadd.f32 0.5, %v1939_v20 }
 0x628   :  { %v1944_v50 = vadd.f32 0.5, %v1940_v49 }
 0x62a   :  { %v1947_v29 = vmul.f32 %v1944_v50, %v1771_v34 }
 0x62b   :  { %v10606_v44 = vpop.eup %10605 }
 0x62c   :  { %v1948_v25 = vmul.f32 %v10606_v44, %v1943_v51  ;;  %v10608_v17 = vpop.eup %10607 }
 0x62d   :  { %v1941_v4 = vmul.f32 0.5, %v10608_v17 }
 0x62e   :  { %v1949_v1 = vadd.f32 %v1948_v25, %v1947_v29 }
 0x62f   :  { %v1945_v37 = vadd.f32 0.5, %v1941_v4 }
 0x630   :  { %10609 = vtanh.f32 %v1949_v1 }
 0x636   :  { %v10610_v55 = vpop.eup %10609 }
 0x637   :  { %v1951_v62 = vmul.f32 %v10610_v55, %v1945_v37 }
 0x639   :  { %1953 = vrot.lane.b32.xlu2 %v1951_v62, %s10886_s0  ;;  %2047 = vmatmul.f32.vlgmr.msra.gmra.mxu0 %v1951_v62 }
 0x63a   :  { %2067 = vmatmul.f32.vlgmr.msra.gmra.mxu1 %v1951_v62  ;;  %2087 = vmatmul.f32.vlgmr.msra.gmra.mxu2 %v1951_v62 }
 0x63b   :  { %2107 = vmatmul.f32.vlgmr.msra.gmra.mxu3 %v1951_v62 }
 0x693   :  { %v1954_v63 = vpop.permute.xlu2 %1953 }
 0x694   :  { %1956 = vst.msk [vmem:[#allocation3 + $0x8] sm:$0x3] %vm538_vm3, %v1954_v63 }
 0x6b6   :  { %v2048_v61 = vpop.f32.mrf.mxu0 }
 0x6b7   :  { %v2049_v18 = vadd.f32 %v2048_v61, %v2023_v53  ;;  %v2068_v5 = vpop.f32.mrf.mxu1 }
 0x6b8   :  { %v2069_v6 = vadd.f32 %v2068_v5, %v2024_v54 }
 0x6b9   :  { %10611 = vtanh.f32 %v2049_v18 }
 0x6ba   :  { %10613 = vtanh.f32 %v2069_v6 }
 0x6bd   :  { %v2088_v10 = vpop.f32.mrf.mxu2 }
 0x6be   :  { %v2108_v11 = vpop.f32.mrf.mxu3  ;;  %v2089_v15 = vadd.f32 %v2088_v10, %v2025_v9 }
 0x6bf   :  { %v10612_v12 = vpop.eup %10611  ;;  %v2109_v13 = vadd.f32 %v2108_v11, %v2026_v8 }
 0x6c0   :  { %v10614_v14 = vpop.eup %10613  ;;  %v2115_v24 = vmul.f32 0.5, %v10612_v12 }
 0x6c1   :  { %v2116_v23 = vmul.f32 0.5, %v10614_v14  ;;  %10615 = vtanh.f32 %v2109_v13 }
 0x6c2   :  { %10617 = vtanh.f32 %v2089_v15  ;;  %v2119_v34 = vadd.f32 0.5, %v2115_v24 }
 0x6c3   :  { %v2120_v31 = vadd.f32 0.5, %v2116_v23 }
 0x6c5   :  { %v2123_v16 = vmul.f32 %v2120_v31, %v1949_v1 }
 0x6c7   :  { %v10616_v32 = vpop.eup %10615 }
 0x6c8   :  { %v2124_v30 = vmul.f32 %v10616_v32, %v2119_v34  ;;  %v10618_v19 = vpop.eup %10617 }
 0x6c9   :  { %v2117_v26 = vmul.f32 0.5, %v10618_v19 }
 0x6ca   :  { %v2125_v46 = vadd.f32 %v2124_v30, %v2123_v16 }
 0x6cb   :  { %v2121_v27 = vadd.f32 0.5, %v2117_v26 }
 0x6cc   :  { %10619 = vtanh.f32 %v2125_v46 }
 0x6d2   :  { %v10620_v21 = vpop.eup %10619 }
 0x6d3   :  { %v2127_v28 = vmul.f32 %v10620_v21, %v2121_v27 }
 0x6d5   :  { %2128 = vst.msk [vmem:[#allocation3 + $0x8] sm:$0x3] %vm717_vm4, %v2127_v28 }
 0x6dc   :  { %v2130_v7 = vld [vmem:[#allocation3 + $0x8] sm:$0x3] }
 0x6dd   :  { %2135 = vst [vmem:[#allocation1 + $0x20] ss:$4 sm:$0xff] %v2130_v7 }
 0x6e4   :  { %v2140_v35 = vld.sshfl [vmem:[#allocation1 + $0x20] sm:$0xff pattern:$0x73625140] }
 0x6e5   :  { %v12088_v36 = vpack.c.bf16 %v2140_v35, %v2140_v35 }
 0x6e6   :  { %10871 = dma.done.wait [#allocation5], 40960 }
 0x6e7   :  { %10872 = vsyncadd [#allocation5], 4294926336  ;;  %v7522_v38 = vld [vmem:[#allocation4 + $0x1c0] sm:$0xf] }
 0x6e8   :  { %v9918_v39 = vld [vmem:[#allocation4 + $0x1dc] sm:$0xf0] }
 0x6e9   :  { %v7778_v40 = vld [vmem:[#allocation4 + $0x3c0] sm:$0xf]  ;;  %v7523_v43 = vor.u32 %v9918_v39, %v7522_v38 }
 0x6ea   :  { %v9982_v45 = vld [vmem:[#allocation4 + $0x3dc] sm:$0xf0] }
 0x6eb   :  { %v8034_v57 = vld [vmem:[#allocation4 + $0x5c0] sm:$0xf]  ;;  %v7779_v0 = vor.u32 %v9982_v45, %v7778_v40  ;;  %4093 = vmatpush.bf16.msrb.mxu0 %v7523_v43 }
 0x6ec   :  { %v10046_v59 = vld [vmem:[#allocation4 + $0x5dc] sm:$0xf0] }
 0x6ed   :  { %v8035_v52 = vor.u32 %v10046_v59, %v8034_v57  ;;  %v8290_v56 = vld [vmem:[#allocation4 + $0x7c0] sm:$0xf]  ;;  %4106 = vmatpush.bf16.msrb.mxu1 %v7779_v0 }
 0x6ee   :  { %v10110_v58 = vld [vmem:[#allocation4 + $0x7dc] sm:$0xf0] }
 0x6ef   :  { %v7490_v42 = vld [vmem:[#allocation4 + $0x180] sm:$0xf]  ;;  %v8291_v47 = vor.u32 %v10110_v58, %v8290_v56  ;;  %4119 = vmatpush.bf16.msrb.mxu2 %v8035_v52 }
 0x6f0   :  { %v9910_v48 = vld [vmem:[#allocation4 + $0x19c] sm:$0xf0] }
 0x6f1   :  { %v7746_v41 = vld [vmem:[#allocation4 + $0x380] sm:$0xf]  ;;  %v7491_v20 = vor.u32 %v9910_v48, %v7490_v42  ;;  %4132 = vmatpush.bf16.msrb.mxu3 %v8291_v47 }
 0x6f2   :  { %v9974_v49 = vld [vmem:[#allocation4 + $0x39c] sm:$0xf0] }
 0x6f3   :  { %v7747_v50 = vor.u32 %v9974_v49, %v7746_v41  ;;  %v8002_v51 = vld [vmem:[#allocation4 + $0x580] sm:$0xf]  ;;  %4094 = vmatpush.bf16.msrb.mxu0 %v7491_v20 }
 0x6f4   :  { %v10038_v44 = vld [vmem:[#allocation4 + $0x59c] sm:$0xf0] }
 0x6f5   :  { %v8258_v29 = vld [vmem:[#allocation4 + $0x780] sm:$0xf]  ;;  %v8003_v25 = vor.u32 %v10038_v44, %v8002_v51  ;;  %4107 = vmatpush.bf16.msrb.mxu1 %v7747_v50 }
 0x6f6   :  { %v10102_v17 = vld [vmem:[#allocation4 + $0x79c] sm:$0xf0] }
 0x6f7   :  { %v7458_v1 = vld [vmem:[#allocation4 + $0x140] sm:$0xf]  ;;  %v8259_v37 = vor.u32 %v10102_v17, %v8258_v29  ;;  %4120 = vmatpush.bf16.msrb.mxu2 %v8003_v25 }
 0x6f8   :  { %v9902_v4 = vld [vmem:[#allocation4 + $0x15c] sm:$0xf0] }
 0x6f9   :  { %v7714_v55 = vld [vmem:[#allocation4 + $0x340] sm:$0xf]  ;;  %v7459_v2 = vor.u32 %v9902_v4, %v7458_v1  ;;  %4133 = vmatpush.bf16.msrb.mxu3 %v8259_v37 }
 0x6fa   :  { %v9966_v62 = vld [vmem:[#allocation4 + $0x35c] sm:$0xf0] }
 0x6fb   :  { %v7970_v63 = vld [vmem:[#allocation4 + $0x540] sm:$0xf]  ;;  %v7715_v18 = vor.u32 %v9966_v62, %v7714_v55  ;;  %4095 = vmatpush.bf16.msrb.mxu0 %v7459_v2 }
 0x6fc   :  { %v10030_v53 = vld [vmem:[#allocation4 + $0x55c] sm:$0xf0] }
 0x6fd   :  { %v8226_v54 = vld [vmem:[#allocation4 + $0x740] sm:$0xf]  ;;  %v7971_v5 = vor.u32 %v10030_v53, %v7970_v63  ;;  %4108 = vmatpush.bf16.msrb.mxu1 %v7715_v18 }
 0x6fe   :  { %v10094_v61 = vld [vmem:[#allocation4 + $0x75c] sm:$0xf0] }
 0x6ff   :  { %v7426_v6 = vld [vmem:[#allocation4 + $0x100] sm:$0xf]  ;;  %v8227_v10 = vor.u32 %v10094_v61, %v8226_v54  ;;  %4121 = vmatpush.bf16.msrb.mxu2 %v7971_v5 }
 0x700   :  { %v9894_v8 = vld [vmem:[#allocation4 + $0x11c] sm:$0xf0] }
 0x701   :  { %v7682_v9 = vld [vmem:[#allocation4 + $0x300] sm:$0xf]  ;;  %v7427_v23 = vor.u32 %v9894_v8, %v7426_v6  ;;  %4134 = vmatpush.bf16.msrb.mxu3 %v8227_v10  ;;  %v9914_v6 = vld [vmem:[#allocation4 + $0x1c4] sm:$0xf] }
 0x702   :  { %v9958_v11 = vld [vmem:[#allocation4 + $0x31c] sm:$0xf0]  ;;  %v9978_v10 = vld [vmem:[#allocation4 + $0x3c4] sm:$0xf] }
 0x703   :  { %v7938_v12 = vld [vmem:[#allocation4 + $0x500] sm:$0xf]  ;;  %v7683_v24 = vor.u32 %v9958_v11, %v7682_v9  ;;  %4096 = vmatpush.bf16.msrb.mxu0 %v7427_v23  ;;  %v7524_v9 = vld [vmem:[#allocation4 + $0x1e0] sm:$0xf0] }
 0x704   :  { %v10022_v13 = vld [vmem:[#allocation4 + $0x51c] sm:$0xf0]  ;;  %v7780_v11 = vld [vmem:[#allocation4 + $0x3e0] sm:$0xf0] }
 0x705   :  { %v8194_v14 = vld [vmem:[#allocation4 + $0x700] sm:$0xf]  ;;  %v7939_v31 = vor.u32 %v10022_v13, %v7938_v12  ;;  %4109 = vmatpush.bf16.msrb.mxu1 %v7683_v24 }
 0x706   :  { %v10086_v15 = vld [vmem:[#allocation4 + $0x71c] sm:$0xf0] }
 0x707   :  { %v7394_v34 = vld [vmem:[#allocation4 + $0xc0] sm:$0xf]  ;;  %v8195_v30 = vor.u32 %v10086_v15, %v8194_v14  ;;  %4122 = vmatpush.bf16.msrb.mxu2 %v7939_v31  ;;  %v10042_v14 = vld [vmem:[#allocation4 + $0x5c4] sm:$0xf]  ;;  %v7527_v31 = vor.u32 %v9914_v6, %v7524_v9 }
 0x708   :  { %v9886_v32 = vld [vmem:[#allocation4 + $0xdc] sm:$0xf0]  ;;  %v8036_v15 = vld [vmem:[#allocation4 + $0x5e0] sm:$0xf0] }
 0x709   :  { %v7650_v16 = vld [vmem:[#allocation4 + $0x2c0] sm:$0xf]  ;;  %v7395_v28 = vor.u32 %v9886_v32, %v7394_v34  ;;  %4135 = vmatpush.bf16.msrb.mxu3 %v8195_v30  ;;  %v7783_v34 = vor.u32 %v9978_v10, %v7780_v11  ;;  %v9906_v30 = vld [vmem:[#allocation4 + $0x184] sm:$0xf] }
 0x70a   :  { %v9950_v19 = vld [vmem:[#allocation4 + $0x2dc] sm:$0xf0]  ;;  %v9874_v11 = vld [vmem:[#allocation4 + $0x84] sm:$0xf] }
 0x70b   :  { %v7906_v46 = vld [vmem:[#allocation4 + $0x4c0] sm:$0xf]  ;;  %v7651_v7 = vor.u32 %v9950_v19, %v7650_v16  ;;  %4097 = vmatpush.bf16.msrb.mxu0 %v7395_v28  ;;  %v8039_v19 = vor.u32 %v10042_v14, %v8036_v15  ;;  %v8004_v28 = vld [vmem:[#allocation4 + $0x5a0] sm:$0xf0] }
 0x70c   :  { %v10014_v26 = vld [vmem:[#allocation4 + $0x4dc] sm:$0xf0]  ;;  %v9938_v14 = vld [vmem:[#allocation4 + $0x284] sm:$0xf] }
 0x70d   :  { %v8162_v27 = vld [vmem:[#allocation4 + $0x6c0] sm:$0xf]  ;;  %v7907_v35 = vor.u32 %v10014_v26, %v7906_v46  ;;  %4110 = vmatpush.bf16.msrb.mxu1 %v7651_v7  ;;  %v7492_v46 = vld [vmem:[#allocation4 + $0x1a0] sm:$0xf0] }
 0x70e   :  { %v10078_v21 = vld [vmem:[#allocation4 + $0x6dc] sm:$0xf0]  ;;  %v9970_v26 = vld [vmem:[#allocation4 + $0x384] sm:$0xf] }
 0x70f   :  { %v7362_v38 = vld [vmem:[#allocation4 + $0x80] sm:$0xf]  ;;  %v8163_v43 = vor.u32 %v10078_v21, %v8162_v27  ;;  %4123 = vmatpush.bf16.msrb.mxu2 %v7907_v35  ;;  %v7748_v27 = vld [vmem:[#allocation4 + $0x3a0] sm:$0xf0]  ;;  %v7495_v35 = vor.u32 %v9906_v30, %v7492_v46 }
 0x710   :  { %v9878_v39 = vld [vmem:[#allocation4 + $0x9c] sm:$0xf0]  ;;  %v10034_v21 = vld [vmem:[#allocation4 + $0x584] sm:$0xf] }
 0x711   :  { %v7618_v40 = vld [vmem:[#allocation4 + $0x280] sm:$0xf]  ;;  %v7363_v56 = vor.u32 %v9878_v39, %v7362_v38  ;;  %4136 = vmatpush.bf16.msrb.mxu3 %v8163_v43  ;;  %v7751_v38 = vor.u32 %v9970_v26, %v7748_v27  ;;  %v9898_v43 = vld [vmem:[#allocation4 + $0x144] sm:$0xf] }
 0x712   :  { %v9942_v45 = vld [vmem:[#allocation4 + $0x29c] sm:$0xf0]  ;;  %v7620_v15 = vld [vmem:[#allocation4 + $0x2a0] sm:$0xf0] }
 0x713   :  { %v7874_v57 = vld [vmem:[#allocation4 + $0x480] sm:$0xf]  ;;  %v7619_v58 = vor.u32 %v9942_v45, %v7618_v40  ;;  %4098 = vmatpush.bf16.msrb.mxu0 %v7363_v56  ;;  %v8007_v45 = vor.u32 %v10034_v21, %v8004_v28  ;;  %v7972_v56 = vld [vmem:[#allocation4 + $0x560] sm:$0xf0] }
 0x714   :  { %v10006_v59 = vld [vmem:[#allocation4 + $0x49c] sm:$0xf0]  ;;  %v7332_v26 = vld [vmem:[#allocation4 + $0x60] sm:$0xf0] }
 0x715   :  { %v8130_v0 = vld [vmem:[#allocation4 + $0x680] sm:$0xf]  ;;  %v7875_v42 = vor.u32 %v10006_v59, %v7874_v57  ;;  %4111 = vmatpush.bf16.msrb.mxu1 %v7619_v58  ;;  %v7460_v57 = vld [vmem:[#allocation4 + $0x160] sm:$0xf0] }
 0x716   :  { %v10070_v52 = vld [vmem:[#allocation4 + $0x69c] sm:$0xf0]  ;;  %v9962_v59 = vld [vmem:[#allocation4 + $0x344] sm:$0xf] }
 0x717   :  { %v7330_v47 = vld [vmem:[#allocation4 + $0x40] sm:$0xf]  ;;  %v8131_v49 = vor.u32 %v10070_v52, %v8130_v0  ;;  %4124 = vmatpush.bf16.msrb.mxu2 %v7875_v42  ;;  %v7716_v0 = vld [vmem:[#allocation4 + $0x360] sm:$0xf0]  ;;  %v7463_v42 = vor.u32 %v9898_v43, %v7460_v57 }
 0x718   :  { %v9870_v48 = vld [vmem:[#allocation4 + $0x5c] sm:$0xf0]  ;;  %v10026_v52 = vld [vmem:[#allocation4 + $0x544] sm:$0xf] }
 0x719   :  { %v7586_v41 = vld [vmem:[#allocation4 + $0x240] sm:$0xf]  ;;  %v7331_v25 = vor.u32 %v9870_v48, %v7330_v47  ;;  %4137 = vmatpush.bf16.msrb.mxu3 %v8131_v49  ;;  %v7719_v47 = vor.u32 %v9962_v59, %v7716_v0  ;;  %v9890_v49 = vld [vmem:[#allocation4 + $0x104] sm:$0xf] }
 0x71a   :  { %v9934_v20 = vld [vmem:[#allocation4 + $0x25c] sm:$0xf0]  ;;  %v9930_v27 = vld [vmem:[#allocation4 + $0x244] sm:$0xf] }
 0x71b   :  { %v7842_v50 = vld [vmem:[#allocation4 + $0x440] sm:$0xf]  ;;  %v7587_v4 = vor.u32 %v9934_v20, %v7586_v41  ;;  %4099 = vmatpush.bf16.msrb.mxu0 %v7331_v25  ;;  %v7975_v20 = vor.u32 %v10026_v52, %v7972_v56  ;;  %v7940_v25 = vld [vmem:[#allocation4 + $0x520] sm:$0xf0] }
 0x71c   :  { %v9998_v51 = vld [vmem:[#allocation4 + $0x45c] sm:$0xf0]  ;;  %v7588_v21 = vld [vmem:[#allocation4 + $0x260] sm:$0xf0] }
 0x71d   :  { %v8098_v44 = vld [vmem:[#allocation4 + $0x640] sm:$0xf]  ;;  %v7843_v37 = vor.u32 %v9998_v51, %v7842_v50  ;;  %4112 = vmatpush.bf16.msrb.mxu1 %v7587_v4  ;;  %v7428_v50 = vld [vmem:[#allocation4 + $0x120] sm:$0xf0]  ;;  %v7591_v43 = vor.u32 %v9930_v27, %v7588_v21  ;;  %v7434_v21 = vld [vmem:[#allocation4 + $0x108] sm:$0xf] }
 0x71e   :  { %v10062_v29 = vld [vmem:[#allocation4 + $0x65c] sm:$0xf0]  ;;  %v9954_v51 = vld [vmem:[#allocation4 + $0x304] sm:$0xf] }
 0x71f   :  { %v7298_v17 = vld [vmem:[#allocation4] sm:$0xf]  ;;  %v8099_v2 = vor.u32 %v10062_v29, %v8098_v44  ;;  %4125 = vmatpush.bf16.msrb.mxu2 %v7843_v37  ;;  %v7684_v44 = vld [vmem:[#allocation4 + $0x320] sm:$0xf0] }
 0x720   :  { %v9862_v1 = vld [vmem:[#allocation4 + $0x1c] sm:$0xf0]  ;;  %v10018_v29 = vld [vmem:[#allocation4 + $0x504] sm:$0xf]  ;;  %v7687_v4 = vor.u32 %v9954_v51, %v7684_v44 }
 0x721   :  { %v7554_v55 = vld [vmem:[#allocation4 + $0x200] sm:$0xf]  ;;  %v7299_v8 = vor.u32 %v9862_v1, %v7298_v17  ;;  %4138 = vmatpush.bf16.msrb.mxu3 %v8099_v2  ;;  %v7431_v1 = vor.u32 %v9890_v49, %v7428_v50  ;;  %v7396_v2 = vld [vmem:[#allocation4 + $0xe0] sm:$0xf0]  ;;  %v9919_v50 = vld [vmem:[#allocation4 + $0x1e4] sm:$0xf0] }
 0x722   :  { %v9926_v62 = vld [vmem:[#allocation4 + $0x21c] sm:$0xf0]  ;;  %v9994_v28 = vld [vmem:[#allocation4 + $0x444] sm:$0xf] }
 0x723   :  { %v7810_v63 = vld [vmem:[#allocation4 + $0x400] sm:$0xf]  ;;  %v7555_v12 = vor.u32 %v9926_v62, %v7554_v55  ;;  %4100 = vmatpush.bf16.msrb.mxu0 %v7299_v8  ;;  %v9882_v62 = vld [vmem:[#allocation4 + $0xc4] sm:$0xf] }
 0x724   :  { %v9990_v53 = vld [vmem:[#allocation4 + $0x41c] sm:$0xf0]  ;;  %v7399_v6 = vor.u32 %v9882_v62, %v7396_v2  ;;  %v7300_v57 = vld [vmem:[#allocation4 + $0x20] sm:$0xf0] }
 0x725   :  { %v8066_v54 = vld [vmem:[#allocation4 + $0x600] sm:$0xf]  ;;  %v7811_v13 = vor.u32 %v9990_v53, %v7810_v63  ;;  %4113 = vmatpush.bf16.msrb.mxu1 %v7555_v12  ;;  %v7943_v63 = vor.u32 %v10018_v29, %v7940_v25  ;;  %v9946_v53 = vld [vmem:[#allocation4 + $0x2c4] sm:$0xf]  ;;  %v7786_v29 = vld [vmem:[#allocation4 + $0x3c8] sm:$0xf] }
 0x726   :  { %v10054_v61 = vld [vmem:[#allocation4 + $0x61c] sm:$0xf0]  ;;  %4101 = vmatmul.bf16.vlgmr.msrb.gmra.mxu0 %v12071_v33  ;;  %v9922_v59 = vld [vmem:[#allocation4 + $0x204] sm:$0xf]  ;;  %v9983_v25 = vld [vmem:[#allocation4 + $0x3e4] sm:$0xf0] }
 0x727   :  { %v8546_v18 = vld [vmem:[#allocation4 + $0x9c0] sm:$0xf]  ;;  %v8067_v23 = vor.u32 %v10054_v61, %v8066_v54  ;;  %4126 = vmatpush.bf16.msrb.mxu2 %v7811_v13  ;;  %v7652_v54 = vld [vmem:[#allocation4 + $0x2e0] sm:$0xf0]  ;;  %v7787_v2 = vor.u32 %v9983_v25, %v7786_v29  ;;  %v7370_v29 = vld [vmem:[#allocation4 + $0x88] sm:$0xf] }
 0x728   :  { %v10174_v5 = vld [vmem:[#allocation4 + $0x9dc] sm:$0xf0]  ;;  %4114 = vmatmul.bf16.vlgmr.msrb.gmra.mxu1 %v12073_v60  ;;  %v10010_v61 = vld [vmem:[#allocation4 + $0x4c4] sm:$0xf]  ;;  %v7655_v8 = vor.u32 %v9946_v53, %v7652_v54  ;;  %v7498_v54 = vld [vmem:[#allocation4 + $0x188] sm:$0xf] }
 0x729   :  { %v8547_v24 = vor.u32 %v10174_v5, %v8546_v18  ;;  %v8514_v32 = vld [vmem:[#allocation4 + $0x980] sm:$0xf]  ;;  %4139 = vmatpush.bf16.msrb.mxu3 %v8067_v23  ;;  %4158 = vmatpush.bf16.msra.mxu1 %v7527_v31  ;;  %v7908_v18 = vld [vmem:[#allocation4 + $0x4e0] sm:$0xf0]  ;;  %v9879_v25 = vld [vmem:[#allocation4 + $0xa4] sm:$0xf0] }
 0x72a   :  { %v10166_v16 = vld [vmem:[#allocation4 + $0x99c] sm:$0xf0]  ;;  %4127 = vmatmul.bf16.vlgmr.msrb.gmra.mxu2 %v12075_v3  ;;  %v7911_v12 = vor.u32 %v10010_v61, %v7908_v18  ;;  %v7364_v13 = vld [vmem:[#allocation4 + $0xa0] sm:$0xf0]  ;;  %v9911_v61 = vld [vmem:[#allocation4 + $0x1a4] sm:$0xf0] }
 0x72b   :  { %4145 = vmatpush.bf16.msra.mxu0 %v8547_v24  ;;  %v8515_v7 = vor.u32 %v10166_v16, %v8514_v32  ;;  %4171 = vmatpush.bf16.msra.mxu2 %v7783_v34  ;;  %v8482_v39 = vld [vmem:[#allocation4 + $0x940] sm:$0xf]  ;;  %v10002_v23 = vld [vmem:[#allocation4 + $0x484] sm:$0xf]  ;;  %v7367_v34 = vor.u32 %v9874_v11, %v7364_v13  ;;  %v7623_v32 = vor.u32 %v9938_v14, %v7620_v15  ;;  %v7754_v18 = vld [vmem:[#allocation4 + $0x388] sm:$0xf] }
 0x72c   :  { %v10158_v40 = vld [vmem:[#allocation4 + $0x95c] sm:$0xf0]  ;;  %4140 = vmatmul.bf16.vlgmr.msrb.gmra.mxu3 %v12077_v22  ;;  %v7876_v24 = vld [vmem:[#allocation4 + $0x4a0] sm:$0xf0]  ;;  %v7466_v15 = vld [vmem:[#allocation4 + $0x148] sm:$0xf] }
 0x72d   :  { %4184 = vmatpush.bf16.msra.mxu3 %v8039_v19  ;;  %v8483_v58 = vor.u32 %v10158_v40, %v8482_v39  ;;  %4159 = vmatpush.bf16.msra.mxu1 %v7495_v35  ;;  %v8450_v48 = vld [vmem:[#allocation4 + $0x900] sm:$0xf]  ;;  %v9866_v19 = vld [vmem:[#allocation4 + $0x44] sm:$0xf]  ;;  %v7879_v46 = vor.u32 %v10002_v23, %v7876_v24  ;;  %v9903_v23 = vld [vmem:[#allocation4 + $0x164] sm:$0xf0] }
 0x72e   :  { %v10150_v41 = vld [vmem:[#allocation4 + $0x91c] sm:$0xf0]  ;;  %v7335_v40 = vor.u32 %v9866_v19, %v7332_v26  ;;  %v7556_v52 = vld [vmem:[#allocation4 + $0x220] sm:$0xf0]  ;;  %v7722_v24 = vld [vmem:[#allocation4 + $0x348] sm:$0xf] }
 0x72f   :  { %4146 = vmatpush.bf16.msra.mxu0 %v8515_v7  ;;  %4172 = vmatpush.bf16.msra.mxu2 %v7751_v38  ;;  %v8451_v17 = vor.u32 %v10150_v41, %v8450_v48  ;;  %v8418_v37 = vld [vmem:[#allocation4 + $0x8c0] sm:$0xf]  ;;  %v7844_v7 = vld [vmem:[#allocation4 + $0x460] sm:$0xf0]  ;;  %v7559_v44 = vor.u32 %v9922_v59, %v7556_v52  ;;  %v7402_v52 = vld [vmem:[#allocation4 + $0xc8] sm:$0xf] }
 0x730   :  { %v10142_v55 = vld [vmem:[#allocation4 + $0x8dc] sm:$0xf0]  ;;  %v7847_v0 = vor.u32 %v9994_v28, %v7844_v7  ;;  %v9986_v56 = vld [vmem:[#allocation4 + $0x404] sm:$0xf]  ;;  %v9895_v28 = vld [vmem:[#allocation4 + $0x124] sm:$0xf0] }
 0x731   :  { %4185 = vmatpush.bf16.msra.mxu3 %v8007_v45  ;;  %4160 = vmatpush.bf16.msra.mxu1 %v7463_v42  ;;  %v8419_v5 = vor.u32 %v10142_v55, %v8418_v37  ;;  %v8386_v9 = vld [vmem:[#allocation4 + $0x880] sm:$0xf]  ;;  %v9858_v45 = vld [vmem:[#allocation4 + $0x4] sm:$0xf]  ;;  %v7690_v7 = vld [vmem:[#allocation4 + $0x308] sm:$0xf] }
 0x732   :  { %v10134_v10 = vld [vmem:[#allocation4 + $0x89c] sm:$0xf0]  ;;  %v10106_v42 = vld [vmem:[#allocation4 + $0x7c4] sm:$0xf]  ;;  %v7303_v51 = vor.u32 %v9858_v45, %v7300_v57 }
 0x733   :  { %4147 = vmatpush.bf16.msra.mxu0 %v8483_v58  ;;  %4173 = vmatpush.bf16.msra.mxu2 %v7719_v47  ;;  %v8387_v31 = vor.u32 %v10134_v10, %v8386_v9  ;;  %v8354_v16 = vld [vmem:[#allocation4 + $0x840] sm:$0xf]  ;;  %v7812_v58 = vld [vmem:[#allocation4 + $0x420] sm:$0xf0]  ;;  %v7499_v9 = vor.u32 %v9911_v61, %v7498_v54  ;;  %v7338_v61 = vld [vmem:[#allocation4 + $0x48] sm:$0xf] }
 0x734   :  { %v10126_v30 = vld [vmem:[#allocation4 + $0x85c] sm:$0xf0]  ;;  %v8292_v47 = vld [vmem:[#allocation4 + $0x7e0] sm:$0xf0] }
 0x735   :  { %4186 = vmatpush.bf16.msra.mxu3 %v7975_v20  ;;  %4161 = vmatpush.bf16.msra.mxu1 %v7431_v1  ;;  %v8355_v35 = vor.u32 %v10126_v30, %v8354_v16  ;;  %v8322_v38 = vld [vmem:[#allocation4 + $0x800] sm:$0xf]  ;;  %v10170_v48 = vld [vmem:[#allocation4 + $0x9c4] sm:$0xf]  ;;  %v7530_v20 = vld [vmem:[#allocation4 + $0x1c8] sm:$0xf]  ;;  %v8295_v1 = vor.u32 %v10106_v42, %v8292_v47  ;;  %v7467_v16 = vor.u32 %v9903_v23, %v7466_v15 }
 0x736   :  { %v10118_v39 = vld [vmem:[#allocation4 + $0x81c] sm:$0xf0]  ;;  %v8548_v49 = vld [vmem:[#allocation4 + $0x9e0] sm:$0xf0]  ;;  %v7531_v37 = vor.u32 %v9919_v50, %v7530_v20  ;;  %v9951_v42 = vld [vmem:[#allocation4 + $0x2e4] sm:$0xf0] }
 0x737   :  { %4148 = vmatpush.bf16.msra.mxu0 %v8451_v17  ;;  %4174 = vmatpush.bf16.msra.mxu2 %v7687_v4  ;;  %v8323_v41 = vor.u32 %v10118_v39, %v8322_v38  ;;  %v7815_v17 = vor.u32 %v9986_v56, %v7812_v58  ;;  %v8551_v4 = vor.u32 %v10170_v48, %v8548_v49  ;;  %v10098_v55 = vld [vmem:[#allocation4 + $0x784] sm:$0xf]  ;;  %v9887_v56 = vld [vmem:[#allocation4 + $0xe4] sm:$0xf0] }
 0x738   :  { %v8260_v62 = vld [vmem:[#allocation4 + $0x7a0] sm:$0xf0]  ;;  %v7658_v58 = vld [vmem:[#allocation4 + $0x2c8] sm:$0xf] }
 0x739   :  { %4187 = vmatpush.bf16.msra.mxu3 %v7943_v63  ;;  %4162 = vmatpush.bf16.msra.mxu1 %v7399_v6  ;;  %v10162_v63 = vld [vmem:[#allocation4 + $0x984] sm:$0xf]  ;;  %v8263_v6 = vor.u32 %v10098_v55, %v8260_v62  ;;  %v7371_v55 = vor.u32 %v9879_v25, %v7370_v29  ;;  %v7306_v15 = vld [vmem:[#allocation4 + $0x8] sm:$0xf] }
 0x73a   :  { %v8516_v53 = vld [vmem:[#allocation4 + $0x9a0] sm:$0xf0]  ;;  %v10095_v29 = vld [vmem:[#allocation4 + $0x764] sm:$0xf0] }
 0x73b   :  { %4149 = vmatpush.bf16.msra.mxu0 %v8419_v5  ;;  %4175 = vmatpush.bf16.msra.mxu2 %v7655_v8  ;;  %v9975_v5 = vld [vmem:[#allocation4 + $0x3a4] sm:$0xf0]  ;;  %v8519_v8 = vor.u32 %v10162_v63, %v8516_v53  ;;  %v10090_v10 = vld [vmem:[#allocation4 + $0x744] sm:$0xf] }
 0x73c   :  { %v8228_v11 = vld [vmem:[#allocation4 + $0x760] sm:$0xf0]  ;;  %v7755_v13 = vor.u32 %v9975_v5, %v7754_v18  ;;  %v9871_v18 = vld [vmem:[#allocation4 + $0x64] sm:$0xf0] }
 0x73d   :  { %4188 = vmatpush.bf16.msra.mxu3 %v7911_v12  ;;  %4163 = vmatpush.bf16.msra.mxu1 %v7367_v34  ;;  %v10154_v12 = vld [vmem:[#allocation4 + $0x944] sm:$0xf]  ;;  %v8231_v34 = vor.u32 %v10090_v10, %v8228_v11  ;;  %v7594_v5 = vld [vmem:[#allocation4 + $0x248] sm:$0xf] }
 0x73e   :  { %v8484_v14 = vld [vmem:[#allocation4 + $0x960] sm:$0xf0]  ;;  %v8490_v25 = vld [vmem:[#allocation4 + $0x948] sm:$0xf] }
 0x73f   :  { %4150 = vmatpush.bf16.msra.mxu0 %v8387_v31  ;;  %4176 = vmatpush.bf16.msra.mxu2 %v7623_v32  ;;  %v9967_v31 = vld [vmem:[#allocation4 + $0x364] sm:$0xf0]  ;;  %v8487_v32 = vor.u32 %v10154_v12, %v8484_v14  ;;  %v10082_v30 = vld [vmem:[#allocation4 + $0x704] sm:$0xf]  ;;  %v7339_v12 = vor.u32 %v9871_v18, %v7338_v61 }
 0x740   :  { %v8196_v19 = vld [vmem:[#allocation4 + $0x720] sm:$0xf0]  ;;  %v7723_v26 = vor.u32 %v9967_v31, %v7722_v24  ;;  %v9863_v24 = vld [vmem:[#allocation4 + $0x24] sm:$0xf0] }
 0x741   :  { %4189 = vmatpush.bf16.msra.mxu3 %v7879_v46  ;;  %4164 = vmatpush.bf16.msra.mxu1 %v7335_v40  ;;  %v10146_v46 = vld [vmem:[#allocation4 + $0x904] sm:$0xf]  ;;  %v8199_v38 = vor.u32 %v10082_v30, %v8196_v19  ;;  %v7435_v40 = vor.u32 %v9895_v28, %v7434_v21  ;;  %v7562_v31 = vld [vmem:[#allocation4 + $0x208] sm:$0xf]  ;;  %v7307_v28 = vor.u32 %v9863_v24, %v7306_v15 }
 0x742   :  { %v8452_v27 = vld [vmem:[#allocation4 + $0x920] sm:$0xf0]  ;;  %v8298_v30 = vld [vmem:[#allocation4 + $0x7c8] sm:$0xf] }
 0x743   :  { %4151 = vmatpush.bf16.msra.mxu0 %v8355_v35  ;;  %4177 = vmatpush.bf16.msra.mxu2 %v7591_v43  ;;  %v9959_v35 = vld [vmem:[#allocation4 + $0x324] sm:$0xf0]  ;;  %v8455_v39 = vor.u32 %v10146_v46, %v8452_v27  ;;  %v10074_v43 = vld [vmem:[#allocation4 + $0x6c4] sm:$0xf] }
 0x744   :  { %v8164_v45 = vld [vmem:[#allocation4 + $0x6e0] sm:$0xf0]  ;;  %v7691_v59 = vor.u32 %v9959_v35, %v7690_v7  ;;  %v10111_v46 = vld [vmem:[#allocation4 + $0x7e4] sm:$0xf0]  ;;  %v9915_v7 = vld [vmem:[#allocation4 + $0x1cc] sm:$0xf] }
 0x745   :  { %4190 = vmatpush.bf16.msra.mxu3 %v7847_v0  ;;  %4165 = vmatpush.bf16.msra.mxu1 %v7303_v51  ;;  %v10138_v57 = vld [vmem:[#allocation4 + $0x8c4] sm:$0xf]  ;;  %v8167_v47 = vor.u32 %v10074_v43, %v8164_v45  ;;  %v7659_v51 = vor.u32 %v9951_v42, %v7658_v58  ;;  %v10175_v27 = vld [vmem:[#allocation4 + $0x9e4] sm:$0xf0]  ;;  %v7532_v35 = vld [vmem:[#allocation4 + $0x1e8] sm:$0xf0] }
 0x746   :  { %v8420_v0 = vld [vmem:[#allocation4 + $0x8e0] sm:$0xf0]  ;;  %v8010_v45 = vld [vmem:[#allocation4 + $0x588] sm:$0xf]  ;;  %v9907_v42 = vld [vmem:[#allocation4 + $0x18c] sm:$0xf] }
 0x747   :  { %4152 = vmatpush.bf16.msra.mxu0 %v8323_v41  ;;  %4178 = vmatpush.bf16.msra.mxu2 %v7559_v44  ;;  %v8423_v48 = vor.u32 %v10138_v57, %v8420_v0  ;;  %v7403_v41 = vor.u32 %v9887_v56, %v7402_v52  ;;  %v10066_v49 = vld [vmem:[#allocation4 + $0x684] sm:$0xf]  ;;  %v10039_v57 = vld [vmem:[#allocation4 + $0x5a4] sm:$0xf0]  ;;  %v7535_v0 = vor.u32 %v9915_v7, %v7532_v35 }
 0x748   :  { %4166 = vmatmul.bf16.vlgmr.msra.gmra.mxu1 %v12071_v33  ;;  %v8132_v20 = vld [vmem:[#allocation4 + $0x6a0] sm:$0xf0]  ;;  %v10103_v52 = vld [vmem:[#allocation4 + $0x7a4] sm:$0xf0] }
 0x749   :  { %4191 = vmatpush.bf16.msra.mxu3 %v7815_v17  ;;  %4210 = vmatpush.bf16.msrb.mxu1 %v8551_v4  ;;  %v10130_v50 = vld [vmem:[#allocation4 + $0x884] sm:$0xf]  ;;  %v7626_v17 = vld [vmem:[#allocation4 + $0x288] sm:$0xf]  ;;  %v8135_v4 = vor.u32 %v10066_v49, %v8132_v20 }
 0x74a   :  { %4153 = vmatmul.bf16.vlgmr.msra.gmra.mxu0 %v12088_v36  ;;  %4179 = vmatmul.bf16.vlgmr.msra.gmra.mxu2 %v12073_v60  ;;  %v8388_v44 = vld [vmem:[#allocation4 + $0x8a0] sm:$0xf0]  ;;  %v8522_v56 = vld [vmem:[#allocation4 + $0x988] sm:$0xf] }
 0x74b   :  { %4197 = vmatpush.bf16.msrb.mxu0 %v8295_v1  ;;  %4223 = vmatpush.bf16.msrb.mxu2 %v7531_v37  ;;  %v9943_v1 = vld [vmem:[#allocation4 + $0x2a4] sm:$0xf0]  ;;  %v8391_v37 = vor.u32 %v10130_v50, %v8388_v44  ;;  %v10058_v62 = vld [vmem:[#allocation4 + $0x644] sm:$0xf] }
 0x74c   :  { %4192 = vmatmul.bf16.vlgmr.msra.gmra.mxu3 %v12075_v3  ;;  %v8100_v63 = vld [vmem:[#allocation4 + $0x660] sm:$0xf0]  ;;  %v7627_v53 = vor.u32 %v9943_v1, %v7626_v17  ;;  %v10167_v58 = vld [vmem:[#allocation4 + $0x9a4] sm:$0xf0]  ;;  %v9899_v1 = vld [vmem:[#allocation4 + $0x14c] sm:$0xf] }
 0x74d   :  { %4236 = vmatpush.bf16.msrb.mxu3 %v7787_v2  ;;  %4211 = vmatpush.bf16.msrb.mxu1 %v8519_v8  ;;  %v10122_v2 = vld [vmem:[#allocation4 + $0x844] sm:$0xf]  ;;  %v8103_v8 = vor.u32 %v10058_v62, %v8100_v63  ;;  %v8523_v49 = vor.u32 %v10167_v58, %v8522_v56  ;;  %v7978_v20 = vld [vmem:[#allocation4 + $0x548] sm:$0xf] }
 0x74e   :  { %v8356_v54 = vld [vmem:[#allocation4 + $0x860] sm:$0xf0]  ;;  %v10031_v50 = vld [vmem:[#allocation4 + $0x564] sm:$0xf0] }
 0x74f   :  { %4198 = vmatpush.bf16.msrb.mxu0 %v8263_v6  ;;  %4224 = vmatpush.bf16.msrb.mxu2 %v7499_v9  ;;  %v9935_v6 = vld [vmem:[#allocation4 + $0x264] sm:$0xf0]  ;;  %v10050_v9 = vld [vmem:[#allocation4 + $0x604] sm:$0xf]  ;;  %v8359_v11 = vor.u32 %v10122_v2, %v8356_v54 }
 0x750   :  { %v8068_v10 = vld [vmem:[#allocation4 + $0x620] sm:$0xf0]  ;;  %v7595_v23 = vor.u32 %v9935_v6, %v7594_v5  ;;  %v10159_v17 = vld [vmem:[#allocation4 + $0x964] sm:$0xf0]  ;;  %v9891_v6 = vld [vmem:[#allocation4 + $0x10c] sm:$0xf] }
 0x751   :  { %4237 = vmatpush.bf16.msrb.mxu3 %v7755_v13  ;;  %4212 = vmatpush.bf16.msrb.mxu1 %v8487_v32  ;;  %v10114_v13 = vld [vmem:[#allocation4 + $0x804] sm:$0xf]  ;;  %v8042_v32 = vld [vmem:[#allocation4 + $0x5c8] sm:$0xf]  ;;  %v8071_v19 = vor.u32 %v10050_v9, %v8068_v10  ;;  %v8491_v62 = vor.u32 %v10159_v17, %v8490_v25 }
 0x752   :  { %v8324_v14 = vld [vmem:[#allocation4 + $0x820] sm:$0xf0]  ;;  %v7946_v63 = vld [vmem:[#allocation4 + $0x508] sm:$0xf] }
 0x753   :  { %4199 = vmatpush.bf16.msrb.mxu0 %v8231_v34  ;;  %4225 = vmatpush.bf16.msrb.mxu2 %v7467_v16  ;;  %v9927_v34 = vld [vmem:[#allocation4 + $0x224] sm:$0xf0]  ;;  %v8327_v21 = vor.u32 %v10114_v13, %v8324_v14 }
 0x754   :  { %v10047_v16 = vld [vmem:[#allocation4 + $0x5e4] sm:$0xf0] }
 0x755   :  { %4238 = vmatpush.bf16.msrb.mxu3 %v7723_v26  ;;  %4213 = vmatpush.bf16.msrb.mxu1 %v8455_v39  ;;  %v8554_v26 = vld [vmem:[#allocation4 + $0x9c8] sm:$0xf]  ;;  %v8043_v39 = vor.u32 %v10047_v16, %v8042_v32  ;;  %v7404_v32 = vld [vmem:[#allocation4 + $0xe8] sm:$0xf0] }
 0x756   :  { %v8555_v43 = vor.u32 %v10175_v27, %v8554_v26  ;;  %v10023_v2 = vld [vmem:[#allocation4 + $0x524] sm:$0xf0] }
 0x757   :  { %4200 = vmatpush.bf16.msrb.mxu0 %v8199_v38  ;;  %4226 = vmatpush.bf16.msrb.mxu2 %v7435_v40  ;;  %v7563_v38 = vor.u32 %v9927_v34, %v7562_v31  ;;  %v8299_v40 = vor.u32 %v10111_v46, %v8298_v30  ;;  %v10087_v61 = vld [vmem:[#allocation4 + $0x724] sm:$0xf0]  ;;  %v7947_v9 = vor.u32 %v10023_v2, %v7946_v63  ;;  %v9883_v34 = vld [vmem:[#allocation4 + $0xcc] sm:$0xf] }
 0x758   :  { %v8458_v18 = vld [vmem:[#allocation4 + $0x908] sm:$0xf]  ;;  %v10043_v63 = vld [vmem:[#allocation4 + $0x5cc] sm:$0xf] }
 0x759   :  { %4239 = vmatpush.bf16.msrb.mxu3 %v7691_v59  ;;  %4214 = vmatpush.bf16.msrb.mxu1 %v8423_v48  ;;  %v8266_v59 = vld [vmem:[#allocation4 + $0x788] sm:$0xf]  ;;  %v8011_v48 = vor.u32 %v10039_v57, %v8010_v45 }
 0x75a   :  { %v10151_v5 = vld [vmem:[#allocation4 + $0x924] sm:$0xf0] }
 0x75b   :  { %4201 = vmatpush.bf16.msrb.mxu0 %v8167_v47  ;;  %4227 = vmatpush.bf16.msrb.mxu2 %v7403_v41  ;;  %v7500_v47 = vld [vmem:[#allocation4 + $0x1a8] sm:$0xf0]  ;;  %v8267_v41 = vor.u32 %v10103_v52, %v8266_v59  ;;  %v10015_v13 = vld [vmem:[#allocation4 + $0x4e4] sm:$0xf0] }
 0x75c   :  { %v7503_v44 = vor.u32 %v9907_v42, %v7500_v47  ;;  %v8170_v14 = vld [vmem:[#allocation4 + $0x6c8] sm:$0xf]  ;;  %v9867_v47 = vld [vmem:[#allocation4 + $0x4c] sm:$0xf] }
 0x75d   :  { %4240 = vmatpush.bf16.msrb.mxu3 %v7659_v51  ;;  %4215 = vmatpush.bf16.msrb.mxu1 %v8391_v37  ;;  %v8234_v51 = vld [vmem:[#allocation4 + $0x748] sm:$0xf]  ;;  %v7979_v37 = vor.u32 %v10031_v50, %v7978_v20 }
 0x75e   :  { %v8426_v24 = vld [vmem:[#allocation4 + $0x8c8] sm:$0xf] }
 0x75f   :  { %4202 = vmatpush.bf16.msrb.mxu0 %v8135_v4  ;;  %4228 = vmatpush.bf16.msrb.mxu2 %v7371_v55  ;;  %v7468_v4 = vld [vmem:[#allocation4 + $0x168] sm:$0xf0]  ;;  %v8235_v55 = vor.u32 %v10095_v29, %v8234_v51  ;;  %v10143_v31 = vld [vmem:[#allocation4 + $0x8e4] sm:$0xf0] }
 0x760   :  { %v7471_v54 = vor.u32 %v9899_v1, %v7468_v4  ;;  %v7882_v46 = vld [vmem:[#allocation4 + $0x488] sm:$0xf]  ;;  %v9859_v4 = vld [vmem:[#allocation4 + $0xc] sm:$0xf] }
 0x761   :  { %4241 = vmatpush.bf16.msrb.mxu3 %v7627_v53  ;;  %4216 = vmatpush.bf16.msrb.mxu1 %v8359_v11  ;;  %v8202_v53 = vld [vmem:[#allocation4 + $0x708] sm:$0xf]  ;;  %v8459_v11 = vor.u32 %v10151_v5, %v8458_v18 }
 0x762   :  { %v8203_v10 = vor.u32 %v10087_v61, %v8202_v53  ;;  %v10007_v26 = vld [vmem:[#allocation4 + $0x4a4] sm:$0xf0]  ;;  %v8044_v53 = vld [vmem:[#allocation4 + $0x5e8] sm:$0xf0] }
 0x763   :  { %4203 = vmatpush.bf16.msrb.mxu0 %v8103_v8  ;;  %4229 = vmatpush.bf16.msrb.mxu2 %v7339_v12  ;;  %v7436_v8 = vld [vmem:[#allocation4 + $0x128] sm:$0xf0]  ;;  %v7914_v12 = vld [vmem:[#allocation4 + $0x4c8] sm:$0xf] }
 0x764   :  { %v7439_v15 = vor.u32 %v9891_v6, %v7436_v8  ;;  %v7915_v16 = vor.u32 %v10015_v13, %v7914_v12  ;;  %v8138_v27 = vld [vmem:[#allocation4 + $0x688] sm:$0xf]  ;;  %v8300_v61 = vld [vmem:[#allocation4 + $0x7e8] sm:$0xf0] }
 0x765   :  { %4242 = vmatpush.bf16.msrb.mxu3 %v7595_v23  ;;  %4217 = vmatpush.bf16.msrb.mxu1 %v8327_v21  ;;  %v10079_v23 = vld [vmem:[#allocation4 + $0x6e4] sm:$0xf0]  ;;  %v7407_v21 = vor.u32 %v9883_v34, %v7404_v32  ;;  %v10171_v6 = vld [vmem:[#allocation4 + $0x9cc] sm:$0xf] }
 0x766   :  { %v8171_v30 = vor.u32 %v10079_v23, %v8170_v14  ;;  %v8394_v7 = vld [vmem:[#allocation4 + $0x888] sm:$0xf]  ;;  %v8556_v8 = vld [vmem:[#allocation4 + $0x9e8] sm:$0xf0] }
 0x767   :  { %4204 = vmatpush.bf16.msrb.mxu0 %v8071_v19  ;;  %4230 = vmatpush.bf16.msrb.mxu2 %v7307_v28  ;;  %v8427_v19 = vor.u32 %v10143_v31, %v8426_v24  ;;  %v10071_v28 = vld [vmem:[#allocation4 + $0x6a4] sm:$0xf0]  ;;  %v9971_v13 = vld [vmem:[#allocation4 + $0x38c] sm:$0xf]  ;;  %v8559_v23 = vor.u32 %v10171_v6, %v8556_v8 }
 0x768   :  { %4218 = vmatmul.bf16.vlgmr.msrb.gmra.mxu1 %v12088_v36  ;;  %v10135_v35 = vld [vmem:[#allocation4 + $0x8a4] sm:$0xf0]  ;;  %v7756_v14 = vld [vmem:[#allocation4 + $0x3a8] sm:$0xf0] }
 0x769   :  { %4243 = vmatpush.bf16.msrb.mxu3 %v7563_v38  ;;  %4262 = vmatpush.bf16.msra.mxu1 %v8299_v40  ;;  %v9875_v38 = vld [vmem:[#allocation4 + $0x8c] sm:$0xf]  ;;  %v7883_v40 = vor.u32 %v10007_v26, %v7882_v46  ;;  %v8395_v45 = vor.u32 %v10135_v35, %v8394_v7  ;;  %v7850_v57 = vld [vmem:[#allocation4 + $0x448] sm:$0xf] }
 0x76a   :  { %4205 = vmatmul.bf16.vlgmr.msrb.gmra.mxu0 %v12077_v22  ;;  %4231 = vmatmul.bf16.vlgmr.msrb.gmra.mxu2 %v12071_v33  ;;  %v9999_v59 = vld [vmem:[#allocation4 + $0x464] sm:$0xf0]  ;;  %v8012_v24 = vld [vmem:[#allocation4 + $0x5a8] sm:$0xf0] }
 0x76b   :  { %4249 = vmatpush.bf16.msra.mxu0 %v8043_v39  ;;  %4275 = vmatpush.bf16.msra.mxu2 %v8555_v43  ;;  %v7372_v39 = vld [vmem:[#allocation4 + $0xa8] sm:$0xf0]  ;;  %v8139_v43 = vor.u32 %v10071_v28, %v8138_v27  ;;  %v10063_v56 = vld [vmem:[#allocation4 + $0x664] sm:$0xf0] }
 0x76c   :  { %4244 = vmatmul.bf16.vlgmr.msrb.gmra.mxu3 %v12073_v60  ;;  %v7375_v52 = vor.u32 %v9875_v38, %v7372_v39  ;;  %v8362_v58 = vld [vmem:[#allocation4 + $0x848] sm:$0xf]  ;;  %v10099_v31 = vld [vmem:[#allocation4 + $0x78c] sm:$0xf] }
 0x76d   :  { %4288 = vmatpush.bf16.msra.mxu3 %v7535_v0  ;;  %4263 = vmatpush.bf16.msra.mxu1 %v8267_v41  ;;  %v8106_v0 = vld [vmem:[#allocation4 + $0x648] sm:$0xf]  ;;  %v7851_v41 = vor.u32 %v9999_v59, %v7850_v57  ;;  %v8268_v34 = vld [vmem:[#allocation4 + $0x7a8] sm:$0xf0] }
 0x76e   :  { %v10127_v42 = vld [vmem:[#allocation4 + $0x864] sm:$0xf0]  ;;  %v8107_v50 = vor.u32 %v10063_v56, %v8106_v0  ;;  %v10163_v32 = vld [vmem:[#allocation4 + $0x98c] sm:$0xf]  ;;  %v8271_v46 = vor.u32 %v10099_v31, %v8268_v34 }
 0x76f   :  { %4250 = vmatpush.bf16.msra.mxu0 %v8011_v48  ;;  %4276 = vmatpush.bf16.msra.mxu2 %v8523_v49  ;;  %v7340_v48 = vld [vmem:[#allocation4 + $0x68] sm:$0xf0]  ;;  %v7818_v49 = vld [vmem:[#allocation4 + $0x408] sm:$0xf]  ;;  %v8363_v51 = vor.u32 %v10127_v42, %v8362_v58 }
 0x770   :  { %v9991_v20 = vld [vmem:[#allocation4 + $0x424] sm:$0xf0]  ;;  %v7343_v17 = vor.u32 %v9867_v47, %v7340_v48  ;;  %v9963_v26 = vld [vmem:[#allocation4 + $0x34c] sm:$0xf] }
 0x771   :  { %4289 = vmatpush.bf16.msra.mxu3 %v7503_v44  ;;  %4264 = vmatpush.bf16.msra.mxu1 %v8235_v55  ;;  %v8074_v44 = vld [vmem:[#allocation4 + $0x608] sm:$0xf]  ;;  %v9979_v55 = vld [vmem:[#allocation4 + $0x3cc] sm:$0xf]  ;;  %v7819_v2 = vor.u32 %v9991_v20, %v7818_v49 }
 0x772   :  { %v10055_v29 = vld [vmem:[#allocation4 + $0x624] sm:$0xf0]  ;;  %v7724_v27 = vld [vmem:[#allocation4 + $0x368] sm:$0xf0] }
 0x773   :  { %4251 = vmatpush.bf16.msra.mxu0 %v7979_v37  ;;  %4277 = vmatpush.bf16.msra.mxu2 %v8491_v62  ;;  %v8330_v25 = vld [vmem:[#allocation4 + $0x808] sm:$0xf]  ;;  %v7308_v37 = vld [vmem:[#allocation4 + $0x28] sm:$0xf0]  ;;  %v8075_v18 = vor.u32 %v10055_v29, %v8074_v44 }
 0x774   :  { %v10119_v1 = vld [vmem:[#allocation4 + $0x824] sm:$0xf0]  ;;  %v7788_v62 = vld [vmem:[#allocation4 + $0x3e8] sm:$0xf0] }
 0x775   :  { %4290 = vmatpush.bf16.msra.mxu3 %v7471_v54  ;;  %4265 = vmatpush.bf16.msra.mxu1 %v8203_v10  ;;  %v10107_v54 = vld [vmem:[#allocation4 + $0x7cc] sm:$0xf]  ;;  %v8331_v5 = vor.u32 %v10119_v1, %v8330_v25  ;;  %v7791_v10 = vor.u32 %v9979_v55, %v7788_v62 }
 0x776   :  { %v8303_v12 = vor.u32 %v10107_v54, %v8300_v61  ;;  %v7980_v7 = vld [vmem:[#allocation4 + $0x568] sm:$0xf0] }
 0x777   :  { %4252 = vmatpush.bf16.msra.mxu0 %v7947_v9  ;;  %4278 = vmatpush.bf16.msra.mxu2 %v8459_v11  ;;  %v7311_v9 = vor.u32 %v9859_v4, %v7308_v37  ;;  %v8047_v11 = vor.u32 %v10043_v63, %v8044_v53  ;;  %v10091_v35 = vld [vmem:[#allocation4 + $0x74c] sm:$0xf] }
 0x778   :  { %v8236_v38 = vld [vmem:[#allocation4 + $0x768] sm:$0xf0] }
 0x779   :  { %4291 = vmatpush.bf16.msra.mxu3 %v7439_v15  ;;  %4266 = vmatpush.bf16.msra.mxu1 %v8171_v30  ;;  %v10035_v15 = vld [vmem:[#allocation4 + $0x58c] sm:$0xf]  ;;  %v7759_v30 = vor.u32 %v9971_v13, %v7756_v14  ;;  %v8239_v57 = vor.u32 %v10091_v35, %v8236_v38 }
 0x77a   :  { %v10155_v39 = vld [vmem:[#allocation4 + $0x94c] sm:$0xf] }
 0x77b   :  { %4253 = vmatpush.bf16.msra.mxu0 %v7915_v16  ;;  %4279 = vmatpush.bf16.msra.mxu2 %v8427_v19  ;;  %v8524_v16 = vld [vmem:[#allocation4 + $0x9a8] sm:$0xf0]  ;;  %v8015_v19 = vor.u32 %v10035_v15, %v8012_v24 }
 0x77c   :  { %v8527_v28 = vor.u32 %v10163_v32, %v8524_v16  ;;  %v9955_v59 = vld [vmem:[#allocation4 + $0x30c] sm:$0xf] }
 0x77d   :  { %4292 = vmatpush.bf16.msra.mxu3 %v7407_v21  ;;  %4267 = vmatpush.bf16.msra.mxu1 %v8139_v43  ;;  %v10027_v21 = vld [vmem:[#allocation4 + $0x54c] sm:$0xf]  ;;  %v7727_v43 = vor.u32 %v9963_v26, %v7724_v27 }
 0x77e   :  { %v7692_v0 = vld [vmem:[#allocation4 + $0x328] sm:$0xf0] }
 0x77f   :  { %4254 = vmatpush.bf16.msra.mxu0 %v7883_v40  ;;  %4280 = vmatpush.bf16.msra.mxu2 %v8395_v45  ;;  %v8492_v40 = vld [vmem:[#allocation4 + $0x968] sm:$0xf0]  ;;  %v7983_v45 = vor.u32 %v10027_v21, %v7980_v7  ;;  %v7695_v49 = vor.u32 %v9955_v59, %v7692_v0  ;;  %v7794_v59 = vld [vmem:[#allocation4 + $0x3d0] sm:$0xf] }
 0x780   :  { %v8495_v56 = vor.u32 %v10155_v39, %v8492_v40  ;;  %v7948_v58 = vld [vmem:[#allocation4 + $0x528] sm:$0xf0] }
 0x781   :  { %4293 = vmatpush.bf16.msra.mxu3 %v7375_v52  ;;  %4268 = vmatpush.bf16.msra.mxu1 %v8107_v50  ;;  %v10019_v52 = vld [vmem:[#allocation4 + $0x50c] sm:$0xf] }
 0x782   :  { %v10083_v42 = vld [vmem:[#allocation4 + $0x70c] sm:$0xf]  ;;  %v7951_v20 = vor.u32 %v10019_v52, %v7948_v58  ;;  %v9984_v52 = vld [vmem:[#allocation4 + $0x3ec] sm:$0xf0] }
 0x783   :  { %4255 = vmatpush.bf16.msra.mxu0 %v7851_v41  ;;  %4281 = vmatpush.bf16.msra.mxu2 %v8363_v51  ;;  %v8204_v47 = vld [vmem:[#allocation4 + $0x728] sm:$0xf0]  ;;  %v10048_v58 = vld [vmem:[#allocation4 + $0x5ec] sm:$0xf0] }
 0x784   :  { %v10147_v48 = vld [vmem:[#allocation4 + $0x90c] sm:$0xf]  ;;  %v8207_v50 = vor.u32 %v10083_v42, %v8204_v47 }
 0x785   :  { %4294 = vmatpush.bf16.msra.mxu3 %v7343_v17  ;;  %4269 = vmatpush.bf16.msra.mxu1 %v8075_v18  ;;  %v8460_v41 = vld [vmem:[#allocation4 + $0x928] sm:$0xf0] }
 0x786   :  { %v9947_v51 = vld [vmem:[#allocation4 + $0x2cc] sm:$0xf]  ;;  %v8463_v25 = vor.u32 %v10147_v48, %v8460_v41  ;;  %v8306_v48 = vld [vmem:[#allocation4 + $0x7d0] sm:$0xf] }
 0x787   :  { %4256 = vmatpush.bf16.msra.mxu0 %v7819_v2  ;;  %4282 = vmatpush.bf16.msra.mxu2 %v8331_v5  ;;  %v7660_v44 = vld [vmem:[#allocation4 + $0x2e8] sm:$0xf0]  ;;  %v10112_v41 = vld [vmem:[#allocation4 + $0x7ec] sm:$0xf0] }
 0x788   :  { %4270 = vmatmul.bf16.vlgmr.msra.gmra.mxu1 %v12077_v22  ;;  %v10011_v29 = vld [vmem:[#allocation4 + $0x4cc] sm:$0xf]  ;;  %v7663_v62 = vor.u32 %v9947_v51, %v7660_v44  ;;  %v7506_v44 = vld [vmem:[#allocation4 + $0x190] sm:$0xf] }
 0x789   :  { %4295 = vmatpush.bf16.msra.mxu3 %v7311_v9  ;;  %4314 = vmatpush.bf16.msrb.mxu1 %v8047_v11  ;;  %v7916_v17 = vld [vmem:[#allocation4 + $0x4e8] sm:$0xf0] }
 0x78a   :  { %4283 = vmatmul.bf16.vlgmr.msra.gmra.mxu2 %v12088_v36  ;;  %4257 = vmatmul.bf16.vlgmr.msra.gmra.mxu0 %v12075_v3  ;;  %v10075_v1 = vld [vmem:[#allocation4 + $0x6cc] sm:$0xf]  ;;  %v7919_v63 = vor.u32 %v10011_v29, %v7916_v17  ;;  %v9912_v29 = vld [vmem:[#allocation4 + $0x1ac] sm:$0xf0]  ;;  %v8307_v17 = vor.u32 %v10112_v41, %v8306_v48 }
 0x78b   :  { %4301 = vmatpush.bf16.msrb.mxu0 %v7791_v10  ;;  %4327 = vmatpush.bf16.msrb.mxu2 %v8303_v12  ;;  %v8172_v4 = vld [vmem:[#allocation4 + $0x6e8] sm:$0xf0]  ;;  %v7378_v41 = vld [vmem:[#allocation4 + $0x90] sm:$0xf] }
 0x78c   :  { %4296 = vmatmul.bf16.vlgmr.msra.gmra.mxu3 %v12071_v33  ;;  %v10139_v37 = vld [vmem:[#allocation4 + $0x8cc] sm:$0xf]  ;;  %v8175_v2 = vor.u32 %v10075_v1, %v8172_v4  ;;  %v9976_v1 = vld [vmem:[#allocation4 + $0x3ac] sm:$0xf0] }
 0x78d   :  { %4340 = vmatpush.bf16.msrb.mxu3 %v8559_v23  ;;  %4315 = vmatpush.bf16.msrb.mxu1 %v8015_v19  ;;  %v8428_v55 = vld [vmem:[#allocation4 + $0x8e8] sm:$0xf0]  ;;  %v8018_v4 = vld [vmem:[#allocation4 + $0x590] sm:$0xf] }
 0x78e   :  { %v9939_v53 = vld [vmem:[#allocation4 + $0x28c] sm:$0xf]  ;;  %v8431_v18 = vor.u32 %v10139_v37, %v8428_v55  ;;  %v10040_v37 = vld [vmem:[#allocation4 + $0x5ac] sm:$0xf0] }
 0x78f   :  { %4302 = vmatpush.bf16.msrb.mxu0 %v7759_v30  ;;  %4328 = vmatpush.bf16.msrb.mxu2 %v8271_v46  ;;  %v7628_v54 = vld [vmem:[#allocation4 + $0x2a8] sm:$0xf0]  ;;  %v8274_v55 = vld [vmem:[#allocation4 + $0x790] sm:$0xf] }
 0x790   :  { %v10003_v61 = vld [vmem:[#allocation4 + $0x48c] sm:$0xf]  ;;  %v7631_v11 = vor.u32 %v9939_v53, %v7628_v54  ;;  %v8019_v54 = vor.u32 %v10040_v37, %v8018_v4  ;;  %v10072_v4 = vld [vmem:[#allocation4 + $0x6ac] sm:$0xf0] }
 0x791   :  { %4341 = vmatpush.bf16.msrb.mxu3 %v8527_v28  ;;  %4316 = vmatpush.bf16.msrb.mxu1 %v7983_v45  ;;  %v7884_v5 = vld [vmem:[#allocation4 + $0x4a8] sm:$0xf0]  ;;  %v7538_v45 = vld [vmem:[#allocation4 + $0x1d0] sm:$0xf] }
 0x792   :  { %v10067_v6 = vld [vmem:[#allocation4 + $0x68c] sm:$0xf]  ;;  %v7887_v12 = vor.u32 %v10003_v61, %v7884_v5  ;;  %v9904_v61 = vld [vmem:[#allocation4 + $0x16c] sm:$0xf0]  ;;  %v12106_v5 = vld [vmem:[#allocation12] sm:$0xff] }
 0x793   :  { %4303 = vmatpush.bf16.msrb.mxu0 %v7727_v43  ;;  %4329 = vmatpush.bf16.msrb.mxu2 %v8239_v57  ;;  %v8140_v8 = vld [vmem:[#allocation4 + $0x6a8] sm:$0xf0]  ;;  %v9920_v57 = vld [vmem:[#allocation4 + $0x1ec] sm:$0xf0] }
 0x794   :  { %v10131_v9 = vld [vmem:[#allocation4 + $0x88c] sm:$0xf]  ;;  %v8143_v13 = vor.u32 %v10067_v6, %v8140_v8  ;;  %v9968_v8 = vld [vmem:[#allocation4 + $0x36c] sm:$0xf0] }
 0x795   :  { %4342 = vmatpush.bf16.msrb.mxu3 %v8495_v56  ;;  %4317 = vmatpush.bf16.msrb.mxu1 %v7951_v20  ;;  %v8396_v10 = vld [vmem:[#allocation4 + $0x8a8] sm:$0xf0]  ;;  %v8050_v56 = vld [vmem:[#allocation4 + $0x5d0] sm:$0xf]  ;;  %v7539_v20 = vor.u32 %v9920_v57, %v7538_v45 }
 0x796   :  { %v9931_v14 = vld [vmem:[#allocation4 + $0x24c] sm:$0xf]  ;;  %v8399_v24 = vor.u32 %v10131_v9, %v8396_v10  ;;  %v8051_v51 = vor.u32 %v10048_v58, %v8050_v56  ;;  %v7986_v9 = vld [vmem:[#allocation4 + $0x550] sm:$0xf] }
 0x797   :  { %4304 = vmatpush.bf16.msrb.mxu0 %v7695_v49  ;;  %4330 = vmatpush.bf16.msrb.mxu2 %v8207_v50  ;;  %v7596_v15 = vld [vmem:[#allocation4 + $0x268] sm:$0xf0]  ;;  %v7795_v50 = vor.u32 %v9984_v52, %v7794_v59  ;;  %v10032_v10 = vld [vmem:[#allocation4 + $0x56c] sm:$0xf0] }
 0x798   :  { %v9995_v23 = vld [vmem:[#allocation4 + $0x44c] sm:$0xf]  ;;  %v7599_v19 = vor.u32 %v9931_v14, %v7596_v15  ;;  %v2477_v14 = vperm.slane %v12106_v5, 0  ;;  %v9952_v57 = vld [vmem:[#allocation4 + $0x2ec] sm:$0xf0] }
 0x799   :  { %4343 = vmatpush.bf16.msrb.mxu3 %v8463_v25  ;;  %4318 = vmatpush.bf16.msrb.mxu1 %v7919_v63  ;;  %v7852_v31 = vld [vmem:[#allocation4 + $0x468] sm:$0xf0]  ;;  %v7762_v25 = vld [vmem:[#allocation4 + $0x390] sm:$0xf]  ;;  %v7507_v63 = vor.u32 %v9912_v29, %v7506_v44 }
 0x79a   :  { %v10059_v34 = vld [vmem:[#allocation4 + $0x64c] sm:$0xf]  ;;  %v7855_v27 = vor.u32 %v9995_v23, %v7852_v31  ;;  %v7763_v53 = vor.u32 %v9976_v1, %v7762_v25  ;;  %v7987_v23 = vor.u32 %v10032_v10, %v7986_v9  ;;  %v9896_v31 = vld [vmem:[#allocation4 + $0x12c] sm:$0xf0] }
 0x79b   :  { %4305 = vmatpush.bf16.msrb.mxu0 %v7663_v62  ;;  %4331 = vmatpush.bf16.msrb.mxu2 %v8175_v2  ;;  %v8108_v32 = vld [vmem:[#allocation4 + $0x668] sm:$0xf0]  ;;  %v10104_v62 = vld [vmem:[#allocation4 + $0x7ac] sm:$0xf0] }
 0x79c   :  { %v10123_v16 = vld [vmem:[#allocation4 + $0x84c] sm:$0xf]  ;;  %v8111_v21 = vor.u32 %v10059_v34, %v8108_v32  ;;  %v7474_v2 = vld [vmem:[#allocation4 + $0x150] sm:$0xf]  ;;  %v8275_v6 = vor.u32 %v10104_v62, %v8274_v55 }
 0x79d   :  { %4344 = vmatpush.bf16.msrb.mxu3 %v8431_v18  ;;  %v8364_v30 = vld [vmem:[#allocation4 + $0x868] sm:$0xf0]  ;;  %4319 = vmatpush.bf16.msrb.mxu1 %v7887_v12  ;;  %v7730_v18 = vld [vmem:[#allocation4 + $0x350] sm:$0xf] }
 0x79e   :  { %v9923_v46 = vld [vmem:[#allocation4 + $0x20c] sm:$0xf]  ;;  %v8367_v38 = vor.u32 %v10123_v16, %v8364_v30  ;;  %v10096_v12 = vld [vmem:[#allocation4 + $0x76c] sm:$0xf0]  ;;  %v7731_v15 = vor.u32 %v9968_v8, %v7730_v18 }
 0x79f   :  { %4306 = vmatpush.bf16.msrb.mxu0 %v7631_v11  ;;  %v7564_v26 = vld [vmem:[#allocation4 + $0x228] sm:$0xf0]  ;;  %4332 = vmatpush.bf16.msrb.mxu2 %v8143_v13  ;;  %v8242_v11 = vld [vmem:[#allocation4 + $0x750] sm:$0xf]  ;;  %v7475_v13 = vor.u32 %v9904_v61, %v7474_v2 }
 0x7a0   :  { %v9987_v28 = vld [vmem:[#allocation4 + $0x40c] sm:$0xf]  ;;  %v7567_v0 = vor.u32 %v9923_v46, %v7564_v26  ;;  %v7698_v34 = vld [vmem:[#allocation4 + $0x310] sm:$0xf]  ;;  %v8243_v32 = vor.u32 %v10096_v12, %v8242_v11 }
 0x7a1   :  { %v7820_v7 = vld [vmem:[#allocation4 + $0x428] sm:$0xf0]  ;;  %4345 = vmatpush.bf16.msrb.mxu3 %v8399_v24  ;;  %4320 = vmatpush.bf16.msrb.mxu1 %v7855_v27  ;;  %v7442_v24 = vld [vmem:[#allocation4 + $0x110] sm:$0xf] }
 0x7a2   :  { %v10051_v35 = vld [vmem:[#allocation4 + $0x60c] sm:$0xf]  ;;  %v7823_v42 = vor.u32 %v9987_v28, %v7820_v7  ;;  %v9960_v16 = vld [vmem:[#allocation4 + $0x32c] sm:$0xf0] }
 0x7a3   :  { %v8076_v39 = vld [vmem:[#allocation4 + $0x628] sm:$0xf0]  ;;  %4307 = vmatpush.bf16.msrb.mxu0 %v7599_v19  ;;  %4333 = vmatpush.bf16.msrb.mxu2 %v8111_v21  ;;  %v7954_v30 = vld [vmem:[#allocation4 + $0x510] sm:$0xf]  ;;  %v4102_v27 = vpop.f32.mrf.mxu0  ;;  %v7443_v21 = vor.u32 %v9896_v31, %v7442_v24  ;;  %v7699_v7 = vor.u32 %v9960_v16, %v7698_v34 }
 0x7a4   :  { %v10115_v40 = vld [vmem:[#allocation4 + $0x80c] sm:$0xf]  ;;  %v8079_v47 = vor.u32 %v10051_v35, %v8076_v39  ;;  %v10024_v19 = vld [vmem:[#allocation4 + $0x52c] sm:$0xf0]  ;;  %v4103_v28 = vadd.f32 %v4102_v27, %v2477_v14 }
 0x7a5   :  { %v8332_v43 = vld [vmem:[#allocation4 + $0x828] sm:$0xf0]  ;;  %4346 = vmatpush.bf16.msrb.mxu3 %v8367_v38  ;;  %4321 = vmatpush.bf16.msrb.mxu1 %v7823_v42  ;;  %v8210_v46 = vld [vmem:[#allocation4 + $0x710] sm:$0xf]  ;;  %v7955_v35 = vor.u32 %v10024_v19, %v7954_v30 }
 0x7a6   :  { %v8335_v49 = vor.u32 %v10115_v40, %v8332_v43  ;;  %v10088_v26 = vld [vmem:[#allocation4 + $0x72c] sm:$0xf0]  ;;  %v4115_v43 = vpop.f32.mrf.mxu1 }
 0x7a7   :  { %4308 = vmatpush.bf16.msrb.mxu0 %v7567_v0  ;;  %4334 = vmatpush.bf16.msrb.mxu2 %v8079_v47  ;;  %v7410_v38 = vld [vmem:[#allocation4 + $0xd0] sm:$0xf]  ;;  %v8211_v45 = vor.u32 %v10088_v26, %v8210_v46  ;;  %v4116_v52 = vadd.f32 %v4115_v43, %v4103_v28  ;;  %v7796_v43 = vld [vmem:[#allocation4 + $0x3f0] sm:$0xf0] }
 0x7a8   :  { %4322 = vmatmul.bf16.vlgmr.msrb.gmra.mxu1 %v12075_v3  ;;  %v9888_v39 = vld [vmem:[#allocation4 + $0xec] sm:$0xf0] }
 0x7a9   :  { %4347 = vmatpush.bf16.msrb.mxu3 %v8335_v49  ;;  %4366 = vmatpush.bf16.msra.mxu1 %v7795_v50  ;;  %v7666_v40 = vld [vmem:[#allocation4 + $0x2d0] sm:$0xf]  ;;  %v7411_v42 = vor.u32 %v9888_v39, %v7410_v38  ;;  %v7540_v39 = vld [vmem:[#allocation4 + $0x1f0] sm:$0xf0] }
 0x7aa   :  { %4335 = vmatmul.bf16.vlgmr.msrb.gmra.mxu2 %v12077_v22  ;;  %4309 = vmatmul.bf16.vlgmr.msrb.gmra.mxu0 %v12073_v60  ;;  %v7922_v59 = vld [vmem:[#allocation4 + $0x4d0] sm:$0xf]  ;;  %v7667_v47 = vor.u32 %v9952_v57, %v7666_v40  ;;  %v9980_v40 = vld [vmem:[#allocation4 + $0x3d4] sm:$0xf] }
 0x7ab   :  { %4353 = vmatpush.bf16.msra.mxu0 %v7539_v20  ;;  %4379 = vmatpush.bf16.msra.mxu2 %v8051_v51  ;;  %v10016_v0 = vld [vmem:[#allocation4 + $0x4ec] sm:$0xf0]  ;;  %v4104_v55 = vpop.f32.mrf.mxu0 }
 0x7ac   :  { %4348 = vmatmul.bf16.vlgmr.msrb.gmra.mxu3 %v12088_v36  ;;  %v8178_v56 = vld [vmem:[#allocation4 + $0x6d0] sm:$0xf]  ;;  %v7923_v48 = vor.u32 %v10016_v0, %v7922_v59  ;;  %v10044_v59 = vld [vmem:[#allocation4 + $0x5d4] sm:$0xf] }
 0x7ad   :  { %4392 = vmatpush.bf16.msra.mxu3 %v8307_v17  ;;  %4367 = vmatpush.bf16.msra.mxu1 %v7763_v53  ;;  %v10080_v58 = vld [vmem:[#allocation4 + $0x6ec] sm:$0xf0]  ;;  %v4128_v25 = vpop.f32.mrf.mxu2  ;;  %v8052_v0 = vld [vmem:[#allocation4 + $0x5f0] sm:$0xf0] }
 0x7ae   :  { %v9880_v49 = vld [vmem:[#allocation4 + $0xac] sm:$0xf0]  ;;  %v8179_v50 = vor.u32 %v10080_v58, %v8178_v56  ;;  %v4129_v37 = vadd.f32 %v4128_v25, %v4116_v52  ;;  %v9900_v55 = vld [vmem:[#allocation4 + $0x154] sm:$0xf] }
 0x7af   :  { %4354 = vmatpush.bf16.msra.mxu0 %v7507_v63  ;;  %4380 = vmatpush.bf16.msra.mxu2 %v8019_v54  ;;  %v7634_v20 = vld [vmem:[#allocation4 + $0x290] sm:$0xf]  ;;  %v4141_v17 = vpop.f32.mrf.mxu3  ;;  %v7379_v62 = vor.u32 %v9880_v49, %v7378_v41  ;;  %v9908_v41 = vld [vmem:[#allocation4 + $0x194] sm:$0xf]  ;;  %v8055_v49 = vor.u32 %v10044_v59, %v8052_v0 }
 0x7b0   :  { %v9944_v51 = vld [vmem:[#allocation4 + $0x2ac] sm:$0xf0]  ;;  %v12113_v18 = vadd.f32 %v4141_v17, %v4129_v37 }
 0x7b1   :  { %4393 = vmatpush.bf16.msra.mxu3 %v8275_v6  ;;  %4368 = vmatpush.bf16.msra.mxu1 %v7731_v15  ;;  %v7890_v44 = vld [vmem:[#allocation4 + $0x490] sm:$0xf]  ;;  %v7635_v63 = vor.u32 %v9944_v51, %v7634_v20  ;;  %v4117_v6 = vpop.f32.mrf.mxu1  ;;  %v7508_v20 = vld [vmem:[#allocation4 + $0x1b0] sm:$0xf0] }
 0x7b2   :  { %v10008_v29 = vld [vmem:[#allocation4 + $0x4ac] sm:$0xf0]  ;;  %v7764_v51 = vld [vmem:[#allocation4 + $0x3b0] sm:$0xf0]  ;;  %v7511_v17 = vor.u32 %v9908_v41, %v7508_v20 }
 0x7b3   :  { %4355 = vmatpush.bf16.msra.mxu0 %v7475_v13  ;;  %4381 = vmatpush.bf16.msra.mxu2 %v7987_v23  ;;  %v8146_v1 = vld [vmem:[#allocation4 + $0x690] sm:$0xf]  ;;  %v7891_v2 = vor.u32 %v10008_v29, %v7890_v44  ;;  %v10036_v44 = vld [vmem:[#allocation4 + $0x594] sm:$0xf] }
 0x7b4   :  { %v7346_v53 = vld [vmem:[#allocation4 + $0x50] sm:$0xf]  ;;  %v8147_v8 = vor.u32 %v10072_v4, %v8146_v1  ;;  %v8020_v29 = vld [vmem:[#allocation4 + $0x5b0] sm:$0xf0] }
 0x7b5   :  { %4394 = vmatpush.bf16.msra.mxu3 %v8243_v32  ;;  %4369 = vmatpush.bf16.msra.mxu1 %v7699_v7  ;;  %v9872_v54 = vld [vmem:[#allocation4 + $0x6c] sm:$0xf0]  ;;  %v4130_v27 = vpop.f32.mrf.mxu2  ;;  %v7636_v41 = vld [vmem:[#allocation4 + $0x2b0] sm:$0xf0] }
 0x7b6   :  { %v7602_v61 = vld [vmem:[#allocation4 + $0x250] sm:$0xf]  ;;  %v7347_v14 = vor.u32 %v9872_v54, %v7346_v53  ;;  %v7732_v53 = vld [vmem:[#allocation4 + $0x370] sm:$0xf0] }
 0x7b7   :  { %4356 = vmatpush.bf16.msra.mxu0 %v7443_v21  ;;  %4382 = vmatpush.bf16.msra.mxu2 %v7955_v35  ;;  %v9936_v9 = vld [vmem:[#allocation4 + $0x26c] sm:$0xf0]  ;;  %v4143_v21 = vpop.f32.mrf.mxu3  ;;  %v9916_v35 = vld [vmem:[#allocation4 + $0x1d4] sm:$0xf] }
 0x7b8   :  { %v7858_v10 = vld [vmem:[#allocation4 + $0x450] sm:$0xf]  ;;  %v7603_v24 = vor.u32 %v9936_v9, %v7602_v61  ;;  %v7543_v58 = vor.u32 %v9916_v35, %v7540_v39  ;;  %v10028_v54 = vld [vmem:[#allocation4 + $0x554] sm:$0xf] }
 0x7b9   :  { %4395 = vmatpush.bf16.msra.mxu3 %v8211_v45  ;;  %4370 = vmatpush.bf16.msra.mxu1 %v7667_v47  ;;  %v10000_v11 = vld [vmem:[#allocation4 + $0x46c] sm:$0xf0]  ;;  %v7988_v61 = vld [vmem:[#allocation4 + $0x570] sm:$0xf0] }
 0x7ba   :  { %v8114_v12 = vld [vmem:[#allocation4 + $0x650] sm:$0xf]  ;;  %v7859_v31 = vor.u32 %v10000_v11, %v7858_v10  ;;  %v9884_v21 = vld [vmem:[#allocation4 + $0xd4] sm:$0xf] }
 0x7bb   :  { %4357 = vmatpush.bf16.msra.mxu0 %v7411_v42  ;;  %4383 = vmatpush.bf16.msra.mxu2 %v7923_v48  ;;  %v10064_v13 = vld [vmem:[#allocation4 + $0x66c] sm:$0xf0]  ;;  %v7799_v42 = vor.u32 %v9980_v40, %v7796_v43  ;;  %v7668_v39 = vld [vmem:[#allocation4 + $0x2f0] sm:$0xf0] }
 0x7bc   :  { %v7314_v15 = vld [vmem:[#allocation4 + $0x10] sm:$0xf]  ;;  %v8115_v30 = vor.u32 %v10064_v13, %v8114_v12  ;;  %v9892_v12 = vld [vmem:[#allocation4 + $0x114] sm:$0xf]  ;;  %v7991_v13 = vor.u32 %v10028_v54, %v7988_v61 }
 0x7bd   :  { %4396 = vmatpush.bf16.msra.mxu3 %v8179_v50  ;;  %v9864_v23 = vld [vmem:[#allocation4 + $0x2c] sm:$0xf0]  ;;  %4371 = vmatpush.bf16.msra.mxu1 %v7635_v63  ;;  %v9972_v50 = vld [vmem:[#allocation4 + $0x394] sm:$0xf] }
 0x7be   :  { %v7570_v34 = vld [vmem:[#allocation4 + $0x210] sm:$0xf]  ;;  %v7315_v38 = vor.u32 %v9864_v23, %v7314_v15  ;;  %v7767_v1 = vor.u32 %v9972_v50, %v7764_v51  ;;  %v7476_v63 = vld [vmem:[#allocation4 + $0x170] sm:$0xf0] }
 0x7bf   :  { %4358 = vmatpush.bf16.msra.mxu0 %v7379_v62  ;;  %4384 = vmatpush.bf16.msra.mxu2 %v7891_v2  ;;  %v9928_v32 = vld [vmem:[#allocation4 + $0x22c] sm:$0xf0]  ;;  %v8023_v62 = vor.u32 %v10036_v44, %v8020_v29  ;;  %v9964_v2 = vld [vmem:[#allocation4 + $0x354] sm:$0xf] }
 0x7c0   :  { %v7826_v16 = vld [vmem:[#allocation4 + $0x410] sm:$0xf]  ;;  %v7571_v45 = vor.u32 %v9928_v32, %v7570_v34  ;;  %v7735_v9 = vor.u32 %v9964_v2, %v7732_v53  ;;  %v9956_v15 = vld [vmem:[#allocation4 + $0x314] sm:$0xf]  ;;  %v2478_v32 = vperm.slane %v12106_v5, 1 }
 0x7c1   :  { %4397 = vmatpush.bf16.msra.mxu3 %v8147_v8  ;;  %v9992_v19 = vld [vmem:[#allocation4 + $0x42c] sm:$0xf0]  ;;  %4372 = vmatpush.bf16.msra.mxu1 %v7603_v24  ;;  %v7479_v8 = vor.u32 %v9900_v55, %v7476_v63  ;;  %v7700_v23 = vld [vmem:[#allocation4 + $0x330] sm:$0xf0] }
 0x7c2   :  { %v8082_v46 = vld [vmem:[#allocation4 + $0x610] sm:$0xf]  ;;  %v7827_v57 = vor.u32 %v9992_v19, %v7826_v16  ;;  %v10020_v24 = vld [vmem:[#allocation4 + $0x514] sm:$0xf] }
 0x7c3   :  { %v10056_v26 = vld [vmem:[#allocation4 + $0x62c] sm:$0xf0]  ;;  %4359 = vmatpush.bf16.msra.mxu0 %v7347_v14  ;;  %4385 = vmatpush.bf16.msra.mxu2 %v7859_v31  ;;  %v7444_v14 = vld [vmem:[#allocation4 + $0x130] sm:$0xf0] }
 0x7c4   :  { %v8562_v28 = vld [vmem:[#allocation4 + $0x9d0] sm:$0xf]  ;;  %v8083_v52 = vor.u32 %v10056_v26, %v8082_v46  ;;  %v7956_v31 = vld [vmem:[#allocation4 + $0x530] sm:$0xf0]  ;;  %v7447_v46 = vor.u32 %v9892_v12, %v7444_v14  ;;  %v7703_v26 = vor.u32 %v9956_v15, %v7700_v23 }
 0x7c5   :  { %v10176_v7 = vld [vmem:[#allocation4 + $0x9ec] sm:$0xf0]  ;;  %4398 = vmatpush.bf16.msra.mxu3 %v8115_v30  ;;  %4373 = vmatpush.bf16.msra.mxu1 %v7571_v45  ;;  %v7959_v35 = vor.u32 %v10020_v24, %v7956_v31  ;;  %v10012_v43 = vld [vmem:[#allocation4 + $0x4d4] sm:$0xf] }
 0x7c6   :  { %v8563_v56 = vor.u32 %v10176_v7, %v8562_v28  ;;  %v8530_v47 = vld [vmem:[#allocation4 + $0x990] sm:$0xf]  ;;  %v7412_v28 = vld [vmem:[#allocation4 + $0xf0] sm:$0xf0]  ;;  %v4167_v7 = vpop.f32.mrf.mxu1 }
 0x7c7   :  { %v10168_v48 = vld [vmem:[#allocation4 + $0x9ac] sm:$0xf0]  ;;  %4360 = vmatpush.bf16.msra.mxu0 %v7315_v38  ;;  %4386 = vmatpush.bf16.msra.mxu2 %v7827_v57  ;;  %v4154_v34 = vpop.f32.mrf.mxu0  ;;  %v9948_v38 = vld [vmem:[#allocation4 + $0x2d4] sm:$0xf]  ;;  %v4168_v57 = vadd.f32 %v4167_v7, %v2478_v32  ;;  %v7415_v59 = vor.u32 %v9884_v21, %v7412_v28  ;;  %v7546_v7 = vld [vmem:[#allocation4 + $0x1d8] sm:$0xf] }
 0x7c8   :  { %v8531_v25 = vor.u32 %v10168_v48, %v8530_v47  ;;  %v8498_v4 = vld [vmem:[#allocation4 + $0x950] sm:$0xf]  ;;  %4374 = vmatmul.bf16.vlgmr.msra.gmra.mxu1 %v12073_v60  ;;  %v12121_v19 = vadd.f32 %v4154_v34, %v12113_v18  ;;  %v7924_v45 = vld [vmem:[#allocation4 + $0x4f0] sm:$0xf0]  ;;  %v7671_v0 = vor.u32 %v9948_v38, %v7668_v39 }
 0x7c9   :  { %4399 = vmatpush.bf16.msra.mxu3 %v8083_v52  ;;  %4418 = vmatpush.bf16.msrb.mxu1 %v7543_v58  ;;  %v10160_v37 = vld [vmem:[#allocation4 + $0x96c] sm:$0xf0]  ;;  %v9876_v58 = vld [vmem:[#allocation4 + $0x94] sm:$0xf] }
 0x7ca   :  { %4361 = vmatmul.bf16.vlgmr.msra.gmra.mxu0 %v12071_v33  ;;  %4387 = vmatmul.bf16.vlgmr.msra.gmra.mxu2 %v12075_v3  ;;  %v8499_v6 = vor.u32 %v10160_v37, %v8498_v4  ;;  %v8466_v10 = vld [vmem:[#allocation4 + $0x910] sm:$0xf]  ;;  %v4613_v40 = vmax.f32 %v12121_v19, 0.0  ;;  %v7380_v47 = vld [vmem:[#allocation4 + $0xb0] sm:$0xf0] }
 0x7cb   :  { %4405 = vmatpush.bf16.msrb.mxu0 %v8563_v56  ;;  %4431 = vmatpush.bf16.msrb.mxu2 %v7799_v42  ;;  %v10152_v11 = vld [vmem:[#allocation4 + $0x92c] sm:$0xf0]  ;;  %v7927_v42 = vor.u32 %v10012_v43, %v7924_v45  ;;  %v9940_v48 = vld [vmem:[#allocation4 + $0x294] sm:$0xf]  ;;  %v7802_v43 = vld [vmem:[#allocation4 + $0x3d8] sm:$0xf] }
 0x7cc   :  { %4400 = vmatmul.bf16.vlgmr.msra.gmra.mxu3 %v12077_v22  ;;  %v8467_v16 = vor.u32 %v10152_v11, %v8466_v10  ;;  %v8434_v30 = vld [vmem:[#allocation4 + $0x8d0] sm:$0xf]  ;;  %v10004_v50 = vld [vmem:[#allocation4 + $0x494] sm:$0xf]  ;;  %v9985_v45 = vld [vmem:[#allocation4 + $0x3f4] sm:$0xf0] }
 0x7cd   :  { %4444 = vmatpush.bf16.msrb.mxu3 %v8055_v49  ;;  %4419 = vmatpush.bf16.msrb.mxu1 %v7511_v17  ;;  %v10144_v27 = vld [vmem:[#allocation4 + $0x8ec] sm:$0xf0]  ;;  %v4180_v49 = vpop.f32.mrf.mxu2  ;;  %v7892_v51 = vld [vmem:[#allocation4 + $0x4b0] sm:$0xf0]  ;;  %v7383_v17 = vor.u32 %v9876_v58, %v7380_v47 }
 0x7ce   :  { %v8435_v18 = vor.u32 %v10144_v27, %v8434_v30  ;;  %v8402_v52 = vld [vmem:[#allocation4 + $0x890] sm:$0xf]  ;;  %v4181_v44 = vadd.f32 %v4180_v49, %v4168_v57  ;;  %v9868_v55 = vld [vmem:[#allocation4 + $0x54] sm:$0xf]  ;;  %v4169_v63 = vpop.f32.mrf.mxu1  ;;  %v7895_v2 = vor.u32 %v10004_v50, %v7892_v51  ;;  %v7770_v49 = vld [vmem:[#allocation4 + $0x398] sm:$0xf] }
 0x7cf   :  { %4406 = vmatpush.bf16.msrb.mxu0 %v8531_v25  ;;  %4432 = vmatpush.bf16.msrb.mxu2 %v7767_v1  ;;  %v10136_v56 = vld [vmem:[#allocation4 + $0x8ac] sm:$0xf0]  ;;  %v4193_v20 = vpop.f32.mrf.mxu3  ;;  %v4156_v29 = vpop.f32.mrf.mxu0  ;;  %v7639_v1 = vor.u32 %v9940_v48, %v7636_v41  ;;  %v7348_v53 = vld [vmem:[#allocation4 + $0x70] sm:$0xf0]  ;;  %v7514_v48 = vld [vmem:[#allocation4 + $0x198] sm:$0xf] }
 0x7d0   :  { %v8403_v25 = vor.u32 %v10136_v56, %v8402_v52  ;;  %v8370_v4 = vld [vmem:[#allocation4 + $0x850] sm:$0xf]  ;;  %v9932_v54 = vld [vmem:[#allocation4 + $0x254] sm:$0xf]  ;;  %v7351_v12 = vor.u32 %v9868_v55, %v7348_v53  ;;  %v9913_v41 = vld [vmem:[#allocation4 + $0x1b4] sm:$0xf0] }
 0x7d1   :  { %4445 = vmatpush.bf16.msrb.mxu3 %v8023_v62  ;;  %4420 = vmatpush.bf16.msrb.mxu1 %v7479_v8  ;;  %v10128_v37 = vld [vmem:[#allocation4 + $0x86c] sm:$0xf0]  ;;  %v12124_v62 = vadd.f32 %v4193_v20, %v4181_v44  ;;  %v7604_v61 = vld [vmem:[#allocation4 + $0x270] sm:$0xf0]  ;;  %v9977_v20 = vld [vmem:[#allocation4 + $0x3b4] sm:$0xf0]  ;;  %v7515_v44 = vor.u32 %v9913_v41, %v7514_v48 }
 0x7d2   :  { %v7860_v8 = vld [vmem:[#allocation4 + $0x470] sm:$0xf0]  ;;  %v8338_v10 = vld [vmem:[#allocation4 + $0x810] sm:$0xf]  ;;  %v9905_v55 = vld [vmem:[#allocation4 + $0x174] sm:$0xf0] }
 0x7d3   :  { %4407 = vmatpush.bf16.msrb.mxu0 %v8499_v6  ;;  %4433 = vmatpush.bf16.msrb.mxu2 %v7735_v9  ;;  %v9996_v6 = vld [vmem:[#allocation4 + $0x454] sm:$0xf]  ;;  %v8371_v9 = vor.u32 %v10128_v37, %v8370_v4  ;;  %v10120_v11 = vld [vmem:[#allocation4 + $0x82c] sm:$0xf0]  ;;  %v7482_v37 = vld [vmem:[#allocation4 + $0x158] sm:$0xf] }
 0x7d4   :  { %v9860_v14 = vld [vmem:[#allocation4 + $0x14] sm:$0xf]  ;;  %v7863_v24 = vor.u32 %v9996_v6, %v7860_v8  ;;  %v8339_v21 = vor.u32 %v10120_v11, %v8338_v10  ;;  %v7738_v63 = vld [vmem:[#allocation4 + $0x358] sm:$0xf] }
 0x7d5   :  { %4446 = vmatpush.bf16.msrb.mxu3 %v7991_v13  ;;  %4421 = vmatpush.bf16.msrb.mxu1 %v7447_v46  ;;  %v7607_v13 = vor.u32 %v9932_v54, %v7604_v61  ;;  %v7316_v15 = vld [vmem:[#allocation4 + $0x30] sm:$0xf0]  ;;  %v7483_v61 = vor.u32 %v9905_v55, %v7482_v37  ;;  %v7642_v41 = vld [vmem:[#allocation4 + $0x298] sm:$0xf] }
 0x7d6   :  { %v9924_v23 = vld [vmem:[#allocation4 + $0x214] sm:$0xf]  ;;  %v7319_v38 = vor.u32 %v9860_v14, %v7316_v15  ;;  %v7706_v14 = vld [vmem:[#allocation4 + $0x318] sm:$0xf] }
 0x7d7   :  { %4408 = vmatpush.bf16.msrb.mxu0 %v8467_v16  ;;  %4434 = vmatpush.bf16.msrb.mxu2 %v7703_v26  ;;  %v7572_v31 = vld [vmem:[#allocation4 + $0x230] sm:$0xf0]  ;;  %v4182_v16 = vpop.f32.mrf.mxu2  ;;  %v4195_v30 = vpop.f32.mrf.mxu3  ;;  %v9961_v15 = vld [vmem:[#allocation4 + $0x334] sm:$0xf0] }
 0x7d8   :  { %v9988_v34 = vld [vmem:[#allocation4 + $0x414] sm:$0xf]  ;;  %v7575_v39 = vor.u32 %v9924_v23, %v7572_v31 }
 0x7d9   :  { %4447 = vmatpush.bf16.msrb.mxu3 %v7959_v35  ;;  %4422 = vmatpush.bf16.msrb.mxu1 %v7415_v59  ;;  %v7828_v32 = vld [vmem:[#allocation4 + $0x430] sm:$0xf0]  ;;  %v9921_v35 = vld [vmem:[#allocation4 + $0x1f4] sm:$0xf0] }
 0x7da   :  { %v10108_v46 = vld [vmem:[#allocation4 + $0x7d4] sm:$0xf]  ;;  %v7831_v57 = vor.u32 %v9988_v34, %v7828_v32 }
 0x7db   :  { %4409 = vmatpush.bf16.msrb.mxu0 %v8435_v18  ;;  %4435 = vmatpush.bf16.msrb.mxu2 %v7671_v0  ;;  %v8308_v26 = vld [vmem:[#allocation4 + $0x7f0] sm:$0xf0]  ;;  %v7547_v0 = vor.u32 %v9921_v35, %v7546_v7  ;;  %v9889_v7 = vld [vmem:[#allocation4 + $0xf4] sm:$0xf0] }
 0x7dc   :  { %v10172_v27 = vld [vmem:[#allocation4 + $0x9d4] sm:$0xf]  ;;  %v8311_v18 = vor.u32 %v10108_v46, %v8308_v26 }
 0x7dd   :  { %4448 = vmatpush.bf16.msrb.mxu3 %v7927_v42  ;;  %4423 = vmatpush.bf16.msrb.mxu1 %v7383_v17  ;;  %v8564_v28 = vld [vmem:[#allocation4 + $0x9f0] sm:$0xf0]  ;;  %v7803_v42 = vor.u32 %v9985_v45, %v7802_v43  ;;  %v2479_v43 = vperm.slane %v12106_v5, 2 }
 0x7de   :  { %v8567_v59 = vor.u32 %v10172_v27, %v8564_v28  ;;  %v10100_v52 = vld [vmem:[#allocation4 + $0x794] sm:$0xf]  ;;  %v7707_v27 = vor.u32 %v9961_v15, %v7706_v14  ;;  %v7418_v28 = vld [vmem:[#allocation4 + $0xd8] sm:$0xf] }
 0x7df   :  { %4410 = vmatpush.bf16.msrb.mxu0 %v8403_v25  ;;  %4436 = vmatpush.bf16.msrb.mxu2 %v7639_v1  ;;  %v8276_v56 = vld [vmem:[#allocation4 + $0x7b0] sm:$0xf0]  ;;  %v7771_v1 = vor.u32 %v9977_v20, %v7770_v49  ;;  %v9945_v49 = vld [vmem:[#allocation4 + $0x2b4] sm:$0xf0] }
 0x7e0   :  { %v10164_v58 = vld [vmem:[#allocation4 + $0x994] sm:$0xf]  ;;  %v8279_v50 = vor.u32 %v10100_v52, %v8276_v56  ;;  %v7643_v55 = vor.u32 %v9945_v49, %v7642_v41  ;;  %v7322_v14 = vld [vmem:[#allocation4 + $0x18] sm:$0xf]  ;;  %v9909_v41 = vld [vmem:[#allocation4 + $0x19c] sm:$0xf] }
 0x7e1   :  { %4449 = vmatpush.bf16.msrb.mxu3 %v7895_v2  ;;  %4424 = vmatpush.bf16.msrb.mxu1 %v7351_v12  ;;  %v8532_v47 = vld [vmem:[#allocation4 + $0x9b0] sm:$0xf0]  ;;  %v9969_v2 = vld [vmem:[#allocation4 + $0x374] sm:$0xf0]  ;;  %v7516_v49 = vld [vmem:[#allocation4 + $0x1b8] sm:$0xf0] }
 0x7e2   :  { %v8535_v51 = vor.u32 %v10164_v58, %v8532_v47  ;;  %v10092_v29 = vld [vmem:[#allocation4 + $0x754] sm:$0xf]  ;;  %v7739_v10 = vor.u32 %v9969_v2, %v7738_v63  ;;  %v7450_v12 = vld [vmem:[#allocation4 + $0x118] sm:$0xf] }
 0x7e3   :  { %4411 = vmatpush.bf16.msrb.mxu0 %v8371_v9  ;;  %4437 = vmatpush.bf16.msrb.mxu2 %v7607_v13  ;;  %v8244_v25 = vld [vmem:[#allocation4 + $0x770] sm:$0xf0]  ;;  %v9897_v13 = vld [vmem:[#allocation4 + $0x134] sm:$0xf0] }
 0x7e4   :  { %v10156_v17 = vld [vmem:[#allocation4 + $0x954] sm:$0xf]  ;;  %v8247_v53 = vor.u32 %v10092_v29, %v8244_v25  ;;  %v7451_v16 = vor.u32 %v9897_v13, %v7450_v12  ;;  %v9881_v47 = vld [vmem:[#allocation4 + $0xb4] sm:$0xf0] }
 0x7e5   :  { %4450 = vmatpush.bf16.msrb.mxu3 %v7863_v24  ;;  %4425 = vmatpush.bf16.msrb.mxu1 %v7319_v38  ;;  %v8500_v4 = vld [vmem:[#allocation4 + $0x970] sm:$0xf0]  ;;  %v4219_v34 = vpop.f32.mrf.mxu1  ;;  %v7674_v38 = vld [vmem:[#allocation4 + $0x2d8] sm:$0xf] }
 0x7e6   :  { %v8503_v54 = vor.u32 %v10156_v17, %v8500_v4  ;;  %v10084_v6 = vld [vmem:[#allocation4 + $0x714] sm:$0xf]  ;;  %v7354_v2 = vld [vmem:[#allocation4 + $0x58] sm:$0xf] }
 0x7e7   :  { %4412 = vmatpush.bf16.msrb.mxu0 %v8339_v21  ;;  %4438 = vmatpush.bf16.msrb.mxu2 %v7575_v39  ;;  %v8212_v8 = vld [vmem:[#allocation4 + $0x730] sm:$0xf0]  ;;  %v4206_v23 = vpop.f32.mrf.mxu0  ;;  %v9953_v39 = vld [vmem:[#allocation4 + $0x2f4] sm:$0xf0] }
 0x7e8   :  { %4426 = vmatmul.bf16.vlgmr.msrb.gmra.mxu1 %v12071_v33  ;;  %v10148_v9 = vld [vmem:[#allocation4 + $0x914] sm:$0xf]  ;;  %v8215_v24 = vor.u32 %v10084_v6, %v8212_v8  ;;  %v4207_v31 = vadd.f32 %v4206_v23, %v12124_v62  ;;  %v7675_v56 = vor.u32 %v9953_v39, %v7674_v38  ;;  %v9865_v23 = vld [vmem:[#allocation4 + $0x34] sm:$0xf0]  ;;  %v9917_v39 = vld [vmem:[#allocation4 + $0x1dc] sm:$0xf] }
 0x7e9   :  { %4451 = vmatpush.bf16.msrb.mxu3 %v7831_v57  ;;  %4470 = vmatpush.bf16.msra.mxu1 %v8567_v59  ;;  %v8468_v11 = vld [vmem:[#allocation4 + $0x930] sm:$0xf0]  ;;  %v7323_v38 = vor.u32 %v9865_v23, %v7322_v14  ;;  %v7452_v14 = vld [vmem:[#allocation4 + $0x138] sm:$0xf0] }
 0x7ea   :  { %4413 = vmatmul.bf16.vlgmr.msrb.gmra.mxu0 %v12088_v36  ;;  %4439 = vmatmul.bf16.vlgmr.msrb.gmra.mxu2 %v12073_v60  ;;  %v8471_v32 = vor.u32 %v10148_v9, %v8468_v11  ;;  %v10076_v30 = vld [vmem:[#allocation4 + $0x6d4] sm:$0xf]  ;;  %v12131_v35 = vadd.f32 %v4219_v34, %v4207_v31  ;;  %v9929_v31 = vld [vmem:[#allocation4 + $0x234] sm:$0xf0] }
 0x7eb   :  { %4457 = vmatpush.bf16.msra.mxu0 %v8311_v18  ;;  %4483 = vmatpush.bf16.msra.mxu2 %v7547_v0  ;;  %v8180_v46 = vld [vmem:[#allocation4 + $0x6f0] sm:$0xf0]  ;;  %v7419_v18 = vor.u32 %v9889_v7, %v7418_v28  ;;  %v10177_v28 = vld [vmem:[#allocation4 + $0x9f4] sm:$0xf0] }
 0x7ec   :  { %4452 = vmatmul.bf16.vlgmr.msrb.gmra.mxu3 %v12075_v3  ;;  %v10140_v26 = vld [vmem:[#allocation4 + $0x8d4] sm:$0xf]  ;;  %v8183_v62 = vor.u32 %v10076_v30, %v8180_v46  ;;  %v4614_v45 = vmax.f32 %v12131_v35, 0.0  ;;  %v8314_v30 = vld [vmem:[#allocation4 + $0x7d8] sm:$0xf] }
 0x7ed   :  { %4496 = vmatpush.bf16.msra.mxu3 %v7803_v42  ;;  %4471 = vmatpush.bf16.msra.mxu1 %v8535_v51  ;;  %v8436_v21 = vld [vmem:[#allocation4 + $0x8f0] sm:$0xf0]  ;;  %v7386_v42 = vld [vmem:[#allocation4 + $0x98] sm:$0xf]  ;;  %v4232_v48 = vpop.f32.mrf.mxu2 }
 0x7ee   :  { %v8439_v57 = vor.u32 %v10140_v26, %v8436_v21  ;;  %v10068_v59 = vld [vmem:[#allocation4 + $0x694] sm:$0xf]  ;;  %v4233_v5 = vadd.f32 %v4232_v48, %v2479_v43  ;;  %v7387_v25 = vor.u32 %v9881_v47, %v7386_v42  ;;  %v8570_v21 = vld [vmem:[#allocation4 + $0x9d8] sm:$0xf]  ;;  %v7548_v43 = vld [vmem:[#allocation4 + $0x1f8] sm:$0xf0] }
 0x7ef   :  { %4458 = vmatpush.bf16.msra.mxu0 %v8279_v50  ;;  %4484 = vmatpush.bf16.msra.mxu2 %v7515_v44  ;;  %v8148_v0 = vld [vmem:[#allocation4 + $0x6b0] sm:$0xf0]  ;;  %v4245_v20 = vpop.f32.mrf.mxu3  ;;  %v4208_v50 = vpop.f32.mrf.mxu0  ;;  %v10105_v42 = vld [vmem:[#allocation4 + $0x7b4] sm:$0xf0] }
 0x7f0   :  { %v10132_v52 = vld [vmem:[#allocation4 + $0x894] sm:$0xf]  ;;  %v8151_v51 = vor.u32 %v10068_v59, %v8148_v0  ;;  %v4221_v44 = vpop.f32.mrf.mxu1  ;;  %v12135_v37 = vadd.f32 %v4245_v20, %v4233_v5  ;;  %v8571_v59 = vor.u32 %v10177_v28, %v8570_v21  ;;  %v8026_v0 = vld [vmem:[#allocation4 + $0x598] sm:$0xf] }
 0x7f1   :  { %4497 = vmatpush.bf16.msra.mxu3 %v7771_v1  ;;  %4472 = vmatpush.bf16.msra.mxu1 %v8503_v54  ;;  %v8404_v58 = vld [vmem:[#allocation4 + $0x8b0] sm:$0xf0]  ;;  %v7610_v54 = vld [vmem:[#allocation4 + $0x258] sm:$0xf] }
 0x7f2   :  { %v8407_v29 = vor.u32 %v10132_v52, %v8404_v58  ;;  %v10060_v17 = vld [vmem:[#allocation4 + $0x654] sm:$0xf]  ;;  %v10041_v52 = vld [vmem:[#allocation4 + $0x5b4] sm:$0xf0]  ;;  %v7551_v58 = vor.u32 %v9917_v39, %v7548_v43 }
 0x7f3   :  { %4459 = vmatpush.bf16.msra.mxu0 %v8247_v53  ;;  %4485 = vmatpush.bf16.msra.mxu2 %v7483_v61  ;;  %v8116_v1 = vld [vmem:[#allocation4 + $0x670] sm:$0xf0]  ;;  %v9873_v53 = vld [vmem:[#allocation4 + $0x74] sm:$0xf0]  ;;  %v8027_v5 = vor.u32 %v10041_v52, %v8026_v0 }
 0x7f4   :  { %v10124_v4 = vld [vmem:[#allocation4 + $0x854] sm:$0xf]  ;;  %v9937_v61 = vld [vmem:[#allocation4 + $0x274] sm:$0xf0]  ;;  %v8119_v6 = vor.u32 %v10060_v17, %v8116_v1  ;;  %v7355_v11 = vor.u32 %v9873_v53, %v7354_v2 }
 0x7f5   :  { %4498 = vmatpush.bf16.msra.mxu3 %v7739_v10  ;;  %4473 = vmatpush.bf16.msra.mxu1 %v8471_v32  ;;  %v8372_v63 = vld [vmem:[#allocation4 + $0x870] sm:$0xf0]  ;;  %v7611_v15 = vor.u32 %v9937_v61, %v7610_v54  ;;  %v4234_v34 = vpop.f32.mrf.mxu2  ;;  %v8058_v32 = vld [vmem:[#allocation4 + $0x5d8] sm:$0xf] }
 0x7f6   :  { %v10052_v8 = vld [vmem:[#allocation4 + $0x614] sm:$0xf]  ;;  %v8375_v10 = vor.u32 %v10124_v4, %v8372_v63  ;;  %v8538_v47 = vld [vmem:[#allocation4 + $0x998] sm:$0xf]  ;;  %v7484_v63 = vld [vmem:[#allocation4 + $0x178] sm:$0xf0] }
 0x7f7   :  { %4460 = vmatpush.bf16.msra.mxu0 %v8215_v24  ;;  %4486 = vmatpush.bf16.msra.mxu2 %v7451_v16  ;;  %v8084_v9 = vld [vmem:[#allocation4 + $0x630] sm:$0xf0]  ;;  %v7578_v24 = vld [vmem:[#allocation4 + $0x218] sm:$0xf]  ;;  %v4247_v46 = vpop.f32.mrf.mxu3 }
 0x7f8   :  { %v10116_v12 = vld [vmem:[#allocation4 + $0x814] sm:$0xf]  ;;  %v10049_v16 = vld [vmem:[#allocation4 + $0x5f4] sm:$0xf0]  ;;  %v8087_v26 = vor.u32 %v10052_v8, %v8084_v9 }
 0x7f9   :  { %4499 = vmatpush.bf16.msra.mxu3 %v7707_v27  ;;  %4474 = vmatpush.bf16.msra.mxu1 %v8439_v57  ;;  %v8340_v13 = vld [vmem:[#allocation4 + $0x830] sm:$0xf0]  ;;  %v10113_v27 = vld [vmem:[#allocation4 + $0x7f4] sm:$0xf0]  ;;  %v8059_v57 = vor.u32 %v10049_v16, %v8058_v32 }
 0x7fa   :  { %v8343_v7 = vor.u32 %v10116_v12, %v8340_v13  ;;  %v10169_v48 = vld [vmem:[#allocation4 + $0x9b4] sm:$0xf0]  ;;  %v9893_v13 = vld [vmem:[#allocation4 + $0x11c] sm:$0xf] }
 0x7fb   :  { %4461 = vmatpush.bf16.msra.mxu0 %v8183_v62  ;;  %4487 = vmatpush.bf16.msra.mxu2 %v7419_v18  ;;  %v7579_v62 = vor.u32 %v9929_v31, %v7578_v24  ;;  %v8315_v18 = vor.u32 %v10113_v27, %v8314_v30  ;;  %v8539_v50 = vor.u32 %v10169_v48, %v8538_v47  ;;  %v10033_v44 = vld [vmem:[#allocation4 + $0x574] sm:$0xf0]  ;;  %v9877_v48 = vld [vmem:[#allocation4 + $0x9c] sm:$0xf] }
 0x7fc   :  { %v10097_v17 = vld [vmem:[#allocation4 + $0x774] sm:$0xf0] }
 0x7fd   :  { %4500 = vmatpush.bf16.msra.mxu3 %v7675_v56  ;;  %4475 = vmatpush.bf16.msra.mxu1 %v8407_v29  ;;  %v8282_v56 = vld [vmem:[#allocation4 + $0x798] sm:$0xf] }
 0x7fe   :  { %v8283_v20 = vor.u32 %v10105_v42, %v8282_v56  ;;  %v8250_v29 = vld [vmem:[#allocation4 + $0x758] sm:$0xf] }
 0x7ff   :  { %4462 = vmatpush.bf16.msra.mxu0 %v8151_v51  ;;  %4488 = vmatpush.bf16.msra.mxu2 %v7387_v25  ;;  %v7994_v51 = vld [vmem:[#allocation4 + $0x558] sm:$0xf]  ;;  %v7519_v25 = vor.u32 %v9909_v41, %v7516_v49  ;;  %v8251_v53 = vor.u32 %v10097_v17, %v8250_v29  ;;  %v7388_v41 = vld [vmem:[#allocation4 + $0xb8] sm:$0xf0] }
 0x800   :  { %v8506_v1 = vld [vmem:[#allocation4 + $0x958] sm:$0xf]  ;;  %v7995_v2 = vor.u32 %v10033_v44, %v7994_v51 }
 0x801   :  { %4501 = vmatpush.bf16.msra.mxu3 %v7643_v55  ;;  %4476 = vmatpush.bf16.msra.mxu1 %v8375_v10  ;;  %v10161_v4 = vld [vmem:[#allocation4 + $0x974] sm:$0xf0]  ;;  %v9901_v55 = vld [vmem:[#allocation4 + $0x15c] sm:$0xf] }
 0x802   :  { %v8507_v54 = vor.u32 %v10161_v4, %v8506_v1  ;;  %v7962_v61 = vld [vmem:[#allocation4 + $0x518] sm:$0xf]  ;;  %v7487_v9 = vor.u32 %v9901_v55, %v7484_v63  ;;  %v7391_v4 = vor.u32 %v9877_v48, %v7388_v41  ;;  %v10165_v48 = vld [vmem:[#allocation4 + $0x99c] sm:$0xf] }
 0x803   :  { %4463 = vmatpush.bf16.msra.mxu0 %v8119_v6  ;;  %4489 = vmatpush.bf16.msra.mxu2 %v7355_v11  ;;  %v10025_v6 = vld [vmem:[#allocation4 + $0x534] sm:$0xf0]  ;;  %v8540_v41 = vld [vmem:[#allocation4 + $0x9b8] sm:$0xf0] }
 0x804   :  { %v8218_v8 = vld [vmem:[#allocation4 + $0x718] sm:$0xf] }
 0x805   :  { %4502 = vmatpush.bf16.msra.mxu3 %v7611_v15  ;;  %4477 = vmatpush.bf16.msra.mxu1 %v8343_v7  ;;  %v10089_v10 = vld [vmem:[#allocation4 + $0x734] sm:$0xf0]  ;;  %v7963_v15 = vor.u32 %v10025_v6, %v7962_v61  ;;  %v4271_v24 = vpop.f32.mrf.mxu1  ;;  %v9885_v7 = vld [vmem:[#allocation4 + $0xdc] sm:$0xf] }
 0x806   :  { %v8474_v11 = vld [vmem:[#allocation4 + $0x918] sm:$0xf]  ;;  %v8219_v31 = vor.u32 %v10089_v10, %v8218_v8 }
 0x807   :  { %4464 = vmatpush.bf16.msra.mxu0 %v8087_v26  ;;  %4490 = vmatpush.bf16.msra.mxu2 %v7323_v38  ;;  %v10153_v12 = vld [vmem:[#allocation4 + $0x934] sm:$0xf0]  ;;  %v4258_v23 = vpop.f32.mrf.mxu0  ;;  %v7455_v26 = vor.u32 %v9893_v13, %v7452_v14  ;;  %v7420_v38 = vld [vmem:[#allocation4 + $0xf8] sm:$0xf0] }
 0x808   :  { %4478 = vmatmul.bf16.vlgmr.msra.gmra.mxu1 %v12088_v36  ;;  %v8475_v34 = vor.u32 %v10153_v12, %v8474_v11  ;;  %v7930_v32 = vld [vmem:[#allocation4 + $0x4d8] sm:$0xf]  ;;  %v4259_v46 = vadd.f32 %v4258_v23, %v12135_v37  ;;  %v7423_v37 = vor.u32 %v9885_v7, %v7420_v38  ;;  %v10173_v38 = vld [vmem:[#allocation4 + $0x9dc] sm:$0xf] }
 0x809   :  { %4503 = vmatpush.bf16.msra.mxu3 %v7579_v62  ;;  %4522 = vmatpush.bf16.msrb.mxu1 %v8315_v18  ;;  %v10017_v16 = vld [vmem:[#allocation4 + $0x4f4] sm:$0xf0] }
 0x80a   :  { %4465 = vmatmul.bf16.vlgmr.msra.gmra.mxu0 %v12077_v22  ;;  %4491 = vmatmul.bf16.vlgmr.msra.gmra.mxu2 %v12071_v33  ;;  %v8186_v30 = vld [vmem:[#allocation4 + $0x6d8] sm:$0xf]  ;;  %v4272_v39 = vadd.f32 %v4271_v24, %v4259_v46  ;;  %v7931_v43 = vor.u32 %v10017_v16, %v7930_v32  ;;  %v9861_v24 = vld [vmem:[#allocation4 + $0x1c] sm:$0xf] }
 0x80b   :  { %4509 = vmatpush.bf16.msrb.mxu0 %v8059_v57  ;;  %4535 = vmatpush.bf16.msrb.mxu2 %v8571_v59  ;;  %v10081_v27 = vld [vmem:[#allocation4 + $0x6f4] sm:$0xf0]  ;;  %v7804_v32 = vld [vmem:[#allocation4 + $0x3f8] sm:$0xf0] }
 0x80c   :  { %4504 = vmatmul.bf16.vlgmr.msra.gmra.mxu3 %v12073_v60  ;;  %v8442_v21 = vld [vmem:[#allocation4 + $0x8d8] sm:$0xf]  ;;  %v8187_v62 = vor.u32 %v10081_v27, %v8186_v30  ;;  %v10045_v16 = vld [vmem:[#allocation4 + $0x5dc] sm:$0xf] }
 0x80d   :  { %4548 = vmatpush.bf16.msrb.mxu3 %v7551_v58  ;;  %4523 = vmatpush.bf16.msrb.mxu1 %v8283_v20  ;;  %v10145_v28 = vld [vmem:[#allocation4 + $0x8f4] sm:$0xf0]  ;;  %v4284_v52 = vpop.f32.mrf.mxu2  ;;  %v4273_v51 = vpop.f32.mrf.mxu1  ;;  %v10109_v27 = vld [vmem:[#allocation4 + $0x7dc] sm:$0xf] }
 0x80e   :  { %v8443_v57 = vor.u32 %v10145_v28, %v8442_v21  ;;  %v7898_v18 = vld [vmem:[#allocation4 + $0x498] sm:$0xf]  ;;  %v12142_v47 = vadd.f32 %v4284_v52, %v4272_v39  ;;  %v8316_v21 = vld [vmem:[#allocation4 + $0x7f8] sm:$0xf0] }
 0x80f   :  { %4510 = vmatpush.bf16.msrb.mxu0 %v8027_v5  ;;  %4536 = vmatpush.bf16.msrb.mxu2 %v8539_v50  ;;  %v10009_v59 = vld [vmem:[#allocation4 + $0x4b4] sm:$0xf0]  ;;  %v12144_v49 = vpop.f32.mrf.mxu3  ;;  %v4260_v50 = vpop.f32.mrf.mxu0  ;;  %v8572_v39 = vld [vmem:[#allocation4 + $0x9f8] sm:$0xf0] }
 0x810   :  { %v8154_v0 = vld [vmem:[#allocation4 + $0x698] sm:$0xf]  ;;  %v7899_v5 = vor.u32 %v10009_v59, %v7898_v18  ;;  %v4615_v20 = vmax.f32 %v12142_v47, 0.0  ;;  %v8319_v18 = vor.u32 %v10109_v27, %v8316_v21  ;;  %v9973_v59 = vld [vmem:[#allocation4 + $0x39c] sm:$0xf]  ;;  %v12147_v50 = vld [vmem:[#allocation12] sm:$0xff] }
 0x811   :  { %4549 = vmatpush.bf16.msrb.mxu3 %v7519_v25  ;;  %4524 = vmatpush.bf16.msrb.mxu1 %v8251_v53  ;;  %v10073_v56 = vld [vmem:[#allocation4 + $0x6b4] sm:$0xf0]  ;;  %v9869_v53 = vld [vmem:[#allocation4 + $0x5c] sm:$0xf]  ;;  %v2480_v51 = vperm.slane %v12147_v50, 3 }
 0x812   :  { %v8410_v58 = vld [vmem:[#allocation4 + $0x898] sm:$0xf]  ;;  %v8155_v44 = vor.u32 %v10073_v56, %v8154_v0  ;;  %v7772_v0 = vld [vmem:[#allocation4 + $0x3b8] sm:$0xf0] }
 0x813   :  { %4511 = vmatpush.bf16.msrb.mxu0 %v7995_v2  ;;  %4537 = vmatpush.bf16.msrb.mxu2 %v8507_v54  ;;  %v10137_v42 = vld [vmem:[#allocation4 + $0x8b4] sm:$0xf0]  ;;  %v7356_v54 = vld [vmem:[#allocation4 + $0x78] sm:$0xf0] }
 0x814   :  { %v8411_v29 = vor.u32 %v10137_v42, %v8410_v58  ;;  %v7866_v25 = vld [vmem:[#allocation4 + $0x458] sm:$0xf]  ;;  %v10037_v52 = vld [vmem:[#allocation4 + $0x59c] sm:$0xf] }
 0x815   :  { %4550 = vmatpush.bf16.msrb.mxu3 %v7487_v9  ;;  %4525 = vmatpush.bf16.msrb.mxu1 %v8219_v31  ;;  %v10001_v17 = vld [vmem:[#allocation4 + $0x474] sm:$0xf0]  ;;  %v4286_v14 = vpop.f32.mrf.mxu2  ;;  %v7324_v31 = vld [vmem:[#allocation4 + $0x38] sm:$0xf0] }
 0x816   :  { %v8122_v1 = vld [vmem:[#allocation4 + $0x658] sm:$0xf]  ;;  %v7867_v61 = vor.u32 %v10001_v17, %v7866_v25  ;;  %v8028_v56 = vld [vmem:[#allocation4 + $0x5b8] sm:$0xf0] }
 0x817   :  { %4512 = vmatpush.bf16.msrb.mxu0 %v7963_v15  ;;  %4538 = vmatpush.bf16.msrb.mxu2 %v8475_v34  ;;  %v10065_v55 = vld [vmem:[#allocation4 + $0x674] sm:$0xf0]  ;;  %v7359_v15 = vor.u32 %v9869_v53, %v7356_v54  ;;  %v9981_v34 = vld [vmem:[#allocation4 + $0x3dc] sm:$0xf]  ;;  %v4299_v30 = vpop.f32.mrf.mxu3 }
 0x818   :  { %v8378_v63 = vld [vmem:[#allocation4 + $0x858] sm:$0xf]  ;;  %v8123_v9 = vor.u32 %v10065_v55, %v8122_v1  ;;  %v10101_v58 = vld [vmem:[#allocation4 + $0x79c] sm:$0xf] }
 0x819   :  { %4551 = vmatpush.bf16.msrb.mxu3 %v7455_v26  ;;  %4526 = vmatpush.bf16.msrb.mxu1 %v8187_v62  ;;  %v10129_v2 = vld [vmem:[#allocation4 + $0x874] sm:$0xf0]  ;;  %v8060_v26 = vld [vmem:[#allocation4 + $0x5f8] sm:$0xf0]  ;;  %v7807_v62 = vor.u32 %v9981_v34, %v7804_v32 }
 0x81a   :  { %v7834_v6 = vld [vmem:[#allocation4 + $0x418] sm:$0xf]  ;;  %v8379_v10 = vor.u32 %v10129_v2, %v8378_v63  ;;  %v8284_v42 = vld [vmem:[#allocation4 + $0x7b8] sm:$0xf0] }
 0x81b   :  { %4513 = vmatpush.bf16.msrb.mxu0 %v7931_v43  ;;  %4539 = vmatpush.bf16.msrb.mxu2 %v8443_v57  ;;  %v9993_v8 = vld [vmem:[#allocation4 + $0x434] sm:$0xf0]  ;;  %v7327_v43 = vor.u32 %v9861_v24, %v7324_v31  ;;  %v8063_v57 = vor.u32 %v10045_v16, %v8060_v26  ;;  %v9965_v25 = vld [vmem:[#allocation4 + $0x35c] sm:$0xf] }
 0x81c   :  { %v8090_v11 = vld [vmem:[#allocation4 + $0x618] sm:$0xf]  ;;  %v7835_v46 = vor.u32 %v9993_v8, %v7834_v6  ;;  %v7740_v17 = vld [vmem:[#allocation4 + $0x378] sm:$0xf0]  ;;  %v4298_v6 = vadd.f32 %v12144_v49, %v2480_v51 }
 0x81d   :  { %4552 = vmatpush.bf16.msrb.mxu3 %v7423_v37  ;;  %4527 = vmatpush.bf16.msrb.mxu1 %v8155_v44  ;;  %v10057_v12 = vld [vmem:[#allocation4 + $0x634] sm:$0xf0]  ;;  %v8575_v37 = vor.u32 %v10173_v38, %v8572_v39  ;;  %v8031_v44 = vor.u32 %v10037_v52, %v8028_v56  ;;  %v10029_v1 = vld [vmem:[#allocation4 + $0x55c] sm:$0xf] }
 0x81e   :  { %v8346_v13 = vld [vmem:[#allocation4 + $0x818] sm:$0xf]  ;;  %v8091_v28 = vor.u32 %v10057_v12, %v8090_v11  ;;  %v7996_v55 = vld [vmem:[#allocation4 + $0x578] sm:$0xf0] }
 0x81f   :  { %4514 = vmatpush.bf16.msrb.mxu0 %v7899_v5  ;;  %4540 = vmatpush.bf16.msrb.mxu2 %v8411_v29  ;;  %v10121_v23 = vld [vmem:[#allocation4 + $0x834] sm:$0xf0]  ;;  %v7775_v5 = vor.u32 %v9973_v59, %v7772_v0  ;;  %v8287_v29 = vor.u32 %v10101_v58, %v8284_v42  ;;  %v10093_v63 = vld [vmem:[#allocation4 + $0x75c] sm:$0xf]  ;;  %v7999_v8 = vor.u32 %v10029_v1, %v7996_v55 }
 0x820   :  { %v8347_v7 = vor.u32 %v10121_v23, %v8346_v13  ;;  %v8252_v2 = vld [vmem:[#allocation4 + $0x778] sm:$0xf0] }
 0x821   :  { %4553 = vmatpush.bf16.msrb.mxu3 %v7391_v4  ;;  %4528 = vmatpush.bf16.msrb.mxu1 %v8123_v9  ;;  %v8543_v4 = vor.u32 %v10165_v48, %v8540_v41  ;;  %v10157_v53 = vld [vmem:[#allocation4 + $0x95c] sm:$0xf]  ;;  %v8255_v9 = vor.u32 %v10093_v63, %v8252_v2 }
 0x822   :  { %v8508_v54 = vld [vmem:[#allocation4 + $0x978] sm:$0xf0] }
 0x823   :  { %4515 = vmatpush.bf16.msrb.mxu0 %v7867_v61  ;;  %4541 = vmatpush.bf16.msrb.mxu2 %v8379_v10  ;;  %v7743_v61 = vor.u32 %v9965_v25, %v7740_v17  ;;  %v9957_v10 = vld [vmem:[#allocation4 + $0x31c] sm:$0xf]  ;;  %v8511_v13 = vor.u32 %v10157_v53, %v8508_v54 }
 0x824   :  { %v7708_v11 = vld [vmem:[#allocation4 + $0x338] sm:$0xf0] }
 0x825   :  { %4554 = vmatpush.bf16.msrb.mxu3 %v7359_v15  ;;  %4529 = vmatpush.bf16.msrb.mxu1 %v8091_v28  ;;  %v10021_v12 = vld [vmem:[#allocation4 + $0x51c] sm:$0xf]  ;;  %v7711_v31 = vor.u32 %v9957_v10, %v7708_v11  ;;  %v4323_v27 = vpop.f32.mrf.mxu1 }
 0x826   :  { %v7964_v14 = vld [vmem:[#allocation4 + $0x538] sm:$0xf0] }
 0x827   :  { %4516 = vmatpush.bf16.msrb.mxu0 %v7835_v46  ;;  %4542 = vmatpush.bf16.msrb.mxu2 %v8347_v7  ;;  %v10085_v15 = vld [vmem:[#allocation4 + $0x71c] sm:$0xf]  ;;  %v4310_v34 = vpop.f32.mrf.mxu0  ;;  %v7967_v32 = vor.u32 %v10021_v12, %v7964_v14 }
 0x828   :  { %4530 = vmatmul.bf16.vlgmr.msrb.gmra.mxu1 %v12077_v22  ;;  %v10149_v23 = vld [vmem:[#allocation4 + $0x91c] sm:$0xf]  ;;  %v4311_v26 = vadd.f32 %v4310_v34, %v4298_v6 }
 0x829   :  { %4555 = vmatpush.bf16.msrb.mxu3 %v7327_v43  ;;  %4574 = vmatpush.bf16.msra.mxu1 %v8063_v57  ;;  %v8476_v24 = vld [vmem:[#allocation4 + $0x938] sm:$0xf0] }
 0x82a   :  { %4543 = vmatmul.bf16.vlgmr.msrb.gmra.mxu2 %v12088_v36  ;;  %4517 = vmatmul.bf16.vlgmr.msrb.gmra.mxu0 %v12075_v3  ;;  %v9949_v49 = vld [vmem:[#allocation4 + $0x2dc] sm:$0xf]  ;;  %v8479_v21 = vor.u32 %v10149_v23, %v8476_v24 }
 0x82b   :  { %4561 = vmatpush.bf16.msra.mxu0 %v7807_v62  ;;  %4587 = vmatpush.bf16.msra.mxu2 %v8319_v18  ;;  %v7676_v30 = vld [vmem:[#allocation4 + $0x2f8] sm:$0xf0]  ;;  %v4324_v62 = vadd.f32 %v4323_v27, %v4311_v26 }
 0x82c   :  { %4556 = vmatmul.bf16.vlgmr.msrb.gmra.mxu3 %v12071_v33  ;;  %v8220_v33 = vld [vmem:[#allocation4 + $0x738] sm:$0xf0]  ;;  %v7679_v57 = vor.u32 %v9949_v49, %v7676_v30 }
 0x82d   :  { %4600 = vmatpush.bf16.msra.mxu3 %v8575_v37  ;;  %4575 = vmatpush.bf16.msra.mxu1 %v8031_v44  ;;  %v8223_v16 = vor.u32 %v10085_v15, %v8220_v33  ;;  %v10013_v46 = vld [vmem:[#allocation4 + $0x4dc] sm:$0xf]  ;;  %v4336_v56 = vpop.f32.mrf.mxu2 }
 0x82e   :  { %v7932_v28 = vld [vmem:[#allocation4 + $0x4f8] sm:$0xf0] }
 0x82f   :  { %4562 = vmatpush.bf16.msra.mxu0 %v7775_v5  ;;  %4588 = vmatpush.bf16.msra.mxu2 %v8287_v29  ;;  %v10077_v7 = vld [vmem:[#allocation4 + $0x6dc] sm:$0xf]  ;;  %v7935_v18 = vor.u32 %v10013_v46, %v7932_v28  ;;  %v4337_v5 = vadd.f32 %v4336_v56, %v4324_v62  ;;  %v4349_v51 = vpop.f32.mrf.mxu3 }
 0x830   :  { %v8188_v38 = vld [vmem:[#allocation4 + $0x6f8] sm:$0xf0] }
 0x831   :  { %4601 = vmatpush.bf16.msra.mxu3 %v8543_v4  ;;  %4576 = vmatpush.bf16.msra.mxu1 %v7999_v8  ;;  %v10141_v39 = vld [vmem:[#allocation4 + $0x8dc] sm:$0xf]  ;;  %v8191_v59 = vor.u32 %v10077_v7, %v8188_v38  ;;  %v12155_v17 = vadd.f32 %v4349_v51, %v4337_v5  ;;  %v4312_v4 = vpop.f32.mrf.mxu0  ;;  %v2481_v38 = vperm.slane %v12147_v50, 4 }
 0x832   :  { %v8444_v43 = vld [vmem:[#allocation4 + $0x8f8] sm:$0xf0] }
 0x833   :  { %4563 = vmatpush.bf16.msra.mxu0 %v7743_v61  ;;  %4589 = vmatpush.bf16.msra.mxu2 %v8255_v9  ;;  %v9941_v0 = vld [vmem:[#allocation4 + $0x29c] sm:$0xf]  ;;  %v8447_v58 = vor.u32 %v10141_v39, %v8444_v43  ;;  %v4325_v61 = vpop.f32.mrf.mxu1  ;;  %v4616_v8 = vmax.f32 %v12155_v17, 0.0 }
 0x834   :  { %v7644_v52 = vld [vmem:[#allocation4 + $0x2b8] sm:$0xf0] }
 0x835   :  { %4602 = vmatpush.bf16.msra.mxu3 %v8511_v13  ;;  %4577 = vmatpush.bf16.msra.mxu1 %v7967_v32  ;;  %v10005_v37 = vld [vmem:[#allocation4 + $0x49c] sm:$0xf]  ;;  %v7647_v25 = vor.u32 %v9941_v0, %v7644_v52 }
 0x836   :  { %v7900_v42 = vld [vmem:[#allocation4 + $0x4b8] sm:$0xf0] }
 0x837   :  { %4564 = vmatpush.bf16.msra.mxu0 %v7711_v31  ;;  %4590 = vmatpush.bf16.msra.mxu2 %v8223_v16  ;;  %v10069_v48 = vld [vmem:[#allocation4 + $0x69c] sm:$0xf]  ;;  %v7903_v55 = vor.u32 %v10005_v37, %v7900_v42  ;;  %v4338_v31 = vpop.f32.mrf.mxu2  ;;  %v4351_v30 = vpop.f32.mrf.mxu3 }
 0x838   :  { %v8156_v41 = vld [vmem:[#allocation4 + $0x6b8] sm:$0xf0] }
 0x839   :  { %4603 = vmatpush.bf16.msra.mxu3 %v8479_v21  ;;  %v10133_v44 = vld [vmem:[#allocation4 + $0x89c] sm:$0xf]  ;;  %4578 = vmatpush.bf16.msra.mxu1 %v7935_v18  ;;  %v8159_v63 = vor.u32 %v10069_v48, %v8156_v41 }
 0x83a   :  { %v8412_v29 = vld [vmem:[#allocation4 + $0x8b8] sm:$0xf0] }
 0x83b   :  { %4565 = vmatpush.bf16.msra.mxu0 %v7679_v57  ;;  %v9933_v1 = vld [vmem:[#allocation4 + $0x25c] sm:$0xf]  ;;  %4591 = vmatpush.bf16.msra.mxu2 %v8191_v59  ;;  %v8415_v6 = vor.u32 %v10133_v44, %v8412_v29 }
 0x83c   :  { %v7612_v2 = vld [vmem:[#allocation4 + $0x278] sm:$0xf0] }
 0x83d   :  { %v9997_v53 = vld [vmem:[#allocation4 + $0x45c] sm:$0xf]  ;;  %4604 = vmatpush.bf16.msra.mxu3 %v8447_v58  ;;  %v7615_v13 = vor.u32 %v9933_v1, %v7612_v2  ;;  %4579 = vmatpush.bf16.msra.mxu1 %v7903_v55 }
 0x83e   :  { %v7868_v54 = vld [vmem:[#allocation4 + $0x478] sm:$0xf0] }
 0x83f   :  { %v10061_v9 = vld [vmem:[#allocation4 + $0x65c] sm:$0xf]  ;;  %4566 = vmatpush.bf16.msra.mxu0 %v7647_v25  ;;  %4592 = vmatpush.bf16.msra.mxu2 %v8159_v63  ;;  %v7871_v14 = vor.u32 %v9997_v53, %v7868_v54 }
 0x840   :  { %v8124_v10 = vld [vmem:[#allocation4 + $0x678] sm:$0xf0] }
 0x841   :  { %v10125_v11 = vld [vmem:[#allocation4 + $0x85c] sm:$0xf]  ;;  %v8127_v15 = vor.u32 %v10061_v9, %v8124_v10  ;;  %4605 = vmatpush.bf16.msra.mxu3 %v8415_v6  ;;  %4580 = vmatpush.bf16.msra.mxu1 %v7871_v14  ;;  %v2483_v14 = vperm.slane %v12147_v50, 6 }
 0x842   :  { %v8380_v12 = vld [vmem:[#allocation4 + $0x878] sm:$0xf0] }
 0x843   :  { %v9925_v33 = vld [vmem:[#allocation4 + $0x21c] sm:$0xf]  ;;  %v8383_v34 = vor.u32 %v10125_v11, %v8380_v12  ;;  %4567 = vmatpush.bf16.msra.mxu0 %v7615_v13  ;;  %4593 = vmatpush.bf16.msra.mxu2 %v8127_v15 }
 0x844   :  { %v7580_v23 = vld [vmem:[#allocation4 + $0x238] sm:$0xf0] }
 0x845   :  { %v9989_v24 = vld [vmem:[#allocation4 + $0x41c] sm:$0xf]  ;;  %v7583_v27 = vor.u32 %v9925_v33, %v7580_v23  ;;  %4606 = vmatpush.bf16.msra.mxu3 %v8383_v34  ;;  %v4375_v62 = vpop.f32.mrf.mxu1 }
 0x846   :  { %v7836_v32 = vld [vmem:[#allocation4 + $0x438] sm:$0xf0] }
 0x847   :  { %v10053_v16 = vld [vmem:[#allocation4 + $0x61c] sm:$0xf]  ;;  %v7839_v21 = vor.u32 %v9989_v24, %v7836_v32  ;;  %4568 = vmatpush.bf16.msra.mxu0 %v7583_v27  ;;  %v4362_v39 = vpop.f32.mrf.mxu0 }
 0x848   :  { %v8092_v49 = vld [vmem:[#allocation4 + $0x638] sm:$0xf0]  ;;  %v4363_v43 = vadd.f32 %v4362_v39, %v2481_v38 }
 0x849   :  { %v10117_v46 = vld [vmem:[#allocation4 + $0x81c] sm:$0xf]  ;;  %v8095_v28 = vor.u32 %v10053_v16, %v8092_v49  ;;  %4581 = vmatpush.bf16.msra.mxu1 %v7839_v21 }
 0x84a   :  { %v8348_v26 = vld [vmem:[#allocation4 + $0x838] sm:$0xf0]  ;;  %4569 = vmatmul.bf16.vlgmr.msra.gmra.mxu0 %v12073_v60  ;;  %v4376_v57 = vadd.f32 %v4375_v62, %v4363_v43 }
 0x84b   :  { %v8351_v7 = vor.u32 %v10117_v46, %v8348_v26  ;;  %4594 = vmatpush.bf16.msra.mxu2 %v8095_v28  ;;  %v2484_v28 = vperm.slane %v12147_v50, 7 }
 0x84c   :  { %4582 = vmatmul.bf16.vlgmr.msra.gmra.mxu1 %v12075_v3  ;;  %v2482_v3 = vperm.slane %v12147_v50, 5 }
 0x84d   :  { %4607 = vmatpush.bf16.msra.mxu3 %v8351_v7  ;;  %v4388_v18 = vpop.f32.mrf.mxu2  ;;  %v4377_v56 = vpop.f32.mrf.mxu1 }
 0x84e   :  { %4595 = vmatmul.bf16.vlgmr.msra.gmra.mxu2 %v12077_v22  ;;  %v4389_v0 = vadd.f32 %v4388_v18, %v4376_v57 }
 0x84f   :  { %v4401_v59 = vpop.f32.mrf.mxu3  ;;  %v4364_v52 = vpop.f32.mrf.mxu0 }
 0x850   :  { %4608 = vmatmul.bf16.vlgmr.msra.gmra.mxu3 %v12088_v36  ;;  %v4402_v37 = vadd.f32 %v4401_v59, %v4389_v0 }
 0x855   :  { %v4390_v58 = vpop.f32.mrf.mxu2 }
 0x857   :  { %v4403_v60 = vpop.f32.mrf.mxu3 }
 0x865   :  { %v4427_v36 = vpop.f32.mrf.mxu1 }
 0x866   :  { %v4428_v41 = vadd.f32 %v4427_v36, %v2482_v3 }
 0x867   :  { %v4414_v42 = vpop.f32.mrf.mxu0 }
 0x868   :  { %v12164_v22 = vadd.f32 %v4414_v42, %v4402_v37 }
 0x86a   :  { %v4617_v48 = vmax.f32 %v12164_v22, 0.0 }
 0x86d   :  { %v4440_v5 = vpop.f32.mrf.mxu2  ;;  %v4429_v1 = vpop.f32.mrf.mxu1 }
 0x86e   :  { %v4441_v44 = vadd.f32 %v4440_v5, %v4428_v41 }
 0x86f   :  { %v4453_v51 = vpop.f32.mrf.mxu3  ;;  %v4416_v29 = vpop.f32.mrf.mxu0 }
 0x870   :  { %v4454_v25 = vadd.f32 %v4453_v51, %v4441_v44 }
 0x875   :  { %v4442_v4 = vpop.f32.mrf.mxu2 }
 0x877   :  { %v4455_v55 = vpop.f32.mrf.mxu3 }
 0x885   :  { %v4479_v53 = vpop.f32.mrf.mxu1 }
 0x887   :  { %v4466_v63 = vpop.f32.mrf.mxu0 }
 0x888   :  { %v4467_v2 = vadd.f32 %v4466_v63, %v4454_v25 }
 0x88a   :  { %v12167_v54 = vadd.f32 %v4479_v53, %v4467_v2 }
 0x88c   :  { %v4618_v61 = vmax.f32 %v12167_v54, 0.0 }
 0x88d   :  { %v4492_v6 = vpop.f32.mrf.mxu2  ;;  %v4481_v11 = vpop.f32.mrf.mxu1 }
 0x88e   :  { %v4493_v15 = vadd.f32 %v4492_v6, %v2483_v14 }
 0x88f   :  { %v4505_v9 = vpop.f32.mrf.mxu3  ;;  %v4468_v10 = vpop.f32.mrf.mxu0 }
 0x890   :  { %v4506_v33 = vadd.f32 %v4505_v9, %v4493_v15 }
 0x895   :  { %v4494_v12 = vpop.f32.mrf.mxu2 }
 0x897   :  { %v4507_v13 = vpop.f32.mrf.mxu3 }
 0x8a5   :  { %v4531_v31 = vpop.f32.mrf.mxu1 }
 0x8a7   :  { %v4518_v23 = vpop.f32.mrf.mxu0 }
 0x8a8   :  { %v4519_v24 = vadd.f32 %v4518_v23, %v4506_v33 }
 0x8aa   :  { %v4532_v34 = vadd.f32 %v4531_v31, %v4519_v24 }
 0x8ad   :  { %v4544_v32 = vpop.f32.mrf.mxu2  ;;  %v4533_v26 = vpop.f32.mrf.mxu1 }
 0x8ae   :  { %v12171_v16 = vadd.f32 %v4544_v32, %v4532_v34 }
 0x8af   :  { %v4557_v49 = vpop.f32.mrf.mxu3  ;;  %v4520_v46 = vpop.f32.mrf.mxu0 }
 0x8b0   :  { %v4619_v30 = vmax.f32 %v12171_v16, 0.0  ;;  %v4558_v7 = vadd.f32 %v4557_v49, %v2484_v28 }
 0x8b5   :  { %v4546_v27 = vpop.f32.mrf.mxu2 }
 0x8b7   :  { %v4559_v21 = vpop.f32.mrf.mxu3 }
 0x8c7   :  { %v4570_v38 = vpop.f32.mrf.mxu0 }
 0x8c8   :  { %v4571_v43 = vadd.f32 %v4570_v38, %v4558_v7 }
 0x8c9   :  { %v4583_v39 = vpop.f32.mrf.mxu1 }
 0x8ca   :  { %v4584_v62 = vadd.f32 %v4583_v39, %v4571_v43 }
 0x8cf   :  { %v4572_v0 = vpop.f32.mrf.mxu0 }
 0x8d1   :  { %v4596_v57 = vpop.f32.mrf.mxu2  ;;  %v4585_v52 = vpop.f32.mrf.mxu1 }
 0x8d2   :  { %v4597_v18 = vadd.f32 %v4596_v57, %v4584_v62 }
 0x8d3   :  { %v4609_v59 = vpop.f32.mrf.mxu3 }
 0x8d4   :  { %v12175_v37 = vadd.f32 %v4609_v59, %v4597_v18 }
 0x8d6   :  { %v4620_v56 = vmax.f32 %v12175_v37, 0.0 }
 0x8d9   :  { %v4598_v58 = vpop.f32.mrf.mxu2 }
 0x8db   :  { %v4611_v60 = vpop.f32.mrf.mxu3 }
 0x8dc   :  { %10873 = dma.done.wait [#allocation5 + $0x1], 32768 }
 0x8dd   :  { %10874 = vsyncadd [#allocation5 + $0x1], 4294934528  ;;  %v8690_v42 = vld [vmem:[#allocation4 + $0xbc0] sm:$0xf]  ;;  %v9556_v54 = vld [vmem:[#allocation4 + $0x1170] sm:$0xf0] }
 0x8de   :  { %v10208_v50 = vld [vmem:[#allocation4 + $0xbdc] sm:$0xf0]  ;;  %s7250_s26 = sshll.u32 %s12485_s10, 4  ;;  %vm7241_vm5 = vcmask 58368   ;;  %s7251_s26 = int_to_ptr.hbm [resolvable:$true] %s7250_s26 }
 0x8df   :  { %v8818_v3 = vld [vmem:[#allocation4 + $0xdc0] sm:$0xf]  ;;  %v8691_v36 = vor.u32 %v10208_v50, %v8690_v42 }
 0x8e0   :  { %v10240_v41 = vld [vmem:[#allocation4 + $0xddc] sm:$0xf0] }
 0x8e1   :  { %v8946_v5 = vld [vmem:[#allocation4 + $0xfc0] sm:$0xf]  ;;  %v8819_v44 = vor.u32 %v10240_v41, %v8818_v3  ;;  %5407 = vmatpush.bf16.msrb.mxu0 %v8691_v36 }
 0x8e2   :  { %v10272_v51 = vld [vmem:[#allocation4 + $0xfdc] sm:$0xf0] }
 0x8e3   :  { %v8947_v29 = vor.u32 %v10272_v51, %v8946_v5  ;;  %v9074_v25 = vld [vmem:[#allocation4 + $0x11c0] sm:$0xf]  ;;  %5420 = vmatpush.bf16.msrb.mxu1 %v8819_v44 }
 0x8e4   :  { %v10304_v1 = vld [vmem:[#allocation4 + $0x11dc] sm:$0xf0] }
 0x8e5   :  { %v8674_v4 = vld [vmem:[#allocation4 + $0xb80] sm:$0xf]  ;;  %v9075_v55 = vor.u32 %v10304_v1, %v9074_v25  ;;  %5433 = vmatpush.bf16.msrb.mxu2 %v8947_v29 }
 0x8e6   :  { %v10204_v63 = vld [vmem:[#allocation4 + $0xb9c] sm:$0xf0] }
 0x8e7   :  { %v8802_v2 = vld [vmem:[#allocation4 + $0xd80] sm:$0xf]  ;;  %v8675_v6 = vor.u32 %v10204_v63, %v8674_v4  ;;  %5446 = vmatpush.bf16.msrb.mxu3 %v9075_v55 }
 0x8e8   :  { %v10236_v53 = vld [vmem:[#allocation4 + $0xd9c] sm:$0xf0] }
 0x8e9   :  { %v8803_v9 = vor.u32 %v10236_v53, %v8802_v2  ;;  %v8930_v10 = vld [vmem:[#allocation4 + $0xf80] sm:$0xf]  ;;  %5408 = vmatpush.bf16.msrb.mxu0 %v8675_v6 }
 0x8ea   :  { %v10268_v11 = vld [vmem:[#allocation4 + $0xf9c] sm:$0xf0] }
 0x8eb   :  { %v9058_v12 = vld [vmem:[#allocation4 + $0x1180] sm:$0xf]  ;;  %v8931_v13 = vor.u32 %v10268_v11, %v8930_v10  ;;  %5421 = vmatpush.bf16.msrb.mxu1 %v8803_v9 }
 0x8ec   :  { %v10300_v14 = vld [vmem:[#allocation4 + $0x119c] sm:$0xf0] }
 0x8ed   :  { %v8658_v15 = vld [vmem:[#allocation4 + $0xb40] sm:$0xf]  ;;  %v9059_v23 = vor.u32 %v10300_v14, %v9058_v12  ;;  %5434 = vmatpush.bf16.msrb.mxu2 %v8931_v13 }
 0x8ee   :  { %v10200_v33 = vld [vmem:[#allocation4 + $0xb5c] sm:$0xf0] }
 0x8ef   :  { %v8786_v24 = vld [vmem:[#allocation4 + $0xd40] sm:$0xf]  ;;  %v8659_v32 = vor.u32 %v10200_v33, %v8658_v15  ;;  %5447 = vmatpush.bf16.msrb.mxu3 %v9059_v23 }
 0x8f0   :  { %v10232_v31 = vld [vmem:[#allocation4 + $0xd5c] sm:$0xf0] }
 0x8f1   :  { %v8914_v34 = vld [vmem:[#allocation4 + $0xf40] sm:$0xf]  ;;  %v8787_v27 = vor.u32 %v10232_v31, %v8786_v24  ;;  %5409 = vmatpush.bf16.msrb.mxu0 %v8659_v32 }
 0x8f2   :  { %v10264_v49 = vld [vmem:[#allocation4 + $0xf5c] sm:$0xf0] }
 0x8f3   :  { %v9042_v46 = vld [vmem:[#allocation4 + $0x1140] sm:$0xf]  ;;  %v8915_v21 = vor.u32 %v10264_v49, %v8914_v34  ;;  %5422 = vmatpush.bf16.msrb.mxu1 %v8787_v27 }
 0x8f4   :  { %v10296_v26 = vld [vmem:[#allocation4 + $0x115c] sm:$0xf0] }
 0x8f5   :  { %v8642_v28 = vld [vmem:[#allocation4 + $0xb00] sm:$0xf]  ;;  %v9043_v39 = vor.u32 %v10296_v26, %v9042_v46  ;;  %5435 = vmatpush.bf16.msrb.mxu2 %v8915_v21 }
 0x8f6   :  { %v10196_v7 = vld [vmem:[#allocation4 + $0xb1c] sm:$0xf0] }
 0x8f7   :  { %v8770_v38 = vld [vmem:[#allocation4 + $0xd00] sm:$0xf]  ;;  %v8643_v0 = vor.u32 %v10196_v7, %v8642_v28  ;;  %5448 = vmatpush.bf16.msrb.mxu3 %v9043_v39 }
 0x8f8   :  { %v10228_v43 = vld [vmem:[#allocation4 + $0xd1c] sm:$0xf0] }
 0x8f9   :  { %v8898_v62 = vld [vmem:[#allocation4 + $0xf00] sm:$0xf]  ;;  %v8771_v52 = vor.u32 %v10228_v43, %v8770_v38  ;;  %5410 = vmatpush.bf16.msrb.mxu0 %v8643_v0  ;;  %v10206_v0 = vld [vmem:[#allocation4 + $0xbc4] sm:$0xf] }
 0x8fa   :  { %v10260_v57 = vld [vmem:[#allocation4 + $0xf1c] sm:$0xf0] }
 0x8fb   :  { %v9026_v18 = vld [vmem:[#allocation4 + $0x1100] sm:$0xf]  ;;  %v8899_v58 = vor.u32 %v10260_v57, %v8898_v62  ;;  %5423 = vmatpush.bf16.msrb.mxu1 %v8771_v52  ;;  %v8692_v52 = vld [vmem:[#allocation4 + $0xbe0] sm:$0xf0] }
 0x8fc   :  { %v10292_v59 = vld [vmem:[#allocation4 + $0x111c] sm:$0xf0] }
 0x8fd   :  { %v8626_v60 = vld [vmem:[#allocation4 + $0xac0] sm:$0xf]  ;;  %v9027_v3 = vor.u32 %v10292_v59, %v9026_v18  ;;  %5436 = vmatpush.bf16.msrb.mxu2 %v8899_v58  ;;  %v10238_v58 = vld [vmem:[#allocation4 + $0xdc4] sm:$0xf] }
 0x8fe   :  { %v10192_v42 = vld [vmem:[#allocation4 + $0xadc] sm:$0xf0] }
 0x8ff   :  { %v8754_v50 = vld [vmem:[#allocation4 + $0xcc0] sm:$0xf]  ;;  %v8627_v29 = vor.u32 %v10192_v42, %v8626_v60  ;;  %5449 = vmatpush.bf16.msrb.mxu3 %v9027_v3  ;;  %v8820_v42 = vld [vmem:[#allocation4 + $0xde0] sm:$0xf0] }
 0x900   :  { %v10224_v36 = vld [vmem:[#allocation4 + $0xcdc] sm:$0xf0]  ;;  %v8948_v3 = vld [vmem:[#allocation4 + $0xfe0] sm:$0xf0] }
 0x901   :  { %v8882_v41 = vld [vmem:[#allocation4 + $0xec0] sm:$0xf]  ;;  %v8755_v25 = vor.u32 %v10224_v36, %v8754_v50  ;;  %5411 = vmatpush.bf16.msrb.mxu0 %v8627_v29  ;;  %v10270_v50 = vld [vmem:[#allocation4 + $0xfc4] sm:$0xf]  ;;  %v8695_v29 = vor.u32 %v10206_v0, %v8692_v52 }
 0x902   :  { %v10256_v5 = vld [vmem:[#allocation4 + $0xedc] sm:$0xf0]  ;;  %v8628_v0 = vld [vmem:[#allocation4 + $0xae0] sm:$0xf0] }
 0x903   :  { %v9010_v51 = vld [vmem:[#allocation4 + $0x10c0] sm:$0xf]  ;;  %v8883_v1 = vor.u32 %v10256_v5, %v8882_v41  ;;  %5424 = vmatpush.bf16.msrb.mxu1 %v8755_v25  ;;  %v10302_v5 = vld [vmem:[#allocation4 + $0x11c4] sm:$0xf]  ;;  %v8823_v25 = vor.u32 %v10238_v58, %v8820_v42 }
 0x904   :  { %v10288_v44 = vld [vmem:[#allocation4 + $0x10dc] sm:$0xf0]  ;;  %v10222_v52 = vld [vmem:[#allocation4 + $0xcc4] sm:$0xf] }
 0x905   :  { %v8610_v4 = vld [vmem:[#allocation4 + $0xa80] sm:$0xf]  ;;  %v9011_v2 = vor.u32 %v10288_v44, %v9010_v51  ;;  %5437 = vmatpush.bf16.msrb.mxu2 %v8883_v1  ;;  %v9076_v51 = vld [vmem:[#allocation4 + $0x11e0] sm:$0xf0]  ;;  %v8951_v1 = vor.u32 %v10270_v50, %v8948_v3 }
 0x906   :  { %v10188_v55 = vld [vmem:[#allocation4 + $0xa9c] sm:$0xf0]  ;;  %v10254_v42 = vld [vmem:[#allocation4 + $0xec4] sm:$0xf] }
 0x907   :  { %v8738_v63 = vld [vmem:[#allocation4 + $0xc80] sm:$0xf]  ;;  %v8611_v12 = vor.u32 %v10188_v55, %v8610_v4  ;;  %5450 = vmatpush.bf16.msrb.mxu3 %v9011_v2  ;;  %v10202_v4 = vld [vmem:[#allocation4 + $0xb84] sm:$0xf]  ;;  %v9079_v2 = vor.u32 %v10302_v5, %v9076_v51 }
 0x908   :  { %v10220_v53 = vld [vmem:[#allocation4 + $0xc9c] sm:$0xf0]  ;;  %v8676_v55 = vld [vmem:[#allocation4 + $0xba0] sm:$0xf0] }
 0x909   :  { %v8866_v6 = vld [vmem:[#allocation4 + $0xe80] sm:$0xf]  ;;  %v8739_v13 = vor.u32 %v10220_v53, %v8738_v63  ;;  %5412 = vmatpush.bf16.msrb.mxu0 %v8611_v12  ;;  %v10234_v63 = vld [vmem:[#allocation4 + $0xd84] sm:$0xf]  ;;  %v8679_v47 = vor.u32 %v10202_v4, %v8676_v55 }
 0x90a   :  { %v10252_v9 = vld [vmem:[#allocation4 + $0xe9c] sm:$0xf0]  ;;  %v8804_v53 = vld [vmem:[#allocation4 + $0xda0] sm:$0xf0] }
 0x90b   :  { %v8994_v10 = vld [vmem:[#allocation4 + $0x1080] sm:$0xf]  ;;  %v8867_v14 = vor.u32 %v10252_v9, %v8866_v6  ;;  %5425 = vmatpush.bf16.msrb.mxu1 %v8739_v13  ;;  %v10266_v6 = vld [vmem:[#allocation4 + $0xf84] sm:$0xf]  ;;  %v12186_v13 = vpack.c.bf16 %v4613_v40, %v4613_v40 }
 0x90c   :  { %v10284_v11 = vld [vmem:[#allocation4 + $0x109c] sm:$0xf0]  ;;  %v8932_v9 = vld [vmem:[#allocation4 + $0xfa0] sm:$0xf0] }
 0x90d   :  { %v8594_v15 = vld [vmem:[#allocation4 + $0xa40] sm:$0xf]  ;;  %v8995_v24 = vor.u32 %v10284_v11, %v8994_v10  ;;  %5438 = vmatpush.bf16.msrb.mxu2 %v8867_v14  ;;  %v12181_v10 = vpack.c.bf16 %v4615_v20, %v4615_v20  ;;  %v10298_v11 = vld [vmem:[#allocation4 + $0x1184] sm:$0xf]  ;;  %v12191_v14 = vpack.c.bf16 %v4616_v8, %v4616_v8  ;;  %v12196_v20 = vpack.c.bf16 %v4614_v45, %v4614_v45 }
 0x90e   :  { %v10184_v33 = vld [vmem:[#allocation4 + $0xa5c] sm:$0xf0]  ;;  %v9060_v12 = vld [vmem:[#allocation4 + $0x11a0] sm:$0xf0]  ;;  %v8935_v19 = vor.u32 %v10266_v6, %v8932_v9 }
 0x90f   :  { %v8722_v23 = vld [vmem:[#allocation4 + $0xc40] sm:$0xf]  ;;  %v8595_v26 = vor.u32 %v10184_v33, %v8594_v15  ;;  %5451 = vmatpush.bf16.msrb.mxu3 %v8995_v24  ;;  %v8807_v15 = vor.u32 %v10234_v63, %v8804_v53  ;;  %v10198_v33 = vld [vmem:[#allocation4 + $0xb44] sm:$0xf]  ;;  %v9063_v17 = vor.u32 %v10298_v11, %v9060_v12 }
 0x910   :  { %v10216_v31 = vld [vmem:[#allocation4 + $0xc5c] sm:$0xf0]  ;;  %v8660_v40 = vld [vmem:[#allocation4 + $0xb60] sm:$0xf0] }
 0x911   :  { %v8850_v34 = vld [vmem:[#allocation4 + $0xe40] sm:$0xf]  ;;  %v8723_v28 = vor.u32 %v10216_v31, %v8722_v23  ;;  %5413 = vmatpush.bf16.msrb.mxu0 %v8595_v26  ;;  %v10230_v23 = vld [vmem:[#allocation4 + $0xd44] sm:$0xf]  ;;  %v8663_v35 = vor.u32 %v10198_v33, %v8660_v40 }
 0x912   :  { %v10248_v32 = vld [vmem:[#allocation4 + $0xe5c] sm:$0xf0]  ;;  %v8788_v24 = vld [vmem:[#allocation4 + $0xd60] sm:$0xf0] }
 0x913   :  { %v8978_v49 = vld [vmem:[#allocation4 + $0x1040] sm:$0xf]  ;;  %v8851_v7 = vor.u32 %v10248_v32, %v8850_v34  ;;  %5426 = vmatpush.bf16.msrb.mxu1 %v8723_v28  ;;  %v10262_v8 = vld [vmem:[#allocation4 + $0xf44] sm:$0xf]  ;;  %v8791_v45 = vor.u32 %v10230_v23, %v8788_v24 }
 0x914   :  { %v10280_v46 = vld [vmem:[#allocation4 + $0x105c] sm:$0xf0]  ;;  %v8916_v31 = vld [vmem:[#allocation4 + $0xf60] sm:$0xf0] }
 0x915   :  { %v8578_v27 = vld [vmem:[#allocation4 + $0xa00] sm:$0xf]  ;;  %v8979_v62 = vor.u32 %v10280_v46, %v8978_v49  ;;  %5439 = vmatpush.bf16.msrb.mxu2 %v8851_v7  ;;  %v10294_v34 = vld [vmem:[#allocation4 + $0x1144] sm:$0xf]  ;;  %v8919_v49 = vor.u32 %v10262_v8, %v8916_v31 }
 0x916   :  { %v10180_v21 = vld [vmem:[#allocation4 + $0xa1c] sm:$0xf0]  ;;  %v9044_v32 = vld [vmem:[#allocation4 + $0x1160] sm:$0xf0] }
 0x917   :  { %v8706_v38 = vld [vmem:[#allocation4 + $0xc00] sm:$0xf]  ;;  %v8579_v60 = vor.u32 %v10180_v21, %v8578_v27  ;;  %5452 = vmatpush.bf16.msrb.mxu3 %v8979_v62  ;;  %v10194_v46 = vld [vmem:[#allocation4 + $0xb04] sm:$0xf]  ;;  %v9047_v21 = vor.u32 %v10294_v34, %v9044_v32 }
 0x918   :  { %v10212_v39 = vld [vmem:[#allocation4 + $0xc1c] sm:$0xf0]  ;;  %v8644_v26 = vld [vmem:[#allocation4 + $0xb20] sm:$0xf0] }
 0x919   :  { %v8834_v43 = vld [vmem:[#allocation4 + $0xe00] sm:$0xf]  ;;  %v8707_v36 = vor.u32 %v10212_v39, %v8706_v38  ;;  %5414 = vmatpush.bf16.msrb.mxu0 %v8579_v60  ;;  %v10226_v27 = vld [vmem:[#allocation4 + $0xd04] sm:$0xf]  ;;  %v8647_v62 = vor.u32 %v10194_v46, %v8644_v26 }
 0x91a   :  { %v10244_v57 = vld [vmem:[#allocation4 + $0xe1c] sm:$0xf0]  ;;  %v8772_v28 = vld [vmem:[#allocation4 + $0xd20] sm:$0xf0] }
 0x91b   :  { %v8962_v18 = vld [vmem:[#allocation4 + $0x1000] sm:$0xf]  ;;  %v8835_v41 = vor.u32 %v10244_v57, %v8834_v43  ;;  %5427 = vmatpush.bf16.msrb.mxu1 %v8707_v36  ;;  %v10258_v7 = vld [vmem:[#allocation4 + $0xf04] sm:$0xf]  ;;  %v8775_v57 = vor.u32 %v10226_v27, %v8772_v28 }
 0x91c   :  { %v10276_v59 = vld [vmem:[#allocation4 + $0x101c] sm:$0xf0]  ;;  %5415 = vmatmul.bf16.vlgmr.msrb.gmra.mxu0 %v12186_v13  ;;  %v8900_v38 = vld [vmem:[#allocation4 + $0xf20] sm:$0xf0] }
 0x91d   :  { %v8963_v44 = vor.u32 %v10276_v59, %v8962_v18  ;;  %5440 = vmatpush.bf16.msrb.mxu2 %v8835_v41  ;;  %5459 = vmatpush.bf16.msra.mxu0 %v8695_v29  ;;  %v10290_v39 = vld [vmem:[#allocation4 + $0x1104] sm:$0xf]  ;;  %v8903_v18 = vor.u32 %v10258_v7, %v8900_v38  ;;  %v8698_v7 = vld [vmem:[#allocation4 + $0xbc8] sm:$0xf] }
 0x91e   :  { %5428 = vmatmul.bf16.vlgmr.msrb.gmra.mxu1 %v12196_v20  ;;  %v9028_v43 = vld [vmem:[#allocation4 + $0x1120] sm:$0xf0]  ;;  %v10209_v38 = vld [vmem:[#allocation4 + $0xbe4] sm:$0xf0] }
 0x91f   :  { %5453 = vmatpush.bf16.msrb.mxu3 %v8963_v44  ;;  %5472 = vmatpush.bf16.msra.mxu1 %v8823_v25  ;;  %v10190_v59 = vld [vmem:[#allocation4 + $0xac4] sm:$0xf]  ;;  %v9031_v58 = vor.u32 %v10290_v39, %v9028_v43  ;;  %v8826_v39 = vld [vmem:[#allocation4 + $0xdc8] sm:$0xf] }
 0x920   :  { %5441 = vmatmul.bf16.vlgmr.msrb.gmra.mxu2 %v12181_v10  ;;  %v8756_v60 = vld [vmem:[#allocation4 + $0xce0] sm:$0xf0]  ;;  %v8631_v41 = vor.u32 %v10190_v59, %v8628_v0 }
 0x921   :  { %5485 = vmatpush.bf16.msra.mxu2 %v8951_v1  ;;  %5460 = vmatpush.bf16.msra.mxu0 %v8679_v47  ;;  %v8884_v50 = vld [vmem:[#allocation4 + $0xee0] sm:$0xf0]  ;;  %v8759_v5 = vor.u32 %v10222_v52, %v8756_v60  ;;  %v9082_v52 = vld [vmem:[#allocation4 + $0x11c8] sm:$0xf] }
 0x922   :  { %5454 = vmatmul.bf16.vlgmr.msrb.gmra.mxu3 %v12191_v14  ;;  %v10286_v3 = vld [vmem:[#allocation4 + $0x10c4] sm:$0xf]  ;;  %v8887_v51 = vor.u32 %v10254_v42, %v8884_v50  ;;  %v8699_v42 = vor.u32 %v10209_v38, %v8698_v7  ;;  %v10193_v7 = vld [vmem:[#allocation4 + $0xae4] sm:$0xf0] }
 0x923   :  { %5498 = vmatpush.bf16.msra.mxu3 %v9079_v2  ;;  %5473 = vmatpush.bf16.msra.mxu1 %v8807_v15  ;;  %v9012_v36 = vld [vmem:[#allocation4 + $0x10e0] sm:$0xf0]  ;;  %v8762_v38 = vld [vmem:[#allocation4 + $0xcc8] sm:$0xf] }
 0x924   :  { %v10186_v44 = vld [vmem:[#allocation4 + $0xa84] sm:$0xf]  ;;  %v9015_v1 = vor.u32 %v10286_v3, %v9012_v36  ;;  %v8682_v36 = vld [vmem:[#allocation4 + $0xb88] sm:$0xf] }
 0x925   :  { %5486 = vmatpush.bf16.msra.mxu2 %v8935_v19  ;;  %5461 = vmatpush.bf16.msra.mxu0 %v8663_v35  ;;  %v8612_v29 = vld [vmem:[#allocation4 + $0xaa0] sm:$0xf0] }
 0x926   :  { %v10218_v25 = vld [vmem:[#allocation4 + $0xc84] sm:$0xf]  ;;  %v8615_v6 = vor.u32 %v10186_v44, %v8612_v29  ;;  %v10237_v44 = vld [vmem:[#allocation4 + $0xda4] sm:$0xf0] }
 0x927   :  { %5499 = vmatpush.bf16.msra.mxu3 %v9063_v17  ;;  %5474 = vmatpush.bf16.msra.mxu1 %v8791_v45  ;;  %v8740_v4 = vld [vmem:[#allocation4 + $0xca0] sm:$0xf0]  ;;  %v8938_v29 = vld [vmem:[#allocation4 + $0xf88] sm:$0xf] }
 0x928   :  { %v10250_v55 = vld [vmem:[#allocation4 + $0xe84] sm:$0xf]  ;;  %v8743_v9 = vor.u32 %v10218_v25, %v8740_v4  ;;  %v10269_v25 = vld [vmem:[#allocation4 + $0xfa4] sm:$0xf0] }
 0x929   :  { %5487 = vmatpush.bf16.msra.mxu2 %v8919_v49  ;;  %5462 = vmatpush.bf16.msra.mxu0 %v8647_v62  ;;  %v8868_v63 = vld [vmem:[#allocation4 + $0xea0] sm:$0xf0]  ;;  %v10241_v62 = vld [vmem:[#allocation4 + $0xde4] sm:$0xf0] }
 0x92a   :  { %v10282_v2 = vld [vmem:[#allocation4 + $0x1084] sm:$0xf]  ;;  %v8871_v11 = vor.u32 %v10250_v55, %v8868_v63  ;;  %v8827_v50 = vor.u32 %v10241_v62, %v8826_v39  ;;  %v10301_v4 = vld [vmem:[#allocation4 + $0x11a4] sm:$0xf0] }
 0x92b   :  { %5500 = vmatpush.bf16.msra.mxu3 %v9047_v21  ;;  %5475 = vmatpush.bf16.msra.mxu1 %v8775_v57  ;;  %v8996_v53 = vld [vmem:[#allocation4 + $0x10a0] sm:$0xf0]  ;;  %v8954_v57 = vld [vmem:[#allocation4 + $0xfc8] sm:$0xf] }
 0x92c   :  { %v10182_v12 = vld [vmem:[#allocation4 + $0xa44] sm:$0xf]  ;;  %v8999_v19 = vor.u32 %v10282_v2, %v8996_v53  ;;  %v8939_v2 = vor.u32 %v10269_v25, %v8938_v29  ;;  %v8666_v53 = vld [vmem:[#allocation4 + $0xb48] sm:$0xf] }
 0x92d   :  { %5488 = vmatpush.bf16.msra.mxu2 %v8903_v18  ;;  %5463 = vmatpush.bf16.msra.mxu0 %v8631_v41  ;;  %v8596_v47 = vld [vmem:[#allocation4 + $0xa60] sm:$0xf0]  ;;  %v10273_v18 = vld [vmem:[#allocation4 + $0xfe4] sm:$0xf0] }
 0x92e   :  { %v10214_v15 = vld [vmem:[#allocation4 + $0xc44] sm:$0xf]  ;;  %v8599_v8 = vor.u32 %v10182_v12, %v8596_v47  ;;  %v8955_v3 = vor.u32 %v10273_v18, %v8954_v57  ;;  %v10205_v41 = vld [vmem:[#allocation4 + $0xba4] sm:$0xf0] }
 0x92f   :  { %5501 = vmatpush.bf16.msra.mxu3 %v9031_v58  ;;  %5476 = vmatpush.bf16.msra.mxu1 %v8759_v5  ;;  %v8724_v33 = vld [vmem:[#allocation4 + $0xc60] sm:$0xf0]  ;;  %v10305_v58 = vld [vmem:[#allocation4 + $0x11e4] sm:$0xf0]  ;;  %v8683_v55 = vor.u32 %v10205_v41, %v8682_v36 }
 0x930   :  { %v10246_v40 = vld [vmem:[#allocation4 + $0xe44] sm:$0xf]  ;;  %v8727_v32 = vor.u32 %v10214_v15, %v8724_v33  ;;  %v8810_v5 = vld [vmem:[#allocation4 + $0xd88] sm:$0xf] }
 0x931   :  { %5489 = vmatpush.bf16.msra.mxu2 %v8887_v51  ;;  %v8852_v23 = vld [vmem:[#allocation4 + $0xe60] sm:$0xf0]  ;;  %5464 = vmatpush.bf16.msra.mxu0 %v8615_v6  ;;  %v9083_v51 = vor.u32 %v10305_v58, %v9082_v52  ;;  %v8811_v63 = vor.u32 %v10237_v44, %v8810_v5  ;;  %v10201_v6 = vld [vmem:[#allocation4 + $0xb64] sm:$0xf0] }
 0x932   :  { %v10278_v17 = vld [vmem:[#allocation4 + $0x1044] sm:$0xf]  ;;  %v8855_v35 = vor.u32 %v10246_v40, %v8852_v23  ;;  %v10233_v12 = vld [vmem:[#allocation4 + $0xd64] sm:$0xf0]  ;;  %v8667_v40 = vor.u32 %v10201_v6, %v8666_v53 }
 0x933   :  { %5502 = vmatpush.bf16.msra.mxu3 %v9015_v1  ;;  %v8980_v24 = vld [vmem:[#allocation4 + $0x1060] sm:$0xf0]  ;;  %5477 = vmatpush.bf16.msra.mxu1 %v8743_v9  ;;  %v9066_v1 = vld [vmem:[#allocation4 + $0x1188] sm:$0xf] }
 0x934   :  { %v10178_v31 = vld [vmem:[#allocation4 + $0xa04] sm:$0xf]  ;;  %v8983_v26 = vor.u32 %v10278_v17, %v8980_v24  ;;  %v8794_v9 = vld [vmem:[#allocation4 + $0xd48] sm:$0xf] }
 0x935   :  { %v8580_v34 = vld [vmem:[#allocation4 + $0xa20] sm:$0xf0]  ;;  %5490 = vmatpush.bf16.msra.mxu2 %v8871_v11  ;;  %5465 = vmatpush.bf16.msra.mxu0 %v8599_v8  ;;  %v9067_v11 = vor.u32 %v10301_v4, %v9066_v1  ;;  %v8922_v47 = vld [vmem:[#allocation4 + $0xf48] sm:$0xf]  ;;  %v8795_v23 = vor.u32 %v10233_v12, %v8794_v9 }
 0x936   :  { %v10210_v45 = vld [vmem:[#allocation4 + $0xc04] sm:$0xf]  ;;  %v8583_v43 = vor.u32 %v10178_v31, %v8580_v34  ;;  %v10265_v15 = vld [vmem:[#allocation4 + $0xf64] sm:$0xf0] }
 0x937   :  { %v8708_v49 = vld [vmem:[#allocation4 + $0xc20] sm:$0xf0]  ;;  %5503 = vmatpush.bf16.msra.mxu3 %v8999_v19  ;;  %5478 = vmatpush.bf16.msra.mxu1 %v8727_v32  ;;  %v9050_v19 = vld [vmem:[#allocation4 + $0x1148] sm:$0xf]  ;;  %v8923_v17 = vor.u32 %v10265_v15, %v8922_v47 }
 0x938   :  { %v10242_v46 = vld [vmem:[#allocation4 + $0xe04] sm:$0xf]  ;;  %v8711_v59 = vor.u32 %v10210_v45, %v8708_v49  ;;  %v10297_v33 = vld [vmem:[#allocation4 + $0x1164] sm:$0xf0] }
 0x939   :  { %v8836_v27 = vld [vmem:[#allocation4 + $0xe20] sm:$0xf0]  ;;  %5491 = vmatpush.bf16.msra.mxu2 %v8855_v35  ;;  %5466 = vmatpush.bf16.msra.mxu0 %v8583_v43  ;;  %v8650_v24 = vld [vmem:[#allocation4 + $0xb08] sm:$0xf]  ;;  %v9051_v34 = vor.u32 %v10297_v33, %v9050_v19 }
 0x93a   :  { %v10274_v21 = vld [vmem:[#allocation4 + $0x1004] sm:$0xf]  ;;  %v8839_v0 = vor.u32 %v10242_v46, %v8836_v27  ;;  %v10197_v8 = vld [vmem:[#allocation4 + $0xb24] sm:$0xf0] }
 0x93b   :  { %v8964_v28 = vld [vmem:[#allocation4 + $0x1020] sm:$0xf0]  ;;  %5504 = vmatpush.bf16.msra.mxu3 %v8983_v26  ;;  %5479 = vmatpush.bf16.msra.mxu1 %v8711_v59  ;;  %v8778_v31 = vld [vmem:[#allocation4 + $0xd08] sm:$0xf]  ;;  %v8651_v26 = vor.u32 %v10197_v8, %v8650_v24 }
 0x93c   :  { %v8967_v60 = vor.u32 %v10274_v21, %v8964_v28  ;;  %5467 = vmatmul.bf16.vlgmr.msra.gmra.mxu0 %v12186_v13  ;;  %v10229_v32 = vld [vmem:[#allocation4 + $0xd24] sm:$0xf0] }
 0x93d   :  { %5492 = vmatpush.bf16.msra.mxu2 %v8839_v0  ;;  %5511 = vmatpush.bf16.msrb.mxu0 %v8699_v42  ;;  %v8906_v35 = vld [vmem:[#allocation4 + $0xf08] sm:$0xf]  ;;  %v8779_v27 = vor.u32 %v10229_v32, %v8778_v31 }
 0x93e   :  { %5480 = vmatmul.bf16.vlgmr.msra.gmra.mxu1 %v12196_v20  ;;  %v10261_v45 = vld [vmem:[#allocation4 + $0xf24] sm:$0xf0] }
 0x93f   :  { %5505 = vmatpush.bf16.msra.mxu3 %v8967_v60  ;;  %5524 = vmatpush.bf16.msrb.mxu1 %v8827_v50  ;;  %v9034_v49 = vld [vmem:[#allocation4 + $0x1108] sm:$0xf]  ;;  %v8907_v21 = vor.u32 %v10261_v45, %v8906_v35  ;;  %v10207_v35 = vld [vmem:[#allocation4 + $0xbcc] sm:$0xf] }
 0x940   :  { %5493 = vmatmul.bf16.vlgmr.msra.gmra.mxu2 %v12181_v10  ;;  %v10293_v46 = vld [vmem:[#allocation4 + $0x1124] sm:$0xf0]  ;;  %v8700_v45 = vld [vmem:[#allocation4 + $0xbe8] sm:$0xf0] }
 0x941   :  { %5537 = vmatpush.bf16.msrb.mxu2 %v8955_v3  ;;  %5512 = vmatpush.bf16.msrb.mxu0 %v8683_v55  ;;  %v8634_v28 = vld [vmem:[#allocation4 + $0xac8] sm:$0xf]  ;;  %v9035_v39 = vor.u32 %v10293_v46, %v9034_v49  ;;  %v10239_v49 = vld [vmem:[#allocation4 + $0xdcc] sm:$0xf] }
 0x942   :  { %5506 = vmatmul.bf16.vlgmr.msra.gmra.mxu3 %v12191_v14  ;;  %v10225_v43 = vld [vmem:[#allocation4 + $0xce4] sm:$0xf0]  ;;  %v8635_v0 = vor.u32 %v10193_v7, %v8634_v28 }
 0x943   :  { %5550 = vmatpush.bf16.msrb.mxu3 %v9083_v51  ;;  %5525 = vmatpush.bf16.msrb.mxu1 %v8811_v63  ;;  %v8890_v62 = vld [vmem:[#allocation4 + $0xec8] sm:$0xf]  ;;  %v8763_v52 = vor.u32 %v10225_v43, %v8762_v38  ;;  %v10303_v38 = vld [vmem:[#allocation4 + $0x11cc] sm:$0xf] }
 0x944   :  { %v10257_v57 = vld [vmem:[#allocation4 + $0xee4] sm:$0xf0] }
 0x945   :  { %5538 = vmatpush.bf16.msrb.mxu2 %v8939_v2  ;;  %5513 = vmatpush.bf16.msrb.mxu0 %v8667_v40  ;;  %v9018_v18 = vld [vmem:[#allocation4 + $0x10c8] sm:$0xf]  ;;  %v8891_v58 = vor.u32 %v10257_v57, %v8890_v62  ;;  %v8703_v62 = vor.u32 %v10207_v35, %v8700_v45  ;;  %v8636_v35 = vld [vmem:[#allocation4 + $0xae8] sm:$0xf0] }
 0x946   :  { %v10289_v59 = vld [vmem:[#allocation4 + $0x10e4] sm:$0xf0]  ;;  %v10223_v45 = vld [vmem:[#allocation4 + $0xccc] sm:$0xf] }
 0x947   :  { %5551 = vmatpush.bf16.msrb.mxu3 %v9067_v11  ;;  %5526 = vmatpush.bf16.msrb.mxu1 %v8795_v23  ;;  %v8618_v60 = vld [vmem:[#allocation4 + $0xa88] sm:$0xf]  ;;  %v9019_v3 = vor.u32 %v10289_v59, %v9018_v18  ;;  %v10203_v59 = vld [vmem:[#allocation4 + $0xb8c] sm:$0xf] }
 0x948   :  { %v10189_v42 = vld [vmem:[#allocation4 + $0xaa4] sm:$0xf0] }
 0x949   :  { %5539 = vmatpush.bf16.msrb.mxu2 %v8923_v17  ;;  %5514 = vmatpush.bf16.msrb.mxu0 %v8651_v26  ;;  %v8746_v50 = vld [vmem:[#allocation4 + $0xc88] sm:$0xf]  ;;  %v8619_v29 = vor.u32 %v10189_v42, %v8618_v60  ;;  %v8828_v26 = vld [vmem:[#allocation4 + $0xde8] sm:$0xf0] }
 0x94a   :  { %v10221_v36 = vld [vmem:[#allocation4 + $0xca4] sm:$0xf0]  ;;  %v8831_v57 = vor.u32 %v10239_v49, %v8828_v26  ;;  %v8812_v60 = vld [vmem:[#allocation4 + $0xda8] sm:$0xf0] }
 0x94b   :  { %5552 = vmatpush.bf16.msrb.mxu3 %v9051_v34  ;;  %5527 = vmatpush.bf16.msrb.mxu1 %v8779_v27  ;;  %v8874_v41 = vld [vmem:[#allocation4 + $0xe88] sm:$0xf]  ;;  %v8747_v25 = vor.u32 %v10221_v36, %v8746_v50  ;;  %v10271_v27 = vld [vmem:[#allocation4 + $0xfcc] sm:$0xf] }
 0x94c   :  { %v10253_v5 = vld [vmem:[#allocation4 + $0xea4] sm:$0xf0]  ;;  %v10267_v42 = vld [vmem:[#allocation4 + $0xf8c] sm:$0xf] }
 0x94d   :  { %5540 = vmatpush.bf16.msrb.mxu2 %v8907_v21  ;;  %v9002_v51 = vld [vmem:[#allocation4 + $0x1088] sm:$0xf]  ;;  %5515 = vmatpush.bf16.msrb.mxu0 %v8635_v0  ;;  %v8875_v1 = vor.u32 %v10253_v5, %v8874_v41  ;;  %v8956_v21 = vld [vmem:[#allocation4 + $0xfe8] sm:$0xf0] }
 0x94e   :  { %v10285_v44 = vld [vmem:[#allocation4 + $0x10a4] sm:$0xf0]  ;;  %v8959_v18 = vor.u32 %v10271_v27, %v8956_v21  ;;  %v8684_v0 = vld [vmem:[#allocation4 + $0xba8] sm:$0xf0] }
 0x94f   :  { %5553 = vmatpush.bf16.msrb.mxu3 %v9035_v39  ;;  %5528 = vmatpush.bf16.msrb.mxu1 %v8763_v52  ;;  %v8602_v4 = vld [vmem:[#allocation4 + $0xa48] sm:$0xf]  ;;  %v9003_v2 = vor.u32 %v10285_v44, %v9002_v51  ;;  %v9084_v39 = vld [vmem:[#allocation4 + $0x11e8] sm:$0xf0]  ;;  %v8687_v41 = vor.u32 %v10203_v59, %v8684_v0 }
 0x950   :  { %v10185_v55 = vld [vmem:[#allocation4 + $0xa64] sm:$0xf0]  ;;  %v10235_v52 = vld [vmem:[#allocation4 + $0xd8c] sm:$0xf] }
 0x951   :  { %5541 = vmatpush.bf16.msrb.mxu2 %v8891_v58  ;;  %v8730_v63 = vld [vmem:[#allocation4 + $0xc48] sm:$0xf]  ;;  %5516 = vmatpush.bf16.msrb.mxu0 %v8619_v29  ;;  %v8603_v47 = vor.u32 %v10185_v55, %v8602_v4  ;;  %v9087_v58 = vor.u32 %v10303_v38, %v9084_v39  ;;  %v8940_v50 = vld [vmem:[#allocation4 + $0xfa8] sm:$0xf0]  ;;  %v8815_v5 = vor.u32 %v10235_v52, %v8812_v60 }
 0x952   :  { %v10217_v53 = vld [vmem:[#allocation4 + $0xc64] sm:$0xf0]  ;;  %v9068_v36 = vld [vmem:[#allocation4 + $0x11a8] sm:$0xf0]  ;;  %v8943_v51 = vor.u32 %v10267_v42, %v8940_v50 }
 0x953   :  { %5554 = vmatpush.bf16.msrb.mxu3 %v9019_v3  ;;  %v8858_v6 = vld [vmem:[#allocation4 + $0xe48] sm:$0xf]  ;;  %5529 = vmatpush.bf16.msrb.mxu1 %v8747_v25  ;;  %v8731_v33 = vor.u32 %v10217_v53, %v8730_v63  ;;  %v10299_v3 = vld [vmem:[#allocation4 + $0x118c] sm:$0xf] }
 0x954   :  { %v10249_v9 = vld [vmem:[#allocation4 + $0xe64] sm:$0xf0]  ;;  %v10199_v44 = vld [vmem:[#allocation4 + $0xb4c] sm:$0xf] }
 0x955   :  { %v8986_v11 = vld [vmem:[#allocation4 + $0x1048] sm:$0xf]  ;;  %5542 = vmatpush.bf16.msrb.mxu2 %v8875_v1  ;;  %v8859_v40 = vor.u32 %v10249_v9, %v8858_v6  ;;  %5517 = vmatpush.bf16.msrb.mxu0 %v8603_v47  ;;  %v8668_v29 = vld [vmem:[#allocation4 + $0xb68] sm:$0xf0]  ;;  %v9071_v1 = vor.u32 %v10299_v3, %v9068_v36 }
 0x956   :  { %v10281_v12 = vld [vmem:[#allocation4 + $0x1064] sm:$0xf0]  ;;  %v10231_v25 = vld [vmem:[#allocation4 + $0xd4c] sm:$0xf]  ;;  %v8671_v6 = vor.u32 %v10199_v44, %v8668_v29 }
 0x957   :  { %v8586_v15 = vld [vmem:[#allocation4 + $0xa08] sm:$0xf]  ;;  %5555 = vmatpush.bf16.msrb.mxu3 %v9003_v2  ;;  %v8987_v8 = vor.u32 %v10281_v12, %v8986_v11  ;;  %5530 = vmatpush.bf16.msrb.mxu1 %v8731_v33  ;;  %v8796_v4 = vld [vmem:[#allocation4 + $0xd68] sm:$0xf0] }
 0x958   :  { %v10181_v19 = vld [vmem:[#allocation4 + $0xa24] sm:$0xf0]  ;;  %v10263_v55 = vld [vmem:[#allocation4 + $0xf4c] sm:$0xf]  ;;  %v8799_v9 = vor.u32 %v10231_v25, %v8796_v4 }
 0x959   :  { %v8714_v23 = vld [vmem:[#allocation4 + $0xc08] sm:$0xf]  ;;  %v8587_v46 = vor.u32 %v10181_v19, %v8586_v15  ;;  %5543 = vmatpush.bf16.msrb.mxu2 %v8859_v40  ;;  %v8924_v63 = vld [vmem:[#allocation4 + $0xf68] sm:$0xf0] }
 0x95a   :  { %v10213_v17 = vld [vmem:[#allocation4 + $0xc24] sm:$0xf0]  ;;  %v10295_v2 = vld [vmem:[#allocation4 + $0x114c] sm:$0xf]  ;;  %v8927_v11 = vor.u32 %v10263_v55, %v8924_v63 }
 0x95b   :  { %v8842_v24 = vld [vmem:[#allocation4 + $0xe08] sm:$0xf]  ;;  %v8715_v28 = vor.u32 %v10213_v17, %v8714_v23  ;;  %5556 = vmatpush.bf16.msrb.mxu3 %v8987_v8  ;;  %5518 = vmatpush.bf16.msrb.mxu0 %v8587_v46  ;;  %v9052_v53 = vld [vmem:[#allocation4 + $0x1168] sm:$0xf0] }
 0x95c   :  { %v10245_v31 = vld [vmem:[#allocation4 + $0xe24] sm:$0xf0]  ;;  %v10195_v12 = vld [vmem:[#allocation4 + $0xb0c] sm:$0xf]  ;;  %v9055_v19 = vor.u32 %v10295_v2, %v9052_v53 }
 0x95d   :  { %v8970_v34 = vld [vmem:[#allocation4 + $0x1008] sm:$0xf]  ;;  %v8843_v7 = vor.u32 %v10245_v31, %v8842_v24  ;;  %5531 = vmatpush.bf16.msrb.mxu1 %v8715_v28  ;;  %v8652_v47 = vld [vmem:[#allocation4 + $0xb28] sm:$0xf0] }
 0x95e   :  { %v10277_v32 = vld [vmem:[#allocation4 + $0x1024] sm:$0xf0]  ;;  %5519 = vmatmul.bf16.vlgmr.msrb.gmra.mxu0 %v12186_v13  ;;  %v10227_v15 = vld [vmem:[#allocation4 + $0xd0c] sm:$0xf]  ;;  %v8655_v8 = vor.u32 %v10195_v12, %v8652_v47 }
 0x95f   :  { %v8971_v43 = vor.u32 %v10277_v32, %v8970_v34  ;;  %5544 = vmatpush.bf16.msrb.mxu2 %v8843_v7  ;;  %5563 = vmatpush.bf16.msra.mxu0 %v8703_v62  ;;  %v8780_v33 = vld [vmem:[#allocation4 + $0xd28] sm:$0xf0] }
 0x960   :  { %5532 = vmatmul.bf16.vlgmr.msrb.gmra.mxu1 %v12196_v20  ;;  %v10259_v40 = vld [vmem:[#allocation4 + $0xf0c] sm:$0xf]  ;;  %v8783_v31 = vor.u32 %v10227_v15, %v8780_v33 }
 0x961   :  { %5557 = vmatpush.bf16.msrb.mxu3 %v8971_v43  ;;  %5576 = vmatpush.bf16.msra.mxu1 %v8831_v57  ;;  %v8908_v23 = vld [vmem:[#allocation4 + $0xf28] sm:$0xf0] }
 0x962   :  { %5545 = vmatmul.bf16.vlgmr.msrb.gmra.mxu2 %v12181_v10  ;;  %v10291_v17 = vld [vmem:[#allocation4 + $0x110c] sm:$0xf]  ;;  %v8911_v34 = vor.u32 %v10259_v40, %v8908_v23  ;;  %v9202_v40 = vld [vmem:[#allocation4 + $0xbd0] sm:$0xf] }
 0x963   :  { %5589 = vmatpush.bf16.msra.mxu2 %v8959_v18  ;;  %5564 = vmatpush.bf16.msra.mxu0 %v8687_v41  ;;  %v9036_v24 = vld [vmem:[#allocation4 + $0x1128] sm:$0xf0]  ;;  %v10336_v23 = vld [vmem:[#allocation4 + $0xbec] sm:$0xf0] }
 0x964   :  { %5558 = vmatmul.bf16.vlgmr.msrb.gmra.mxu3 %v12191_v14  ;;  %v10191_v32 = vld [vmem:[#allocation4 + $0xacc] sm:$0xf]  ;;  %v9039_v49 = vor.u32 %v10291_v17, %v9036_v24  ;;  %v9330_v17 = vld [vmem:[#allocation4 + $0xdd0] sm:$0xf] }
 0x965   :  { %5602 = vmatpush.bf16.msra.mxu3 %v9087_v58  ;;  %5577 = vmatpush.bf16.msra.mxu1 %v8815_v5  ;;  %v8764_v46 = vld [vmem:[#allocation4 + $0xce8] sm:$0xf0]  ;;  %v8639_v7 = vor.u32 %v10191_v32, %v8636_v35 }
 0x966   :  { %v10255_v26 = vld [vmem:[#allocation4 + $0xecc] sm:$0xf]  ;;  %v8767_v38 = vor.u32 %v10223_v45, %v8764_v46  ;;  %v9586_v45 = vld [vmem:[#allocation4 + $0x11d0] sm:$0xf] }
 0x967   :  { %5590 = vmatpush.bf16.msra.mxu2 %v8943_v51  ;;  %5565 = vmatpush.bf16.msra.mxu0 %v8671_v6  ;;  %v8892_v27 = vld [vmem:[#allocation4 + $0xee8] sm:$0xf0] }
 0x968   :  { %v10287_v21 = vld [vmem:[#allocation4 + $0x10cc] sm:$0xf]  ;;  %v8895_v39 = vor.u32 %v10255_v26, %v8892_v27  ;;  %v9203_v26 = vor.u32 %v10336_v23, %v9202_v40  ;;  %v9394_v40 = vld [vmem:[#allocation4 + $0xed0] sm:$0xf] }
 0x969   :  { %5603 = vmatpush.bf16.msra.mxu3 %v9071_v1  ;;  %5578 = vmatpush.bf16.msra.mxu1 %v8799_v9  ;;  %v9020_v28 = vld [vmem:[#allocation4 + $0x10e8] sm:$0xf0]  ;;  %v10384_v23 = vld [vmem:[#allocation4 + $0xeec] sm:$0xf0] }
 0x96a   :  { %v10187_v43 = vld [vmem:[#allocation4 + $0xa8c] sm:$0xf]  ;;  %v9023_v18 = vor.u32 %v10287_v21, %v9020_v28  ;;  %v9186_v28 = vld [vmem:[#allocation4 + $0xb90] sm:$0xf] }
 0x96b   :  { %5591 = vmatpush.bf16.msra.mxu2 %v8927_v11  ;;  %5566 = vmatpush.bf16.msra.mxu0 %v8655_v8  ;;  %v8620_v62 = vld [vmem:[#allocation4 + $0xaa8] sm:$0xf0]  ;;  %v10368_v8 = vld [vmem:[#allocation4 + $0xdec] sm:$0xf0] }
 0x96c   :  { %v10219_v57 = vld [vmem:[#allocation4 + $0xc8c] sm:$0xf]  ;;  %v8623_v42 = vor.u32 %v10187_v43, %v8620_v62  ;;  %v9331_v27 = vor.u32 %v10368_v8, %v9330_v17  ;;  %v10364_v43 = vld [vmem:[#allocation4 + $0xdac] sm:$0xf0] }
 0x96d   :  { %5604 = vmatpush.bf16.msra.mxu3 %v9055_v19  ;;  %5579 = vmatpush.bf16.msra.mxu1 %v8783_v31  ;;  %v8748_v59 = vld [vmem:[#allocation4 + $0xca8] sm:$0xf0]  ;;  %v9458_v31 = vld [vmem:[#allocation4 + $0xfd0] sm:$0xf] }
 0x96e   :  { %v10251_v0 = vld [vmem:[#allocation4 + $0xe8c] sm:$0xf]  ;;  %v8751_v50 = vor.u32 %v10219_v57, %v8748_v59  ;;  %v9442_v62 = vld [vmem:[#allocation4 + $0xf90] sm:$0xf] }
 0x96f   :  { %5592 = vmatpush.bf16.msra.mxu2 %v8911_v34  ;;  %v8876_v52 = vld [vmem:[#allocation4 + $0xea8] sm:$0xf0]  ;;  %5567 = vmatpush.bf16.msra.mxu0 %v8639_v7  ;;  %v10400_v34 = vld [vmem:[#allocation4 + $0xfec] sm:$0xf0] }
 0x970   :  { %v10283_v58 = vld [vmem:[#allocation4 + $0x108c] sm:$0xf]  ;;  %v8879_v3 = vor.u32 %v10251_v0, %v8876_v52  ;;  %v9459_v21 = vor.u32 %v10400_v34, %v9458_v31  ;;  %v10332_v7 = vld [vmem:[#allocation4 + $0xbac] sm:$0xf0]  ;;  %v9395_v34 = vor.u32 %v10384_v23, %v9394_v40  ;;  %v9188_v40 = vld [vmem:[#allocation4 + $0xbb0] sm:$0xf0] }
 0x971   :  { %5605 = vmatpush.bf16.msra.mxu3 %v9039_v49  ;;  %v9004_v60 = vld [vmem:[#allocation4 + $0x10a8] sm:$0xf0]  ;;  %5580 = vmatpush.bf16.msra.mxu1 %v8767_v38  ;;  %v10432_v49 = vld [vmem:[#allocation4 + $0x11ec] sm:$0xf0]  ;;  %v9187_v0 = vor.u32 %v10332_v7, %v9186_v28  ;;  %v10362_v23 = vld [vmem:[#allocation4 + $0xd94] sm:$0xf] }
 0x972   :  { %v10183_v36 = vld [vmem:[#allocation4 + $0xa4c] sm:$0xf]  ;;  %v9007_v51 = vor.u32 %v10283_v58, %v9004_v60  ;;  %v9314_v38 = vld [vmem:[#allocation4 + $0xd90] sm:$0xf] }
 0x973   :  { %5593 = vmatpush.bf16.msra.mxu2 %v8895_v39  ;;  %v8604_v41 = vld [vmem:[#allocation4 + $0xa68] sm:$0xf0]  ;;  %5568 = vmatpush.bf16.msra.mxu0 %v8623_v42  ;;  %v9587_v39 = vor.u32 %v10432_v49, %v9586_v45  ;;  %v10396_v57 = vld [vmem:[#allocation4 + $0xfac] sm:$0xf0]  ;;  %v9315_v52 = vor.u32 %v10364_v43, %v9314_v38 }
 0x974   :  { %v10215_v5 = vld [vmem:[#allocation4 + $0xc4c] sm:$0xf]  ;;  %v8607_v55 = vor.u32 %v10183_v36, %v8604_v41  ;;  %v10428_v59 = vld [vmem:[#allocation4 + $0x11ac] sm:$0xf0]  ;;  %v9443_v58 = vor.u32 %v10396_v57, %v9442_v62 }
 0x975   :  { %5606 = vmatpush.bf16.msra.mxu3 %v9023_v18  ;;  %v8732_v44 = vld [vmem:[#allocation4 + $0xc68] sm:$0xf0]  ;;  %5581 = vmatpush.bf16.msra.mxu1 %v8751_v50  ;;  %v9570_v18 = vld [vmem:[#allocation4 + $0x1190] sm:$0xf] }
 0x976   :  { %v10247_v29 = vld [vmem:[#allocation4 + $0xe4c] sm:$0xf]  ;;  %v8735_v53 = vor.u32 %v10215_v5, %v8732_v44  ;;  %v9170_v60 = vld [vmem:[#allocation4 + $0xb50] sm:$0xf] }
 0x977   :  { %v8860_v25 = vld [vmem:[#allocation4 + $0xe68] sm:$0xf0]  ;;  %5594 = vmatpush.bf16.msra.mxu2 %v8879_v3  ;;  %5569 = vmatpush.bf16.msra.mxu0 %v8607_v55  ;;  %v10328_v42 = vld [vmem:[#allocation4 + $0xb6c] sm:$0xf0]  ;;  %v9571_v3 = vor.u32 %v10428_v59, %v9570_v18 }
 0x978   :  { %v10279_v1 = vld [vmem:[#allocation4 + $0x104c] sm:$0xf]  ;;  %v8863_v6 = vor.u32 %v10247_v29, %v8860_v25  ;;  %v9298_v50 = vld [vmem:[#allocation4 + $0xd50] sm:$0xf]  ;;  %v9171_v29 = vor.u32 %v10328_v42, %v9170_v60 }
 0x979   :  { %v8988_v4 = vld [vmem:[#allocation4 + $0x1068] sm:$0xf0]  ;;  %5607 = vmatpush.bf16.msra.mxu3 %v9007_v51  ;;  %5582 = vmatpush.bf16.msra.mxu1 %v8735_v53  ;;  %v10360_v36 = vld [vmem:[#allocation4 + $0xd6c] sm:$0xf0] }
 0x97a   :  { %v10179_v63 = vld [vmem:[#allocation4 + $0xa0c] sm:$0xf]  ;;  %v8991_v47 = vor.u32 %v10279_v1, %v8988_v4  ;;  %v9426_v41 = vld [vmem:[#allocation4 + $0xf50] sm:$0xf]  ;;  %v9299_v25 = vor.u32 %v10360_v36, %v9298_v50 }
 0x97b   :  { %v8588_v2 = vld [vmem:[#allocation4 + $0xa28] sm:$0xf0]  ;;  %5595 = vmatpush.bf16.msra.mxu2 %v8863_v6  ;;  %v10392_v5 = vld [vmem:[#allocation4 + $0xf6c] sm:$0xf0] }
 0x97c   :  { %v10211_v9 = vld [vmem:[#allocation4 + $0xc0c] sm:$0xf]  ;;  %v8591_v24 = vor.u32 %v10179_v63, %v8588_v2  ;;  %v9554_v51 = vld [vmem:[#allocation4 + $0x1150] sm:$0xf]  ;;  %v9427_v1 = vor.u32 %v10392_v5, %v9426_v41 }
 0x97d   :  { %v8716_v11 = vld [vmem:[#allocation4 + $0xc28] sm:$0xf0]  ;;  %5608 = vmatpush.bf16.msra.mxu3 %v8991_v47  ;;  %v10424_v44 = vld [vmem:[#allocation4 + $0x116c] sm:$0xf0] }
 0x97e   :  { %v10243_v12 = vld [vmem:[#allocation4 + $0xe0c] sm:$0xf]  ;;  %v8719_v32 = vor.u32 %v10211_v9, %v8716_v11  ;;  %5570 = vmatpush.bf16.msra.mxu0 %v8591_v24  ;;  %v9154_v4 = vld [vmem:[#allocation4 + $0xb10] sm:$0xf]  ;;  %v9555_v2 = vor.u32 %v10424_v44, %v9554_v51 }
 0x97f   :  { %v8844_v15 = vld [vmem:[#allocation4 + $0xe28] sm:$0xf0]  ;;  %v10324_v55 = vld [vmem:[#allocation4 + $0xb2c] sm:$0xf0] }
 0x980   :  { %v10275_v19 = vld [vmem:[#allocation4 + $0x100c] sm:$0xf]  ;;  %v8847_v35 = vor.u32 %v10243_v12, %v8844_v15  ;;  %5583 = vmatpush.bf16.msra.mxu1 %v8719_v32  ;;  %v9282_v63 = vld [vmem:[#allocation4 + $0xd10] sm:$0xf] }
 0x981   :  { %v8972_v33 = vld [vmem:[#allocation4 + $0x1028] sm:$0xf0]  ;;  %5571 = vmatmul.bf16.vlgmr.msra.gmra.mxu0 %v12186_v13  ;;  %v9410_v53 = vld [vmem:[#allocation4 + $0xf10] sm:$0xf] }
 0x982   :  { %v8975_v46 = vor.u32 %v10275_v19, %v8972_v33  ;;  %5596 = vmatpush.bf16.msra.mxu2 %v8847_v35  ;;  %6401 = vmatpush.bf16.msrb.mxu0 %v9203_v26  ;;  %v10388_v6 = vld [vmem:[#allocation4 + $0xf2c] sm:$0xf0] }
 0x983   :  { %5584 = vmatmul.bf16.vlgmr.msra.gmra.mxu1 %v12196_v20  ;;  %v9538_v9 = vld [vmem:[#allocation4 + $0x1110] sm:$0xf]  ;;  %v9411_v20 = vor.u32 %v10388_v6, %v9410_v53  ;;  %v9332_v53 = vld [vmem:[#allocation4 + $0xdf0] sm:$0xf0] }
 0x984   :  { %5609 = vmatpush.bf16.msra.mxu3 %v8975_v46  ;;  %6414 = vmatpush.bf16.msrb.mxu1 %v9331_v27  ;;  %v10420_v13 = vld [vmem:[#allocation4 + $0x112c] sm:$0xf0]  ;;  %v10398_v6 = vld [vmem:[#allocation4 + $0xfd4] sm:$0xf] }
 0x985   :  { %5597 = vmatmul.bf16.vlgmr.msra.gmra.mxu2 %v12181_v10  ;;  %v10356_v10 = vld [vmem:[#allocation4 + $0xd2c] sm:$0xf0]  ;;  %v9539_v19 = vor.u32 %v10420_v13, %v9538_v9  ;;  %v9460_v9 = vld [vmem:[#allocation4 + $0xff0] sm:$0xf0] }
 0x986   :  { %6427 = vmatpush.bf16.msrb.mxu2 %v9459_v21  ;;  %6402 = vmatpush.bf16.msrb.mxu0 %v9187_v0  ;;  %v9283_v11 = vor.u32 %v10356_v10, %v9282_v63  ;;  %v9138_v12 = vld [vmem:[#allocation4 + $0xad0] sm:$0xf]  ;;  %v9204_v63 = vld [vmem:[#allocation4 + $0xbf0] sm:$0xf0] }
 0x987   :  { %5610 = vmatmul.bf16.vlgmr.msra.gmra.mxu3 %v12191_v14  ;;  %v9155_v14 = vor.u32 %v10324_v55, %v9154_v4  ;;  %v10320_v47 = vld [vmem:[#allocation4 + $0xaec] sm:$0xf0]  ;;  %v10334_v55 = vld [vmem:[#allocation4 + $0xbd4] sm:$0xf] }
 0x988   :  { %6440 = vmatpush.bf16.msrb.mxu3 %v9587_v39  ;;  %6415 = vmatpush.bf16.msrb.mxu1 %v9315_v52  ;;  %v9266_v15 = vld [vmem:[#allocation4 + $0xcd0] sm:$0xf]  ;;  %v9139_v8 = vor.u32 %v10320_v47, %v9138_v12  ;;  %v9207_v47 = vor.u32 %v10334_v55, %v9204_v63  ;;  %v9268_v55 = vld [vmem:[#allocation4 + $0xcf0] sm:$0xf0] }
 0x989   :  { %v10352_v33 = vld [vmem:[#allocation4 + $0xcec] sm:$0xf0]  ;;  %v10382_v63 = vld [vmem:[#allocation4 + $0xed4] sm:$0xf] }
 0x98a   :  { %6428 = vmatpush.bf16.msrb.mxu2 %v9443_v58  ;;  %6403 = vmatpush.bf16.msrb.mxu0 %v9171_v29  ;;  %v9522_v17 = vld [vmem:[#allocation4 + $0x10d0] sm:$0xf]  ;;  %v9267_v31 = vor.u32 %v10352_v33, %v9266_v15  ;;  %v10330_v33 = vld [vmem:[#allocation4 + $0xb94] sm:$0xf] }
 0x98b   :  { %v10416_v24 = vld [vmem:[#allocation4 + $0x10ec] sm:$0xf0]  ;;  %v9191_v16 = vor.u32 %v10330_v33, %v9188_v40  ;;  %v10378_v33 = vld [vmem:[#allocation4 + $0xe94] sm:$0xf] }
 0x98c   :  { %6441 = vmatpush.bf16.msrb.mxu3 %v9571_v3  ;;  %6416 = vmatpush.bf16.msrb.mxu1 %v9299_v25  ;;  %v9122_v32 = vld [vmem:[#allocation4 + $0xa90] sm:$0xf]  ;;  %v9523_v49 = vor.u32 %v10416_v24, %v9522_v17  ;;  %v9316_v24 = vld [vmem:[#allocation4 + $0xdb0] sm:$0xf0] }
 0x98d   :  { %v10316_v35 = vld [vmem:[#allocation4 + $0xaac] sm:$0xf0]  ;;  %v9319_v22 = vor.u32 %v10362_v23, %v9316_v24  ;;  %v9380_v40 = vld [vmem:[#allocation4 + $0xeb0] sm:$0xf0] }
 0x98e   :  { %6429 = vmatpush.bf16.msrb.mxu2 %v9427_v1  ;;  %6404 = vmatpush.bf16.msrb.mxu0 %v9155_v14  ;;  %v9250_v45 = vld [vmem:[#allocation4 + $0xc90] sm:$0xf]  ;;  %v9123_v7 = vor.u32 %v10316_v35, %v9122_v32  ;;  %v10426_v32 = vld [vmem:[#allocation4 + $0x1194] sm:$0xf] }
 0x98f   :  { %v10348_v46 = vld [vmem:[#allocation4 + $0xcac] sm:$0xf0]  ;;  %v9572_v35 = vld [vmem:[#allocation4 + $0x11b0] sm:$0xf0] }
 0x990   :  { %6442 = vmatpush.bf16.msrb.mxu3 %v9555_v2  ;;  %6417 = vmatpush.bf16.msrb.mxu1 %v9283_v11  ;;  %v9378_v26 = vld [vmem:[#allocation4 + $0xe90] sm:$0xf]  ;;  %v9251_v38 = vor.u32 %v10348_v46, %v9250_v45  ;;  %v10366_v2 = vld [vmem:[#allocation4 + $0xdd4] sm:$0xf]  ;;  %v12222_v45 = vpack.c.bf16 %v4617_v48, %v4617_v48  ;;  %v9575_v37 = vor.u32 %v10426_v32, %v9572_v35 }
 0x991   :  { %v10380_v27 = vld [vmem:[#allocation4 + $0xeac] sm:$0xf0]  ;;  %v10430_v11 = vld [vmem:[#allocation4 + $0x11d4] sm:$0xf]  ;;  %v9335_v15 = vor.u32 %v10366_v2, %v9332_v53 }
 0x992   :  { %6430 = vmatpush.bf16.msrb.mxu2 %v9411_v20  ;;  %v9506_v21 = vld [vmem:[#allocation4 + $0x1090] sm:$0xf]  ;;  %6405 = vmatpush.bf16.msrb.mxu0 %v9139_v8  ;;  %v9379_v39 = vor.u32 %v10380_v27, %v9378_v26  ;;  %v9588_v20 = vld [vmem:[#allocation4 + $0x11f0] sm:$0xf0] }
 0x993   :  { %v10412_v28 = vld [vmem:[#allocation4 + $0x10ac] sm:$0xf0]  ;;  %v9591_v17 = vor.u32 %v10430_v11, %v9588_v20  ;;  %v10394_v8 = vld [vmem:[#allocation4 + $0xf94] sm:$0xf] }
 0x994   :  { %6443 = vmatpush.bf16.msrb.mxu3 %v9539_v19  ;;  %6418 = vmatpush.bf16.msrb.mxu1 %v9267_v31  ;;  %v9106_v43 = vld [vmem:[#allocation4 + $0xa50] sm:$0xf]  ;;  %v9507_v18 = vor.u32 %v10412_v28, %v9506_v21  ;;  %v9463_v19 = vor.u32 %v10398_v6, %v9460_v9  ;;  %v9444_v31 = vld [vmem:[#allocation4 + $0xfb0] sm:$0xf0] }
 0x995   :  { %v10312_v62 = vld [vmem:[#allocation4 + $0xa6c] sm:$0xf0]  ;;  %v10326_v46 = vld [vmem:[#allocation4 + $0xb54] sm:$0xf]  ;;  %v9447_v26 = vor.u32 %v10394_v8, %v9444_v31 }
 0x996   :  { %6431 = vmatpush.bf16.msrb.mxu2 %v9395_v34  ;;  %v9234_v57 = vld [vmem:[#allocation4 + $0xc50] sm:$0xf]  ;;  %6406 = vmatpush.bf16.msrb.mxu0 %v9123_v7  ;;  %v9107_v42 = vor.u32 %v10312_v62, %v9106_v43  ;;  %v12217_v34 = vpack.c.bf16 %v4619_v30, %v4619_v30  ;;  %v12232_v30 = vpack.c.bf16 %v4618_v61, %v4618_v61  ;;  %v9172_v48 = vld [vmem:[#allocation4 + $0xb70] sm:$0xf0]  ;;  %v12235_v7 = vld [vmem:[#allocation14] sm:$0xf] }
 0x997   :  { %v10344_v59 = vld [vmem:[#allocation4 + $0xc6c] sm:$0xf0]  ;;  %v10358_v27 = vld [vmem:[#allocation4 + $0xd54] sm:$0xf]  ;;  %v9175_v61 = vor.u32 %v10326_v46, %v9172_v48  ;;  %v9383_v46 = vor.u32 %v10378_v33, %v9380_v40 }
 0x998   :  { %6444 = vmatpush.bf16.msrb.mxu3 %v9523_v49  ;;  %v9362_v0 = vld [vmem:[#allocation4 + $0xe50] sm:$0xf]  ;;  %6419 = vmatpush.bf16.msrb.mxu1 %v9251_v38  ;;  %v9235_v36 = vor.u32 %v10344_v59, %v9234_v57  ;;  %v12227_v49 = vpack.c.bf16 %v4620_v56, %v4620_v56  ;;  %v9300_v21 = vld [vmem:[#allocation4 + $0xd70] sm:$0xf0]  ;;  %v4759_v59 = vperm.slane %v12235_v7, 0 }
 0x999   :  { %v10376_v52 = vld [vmem:[#allocation4 + $0xe6c] sm:$0xf0]  ;;  %v10390_v56 = vld [vmem:[#allocation4 + $0xf54] sm:$0xf]  ;;  %v9303_v43 = vor.u32 %v10358_v27, %v9300_v21 }
 0x99a   :  { %v9490_v58 = vld [vmem:[#allocation4 + $0x1050] sm:$0xf]  ;;  %6432 = vmatpush.bf16.msrb.mxu2 %v9379_v39  ;;  %v9363_v41 = vor.u32 %v10376_v52, %v9362_v0  ;;  %6407 = vmatpush.bf16.msrb.mxu0 %v9107_v42  ;;  %v9428_v28 = vld [vmem:[#allocation4 + $0xf70] sm:$0xf0] }
 0x99b   :  { %v10408_v60 = vld [vmem:[#allocation4 + $0x106c] sm:$0xf0]  ;;  %v10422_v38 = vld [vmem:[#allocation4 + $0x1154] sm:$0xf]  ;;  %v9431_v62 = vor.u32 %v10390_v56, %v9428_v28 }
 0x99c   :  { %v9090_v50 = vld [vmem:[#allocation4 + $0xa10] sm:$0xf]  ;;  %6445 = vmatpush.bf16.msrb.mxu3 %v9507_v18  ;;  %v9491_v29 = vor.u32 %v10408_v60, %v9490_v58  ;;  %6420 = vmatpush.bf16.msrb.mxu1 %v9235_v36  ;;  %v10322_v39 = vld [vmem:[#allocation4 + $0xb14] sm:$0xf]  ;;  %v9559_v0 = vor.u32 %v10422_v38, %v9556_v54  ;;  %v5416_v36 = vpop.f32.mrf.mxu0 }
 0x99d   :  { %v10308_v3 = vld [vmem:[#allocation4 + $0xa2c] sm:$0xf0]  ;;  %v9156_v57 = vld [vmem:[#allocation4 + $0xb30] sm:$0xf0] }
 0x99e   :  { %v9218_v5 = vld [vmem:[#allocation4 + $0xc10] sm:$0xf]  ;;  %v9091_v10 = vor.u32 %v10308_v3, %v9090_v50  ;;  %6433 = vmatpush.bf16.msrb.mxu2 %v9363_v41  ;;  %v10354_v18 = vld [vmem:[#allocation4 + $0xd14] sm:$0xf]  ;;  %v9159_v3 = vor.u32 %v10322_v39, %v9156_v57 }
 0x99f   :  { %v10340_v51 = vld [vmem:[#allocation4 + $0xc2c] sm:$0xf0]  ;;  %v9284_v52 = vld [vmem:[#allocation4 + $0xd30] sm:$0xf0] }
 0x9a0   :  { %v9346_v44 = vld [vmem:[#allocation4 + $0xe10] sm:$0xf]  ;;  %v9219_v13 = vor.u32 %v10340_v51, %v9218_v5  ;;  %6446 = vmatpush.bf16.msrb.mxu3 %v9491_v29  ;;  %6408 = vmatpush.bf16.msrb.mxu0 %v9091_v10  ;;  %v10386_v58 = vld [vmem:[#allocation4 + $0xf14] sm:$0xf]  ;;  %v9287_v41 = vor.u32 %v10354_v18, %v9284_v52 }
 0x9a1   :  { %v10372_v25 = vld [vmem:[#allocation4 + $0xe2c] sm:$0xf0]  ;;  %v9412_v60 = vld [vmem:[#allocation4 + $0xf30] sm:$0xf0] }
 0x9a2   :  { %v9474_v1 = vld [vmem:[#allocation4 + $0x1010] sm:$0xf]  ;;  %v9347_v14 = vor.u32 %v10372_v25, %v9346_v44  ;;  %6421 = vmatpush.bf16.msrb.mxu1 %v9219_v13  ;;  %v10418_v42 = vld [vmem:[#allocation4 + $0x1114] sm:$0xf]  ;;  %v9415_v5 = vor.u32 %v10386_v58, %v9412_v60  ;;  %v5417_v25 = vadd.f32 %v5416_v36, %v4759_v59  ;;  %v9210_v36 = vld [vmem:[#allocation4 + $0xbd8] sm:$0xf] }
 0x9a3   :  { %v10404_v4 = vld [vmem:[#allocation4 + $0x102c] sm:$0xf0]  ;;  %6409 = vmatmul.bf16.vlgmr.msrb.gmra.mxu0 %v12222_v45  ;;  %v9540_v50 = vld [vmem:[#allocation4 + $0x1130] sm:$0xf0] }
 0x9a4   :  { %v9475_v12 = vor.u32 %v10404_v4, %v9474_v1  ;;  %6434 = vmatpush.bf16.msrb.mxu2 %v9347_v14  ;;  %6453 = vmatpush.bf16.msra.mxu0 %v9207_v47  ;;  %v10318_v51 = vld [vmem:[#allocation4 + $0xad4] sm:$0xf]  ;;  %v5429_v1 = vpop.f32.mrf.mxu1  ;;  %v9543_v4 = vor.u32 %v10418_v42, %v9540_v50  ;;  %v5442_v47 = vpop.f32.mrf.mxu2 }
 0x9a5   :  { %6422 = vmatmul.bf16.vlgmr.msrb.gmra.mxu1 %v12232_v30  ;;  %v9140_v44 = vld [vmem:[#allocation4 + $0xaf0] sm:$0xf0]  ;;  %v5430_v6 = vadd.f32 %v5429_v1, %v5417_v25  ;;  %v5418_v35 = vpop.f32.mrf.mxu0  ;;  %v10401_v25 = vld [vmem:[#allocation4 + $0xff4] sm:$0xf0] }
 0x9a6   :  { %6447 = vmatpush.bf16.msrb.mxu3 %v9475_v12  ;;  %6466 = vmatpush.bf16.msra.mxu1 %v9335_v15  ;;  %v10350_v29 = vld [vmem:[#allocation4 + $0xcd4] sm:$0xf]  ;;  %v9143_v9 = vor.u32 %v10318_v51, %v9140_v44  ;;  %v10369_v44 = vld [vmem:[#allocation4 + $0xdf4] sm:$0xf0] }
 0x9a7   :  { %6435 = vmatmul.bf16.vlgmr.msrb.gmra.mxu2 %v12217_v34  ;;  %v9396_v2 = vld [vmem:[#allocation4 + $0xef0] sm:$0xf0]  ;;  %v9271_v13 = vor.u32 %v10350_v29, %v9268_v55  ;;  %v5443_v23 = vadd.f32 %v5442_v47, %v5430_v6  ;;  %v9466_v29 = vld [vmem:[#allocation4 + $0xfd8] sm:$0xf] }
 0x9a8   :  { %6479 = vmatpush.bf16.msra.mxu2 %v9463_v19  ;;  %6454 = vmatpush.bf16.msra.mxu0 %v9191_v16  ;;  %v10414_v10 = vld [vmem:[#allocation4 + $0x10d4] sm:$0xf]  ;;  %v9399_v14 = vor.u32 %v10382_v63, %v9396_v2  ;;  %v9594_v55 = vld [vmem:[#allocation4 + $0x11d8] sm:$0xf]  ;;  %v9467_v6 = vor.u32 %v10401_v25, %v9466_v29 }
 0x9a9   :  { %6448 = vmatmul.bf16.vlgmr.msrb.gmra.mxu3 %v12227_v49  ;;  %v9524_v53 = vld [vmem:[#allocation4 + $0x10f0] sm:$0xf0]  ;;  %v10433_v63 = vld [vmem:[#allocation4 + $0x11f4] sm:$0xf0] }
 0x9aa   :  { %6492 = vmatpush.bf16.msra.mxu3 %v9591_v17  ;;  %6467 = vmatpush.bf16.msra.mxu1 %v9319_v22  ;;  %v10314_v11 = vld [vmem:[#allocation4 + $0xa94] sm:$0xf]  ;;  %v9527_v15 = vor.u32 %v10414_v10, %v9524_v53  ;;  %v5455_v17 = vpop.f32.mrf.mxu3  ;;  %v10397_v47 = vld [vmem:[#allocation4 + $0xfb4] sm:$0xf0] }
 0x9ab   :  { %v9124_v20 = vld [vmem:[#allocation4 + $0xab0] sm:$0xf0]  ;;  %v12241_v32 = vadd.f32 %v5455_v17, %v5443_v23  ;;  %v9178_v17 = vld [vmem:[#allocation4 + $0xb58] sm:$0xf] }
 0x9ac   :  { %6480 = vmatpush.bf16.msra.mxu2 %v9447_v26  ;;  %6455 = vmatpush.bf16.msra.mxu0 %v9175_v61  ;;  %v10346_v12 = vld [vmem:[#allocation4 + $0xc94] sm:$0xf]  ;;  %v9127_v31 = vor.u32 %v10314_v11, %v9124_v20  ;;  %v5431_v27 = vpop.f32.mrf.mxu1  ;;  %v5444_v52 = vpop.f32.mrf.mxu2  ;;  %v9595_v11 = vor.u32 %v10433_v63, %v9594_v55  ;;  %v10365_v20 = vld [vmem:[#allocation4 + $0xdb4] sm:$0xf0] }
 0x9ad   :  { %v9252_v19 = vld [vmem:[#allocation4 + $0xcb0] sm:$0xf0]  ;;  %v10361_v35 = vld [vmem:[#allocation4 + $0xd74] sm:$0xf0] }
 0x9ae   :  { %6493 = vmatpush.bf16.msra.mxu3 %v9575_v37  ;;  %6468 = vmatpush.bf16.msra.mxu1 %v9303_v43  ;;  %v10410_v24 = vld [vmem:[#allocation4 + $0x1094] sm:$0xf]  ;;  %v9255_v16 = vor.u32 %v10346_v12, %v9252_v19  ;;  %v9450_v12 = vld [vmem:[#allocation4 + $0xf98] sm:$0xf] }
 0x9af   :  { %v9508_v8 = vld [vmem:[#allocation4 + $0x10b0] sm:$0xf0]  ;;  %v10429_v19 = vld [vmem:[#allocation4 + $0x11b4] sm:$0xf0]  ;;  %v9451_v23 = vor.u32 %v10397_v47, %v9450_v12 }
 0x9b0   :  { %6481 = vmatpush.bf16.msra.mxu2 %v9431_v62  ;;  %6456 = vmatpush.bf16.msra.mxu0 %v9159_v3  ;;  %v10310_v22 = vld [vmem:[#allocation4 + $0xa54] sm:$0xf]  ;;  %v9511_v21 = vor.u32 %v10410_v24, %v9508_v8  ;;  %v10329_v24 = vld [vmem:[#allocation4 + $0xb74] sm:$0xf0] }
 0x9b1   :  { %v9108_v26 = vld [vmem:[#allocation4 + $0xa70] sm:$0xf0]  ;;  %v9306_v8 = vld [vmem:[#allocation4 + $0xd58] sm:$0xf] }
 0x9b2   :  { %6494 = vmatpush.bf16.msra.mxu3 %v9559_v0  ;;  %6469 = vmatpush.bf16.msra.mxu1 %v9287_v41  ;;  %v10342_v48 = vld [vmem:[#allocation4 + $0xc54] sm:$0xf]  ;;  %v9111_v61 = vor.u32 %v10310_v22, %v9108_v26  ;;  %v5457_v3 = vpop.f32.mrf.mxu3  ;;  %v10337_v41 = vld [vmem:[#allocation4 + $0xbf4] sm:$0xf0] }
 0x9b3   :  { %v9236_v37 = vld [vmem:[#allocation4 + $0xc70] sm:$0xf0]  ;;  %v9211_v10 = vor.u32 %v10337_v41, %v9210_v36  ;;  %v9562_v22 = vld [vmem:[#allocation4 + $0x1158] sm:$0xf] }
 0x9b4   :  { %6482 = vmatpush.bf16.msra.mxu2 %v9415_v5  ;;  %6457 = vmatpush.bf16.msra.mxu0 %v9143_v9  ;;  %v10374_v56 = vld [vmem:[#allocation4 + $0xe54] sm:$0xf]  ;;  %v9239_v62 = vor.u32 %v10342_v48, %v9236_v37  ;;  %v9338_v5 = vld [vmem:[#allocation4 + $0xdd8] sm:$0xf]  ;;  %v9179_v48 = vor.u32 %v10329_v24, %v9178_v17 }
 0x9b5   :  { %v9364_v28 = vld [vmem:[#allocation4 + $0xe70] sm:$0xf0]  ;;  %v9339_v53 = vor.u32 %v10369_v44, %v9338_v5  ;;  %v9194_v9 = vld [vmem:[#allocation4 + $0xb98] sm:$0xf] }
 0x9b6   :  { %6495 = vmatpush.bf16.msra.mxu3 %v9543_v4  ;;  %6470 = vmatpush.bf16.msra.mxu1 %v9271_v13  ;;  %v10406_v38 = vld [vmem:[#allocation4 + $0x1054] sm:$0xf]  ;;  %v9367_v57 = vor.u32 %v10374_v56, %v9364_v28  ;;  %v10333_v13 = vld [vmem:[#allocation4 + $0xbb4] sm:$0xf0] }
 0x9b7   :  { %v9492_v54 = vld [vmem:[#allocation4 + $0x1070] sm:$0xf0]  ;;  %v9195_v33 = vor.u32 %v10333_v13, %v9194_v9  ;;  %v10425_v26 = vld [vmem:[#allocation4 + $0x1174] sm:$0xf0] }
 0x9b8   :  { %6483 = vmatpush.bf16.msra.mxu2 %v9399_v14  ;;  %6458 = vmatpush.bf16.msra.mxu0 %v9127_v31  ;;  %v10306_v39 = vld [vmem:[#allocation4 + $0xa14] sm:$0xf]  ;;  %v9495_v58 = vor.u32 %v10406_v38, %v9492_v54  ;;  %v9322_v14 = vld [vmem:[#allocation4 + $0xd98] sm:$0xf]  ;;  %v4760_v38 = vperm.slane %v12235_v7, 1  ;;  %v9563_v54 = vor.u32 %v10425_v26, %v9562_v22 }
 0x9b9   :  { %v9092_v43 = vld [vmem:[#allocation4 + $0xa30] sm:$0xf0]  ;;  %v9323_v40 = vor.u32 %v10365_v20, %v9322_v14  ;;  %v9162_v27 = vld [vmem:[#allocation4 + $0xb18] sm:$0xf] }
 0x9ba   :  { %6496 = vmatpush.bf16.msra.mxu3 %v9527_v15  ;;  %6471 = vmatpush.bf16.msra.mxu1 %v9255_v16  ;;  %v10338_v18 = vld [vmem:[#allocation4 + $0xc14] sm:$0xf]  ;;  %v9095_v51 = vor.u32 %v10306_v39, %v9092_v43  ;;  %v9578_v15 = vld [vmem:[#allocation4 + $0x1198] sm:$0xf] }
 0x9bb   :  { %v9220_v59 = vld [vmem:[#allocation4 + $0xc30] sm:$0xf0]  ;;  %v9579_v31 = vor.u32 %v10429_v19, %v9578_v15  ;;  %v9434_v16 = vld [vmem:[#allocation4 + $0xf58] sm:$0xf]  ;;  %v5481_v3 = vpop.f32.mrf.mxu1 }
 0x9bc   :  { %6484 = vmatpush.bf16.msra.mxu2 %v9383_v46  ;;  %v10370_v0 = vld [vmem:[#allocation4 + $0xe14] sm:$0xf]  ;;  %6459 = vmatpush.bf16.msra.mxu0 %v9111_v61  ;;  %v9223_v1 = vor.u32 %v10338_v18, %v9220_v59  ;;  %v10393_v46 = vld [vmem:[#allocation4 + $0xf74] sm:$0xf0]  ;;  %v5468_v59 = vpop.f32.mrf.mxu0 }
 0x9bd   :  { %v9348_v60 = vld [vmem:[#allocation4 + $0xe30] sm:$0xf0]  ;;  %v9435_v37 = vor.u32 %v10393_v46, %v9434_v16  ;;  %v10325_v56 = vld [vmem:[#allocation4 + $0xb34] sm:$0xf0] }
 0x9be   :  { %6497 = vmatpush.bf16.msra.mxu3 %v9511_v21  ;;  %v10402_v42 = vld [vmem:[#allocation4 + $0x1014] sm:$0xf]  ;;  %6472 = vmatpush.bf16.msra.mxu1 %v9239_v62  ;;  %v9351_v4 = vor.u32 %v10370_v0, %v9348_v60  ;;  %v9307_v21 = vor.u32 %v10361_v35, %v9306_v8  ;;  %v9290_v28 = vld [vmem:[#allocation4 + $0xd18] sm:$0xf]  ;;  %v9163_v18 = vor.u32 %v10325_v56, %v9162_v27 }
 0x9bf   :  { %v9476_v50 = vld [vmem:[#allocation4 + $0x1030] sm:$0xf0]  ;;  %v10357_v61 = vld [vmem:[#allocation4 + $0xd34] sm:$0xf0] }
 0x9c0   :  { %6485 = vmatpush.bf16.msra.mxu2 %v9367_v57  ;;  %v9479_v2 = vor.u32 %v10402_v42, %v9476_v50  ;;  %6460 = vmatpush.bf16.msra.mxu0 %v9095_v51  ;;  %v9418_v39 = vld [vmem:[#allocation4 + $0xf18] sm:$0xf]  ;;  %v9291_v0 = vor.u32 %v10357_v61, %v9290_v28  ;;  %v5469_v50 = vadd.f32 %v5468_v59, %v4760_v38 }
 0x9c1   :  { %v10389_v43 = vld [vmem:[#allocation4 + $0xf34] sm:$0xf0] }
 0x9c2   :  { %6498 = vmatpush.bf16.msra.mxu3 %v9495_v58  ;;  %6473 = vmatpush.bf16.msra.mxu1 %v9223_v1  ;;  %v9546_v62 = vld [vmem:[#allocation4 + $0x1118] sm:$0xf]  ;;  %v9419_v52 = vor.u32 %v10389_v43, %v9418_v39  ;;  %v5482_v25 = vadd.f32 %v5481_v3, %v5469_v50  ;;  %v10399_v50 = vld [vmem:[#allocation4 + $0xfdc] sm:$0xf] }
 0x9c3   :  { %6461 = vmatmul.bf16.vlgmr.msra.gmra.mxu0 %v12222_v45  ;;  %v10421_v57 = vld [vmem:[#allocation4 + $0x1134] sm:$0xf0]  ;;  %v9468_v3 = vld [vmem:[#allocation4 + $0xff8] sm:$0xf0] }
 0x9c4   :  { %6486 = vmatpush.bf16.msra.mxu2 %v9351_v4  ;;  %6505 = vmatpush.bf16.msrb.mxu0 %v9211_v10  ;;  %v9146_v58 = vld [vmem:[#allocation4 + $0xad8] sm:$0xf]  ;;  %v9547_v36 = vor.u32 %v10421_v57, %v9546_v62 }
 0x9c5   :  { %6474 = vmatmul.bf16.vlgmr.msra.gmra.mxu1 %v12232_v30  ;;  %v10321_v60 = vld [vmem:[#allocation4 + $0xaf4] sm:$0xf0]  ;;  %v5507_v20 = vpop.f32.mrf.mxu3 }
 0x9c6   :  { %6499 = vmatpush.bf16.msra.mxu3 %v9479_v2  ;;  %6518 = vmatpush.bf16.msrb.mxu1 %v9339_v53  ;;  %v9274_v42 = vld [vmem:[#allocation4 + $0xcd8] sm:$0xf]  ;;  %v9147_v1 = vor.u32 %v10321_v60, %v9146_v58  ;;  %v5494_v53 = vpop.f32.mrf.mxu2  ;;  %v10367_v58 = vld [vmem:[#allocation4 + $0xddc] sm:$0xf] }
 0x9c7   :  { %6487 = vmatmul.bf16.vlgmr.msra.gmra.mxu2 %v12217_v34  ;;  %v10353_v41 = vld [vmem:[#allocation4 + $0xcf4] sm:$0xf0] }
 0x9c8   :  { %6531 = vmatpush.bf16.msrb.mxu2 %v9467_v6  ;;  %6506 = vmatpush.bf16.msrb.mxu0 %v9195_v33  ;;  %v9402_v5 = vld [vmem:[#allocation4 + $0xed8] sm:$0xf]  ;;  %v9275_v4 = vor.u32 %v10353_v41, %v9274_v42  ;;  %v5470_v33 = vpop.f32.mrf.mxu0  ;;  %v9340_v42 = vld [vmem:[#allocation4 + $0xdf8] sm:$0xf0] }
 0x9c9   :  { %6500 = vmatmul.bf16.vlgmr.msra.gmra.mxu3 %v12227_v49  ;;  %v10385_v51 = vld [vmem:[#allocation4 + $0xef4] sm:$0xf0] }
 0x9ca   :  { %6544 = vmatpush.bf16.msrb.mxu3 %v9595_v11  ;;  %6519 = vmatpush.bf16.msrb.mxu1 %v9323_v40  ;;  %v9530_v44 = vld [vmem:[#allocation4 + $0x10d8] sm:$0xf]  ;;  %v9403_v55 = vor.u32 %v10385_v51, %v9402_v5  ;;  %v5495_v11 = vadd.f32 %v5494_v53, %v5482_v25  ;;  %v10431_v5 = vld [vmem:[#allocation4 + $0x11dc] sm:$0xf]  ;;  %v9343_v25 = vor.u32 %v10367_v58, %v9340_v42 }
 0x9cb   :  { %v10417_v29 = vld [vmem:[#allocation4 + $0x10f4] sm:$0xf0]  ;;  %v9596_v51 = vld [vmem:[#allocation4 + $0x11f8] sm:$0xf0] }
 0x9cc   :  { %6532 = vmatpush.bf16.msrb.mxu2 %v9451_v23  ;;  %6507 = vmatpush.bf16.msrb.mxu0 %v9179_v48  ;;  %v9130_v63 = vld [vmem:[#allocation4 + $0xa98] sm:$0xf]  ;;  %v9531_v6 = vor.u32 %v10417_v29, %v9530_v44  ;;  %v12248_v19 = vadd.f32 %v5507_v20, %v5495_v11  ;;  %v10395_v53 = vld [vmem:[#allocation4 + $0xf9c] sm:$0xf] }
 0x9cd   :  { %v10317_v2 = vld [vmem:[#allocation4 + $0xab4] sm:$0xf0]  ;;  %v5509_v59 = vpop.f32.mrf.mxu3  ;;  %v9404_v58 = vld [vmem:[#allocation4 + $0xef8] sm:$0xf0] }
 0x9ce   :  { %6545 = vmatpush.bf16.msrb.mxu3 %v9579_v31  ;;  %6520 = vmatpush.bf16.msrb.mxu1 %v9307_v21  ;;  %v9258_v10 = vld [vmem:[#allocation4 + $0xc98] sm:$0xf]  ;;  %v9131_v15 = vor.u32 %v10317_v2, %v9130_v63  ;;  %v5483_v31 = vpop.f32.mrf.mxu1  ;;  %v5496_v39 = vpop.f32.mrf.mxu2  ;;  %v10363_v63 = vld [vmem:[#allocation4 + $0xd9c] sm:$0xf]  ;;  %v9599_v2 = vor.u32 %v10431_v5, %v9596_v51 }
 0x9cf   :  { %v10349_v9 = vld [vmem:[#allocation4 + $0xcb4] sm:$0xf0]  ;;  %v9532_v42 = vld [vmem:[#allocation4 + $0x10f8] sm:$0xf0] }
 0x9d0   :  { %6533 = vmatpush.bf16.msrb.mxu2 %v9435_v37  ;;  %6508 = vmatpush.bf16.msrb.mxu0 %v9163_v18  ;;  %v9386_v13 = vld [vmem:[#allocation4 + $0xe98] sm:$0xf]  ;;  %v9259_v40 = vor.u32 %v10349_v9, %v9258_v10  ;;  %v9324_v10 = vld [vmem:[#allocation4 + $0xdb8] sm:$0xf0] }
 0x9d1   :  { %v10381_v14 = vld [vmem:[#allocation4 + $0xeb4] sm:$0xf0]  ;;  %v10427_v9 = vld [vmem:[#allocation4 + $0x119c] sm:$0xf]  ;;  %v9327_v11 = vor.u32 %v10363_v63, %v9324_v10 }
 0x9d2   :  { %6546 = vmatpush.bf16.msrb.mxu3 %v9563_v54  ;;  %6521 = vmatpush.bf16.msrb.mxu1 %v9291_v0  ;;  %v9514_v12 = vld [vmem:[#allocation4 + $0x1098] sm:$0xf]  ;;  %v9387_v23 = vor.u32 %v10381_v14, %v9386_v13  ;;  %v10335_v0 = vld [vmem:[#allocation4 + $0xbdc] sm:$0xf] }
 0x9d3   :  { %v10413_v47 = vld [vmem:[#allocation4 + $0x10b4] sm:$0xf0]  ;;  %v9580_v13 = vld [vmem:[#allocation4 + $0x11b8] sm:$0xf0] }
 0x9d4   :  { %6534 = vmatpush.bf16.msrb.mxu2 %v9419_v52  ;;  %6509 = vmatpush.bf16.msrb.mxu0 %v9147_v1  ;;  %v9114_v17 = vld [vmem:[#allocation4 + $0xa58] sm:$0xf]  ;;  %v9515_v35 = vor.u32 %v10413_v47, %v9514_v12  ;;  %v9212_v52 = vld [vmem:[#allocation4 + $0xbf8] sm:$0xf0]  ;;  %v9471_v1 = vor.u32 %v10399_v50, %v9468_v3  ;;  %v9583_v33 = vor.u32 %v10427_v9, %v9580_v13 }
 0x9d5   :  { %v10313_v24 = vld [vmem:[#allocation4 + $0xa74] sm:$0xf0]  ;;  %v9215_v29 = vor.u32 %v10335_v0, %v9212_v52  ;;  %v10327_v12 = vld [vmem:[#allocation4 + $0xb5c] sm:$0xf] }
 0x9d6   :  { %6547 = vmatpush.bf16.msrb.mxu3 %v9547_v36  ;;  %6522 = vmatpush.bf16.msrb.mxu1 %v9275_v4  ;;  %v9242_v8 = vld [vmem:[#allocation4 + $0xc58] sm:$0xf]  ;;  %v9115_v27 = vor.u32 %v10313_v24, %v9114_v17  ;;  %v10331_v4 = vld [vmem:[#allocation4 + $0xb9c] sm:$0xf] }
 0x9d7   :  { %v10345_v16 = vld [vmem:[#allocation4 + $0xc74] sm:$0xf0]  ;;  %v9180_v47 = vld [vmem:[#allocation4 + $0xb78] sm:$0xf0] }
 0x9d8   :  { %6535 = vmatpush.bf16.msrb.mxu2 %v9403_v55  ;;  %v9370_v46 = vld [vmem:[#allocation4 + $0xe58] sm:$0xf]  ;;  %6510 = vmatpush.bf16.msrb.mxu0 %v9131_v15  ;;  %v9243_v56 = vor.u32 %v10345_v16, %v9242_v8  ;;  %v9196_v55 = vld [vmem:[#allocation4 + $0xbb8] sm:$0xf0]  ;;  %v9183_v31 = vor.u32 %v10327_v12, %v9180_v47 }
 0x9d9   :  { %v10377_v22 = vld [vmem:[#allocation4 + $0xe74] sm:$0xf0]  ;;  %v9199_v14 = vor.u32 %v10331_v4, %v9196_v55  ;;  %v10359_v15 = vld [vmem:[#allocation4 + $0xd5c] sm:$0xf] }
 0x9da   :  { %6548 = vmatpush.bf16.msrb.mxu3 %v9531_v6  ;;  %v9498_v26 = vld [vmem:[#allocation4 + $0x1058] sm:$0xf]  ;;  %6523 = vmatpush.bf16.msrb.mxu1 %v9259_v40  ;;  %v9371_v28 = vor.u32 %v10377_v22, %v9370_v46  ;;  %v9452_v6 = vld [vmem:[#allocation4 + $0xfb8] sm:$0xf0] }
 0x9db   :  { %v10409_v48 = vld [vmem:[#allocation4 + $0x1074] sm:$0xf0]  ;;  %v9455_v20 = vor.u32 %v10395_v53, %v9452_v6  ;;  %v9308_v40 = vld [vmem:[#allocation4 + $0xd78] sm:$0xf0] }
 0x9dc   :  { %v9098_v21 = vld [vmem:[#allocation4 + $0xa18] sm:$0xf]  ;;  %6536 = vmatpush.bf16.msrb.mxu2 %v9387_v23  ;;  %v9499_v43 = vor.u32 %v10409_v48, %v9498_v26  ;;  %6511 = vmatpush.bf16.msrb.mxu0 %v9115_v27  ;;  %v10391_v23 = vld [vmem:[#allocation4 + $0xf5c] sm:$0xf] }
 0x9dd   :  { %v10309_v37 = vld [vmem:[#allocation4 + $0xa34] sm:$0xf0]  ;;  %v9436_v17 = vld [vmem:[#allocation4 + $0xf78] sm:$0xf0] }
 0x9de   :  { %v9226_v38 = vld [vmem:[#allocation4 + $0xc18] sm:$0xf]  ;;  %6549 = vmatpush.bf16.msrb.mxu3 %v9515_v35  ;;  %v9099_v60 = vor.u32 %v10309_v37, %v9098_v21  ;;  %6524 = vmatpush.bf16.msrb.mxu1 %v9243_v56  ;;  %v10423_v24 = vld [vmem:[#allocation4 + $0x115c] sm:$0xf]  ;;  %v9311_v35 = vor.u32 %v10359_v15, %v9308_v40  ;;  %v9439_v16 = vor.u32 %v10391_v23, %v9436_v17 }
 0x9df   :  { %v10341_v54 = vld [vmem:[#allocation4 + $0xc34] sm:$0xf0]  ;;  %v9564_v8 = vld [vmem:[#allocation4 + $0x1178] sm:$0xf0] }
 0x9e0   :  { %v9354_v61 = vld [vmem:[#allocation4 + $0xe18] sm:$0xf]  ;;  %6537 = vmatpush.bf16.msrb.mxu2 %v9371_v28  ;;  %v9227_v36 = vor.u32 %v10341_v54, %v9226_v38  ;;  %6512 = vmatpush.bf16.msrb.mxu0 %v9099_v60  ;;  %v10323_v46 = vld [vmem:[#allocation4 + $0xb1c] sm:$0xf]  ;;  %v9567_v48 = vor.u32 %v10423_v24, %v9564_v8  ;;  %v12254_v54 = vpop.f32.mrf.mxu0 }
 0x9e1   :  { %v10373_v62 = vld [vmem:[#allocation4 + $0xe34] sm:$0xf0]  ;;  %v9164_v22 = vld [vmem:[#allocation4 + $0xb38] sm:$0xf0] }
 0x9e2   :  { %v9482_v57 = vld [vmem:[#allocation4 + $0x1018] sm:$0xf]  ;;  %v9355_v41 = vor.u32 %v10373_v62, %v9354_v61  ;;  %6550 = vmatpush.bf16.msrb.mxu3 %v9499_v43  ;;  %6525 = vmatpush.bf16.msrb.mxu1 %v9227_v36  ;;  %v10355_v26 = vld [vmem:[#allocation4 + $0xd1c] sm:$0xf]  ;;  %v9167_v38 = vor.u32 %v10323_v46, %v9164_v22 }
 0x9e3   :  { %v10405_v18 = vld [vmem:[#allocation4 + $0x1034] sm:$0xf0]  ;;  %6513 = vmatmul.bf16.vlgmr.msrb.gmra.mxu0 %v12222_v45  ;;  %v9292_v27 = vld [vmem:[#allocation4 + $0xd38] sm:$0xf0] }
 0x9e4   :  { %v9483_v44 = vor.u32 %v10405_v18, %v9482_v57  ;;  %6538 = vmatpush.bf16.msrb.mxu2 %v9355_v41  ;;  %6557 = vmatpush.bf16.msra.mxu0 %v9215_v29  ;;  %v10387_v21 = vld [vmem:[#allocation4 + $0xf1c] sm:$0xf]  ;;  %v9295_v61 = vor.u32 %v10355_v26, %v9292_v27  ;;  %v12256_v18 = vpop.f32.mrf.mxu1 }
 0x9e5   :  { %6526 = vmatmul.bf16.vlgmr.msrb.gmra.mxu1 %v12232_v30  ;;  %v9420_v37 = vld [vmem:[#allocation4 + $0xf38] sm:$0xf0] }
 0x9e6   :  { %6551 = vmatpush.bf16.msrb.mxu3 %v9483_v44  ;;  %6570 = vmatpush.bf16.msra.mxu1 %v9343_v25  ;;  %v10419_v56 = vld [vmem:[#allocation4 + $0x111c] sm:$0xf]  ;;  %v9423_v39 = vor.u32 %v10387_v21, %v9420_v37  ;;  %v12258_v44 = vpop.f32.mrf.mxu2 }
 0x9e7   :  { %6539 = vmatmul.bf16.vlgmr.msrb.gmra.mxu2 %v12217_v34  ;;  %v9548_v28 = vld [vmem:[#allocation4 + $0x1138] sm:$0xf0]  ;;  %v12260_v55 = vpop.f32.mrf.mxu3 }
 0x9e8   :  { %6583 = vmatpush.bf16.msra.mxu2 %v9471_v1  ;;  %6558 = vmatpush.bf16.msra.mxu0 %v9199_v14  ;;  %v10319_v43 = vld [vmem:[#allocation4 + $0xadc] sm:$0xf]  ;;  %v9551_v59 = vor.u32 %v10419_v56, %v9548_v28  ;;  %v5522_v53 = vpop.f32.mrf.mxu0 }
 0x9e9   :  { %6552 = vmatmul.bf16.vlgmr.msrb.gmra.mxu3 %v12227_v49  ;;  %v9148_v62 = vld [vmem:[#allocation4 + $0xaf8] sm:$0xf0] }
 0x9ea   :  { %6596 = vmatpush.bf16.msra.mxu3 %v9599_v2  ;;  %6571 = vmatpush.bf16.msra.mxu1 %v9327_v11  ;;  %v10351_v57 = vld [vmem:[#allocation4 + $0xcdc] sm:$0xf]  ;;  %v9151_v50 = vor.u32 %v10319_v43, %v9148_v62  ;;  %v10441_v43 = vld [vmem:[%s12482_s7 + $0x38] sm:$0xff] }
 0x9eb   :  { %v9276_v0 = vld [vmem:[#allocation4 + $0xcf8] sm:$0xf0]  ;;  %v10449_v62 = vld [vmem:[%s12482_s7 + $0x78] sm:$0xff] }
 0x9ec   :  { %6584 = vmatpush.bf16.msra.mxu2 %v9455_v20  ;;  %6559 = vmatpush.bf16.msra.mxu0 %v9183_v31  ;;  %v10383_v52 = vld [vmem:[#allocation4 + $0xedc] sm:$0xf]  ;;  %v9279_v3 = vor.u32 %v10351_v57, %v9276_v0  ;;  %v5535_v20 = vpop.f32.mrf.mxu1  ;;  %v10457_v57 = vld [vmem:[%s12482_s7 + $0xb8] sm:$0xff] }
 0x9ed   :  { %v10415_v60 = vld [vmem:[#allocation4 + $0x10dc] sm:$0xf]  ;;  %v9407_v36 = vor.u32 %v10383_v52, %v9404_v58 }
 0x9ee   :  { %6597 = vmatpush.bf16.msra.mxu3 %v9583_v33  ;;  %6572 = vmatpush.bf16.msra.mxu1 %v9311_v35  ;;  %v10315_v41 = vld [vmem:[#allocation4 + $0xa9c] sm:$0xf]  ;;  %v9535_v29 = vor.u32 %v10415_v60, %v9532_v42  ;;  %v5548_v46 = vpop.f32.mrf.mxu2 }
 0x9ef   :  { %v9132_v5 = vld [vmem:[#allocation4 + $0xab8] sm:$0xf0]  ;;  %v5561_v21 = vpop.f32.mrf.mxu3  ;;  %v5616_v46 = vmax.f32 %v12248_v19, 0.0 }
 0x9f0   :  { %6585 = vmatpush.bf16.msra.mxu2 %v9439_v16  ;;  %6560 = vmatpush.bf16.msra.mxu0 %v9167_v38  ;;  %v10347_v51 = vld [vmem:[#allocation4 + $0xc9c] sm:$0xf]  ;;  %v9135_v10 = vor.u32 %v10315_v41, %v9132_v5  ;;  %v10446_v41 = vld [vmem:[%s12482_s7 + $0x60] sm:$0xff] }
 0x9f1   :  { %v9260_v25 = vld [vmem:[#allocation4 + $0xcb8] sm:$0xf0]  ;;  %v6614_v19 = vpack.c.bf16 %v5616_v46, %v5616_v46 }
 0x9f2   :  { %6598 = vmatpush.bf16.msra.mxu3 %v9567_v48  ;;  %6573 = vmatpush.bf16.msra.mxu1 %v9295_v61  ;;  %v10379_v1 = vld [vmem:[#allocation4 + $0xe9c] sm:$0xf]  ;;  %v9263_v6 = vor.u32 %v10347_v51, %v9260_v25  ;;  %v10462_v25 = vld [vmem:[%s12482_s7 + $0xe0] sm:$0xff] }
 0x9f3   :  { %v9388_v4 = vld [vmem:[#allocation4 + $0xeb8] sm:$0xf0] }
 0x9f4   :  { %6586 = vmatpush.bf16.msra.mxu2 %v9423_v39  ;;  %v10411_v63 = vld [vmem:[#allocation4 + $0x109c] sm:$0xf]  ;;  %6561 = vmatpush.bf16.msra.mxu0 %v9151_v50  ;;  %v9391_v9 = vor.u32 %v10379_v1, %v9388_v4  ;;  %v10437_v1 = vld [vmem:[%s12482_s7 + $0x18] sm:$0xff] }
 0x9f5   :  { %v9516_v2 = vld [vmem:[#allocation4 + $0x10b8] sm:$0xf0]  ;;  %v10445_v4 = vld [vmem:[%s12482_s7 + $0x58] sm:$0xff] }
 0x9f6   :  { %6599 = vmatpush.bf16.msra.mxu3 %v9551_v59  ;;  %6574 = vmatpush.bf16.msra.mxu1 %v9279_v3  ;;  %v10311_v13 = vld [vmem:[#allocation4 + $0xa5c] sm:$0xf]  ;;  %v9519_v12 = vor.u32 %v10411_v63, %v9516_v2  ;;  %v10465_v59 = vld [vmem:[%s12482_s7 + $0xf8] sm:$0xff]  ;;  %v10438_v3 = vld [vmem:[%s12482_s7 + $0x20] sm:$0xff] }
 0x9f7   :  { %v9116_v14 = vld [vmem:[#allocation4 + $0xa78] sm:$0xf0] }
 0x9f8   :  { %6587 = vmatpush.bf16.msra.mxu2 %v9407_v36  ;;  %v10343_v11 = vld [vmem:[#allocation4 + $0xc5c] sm:$0xf]  ;;  %6562 = vmatpush.bf16.msra.mxu0 %v9135_v10  ;;  %v9119_v17 = vor.u32 %v10311_v13, %v9116_v14 }
 0x9f9   :  { %v9244_v47 = vld [vmem:[#allocation4 + $0xc78] sm:$0xf0] }
 0x9fa   :  { %6600 = vmatpush.bf16.msra.mxu3 %v9535_v29  ;;  %v10375_v15 = vld [vmem:[#allocation4 + $0xe5c] sm:$0xf]  ;;  %6575 = vmatpush.bf16.msra.mxu1 %v9263_v6  ;;  %v9247_v24 = vor.u32 %v10343_v11, %v9244_v47  ;;  %v10461_v6 = vld [vmem:[%s12482_s7 + $0xd8] sm:$0xff] }
 0x9fb   :  { %v9372_v33 = vld [vmem:[#allocation4 + $0xe78] sm:$0xf0] }
 0x9fc   :  { %v10407_v40 = vld [vmem:[#allocation4 + $0x105c] sm:$0xf]  ;;  %6588 = vmatpush.bf16.msra.mxu2 %v9391_v9  ;;  %v9375_v8 = vor.u32 %v10375_v15, %v9372_v33  ;;  %6563 = vmatpush.bf16.msra.mxu0 %v9119_v17 }
 0x9fd   :  { %v9500_v23 = vld [vmem:[#allocation4 + $0x1078] sm:$0xf0] }
 0x9fe   :  { %v10307_v31 = vld [vmem:[#allocation4 + $0xa1c] sm:$0xf]  ;;  %6601 = vmatpush.bf16.msra.mxu3 %v9519_v12  ;;  %v9503_v22 = vor.u32 %v10407_v40, %v9500_v23  ;;  %6576 = vmatpush.bf16.msra.mxu1 %v9247_v24  ;;  %v5572_v36 = vpop.f32.mrf.mxu0 }
 0x9ff   :  { %v9100_v35 = vld [vmem:[#allocation4 + $0xa38] sm:$0xf0] }
 0xa00   :  { %v10339_v16 = vld [vmem:[#allocation4 + $0xc1c] sm:$0xf]  ;;  %v9103_v28 = vor.u32 %v10307_v31, %v9100_v35  ;;  %6589 = vmatpush.bf16.msra.mxu2 %v9375_v8  ;;  %v5585_v5 = vpop.f32.mrf.mxu1  ;;  %v10434_v31 = vld [vmem:[%s12482_s7] sm:$0xff]  ;;  %v5615_v35 = vmax.f32 %v12241_v32, 0.0  ;;  %v10481_v32 = vld [vmem:[%s12482_s7 + $0x178] sm:$0xff] }
 0xa01   :  { %v9228_v26 = vld [vmem:[#allocation4 + $0xc38] sm:$0xf0] }
 0xa02   :  { %v10371_v48 = vld [vmem:[#allocation4 + $0xe1c] sm:$0xf]  ;;  %v9231_v38 = vor.u32 %v10339_v16, %v9228_v26  ;;  %6602 = vmatpush.bf16.msra.mxu3 %v9503_v22  ;;  %6564 = vmatpush.bf16.msra.mxu0 %v9103_v28  ;;  %v10442_v16 = vld [vmem:[%s12482_s7 + $0x40] sm:$0xff]  ;;  %v10473_v22 = vld [vmem:[%s12482_s7 + $0x138] sm:$0xff]  ;;  %v6613_v21 = vpack.c.bf16 %v5615_v35, %v5615_v35 }
 0xa03   :  { %v9356_v27 = vld [vmem:[#allocation4 + $0xe38] sm:$0xf0] }
 0xa04   :  { %v10403_v37 = vld [vmem:[#allocation4 + $0x101c] sm:$0xf]  ;;  %v9359_v61 = vor.u32 %v10371_v48, %v9356_v27  ;;  %6577 = vmatpush.bf16.msra.mxu1 %v9231_v38  ;;  %v10458_v27 = vld [vmem:[%s12482_s7 + $0xc0] sm:$0xff] }
 0xa05   :  { %v9484_v56 = vld [vmem:[#allocation4 + $0x1038] sm:$0xf0]  ;;  %6565 = vmatmul.bf16.vlgmr.msra.gmra.mxu0 %v12222_v45 }
 0xa06   :  { %v9487_v39 = vor.u32 %v10403_v37, %v9484_v56  ;;  %6590 = vmatpush.bf16.msra.mxu2 %v9359_v61  ;;  %7137 = vmatpush.bf16.msrb.mxu0 %v10441_v43  ;;  %v10440_v0 = vld [vmem:[%s12482_s7 + $0x30] sm:$0xff]  ;;  %v10439_v42 = vld [vmem:[%s12482_s7 + $0x28] sm:$0xff]  ;;  %v5574_v13 = vpop.f32.mrf.mxu0  ;;  %v12382_v61 = vld [vmem:[#allocation15] sm:$0xf] }
 0xa07   :  { %v10448_v52 = vld [vmem:[%s12482_s7 + $0x70] sm:$0xff]  ;;  %6578 = vmatmul.bf16.vlgmr.msra.gmra.mxu1 %v12232_v30  ;;  %v10447_v45 = vld [vmem:[%s12482_s7 + $0x68] sm:$0xff]  ;;  %v4762_v30 = vperm.slane %v12235_v7, 3  ;;  %v5754_v13 = vperm.slane %v12382_v61, 1 }
 0xa08   :  { %6603 = vmatpush.bf16.msra.mxu3 %v9487_v39  ;;  %7150 = vmatpush.bf16.msrb.mxu1 %v10449_v62  ;;  %v10456_v58 = vld [vmem:[%s12482_s7 + $0xb0] sm:$0xff]  ;;  %v10463_v50 = vld [vmem:[%s12482_s7 + $0xe8] sm:$0xff]  ;;  %v5598_v63 = vpop.f32.mrf.mxu2  ;;  %v5587_v11 = vpop.f32.mrf.mxu1  ;;  %v5753_v62 = vperm.slane %v12382_v61, 0 }
 0xa09   :  { %6591 = vmatmul.bf16.vlgmr.msra.gmra.mxu2 %v12217_v34  ;;  %v10464_v60 = vld [vmem:[%s12482_s7 + $0xf0] sm:$0xff]  ;;  %v10455_v34 = vld [vmem:[%s12482_s7 + $0xa8] sm:$0xff]  ;;  %v5573_v29 = vadd.f32 %v5572_v36, %v4762_v30 }
 0xa0a   :  { %7163 = vmatpush.bf16.msrb.mxu2 %v10457_v57  ;;  %7138 = vmatpush.bf16.msrb.mxu0 %v10440_v0  ;;  %v5611_v2 = vpop.f32.mrf.mxu3  ;;  %v10436_v9 = vld [vmem:[%s12482_s7 + $0x10] sm:$0xff]  ;;  %v10435_v15 = vld [vmem:[%s12482_s7 + $0x8] sm:$0xff]  ;;  %v10470_v57 = vld [vmem:[%s12482_s7 + $0x120] sm:$0xff] }
 0xa0b   :  { %6604 = vmatmul.bf16.vlgmr.msra.gmra.mxu3 %v12227_v49  ;;  %v4761_v49 = vperm.slane %v12235_v7, 2  ;;  %v10454_v7 = vld [vmem:[%s12482_s7 + $0xa0] sm:$0xff]  ;;  %v5586_v53 = vadd.f32 %v5585_v5, %v5573_v29  ;;  %v10444_v14 = vld [vmem:[%s12482_s7 + $0x50] sm:$0xff]  ;;  %v10443_v33 = vld [vmem:[%s12482_s7 + $0x48] sm:$0xff] }
 0xa0c   :  { %7176 = vmatpush.bf16.msrb.mxu3 %v10465_v59  ;;  %7151 = vmatpush.bf16.msrb.mxu1 %v10448_v52  ;;  %v10460_v47 = vld [vmem:[%s12482_s7 + $0xd0] sm:$0xff]  ;;  %v10459_v8 = vld [vmem:[%s12482_s7 + $0xc8] sm:$0xff]  ;;  %v10478_v0 = vld [vmem:[%s12482_s7 + $0x160] sm:$0xff] }
 0xa0d   :  { %v5521_v51 = vadd.f32 %v12254_v54, %v4761_v49  ;;  %v10453_v54 = vld [vmem:[%s12482_s7 + $0x98] sm:$0xff]  ;;  %v5599_v12 = vadd.f32 %v5598_v63, %v5586_v53  ;;  %v10472_v37 = vld [vmem:[%s12482_s7 + $0x130] sm:$0xff]  ;;  %v10471_v39 = vld [vmem:[%s12482_s7 + $0x128] sm:$0xff] }
 0xa0e   :  { %7164 = vmatpush.bf16.msrb.mxu2 %v10456_v58  ;;  %7139 = vmatpush.bf16.msrb.mxu0 %v10439_v42  ;;  %v10480_v56 = vld [vmem:[%s12482_s7 + $0x170] sm:$0xff]  ;;  %v10479_v43 = vld [vmem:[%s12482_s7 + $0x168] sm:$0xff]  ;;  %v10469_v42 = vld [vmem:[%s12482_s7 + $0x118] sm:$0xff] }
 0xa0f   :  { %v5534_v10 = vadd.f32 %v12256_v18, %v5521_v51  ;;  %v10452_v18 = vld [vmem:[%s12482_s7 + $0x90] sm:$0xff]  ;;  %v5612_v24 = vadd.f32 %v5611_v2, %v5599_v12  ;;  %v10467_v51 = vld [vmem:[%s12482_s7 + $0x108] sm:$0xff]  ;;  %v10466_v63 = vld [vmem:[%s12482_s7 + $0x100] sm:$0xff] }
 0xa10   :  { %7177 = vmatpush.bf16.msrb.mxu3 %v10464_v60  ;;  %7152 = vmatpush.bf16.msrb.mxu1 %v10447_v45  ;;  %v5600_v40 = vpop.f32.mrf.mxu2  ;;  %v10477_v45 = vld [vmem:[%s12482_s7 + $0x158] sm:$0xff]  ;;  %v10476_v36 = vld [vmem:[%s12482_s7 + $0x150] sm:$0xff]  ;;  %v10475_v29 = vld [vmem:[%s12482_s7 + $0x148] sm:$0xff] }
 0xa11   :  { %v5547_v20 = vadd.f32 %v12258_v44, %v5534_v10  ;;  %v10451_v44 = vld [vmem:[%s12482_s7 + $0x88] sm:$0xff]  ;;  %v5618_v48 = vmax.f32 %v5612_v24, 0.0  ;;  %v10474_v2 = vld [vmem:[%s12482_s7 + $0x140] sm:$0xff] }
 0xa12   :  { %7165 = vmatpush.bf16.msrb.mxu2 %v10455_v34  ;;  %7140 = vmatpush.bf16.msrb.mxu0 %v10438_v3  ;;  %v5613_v23 = vpop.f32.mrf.mxu3  ;;  %v10487_v10 = vld [vmem:[%s12482_s7 + $0x1a8] sm:$0xff] }
 0xa13   :  { %v5560_v17 = vadd.f32 %v12260_v55, %v5547_v20  ;;  %v10450_v55 = vld [vmem:[%s12482_s7 + $0x80] sm:$0xff]  ;;  %v6616_v38 = vpack.c.bf16 %v5618_v48, %v5618_v48  ;;  %v10484_v20 = vld [vmem:[%s12482_s7 + $0x190] sm:$0xff]  ;;  %v10493_v48 = vld [vmem:[%s12482_s7 + $0x1d8] sm:$0xff] }
 0xa14   :  { %7178 = vmatpush.bf16.msrb.mxu3 %v10463_v50  ;;  %7153 = vmatpush.bf16.msrb.mxu1 %v10446_v41  ;;  %v10468_v50 = vld [vmem:[%s12482_s7 + $0x110] sm:$0xff] }
 0xa15   :  { %v5617_v26 = vmax.f32 %v5560_v17, 0.0 }
 0xa16   :  { %7166 = vmatpush.bf16.msrb.mxu2 %v10454_v7  ;;  %7141 = vmatpush.bf16.msrb.mxu0 %v10437_v1  ;;  %v10489_v7 = vld [vmem:[%s12482_s7 + $0x1b8] sm:$0xff]  ;;  %v10488_v1 = vld [vmem:[%s12482_s7 + $0x1b0] sm:$0xff] }
 0xa17   :  { %v6615_v28 = vpack.c.bf16 %v5617_v26, %v5617_v26  ;;  %v5755_v26 = vperm.slane %v12382_v61, 2 }
 0xa18   :  { %7179 = vmatpush.bf16.msrb.mxu3 %v10462_v25  ;;  %7154 = vmatpush.bf16.msrb.mxu1 %v10445_v4 }
 0xa1a   :  { %7167 = vmatpush.bf16.msrb.mxu2 %v10453_v54  ;;  %7142 = vmatpush.bf16.msrb.mxu0 %v10436_v9  ;;  %v10485_v9 = vld [vmem:[%s12482_s7 + $0x198] sm:$0xff] }
 0xa1c   :  { %7180 = vmatpush.bf16.msrb.mxu3 %v10461_v6  ;;  %7155 = vmatpush.bf16.msrb.mxu1 %v10444_v14  ;;  %v10486_v6 = vld [vmem:[%s12482_s7 + $0x1a0] sm:$0xff] }
 0xa1e   :  { %7168 = vmatpush.bf16.msrb.mxu2 %v10452_v18  ;;  %7143 = vmatpush.bf16.msrb.mxu0 %v10435_v15 }
 0xa20   :  { %7181 = vmatpush.bf16.msrb.mxu3 %v10460_v47  ;;  %7156 = vmatpush.bf16.msrb.mxu1 %v10443_v33  ;;  %v6410_v59 = vpop.f32.mrf.mxu0 }
 0xa21   :  { %v6411_v52 = vadd.f32 %v6410_v59, %v5753_v62 }
 0xa22   :  { %7169 = vmatpush.bf16.msrb.mxu2 %v10451_v44  ;;  %7144 = vmatpush.bf16.msrb.mxu0 %v10434_v31  ;;  %v6423_v58 = vpop.f32.mrf.mxu1  ;;  %v10483_v44 = vld [vmem:[%s12482_s7 + $0x188] sm:$0xff]  ;;  %v10497_v31 = vld [vmem:[%s12482_s7 + $0x1f8] sm:$0xff] }
 0xa23   :  { %v6424_v60 = vadd.f32 %v6423_v58, %v6411_v52 }
 0xa24   :  { %7182 = vmatpush.bf16.msrb.mxu3 %v10459_v8  ;;  %7157 = vmatpush.bf16.msrb.mxu1 %v10442_v16  ;;  %v10482_v8 = vld [vmem:[%s12482_s7 + $0x180] sm:$0xff]  ;;  %v10496_v16 = vld [vmem:[%s12482_s7 + $0x1f0] sm:$0xff] }
 0xa25   :  { %7145 = vmatmul.bf16.vlgmr.msrb.gmra.mxu0 %v6613_v21  ;;  %v10492_v21 = vld [vmem:[%s12482_s7 + $0x1d0] sm:$0xff] }
 0xa26   :  { %7170 = vmatpush.bf16.msrb.mxu2 %v10450_v55  ;;  %7189 = vmatpush.bf16.msra.mxu0 %v10473_v22  ;;  %v10495_v22 = vld [vmem:[%s12482_s7 + $0x1e8] sm:$0xff] }
 0xa27   :  { %7158 = vmatmul.bf16.vlgmr.msrb.gmra.mxu1 %v6614_v19 }
 0xa28   :  { %7202 = vmatpush.bf16.msra.mxu1 %v10481_v32  ;;  %7183 = vmatpush.bf16.msrb.mxu3 %v10458_v27  ;;  %v6412_v3 = vpop.f32.mrf.mxu0  ;;  %v10494_v32 = vld [vmem:[%s12482_s7 + $0x1e0] sm:$0xff] }
 0xa29   :  { %7171 = vmatmul.bf16.vlgmr.msrb.gmra.mxu2 %v6615_v28 }
 0xa2a   :  { %7190 = vmatpush.bf16.msra.mxu0 %v10472_v37  ;;  %v6436_v34 = vpop.f32.mrf.mxu2  ;;  %v6425_v41 = vpop.f32.mrf.mxu1  ;;  %7215 = vmatpush.bf16.msra.mxu2 %v10489_v7 }
 0xa2b   :  { %7184 = vmatmul.bf16.vlgmr.msrb.gmra.mxu3 %v6616_v38  ;;  %v6437_v30 = vadd.f32 %v6436_v34, %v6424_v60  ;;  %v10491_v38 = vld [vmem:[%s12482_s7 + $0x1c8] sm:$0xff] }
 0xa2c   :  { %7203 = vmatpush.bf16.msra.mxu1 %v10480_v56  ;;  %v6449_v49 = vpop.f32.mrf.mxu3  ;;  %7228 = vmatpush.bf16.msra.mxu3 %v10497_v31 }
 0xa2d   :  { %v6450_v5 = vadd.f32 %v6449_v49, %v6437_v30 }
 0xa2e   :  { %7191 = vmatpush.bf16.msra.mxu0 %v10471_v39  ;;  %7216 = vmatpush.bf16.msra.mxu2 %v10488_v1 }
 0xa2f   :  { %v6609_v54 = vmax.f32 %v6450_v5, 0.0 }
 0xa30   :  { %7204 = vmatpush.bf16.msra.mxu1 %v10479_v43  ;;  %7229 = vmatpush.bf16.msra.mxu3 %v10496_v16 }
 0xa31   :  { %v6617_v53 = vpack.c.bf16 %v6609_v54, %v6609_v54  ;;  %v10622_v54 = vld [vmem:[#allocation17] ss:$0 sm:$0xff] }
 0xa32   :  { %7192 = vmatpush.bf16.msra.mxu0 %v10470_v57  ;;  %v6438_v25 = vpop.f32.mrf.mxu2  ;;  %7217 = vmatpush.bf16.msra.mxu2 %v10487_v10 }
 0xa34   :  { %7205 = vmatpush.bf16.msra.mxu1 %v10478_v0  ;;  %v6451_v4 = vpop.f32.mrf.mxu3  ;;  %7230 = vmatpush.bf16.msra.mxu3 %v10495_v22  ;;  %v10490_v0 = vld [vmem:[%s12482_s7 + $0x1c0] sm:$0xff]  ;;  %s10889_s7 = smov [#allocation18]  }
 0xa35   :  { %s7248_s8 = sshll.u32 %s10889_s7, 4  ;;  %s7249_s8 = int_to_ptr.vmem [resolvable:$true] %s7248_s8 }
 0xa36   :  { %7193 = vmatpush.bf16.msra.mxu0 %v10469_v42  ;;  %7218 = vmatpush.bf16.msra.mxu2 %v10486_v6 }
 0xa38   :  { %7206 = vmatpush.bf16.msra.mxu1 %v10477_v45  ;;  %7231 = vmatpush.bf16.msra.mxu3 %v10494_v32  ;;  %v5756_v45 = vperm.slane %v12382_v61, 3 }
 0xa3a   :  { %7194 = vmatpush.bf16.msra.mxu0 %v10468_v50  ;;  %7219 = vmatpush.bf16.msra.mxu2 %v10485_v9 }
 0xa3c   :  { %7207 = vmatpush.bf16.msra.mxu1 %v10476_v36  ;;  %7232 = vmatpush.bf16.msra.mxu3 %v10493_v48 }
 0xa3e   :  { %7195 = vmatpush.bf16.msra.mxu0 %v10467_v51  ;;  %7220 = vmatpush.bf16.msra.mxu2 %v10484_v20 }
 0xa40   :  { %7208 = vmatpush.bf16.msra.mxu1 %v10475_v29  ;;  %v6462_v14 = vpop.f32.mrf.mxu0  ;;  %7233 = vmatpush.bf16.msra.mxu3 %v10492_v21 }
 0xa41   :  { %v6463_v18 = vadd.f32 %v6462_v14, %v5754_v13 }
 0xa42   :  { %7196 = vmatpush.bf16.msra.mxu0 %v10466_v63  ;;  %v6475_v11 = vpop.f32.mrf.mxu1  ;;  %7221 = vmatpush.bf16.msra.mxu2 %v10483_v44 }
 0xa43   :  { %v6476_v12 = vadd.f32 %v6475_v11, %v6463_v18 }
 0xa44   :  { %7209 = vmatpush.bf16.msra.mxu1 %v10474_v2  ;;  %7234 = vmatpush.bf16.msra.mxu3 %v10491_v38 }
 0xa45   :  { %7197 = vmatmul.bf16.vlgmr.msra.gmra.mxu0 %v6617_v53 }
 0xa46   :  { %7222 = vmatpush.bf16.msra.mxu2 %v10482_v8 }
 0xa48   :  { %v6464_v23 = vpop.f32.mrf.mxu0  ;;  %7235 = vmatpush.bf16.msra.mxu3 %v10490_v0 }
 0xa4a   :  { %v6488_v47 = vpop.f32.mrf.mxu2  ;;  %v6477_v17 = vpop.f32.mrf.mxu1 }
 0xa4b   :  { %v6489_v15 = vadd.f32 %v6488_v47, %v6476_v12 }
 0xa4c   :  { %v6501_v33 = vpop.f32.mrf.mxu3 }
 0xa4d   :  { %v6502_v40 = vadd.f32 %v6501_v33, %v6489_v15 }
 0xa4f   :  { %v6610_v24 = vmax.f32 %v6502_v40, 0.0 }
 0xa51   :  { %v6618_v35 = vpack.c.bf16 %v6610_v24, %v6610_v24 }
 0xa52   :  { %v6490_v55 = vpop.f32.mrf.mxu2 }
 0xa53   :  { %7210 = vmatmul.bf16.vlgmr.msra.gmra.mxu1 %v6618_v35 }
 0xa54   :  { %v6503_v46 = vpop.f32.mrf.mxu3 }
 0xa60   :  { %v6514_v27 = vpop.f32.mrf.mxu0 }
 0xa61   :  { %v6515_v19 = vadd.f32 %v6514_v27, %v5755_v26 }
 0xa62   :  { %v6527_v37 = vpop.f32.mrf.mxu1 }
 0xa63   :  { %v6528_v56 = vadd.f32 %v6527_v37, %v6515_v19 }
 0xa68   :  { %v6516_v57 = vpop.f32.mrf.mxu0 }
 0xa6a   :  { %v6540_v28 = vpop.f32.mrf.mxu2  ;;  %v6529_v59 = vpop.f32.mrf.mxu1 }
 0xa6b   :  { %v6541_v39 = vadd.f32 %v6540_v28, %v6528_v56 }
 0xa6c   :  { %v6553_v43 = vpop.f32.mrf.mxu3 }
 0xa6d   :  { %v6554_v62 = vadd.f32 %v6553_v43, %v6541_v39 }
 0xa6f   :  { %v6611_v52 = vmax.f32 %v6554_v62, 0.0 }
 0xa71   :  { %v6619_v58 = vpack.c.bf16 %v6611_v52, %v6611_v52 }
 0xa72   :  { %v6542_v60 = vpop.f32.mrf.mxu2 }
 0xa73   :  { %7223 = vmatmul.bf16.vlgmr.msra.gmra.mxu2 %v6619_v58 }
 0xa74   :  { %v6555_v42 = vpop.f32.mrf.mxu3 }
 0xa82   :  { %v6566_v34 = vpop.f32.mrf.mxu0 }
 0xa83   :  { %v6567_v30 = vadd.f32 %v6566_v34, %v5756_v45 }
 0xa84   :  { %v6579_v49 = vpop.f32.mrf.mxu1 }
 0xa85   :  { %v6580_v50 = vadd.f32 %v6579_v49, %v6567_v30 }
 0xa8a   :  { %v6568_v7 = vpop.f32.mrf.mxu0 }
 0xa8c   :  { %v6592_v3 = vpop.f32.mrf.mxu2  ;;  %v6581_v5 = vpop.f32.mrf.mxu1 }
 0xa8d   :  { %v6593_v41 = vadd.f32 %v6592_v3, %v6580_v50 }
 0xa8e   :  { %v6605_v36 = vpop.f32.mrf.mxu3 }
 0xa8f   :  { %v6606_v51 = vadd.f32 %v6605_v36, %v6593_v41 }
 0xa91   :  { %v6612_v29 = vmax.f32 %v6606_v51, 0.0 }
 0xa93   :  { %v6620_v25 = vpack.c.bf16 %v6612_v29, %v6612_v29 }
 0xa94   :  { %v6594_v1 = vpop.f32.mrf.mxu2 }
 0xa95   :  { %7236 = vmatmul.bf16.vlgmr.msra.gmra.mxu3 %v6620_v25 }
 0xa96   :  { %v6607_v4 = vpop.f32.mrf.mxu3 }
 0xaa2   :  { %v7146_v63 = vpop.f32.mrf.mxu0 }
 0xaa3   :  { %v7147_v2 = vadd.f32 %v10622_v54, %v7146_v63 }
 0xaa4   :  { %v7159_v10 = vpop.f32.mrf.mxu1 }
 0xaa5   :  { %v7160_v61 = vadd.f32 %v7159_v10, %v7147_v2 }
 0xaaa   :  { %v7148_v6 = vpop.f32.mrf.mxu0 }
 0xaac   :  { %v7172_v53 = vpop.f32.mrf.mxu2  ;;  %v7161_v13 = vpop.f32.mrf.mxu1 }
 0xaad   :  { %v7173_v9 = vadd.f32 %v7172_v53, %v7160_v61 }
 0xaae   :  { %v7185_v14 = vpop.f32.mrf.mxu3 }
 0xaaf   :  { %v7186_v18 = vadd.f32 %v7185_v14, %v7173_v9 }
 0xab4   :  { %v7174_v11 = vpop.f32.mrf.mxu2 }
 0xab6   :  { %v7187_v20 = vpop.f32.mrf.mxu3 }
 0xac2   :  { %v7198_v12 = vpop.f32.mrf.mxu0 }
 0xac3   :  { %v7199_v47 = vadd.f32 %v7198_v12, %v7186_v18 }
 0xaca   :  { %v7200_v15 = vpop.f32.mrf.mxu0 }
 0xad0   :  { %v7211_v33 = vpop.f32.mrf.mxu1 }
 0xad1   :  { %v7212_v17 = vadd.f32 %v7211_v33, %v7199_v47 }
 0xad8   :  { %v7213_v44 = vpop.f32.mrf.mxu1 }
 0xaf6   :  { %v7224_v40 = vpop.f32.mrf.mxu2 }
 0xaf7   :  { %v7225_v24 = vadd.f32 %v7224_v40, %v7212_v17 }
 0xafe   :  { %v7226_v23 = vpop.f32.mrf.mxu2 }
 0xb18   :  { %v7237_v8 = vpop.f32.mrf.mxu3 }
 0xb19   :  { %v7238_v31 = vadd.f32 %v7237_v8, %v7225_v24 }
 0xb1b   :  { %7242 = vst.msk [vmem:[#allocation18] sm:$0x3] %vm7241_vm5, %v7238_v31 }
 0xb1c   :  { %7253 = dma.vmem_to_hbm [thread:$0]  %s7249_s8, 32, %s7251_s26, [#allocation8]  }
 0xb20   :  { %v7239_v35 = vpop.f32.mrf.mxu3 }
 0xb21   :  { %10875 = dma.done.wait [#allocation8], 32  }
 0xb22   :  { %10876 = vsyncadd [#allocation8], 4294967264 }
 0xb23   :  { %7258 = vsyncpa [#allocation7], 1 }
 0xb24   :  { %7259 = vsyncpa [#allocation10], 1 }
 0xb25   :  { %7260 = vsyncpa [#allocation13], 1 }
 0xb26   :  { %7261 = vsyncpa [#allocation16], 1 }
 0xb27   :  { %7262 = vsyncpa [#allocation8], 1 }
 0xb28   :  { %7263 = vsyncmov [#allocation5] }
 0xb2b   :  { %s7264_s27 = vpop.sfrf %7263 }
 0xb2c   :  { %p9856_p0 = scmp.ne.s32.totalorder %s7264_s27, 0 }
 0xb2e   :  { %7268 = shalt.err (%p9856_p0)  }
 0xb2f   :  { %7270 = vsyncmov [#allocation5 + $0x1] }
 0xb32   :  { %s7271_s10 = vpop.sfrf %7270 }
 0xb33   :  { %p9857_p1 = scmp.ne.s32.totalorder %s7271_s10, 0 }
 0xb35   :  { %7275 = shalt.err (%p9857_p1)  }

</bundles_post_ra>
